<compile_context>
chip_gen: v5e
topology: v5e:2x2
jax: 0.10.0
libtpu: 0.0.40
codegen_flags: <defaults>
</compile_context>

<pallas_src>
import functools
import math

import jax
import jax.numpy as jnp
from jax.experimental import pallas as pl
from jax.experimental.pallas import tpu as pltpu


# ----------------------------------------------------------------------------
# small helpers
# ----------------------------------------------------------------------------

def _attn_tile(n):
    # query tile: <=128 (keeps the per-head f32 score tile small), divides N.
    for t in (128, 64, 32, 16, 8):
        if n % t == 0:
            return t
    # TODO(synk): masked tail handling for N not divisible by 8.
    return n


def _ff_tile(m):
    for t in (1024, 512, 256, 128, 64, 32, 16, 8):
        if m % t == 0:
            return t
    # TODO(synk): masked tail handling for M not divisible by 8.
    return m


def _ln_normalize(x, eps=1e-5):
    # LayerNorm without affine (gamma/beta are folded into the next matmul).
    mean = jnp.mean(x, axis=-1, keepdims=True)
    cent = x - mean
    var = jnp.mean(cent * cent, axis=-1, keepdims=True)
    return cent * jax.lax.rsqrt(var + eps)


def _gelu_tanh(x):
    c = math.sqrt(2.0 / math.pi)
    return 0.5 * x * (1.0 + jnp.tanh(c * (x + 0.044715 * (x * x * x))))


# ----------------------------------------------------------------------------
# kernels
# ----------------------------------------------------------------------------

def _self_attn_block_kernel(x_ref, wq_ref, bq_ref, wk_ref, bk_ref, wv_ref,
                            bv_ref, wo_ref, bo_ref, o_ref, *, tq, heads, dh):
    """out_tile = SelfAttn(LN1(x))_tile @ Wout + b_out + x_tile (one q-tile)."""
    qi = pl.program_id(1)
    row0 = pl.multiple_of(qi * tq, tq)

    x_full = x_ref[0]                              # (N, dim)  f32  (whole batch row)
    x_tile = x_ref[0, pl.ds(row0, tq), :]          # (tq, dim) f32  (queries + residual)

    y_full = _ln_normalize(x_full).astype(jnp.bfloat16)   # keys/values source
    y_q = _ln_normalize(x_tile).astype(jnp.bfloat16)      # query source

    acc = bo_ref[...] + x_tile                     # (tq, dim) f32: bias + residual
    for h in range(heads):
        qh = (jnp.dot(y_q, wq_ref[h], preferred_element_type=jnp.float32)
              + bq_ref[h]).astype(jnp.bfloat16)                       # (tq, dh)
        kh = (jnp.dot(y_full, wk_ref[h], preferred_element_type=jnp.float32)
              + bk_ref[h]).astype(jnp.bfloat16)                       # (N, dh)
        vh = (jnp.dot(y_full, wv_ref[h], preferred_element_type=jnp.float32)
              + bv_ref[h]).astype(jnp.bfloat16)                       # (N, dh)
        # scores (1/sqrt(dh) already folded into W_q)
        s = jax.lax.dot_general(qh, kh, (((1,), (1,)), ((), ())),
                                preferred_element_type=jnp.float32)    # (tq, N)
        m = jnp.max(s, axis=-1, keepdims=True)
        e = jnp.exp(s - m)
        l = jnp.sum(e, axis=-1, keepdims=True)
        oh = jnp.dot(e.astype(jnp.bfloat16), vh,
                     preferred_element_type=jnp.float32)               # (tq, dh)
        oh = oh * pl.reciprocal(l, approx=True)
        # fused output projection: accumulate this head's slice of W_out
        acc = acc + jnp.dot(oh.astype(jnp.bfloat16), wo_ref[h],
                            preferred_element_type=jnp.float32)        # (tq, dim)
    o_ref[0] = acc.astype(o_ref.dtype)


def _cross_attn_block_kernel(x_ref, ctx_ref, wq_ref, bq_ref, wk_ref, wv_ref,
                             wo_ref, bo_ref, o_ref, *, heads, dh):
    """out_tile = CrossAttn(LN2(x), context) @ Wout + b_out + x_tile."""
    x_tile = x_ref[0]                               # (tq, dim) f32
    y = _ln_normalize(x_tile).astype(jnp.bfloat16)  # (tq, dim)
    ctx = ctx_ref[0].astype(jnp.bfloat16)           # (S, ctx_dim) — K/V proj fused here

    acc = bo_ref[...] + x_tile                      # (tq, dim) f32
    for h in range(heads):
        qh = (jnp.dot(y, wq_ref[h], preferred_element_type=jnp.float32)
              + bq_ref[h]).astype(jnp.bfloat16)                        # (tq, dh)
        kh = jnp.dot(ctx, wk_ref[h],
                     preferred_element_type=jnp.float32).astype(jnp.bfloat16)  # (S, dh)
        vh = jnp.dot(ctx, wv_ref[h],
                     preferred_element_type=jnp.float32).astype(jnp.bfloat16)  # (S, dh)
        s = jax.lax.dot_general(qh, kh, (((1,), (1,)), ((), ())),
                                preferred_element_type=jnp.float32)    # (tq, S)
        m = jnp.max(s, axis=-1, keepdims=True)
        e = jnp.exp(s - m)
        l = jnp.sum(e, axis=-1, keepdims=True)
        oh = jnp.dot(e.astype(jnp.bfloat16), vh,
                     preferred_element_type=jnp.float32)               # (tq, dh)
        oh = oh * pl.reciprocal(l, approx=True)
        acc = acc + jnp.dot(oh.astype(jnp.bfloat16), wo_ref[h],
                            preferred_element_type=jnp.float32)
    o_ref[0] = acc.astype(o_ref.dtype)


def _ff_block_kernel(x_ref, wp_ref, bp_ref, wo_ref, bo_ref, o_ref, *, inner_ff):
    """out = GEGLU(LN3(x)) @ Wout + b_out + x  (fully fused feed-forward)."""
    x = x_ref[...]                                  # (tm, dim) f32
    y = _ln_normalize(x).astype(jnp.bfloat16)
    h = jnp.dot(y, wp_ref[...], preferred_element_type=jnp.float32) + bp_ref[...]
    a = h[:, :inner_ff]                             # lane-aligned split (inner_ff % 128 == 0)
    g = h[:, inner_ff:]
    act = (a * _gelu_tanh(g)).astype(jnp.bfloat16)  # (tm, inner_ff)
    out = jnp.dot(act, wo_ref[...], preferred_element_type=jnp.float32) \
        + bo_ref[...] + x
    o_ref[...] = out.astype(o_ref.dtype)


# ----------------------------------------------------------------------------
# pallas_call wrappers (cached per shape)
# ----------------------------------------------------------------------------

@functools.lru_cache(maxsize=None)
def _self_attn_call(B, N, dim, heads, dh, tq):
    kernel = functools.partial(_self_attn_block_kernel, tq=tq, heads=heads, dh=dh)
    return pl.pallas_call(
        kernel,
        out_shape=jax.ShapeDtypeStruct((B, N, dim), jnp.float32),
        grid=(B, N // tq),
        in_specs=[
            pl.BlockSpec((1, N, dim), lambda b, i: (b, 0, 0)),        # x (full batch row)
            pl.BlockSpec((heads, dim, dh), lambda b, i: (0, 0, 0)),   # Wq (scaled, LN1 folded)
            pl.BlockSpec((heads, 1, dh), lambda b, i: (0, 0, 0)),     # bq
            pl.BlockSpec((heads, dim, dh), lambda b, i: (0, 0, 0)),   # Wk
            pl.BlockSpec((heads, 1, dh), lambda b, i: (0, 0, 0)),     # bk
            pl.BlockSpec((heads, dim, dh), lambda b, i: (0, 0, 0)),   # Wv
            pl.BlockSpec((heads, 1, dh), lambda b, i: (0, 0, 0)),     # bv
            pl.BlockSpec((heads, dh, dim), lambda b, i: (0, 0, 0)),   # Wout
            pl.BlockSpec((1, dim), lambda b, i: (0, 0)),              # b_out
        ],
        out_specs=pl.BlockSpec((1, tq, dim), lambda b, i: (b, i, 0)),
        compiler_params=pltpu.CompilerParams(
            dimension_semantics=("parallel", "arbitrary")),
    )


@functools.lru_cache(maxsize=None)
def _cross_attn_call(B, N, dim, S, ctx_dim, heads, dh, tq):
    kernel = functools.partial(_cross_attn_block_kernel, heads=heads, dh=dh)
    return pl.pallas_call(
        kernel,
        out_shape=jax.ShapeDtypeStruct((B, N, dim), jnp.float32),
        grid=(B, N // tq),
        in_specs=[
            pl.BlockSpec((1, tq, dim), lambda b, i: (b, i, 0)),        # x tile
            pl.BlockSpec((1, S, ctx_dim), lambda b, i: (b, 0, 0)),     # context row
            pl.BlockSpec((heads, dim, dh), lambda b, i: (0, 0, 0)),    # Wq (scaled, LN2 folded)
            pl.BlockSpec((heads, 1, dh), lambda b, i: (0, 0, 0)),      # bq
            pl.BlockSpec((heads, ctx_dim, dh), lambda b, i: (0, 0, 0)),# Wk
            pl.BlockSpec((heads, ctx_dim, dh), lambda b, i: (0, 0, 0)),# Wv
            pl.BlockSpec((heads, dh, dim), lambda b, i: (0, 0, 0)),    # Wout
            pl.BlockSpec((1, dim), lambda b, i: (0, 0)),               # b_out
        ],
        out_specs=pl.BlockSpec((1, tq, dim), lambda b, i: (b, i, 0)),
        compiler_params=pltpu.CompilerParams(
            dimension_semantics=("parallel", "parallel")),
    )


@functools.lru_cache(maxsize=None)
def _ff_call(M, dim, inner_ff, tm):
    kernel = functools.partial(_ff_block_kernel, inner_ff=inner_ff)
    return pl.pallas_call(
        kernel,
        out_shape=jax.ShapeDtypeStruct((M, dim), jnp.float32),
        grid=(M // tm,),
        in_specs=[
            pl.BlockSpec((tm, dim), lambda i: (i, 0)),                 # x
            pl.BlockSpec((dim, 2 * inner_ff), lambda i: (0, 0)),       # Wproj (LN3 folded)
            pl.BlockSpec((1, 2 * inner_ff), lambda i: (0, 0)),         # bproj
            pl.BlockSpec((inner_ff, dim), lambda i: (0, 0)),           # Wout
            pl.BlockSpec((1, dim), lambda i: (0, 0)),                  # b_out
        ],
        out_specs=pl.BlockSpec((tm, dim), lambda i: (i, 0)),
        compiler_params=pltpu.CompilerParams(dimension_semantics=("parallel",)),
    )


# ----------------------------------------------------------------------------
# BasicTransformerBlock forward
# ----------------------------------------------------------------------------

def basic_transformer_block_forward(p, x, context):
    B, N, dim = x.shape
    heads, dh = p["heads"], p["dim_head"]
    Bc, S, ctx_dim = context.shape
    tq = _attn_tile(N)

    # ---- x = attn1(norm1(x)) + x   (self-attention, fully fused)
    x = _self_attn_call(B, N, dim, heads, dh, tq)(
        x, p["a1_wq"], p["a1_bq"], p["a1_wk"], p["a1_bk"],
        p["a1_wv"], p["a1_bv"], p["a1_wo"], p["a1_bo"])

    # ---- x = attn2(norm2(x), context) + x   (cross-attention, fully fused)
    x = _cross_attn_call(B, N, dim, S, ctx_dim, heads, dh, tq)(
        x, context, p["a2_wq"], p["a2_bq"], p["a2_wk"], p["a2_wv"],
        p["a2_wo"], p["a2_bo"])

    # ---- x = ff(norm3(x)) + x   (LN3 + GEGLU + FF out, fully fused)
    M = B * N
    inner_ff = p["ff_wo"].shape[0]
    tm = _ff_tile(M)
    xf = _ff_call(M, dim, inner_ff, tm)(
        x.reshape(M, dim), p["ff_wp"], p["ff_bp"], p["ff_wo"], p["ff_bo"])
    return xf.reshape(B, N, dim)


# ----------------------------------------------------------------------------
# parameters (deterministic) and pure-JAX reference
# ----------------------------------------------------------------------------

def build_params(key, dim, n_heads, d_head, context_dim, ff_mult=4):
    inner = n_heads * d_head
    inner_ff = dim * ff_mult
    ks = jax.random.split(key, 20)

    def w(k, i, o, s=0.02):
        return s * jax.random.normal(k, (i, o), jnp.float32)

    raw = {
        "norm1_g": 1.0 + 0.05 * jax.random.normal(ks[14], (dim,), jnp.float32),
        "norm1_b": 0.05 * jax.random.normal(ks[15], (dim,), jnp.float32),
        "norm2_g": 1.0 + 0.05 * jax.random.normal(ks[16], (dim,), jnp.float32),
        "norm2_b": 0.05 * jax.random.normal(ks[17], (dim,), jnp.float32),
        "norm3_g": 1.0 + 0.05 * jax.random.normal(ks[18], (dim,), jnp.float32),
        "norm3_b": 0.05 * jax.random.normal(ks[19], (dim,), jnp.float32),
        "attn1_wq": w(ks[0], dim, inner), "attn1_wk": w(ks[1], dim, inner),
        "attn1_wv": w(ks[2], dim, inner),
        "attn1_w_out": w(ks[3], inner, dim),
        "attn1_b_out": 0.02 * jax.random.normal(ks[4], (dim,), jnp.float32),
        "attn2_wq": w(ks[5], dim, inner),
        "attn2_wk": w(ks[6], context_dim, inner), "attn2_wv": w(ks[7], context_dim, inner),
        "attn2_w_out": w(ks[8], inner, dim),
        "attn2_b_out": 0.02 * jax.random.normal(ks[9], (dim,), jnp.float32),
        "ff_w_proj": w(ks[10], dim, 2 * inner_ff),
        "ff_b_proj": 0.02 * jax.random.normal(ks[11], (2 * inner_ff,), jnp.float32),
        "ff_w_out": w(ks[12], inner_ff, dim),
        "ff_b_out": 0.02 * jax.random.normal(ks[13], (dim,), jnp.float32),
    }

    scale = d_head ** (-0.5)
    bf = lambda a: a.astype(jnp.bfloat16)

    def per_head_cols(wt):   # (in, heads*dh) -> (heads, in, dh)
        return wt.reshape(wt.shape[0], n_heads, d_head).transpose(1, 0, 2)

    def per_head_rows(wt):   # (heads*dh, out) -> (heads, dh, out)
        return wt.reshape(n_heads, d_head, wt.shape[1])

    def per_head_bias(b):    # (heads*dh,) -> (heads, 1, dh)
        return b.reshape(n_heads, 1, d_head)

    g1, b1 = raw["norm1_g"][:, None], raw["norm1_b"]
    g2, b2 = raw["norm2_g"][:, None], raw["norm2_b"]
    g3, b3 = raw["norm3_g"][:, None], raw["norm3_b"]

    params = {
        "heads": n_heads, "dim_head": d_head,
        # self-attention: LN1 affine + SDPA scale folded into per-head weights
        "a1_wq": bf(per_head_cols(g1 * raw["attn1_wq"] * scale)),
        "a1_bq": per_head_bias(scale * (b1 @ raw["attn1_wq"])),
        "a1_wk": bf(per_head_cols(g1 * raw["attn1_wk"])),
        "a1_bk": per_head_bias(b1 @ raw["attn1_wk"]),
        "a1_wv": bf(per_head_cols(g1 * raw["attn1_wv"])),
        "a1_bv": per_head_bias(b1 @ raw["attn1_wv"]),
        "a1_wo": bf(per_head_rows(raw["attn1_w_out"])),
        "a1_bo": raw["attn1_b_out"].reshape(1, dim),
        # cross-attention: LN2 affine + scale folded into Q; K/V from raw context
        "a2_wq": bf(per_head_cols(g2 * raw["attn2_wq"] * scale)),
        "a2_bq": per_head_bias(scale * (b2 @ raw["attn2_wq"])),
        "a2_wk": bf(per_head_cols(raw["attn2_wk"])),
        "a2_wv": bf(per_head_cols(raw["attn2_wv"])),
        "a2_wo": bf(per_head_rows(raw["attn2_w_out"])),
        "a2_bo": raw["attn2_b_out"].reshape(1, dim),
        # feed-forward: LN3 affine folded into GEGLU projection
        "ff_wp": bf(g3 * raw["ff_w_proj"]),
        "ff_bp": (b3 @ raw["ff_w_proj"] + raw["ff_b_proj"]).reshape(1, 2 * inner_ff),
        "ff_wo": bf(raw["ff_w_out"]),
        "ff_bo": raw["ff_b_out"].reshape(1, dim),
    }
    return raw, params


def reference_forward(raw, x, context, heads, dh):
    """Pure-JAX f32 reference of BasicTransformerBlock.forward (for validation)."""
    def ln(t, g, b):
        m = t.mean(-1, keepdims=True)
        v = ((t - m) ** 2).mean(-1, keepdims=True)
        return (t - m) / jnp.sqrt(v + 1e-5) * g + b

    def mha(q, k, v):
        B, Nq, _ = q.shape
        Nk = k.shape[1]
        qh = q.reshape(B, Nq, heads, dh).transpose(0, 2, 1, 3)
        kh = k.reshape(B, Nk, heads, dh).transpose(0, 2, 1, 3)
        vh = v.reshape(B, Nk, heads, dh).transpose(0, 2, 1, 3)
        s = jnp.einsum("bhqd,bhkd->bhqk", qh, kh) * (dh ** -0.5)
        p = jax.nn.softmax(s, axis=-1)
        o = jnp.einsum("bhqk,bhkd->bhqd", p, vh)
        return o.transpose(0, 2, 1, 3).reshape(B, Nq, heads * dh)

    h = ln(x, raw["norm1_g"], raw["norm1_b"])
    x = mha(h @ raw["attn1_wq"], h @ raw["attn1_wk"], h @ raw["attn1_wv"]) \
        @ raw["attn1_w_out"] + raw["attn1_b_out"] + x

    h = ln(x, raw["norm2_g"], raw["norm2_b"])
    x = mha(h @ raw["attn2_wq"], context @ raw["attn2_wk"], context @ raw["attn2_wv"]) \
        @ raw["attn2_w_out"] + raw["attn2_b_out"] + x

    h = ln(x, raw["norm3_g"], raw["norm3_b"])
    hp = h @ raw["ff_w_proj"] + raw["ff_b_proj"]
    inner_ff = hp.shape[-1] // 2
    g = hp[..., :inner_ff] * jax.nn.gelu(hp[..., inner_ff:], approximate=False)
    x = g @ raw["ff_w_out"] + raw["ff_b_out"] + x
    return x


# ----------------------------------------------------------------------------
# Main
# ----------------------------------------------------------------------------

if __name__ == "__main__":
    key = jax.random.PRNGKey(0)
    k_x, k_ctx, k_p = jax.random.split(key, 3)

    B, N, dim = 2, 256, 64           # dense stand-in for a jagged VDB voxel batch
    n_heads, d_head = 4, 16          # inner_dim = 64
    S, context_dim = 8, 32

    x = jax.random.normal(k_x, (B, N, dim), jnp.float32)
    context = jax.random.normal(k_ctx, (B, S, context_dim), jnp.float32)

    raw, params = build_params(k_p, dim, n_heads, d_head, context_dim)

    out = basic_transformer_block_forward(params, x, context)
    out = jax.block_until_ready(out)

    assert out.shape == (B, N, dim)
    assert bool(jnp.all(jnp.isfinite(out)))

    ref = reference_forward(raw, x, context, n_heads, d_head)
    err = float(jnp.max(jnp.abs(out - ref)))
    assert err < 5e-2, f"max abs error vs reference: {err}"

    print("KERNEL_OK")
</pallas_src>

<mosaic_0001>
module attributes {stable_mosaic.version = 11 : i64} {
  func.func @_self_attn_block_kernel(%arg0: i32, %arg1: i32, %arg2: memref<1x256x64xf32, #tpu.memory_space<vmem>>, %arg3: memref<4x64x16xbf16, #tpu.memory_space<vmem>>, %arg4: memref<4x1x16xf32, #tpu.memory_space<vmem>>, %arg5: memref<4x64x16xbf16, #tpu.memory_space<vmem>>, %arg6: memref<4x1x16xf32, #tpu.memory_space<vmem>>, %arg7: memref<4x64x16xbf16, #tpu.memory_space<vmem>>, %arg8: memref<4x1x16xf32, #tpu.memory_space<vmem>>, %arg9: memref<4x16x64xbf16, #tpu.memory_space<vmem>>, %arg10: memref<1x64xf32, #tpu.memory_space<vmem>>, %arg11: memref<1x128x64xf32, #tpu.memory_space<vmem>>) attributes {dimension_semantics = [#tpu.dimension_semantics<parallel>, #tpu.dimension_semantics<arbitrary>], iteration_bounds = array<i64: 2, 2>, scalar_prefetch = 0 : i64, scratch_operands = 0 : i64, tpu.core_type = #tpu.core_type<tc>, window_params = [{transform_indices = @transform_0, window_bounds = array<i64: 1, 256, 64>}, {pipeline_mode = #tpu.pipeline_mode<synchronous>, transform_indices = @transform_1, window_bounds = array<i64: 4, 64, 16>}, {pipeline_mode = #tpu.pipeline_mode<synchronous>, transform_indices = @transform_2, window_bounds = array<i64: 4, 1, 16>}, {pipeline_mode = #tpu.pipeline_mode<synchronous>, transform_indices = @transform_3, window_bounds = array<i64: 4, 64, 16>}, {pipeline_mode = #tpu.pipeline_mode<synchronous>, transform_indices = @transform_4, window_bounds = array<i64: 4, 1, 16>}, {pipeline_mode = #tpu.pipeline_mode<synchronous>, transform_indices = @transform_5, window_bounds = array<i64: 4, 64, 16>}, {pipeline_mode = #tpu.pipeline_mode<synchronous>, transform_indices = @transform_6, window_bounds = array<i64: 4, 1, 16>}, {pipeline_mode = #tpu.pipeline_mode<synchronous>, transform_indices = @transform_7, window_bounds = array<i64: 4, 16, 64>}, {pipeline_mode = #tpu.pipeline_mode<synchronous>, transform_indices = @transform_8, window_bounds = array<i64: 1, 64>}, {transform_indices = @transform_9, window_bounds = array<i64: 1, 128, 64>}]} {
    %c128_i32 = arith.constant 128 : i32
    %0 = arith.muli %arg1, %c128_i32 : i32
    %1 = tpu.assume_multiple %0, 128 : i32
    %c0 = arith.constant 0 : index
    %c0_0 = arith.constant 0 : index
    %c0_1 = arith.constant 0 : index
    %2 = vector.load %arg2[%c0, %c0_0, %c0_1] : memref<1x256x64xf32, #tpu.memory_space<vmem>>, vector<1x256x64xf32>
    %3 = vector.shape_cast %2 : vector<1x256x64xf32> to vector<256x64xf32>
    %c0_2 = arith.constant 0 : index
    %4 = arith.index_cast %1 : i32 to index
    %c0_3 = arith.constant 0 : index
    %5 = vector.load %arg2[%c0_2, %4, %c0_3] : memref<1x256x64xf32, #tpu.memory_space<vmem>>, vector<1x128x64xf32>
    %6 = vector.shape_cast %5 : vector<1x128x64xf32> to vector<128x64xf32>
    %cst = arith.constant dense<0.000000e+00> : vector<256xf32>
    %7 = vector.multi_reduction <add>, %3, %cst [1] : vector<256x64xf32> to vector<256xf32>
    %8 = vector.shape_cast %7 : vector<256xf32> to vector<256x1xf32>
    %cst_4 = arith.constant 6.400000e+01 : f32
    %9 = vector.broadcast %cst_4 : f32 to vector<256x1xf32>
    %10 = arith.divf %8, %9 : vector<256x1xf32>
    %11 = vector.broadcast %10 : vector<256x1xf32> to vector<256x64xf32>
    %12 = arith.subf %3, %11 : vector<256x64xf32>
    %13 = arith.mulf %12, %12 : vector<256x64xf32>
    %cst_5 = arith.constant dense<0.000000e+00> : vector<256xf32>
    %14 = vector.multi_reduction <add>, %13, %cst_5 [1] : vector<256x64xf32> to vector<256xf32>
    %15 = vector.shape_cast %14 : vector<256xf32> to vector<256x1xf32>
    %cst_6 = arith.constant 6.400000e+01 : f32
    %16 = vector.broadcast %cst_6 : f32 to vector<256x1xf32>
    %17 = arith.divf %15, %16 : vector<256x1xf32>
    %cst_7 = arith.constant 9.99999974E-6 : f32
    %18 = vector.broadcast %cst_7 : f32 to vector<256x1xf32>
    %19 = arith.addf %17, %18 : vector<256x1xf32>
    %20 = math.rsqrt %19 : vector<256x1xf32>
    %21 = vector.broadcast %20 : vector<256x1xf32> to vector<256x64xf32>
    %22 = arith.mulf %12, %21 : vector<256x64xf32>
    %23 = arith.truncf %22 : vector<256x64xf32> to vector<256x64xbf16>
    %cst_8 = arith.constant dense<0.000000e+00> : vector<128xf32>
    %24 = vector.multi_reduction <add>, %6, %cst_8 [1] : vector<128x64xf32> to vector<128xf32>
    %25 = vector.shape_cast %24 : vector<128xf32> to vector<128x1xf32>
    %cst_9 = arith.constant 6.400000e+01 : f32
    %26 = vector.broadcast %cst_9 : f32 to vector<128x1xf32>
    %27 = arith.divf %25, %26 : vector<128x1xf32>
    %28 = vector.broadcast %27 : vector<128x1xf32> to vector<128x64xf32>
    %29 = arith.subf %6, %28 : vector<128x64xf32>
    %30 = arith.mulf %29, %29 : vector<128x64xf32>
    %cst_10 = arith.constant dense<0.000000e+00> : vector<128xf32>
    %31 = vector.multi_reduction <add>, %30, %cst_10 [1] : vector<128x64xf32> to vector<128xf32>
    %32 = vector.shape_cast %31 : vector<128xf32> to vector<128x1xf32>
    %cst_11 = arith.constant 6.400000e+01 : f32
    %33 = vector.broadcast %cst_11 : f32 to vector<128x1xf32>
    %34 = arith.divf %32, %33 : vector<128x1xf32>
    %cst_12 = arith.constant 9.99999974E-6 : f32
    %35 = vector.broadcast %cst_12 : f32 to vector<128x1xf32>
    %36 = arith.addf %34, %35 : vector<128x1xf32>
    %37 = math.rsqrt %36 : vector<128x1xf32>
    %38 = vector.broadcast %37 : vector<128x1xf32> to vector<128x64xf32>
    %39 = arith.mulf %29, %38 : vector<128x64xf32>
    %40 = arith.truncf %39 : vector<128x64xf32> to vector<128x64xbf16>
    %c0_13 = arith.constant 0 : index
    %c0_14 = arith.constant 0 : index
    %41 = vector.load %arg10[%c0_13, %c0_14] : memref<1x64xf32, #tpu.memory_space<vmem>>, vector<1x64xf32>
    %42 = vector.broadcast %41 : vector<1x64xf32> to vector<128x64xf32>
    %43 = arith.addf %42, %6 : vector<128x64xf32>
    %c0_15 = arith.constant 0 : index
    %c0_16 = arith.constant 0 : index
    %c0_17 = arith.constant 0 : index
    %44 = vector.load %arg3[%c0_15, %c0_16, %c0_17] : memref<4x64x16xbf16, #tpu.memory_space<vmem>>, vector<1x64x16xbf16>
    %45 = vector.shape_cast %44 : vector<1x64x16xbf16> to vector<64x16xbf16>
    %cst_18 = arith.constant dense<0.000000e+00> : vector<128x16xf32>
    %46 = tpu.matmul %40, %45, %cst_18 {dimension_numbers = #tpu.dot_dimension_numbers<[1], [0], [0], [1], [0, 0, 1, 1], [], []>} : vector<128x64xbf16>, vector<64x16xbf16>, vector<128x16xf32> -> vector<128x16xf32>
    %c0_19 = arith.constant 0 : index
    %c0_20 = arith.constant 0 : index
    %c0_21 = arith.constant 0 : index
    %47 = vector.load %arg4[%c0_19, %c0_20, %c0_21] : memref<4x1x16xf32, #tpu.memory_space<vmem>>, vector<1x1x16xf32>
    %48 = vector.shape_cast %47 : vector<1x1x16xf32> to vector<1x16xf32>
    %49 = vector.broadcast %48 : vector<1x16xf32> to vector<128x16xf32>
    %50 = arith.addf %46, %49 : vector<128x16xf32>
    %51 = arith.truncf %50 : vector<128x16xf32> to vector<128x16xbf16>
    %c0_22 = arith.constant 0 : index
    %c0_23 = arith.constant 0 : index
    %c0_24 = arith.constant 0 : index
    %52 = vector.load %arg5[%c0_22, %c0_23, %c0_24] : memref<4x64x16xbf16, #tpu.memory_space<vmem>>, vector<1x64x16xbf16>
    %53 = vector.shape_cast %52 : vector<1x64x16xbf16> to vector<64x16xbf16>
    %cst_25 = arith.constant dense<0.000000e+00> : vector<256x16xf32>
    %54 = tpu.matmul %23, %53, %cst_25 {dimension_numbers = #tpu.dot_dimension_numbers<[1], [0], [0], [1], [0, 0, 1, 1], [], []>} : vector<256x64xbf16>, vector<64x16xbf16>, vector<256x16xf32> -> vector<256x16xf32>
    %c0_26 = arith.constant 0 : index
    %c0_27 = arith.constant 0 : index
    %c0_28 = arith.constant 0 : index
    %55 = vector.load %arg6[%c0_26, %c0_27, %c0_28] : memref<4x1x16xf32, #tpu.memory_space<vmem>>, vector<1x1x16xf32>
    %56 = vector.shape_cast %55 : vector<1x1x16xf32> to vector<1x16xf32>
    %57 = vector.broadcast %56 : vector<1x16xf32> to vector<256x16xf32>
    %58 = arith.addf %54, %57 : vector<256x16xf32>
    %59 = arith.truncf %58 : vector<256x16xf32> to vector<256x16xbf16>
    %c0_29 = arith.constant 0 : index
    %c0_30 = arith.constant 0 : index
    %c0_31 = arith.constant 0 : index
    %60 = vector.load %arg7[%c0_29, %c0_30, %c0_31] : memref<4x64x16xbf16, #tpu.memory_space<vmem>>, vector<1x64x16xbf16>
    %61 = vector.shape_cast %60 : vector<1x64x16xbf16> to vector<64x16xbf16>
    %cst_32 = arith.constant dense<0.000000e+00> : vector<256x16xf32>
    %62 = tpu.matmul %23, %61, %cst_32 {dimension_numbers = #tpu.dot_dimension_numbers<[1], [0], [0], [1], [0, 0, 1, 1], [], []>} : vector<256x64xbf16>, vector<64x16xbf16>, vector<256x16xf32> -> vector<256x16xf32>
    %c0_33 = arith.constant 0 : index
    %c0_34 = arith.constant 0 : index
    %c0_35 = arith.constant 0 : index
    %63 = vector.load %arg8[%c0_33, %c0_34, %c0_35] : memref<4x1x16xf32, #tpu.memory_space<vmem>>, vector<1x1x16xf32>
    %64 = vector.shape_cast %63 : vector<1x1x16xf32> to vector<1x16xf32>
    %65 = vector.broadcast %64 : vector<1x16xf32> to vector<256x16xf32>
    %66 = arith.addf %62, %65 : vector<256x16xf32>
    %67 = arith.truncf %66 : vector<256x16xf32> to vector<256x16xbf16>
    %cst_36 = arith.constant dense<0.000000e+00> : vector<128x256xf32>
    %68 = tpu.matmul %51, %59, %cst_36 {dimension_numbers = #tpu.dot_dimension_numbers<[1], [1], [0], [0], [0, 0, 1, 0], [], []>} : vector<128x16xbf16>, vector<256x16xbf16>, vector<128x256xf32> -> vector<128x256xf32>
    %cst_37 = arith.constant dense<0xFF800000> : vector<128xf32>
    %69 = vector.multi_reduction <maximumf>, %68, %cst_37 [1] : vector<128x256xf32> to vector<128xf32>
    %70 = vector.shape_cast %69 : vector<128xf32> to vector<128x1xf32>
    %71 = vector.broadcast %70 : vector<128x1xf32> to vector<128x256xf32>
    %72 = arith.subf %68, %71 : vector<128x256xf32>
    %73 = math.exp %72 : vector<128x256xf32>
    %cst_38 = arith.constant dense<0.000000e+00> : vector<128xf32>
    %74 = vector.multi_reduction <add>, %73, %cst_38 [1] : vector<128x256xf32> to vector<128xf32>
    %75 = vector.shape_cast %74 : vector<128xf32> to vector<128x1xf32>
    %76 = arith.truncf %73 : vector<128x256xf32> to vector<128x256xbf16>
    %cst_39 = arith.constant dense<0.000000e+00> : vector<128x16xf32>
    %77 = tpu.matmul %76, %67, %cst_39 {dimension_numbers = #tpu.dot_dimension_numbers<[1], [0], [0], [1], [0, 0, 1, 1], [], []>} : vector<128x256xbf16>, vector<256x16xbf16>, vector<128x16xf32> -> vector<128x16xf32>
    %78 = tpu.reciprocal %75 {approx = true} : vector<128x1xf32> -> vector<128x1xf32>
    %79 = vector.broadcast %78 : vector<128x1xf32> to vector<128x16xf32>
    %80 = arith.mulf %77, %79 : vector<128x16xf32>
    %81 = arith.truncf %80 : vector<128x16xf32> to vector<128x16xbf16>
    %c0_40 = arith.constant 0 : index
    %c0_41 = arith.constant 0 : index
    %c0_42 = arith.constant 0 : index
    %82 = vector.load %arg9[%c0_40, %c0_41, %c0_42] : memref<4x16x64xbf16, #tpu.memory_space<vmem>>, vector<1x16x64xbf16>
    %83 = vector.shape_cast %82 : vector<1x16x64xbf16> to vector<16x64xbf16>
    %cst_43 = arith.constant dense<0.000000e+00> : vector<128x64xf32>
    %84 = tpu.matmul %81, %83, %cst_43 {dimension_numbers = #tpu.dot_dimension_numbers<[1], [0], [0], [1], [0, 0, 1, 1], [], []>} : vector<128x16xbf16>, vector<16x64xbf16>, vector<128x64xf32> -> vector<128x64xf32>
    %85 = arith.addf %43, %84 : vector<128x64xf32>
    %c1 = arith.constant 1 : index
    %c0_44 = arith.constant 0 : index
    %c0_45 = arith.constant 0 : index
    %86 = vector.load %arg3[%c1, %c0_44, %c0_45] : memref<4x64x16xbf16, #tpu.memory_space<vmem>>, vector<1x64x16xbf16>
    %87 = vector.shape_cast %86 : vector<1x64x16xbf16> to vector<64x16xbf16>
    %cst_46 = arith.constant dense<0.000000e+00> : vector<128x16xf32>
    %88 = tpu.matmul %40, %87, %cst_46 {dimension_numbers = #tpu.dot_dimension_numbers<[1], [0], [0], [1], [0, 0, 1, 1], [], []>} : vector<128x64xbf16>, vector<64x16xbf16>, vector<128x16xf32> -> vector<128x16xf32>
    %c1_47 = arith.constant 1 : index
    %c0_48 = arith.constant 0 : index
    %c0_49 = arith.constant 0 : index
    %89 = vector.load %arg4[%c1_47, %c0_48, %c0_49] : memref<4x1x16xf32, #tpu.memory_space<vmem>>, vector<1x1x16xf32>
    %90 = vector.shape_cast %89 : vector<1x1x16xf32> to vector<1x16xf32>
    %91 = vector.broadcast %90 : vector<1x16xf32> to vector<128x16xf32>
    %92 = arith.addf %88, %91 : vector<128x16xf32>
    %93 = arith.truncf %92 : vector<128x16xf32> to vector<128x16xbf16>
    %c1_50 = arith.constant 1 : index
    %c0_51 = arith.constant 0 : index
    %c0_52 = arith.constant 0 : index
    %94 = vector.load %arg5[%c1_50, %c0_51, %c0_52] : memref<4x64x16xbf16, #tpu.memory_space<vmem>>, vector<1x64x16xbf16>
    %95 = vector.shape_cast %94 : vector<1x64x16xbf16> to vector<64x16xbf16>
    %cst_53 = arith.constant dense<0.000000e+00> : vector<256x16xf32>
    %96 = tpu.matmul %23, %95, %cst_53 {dimension_numbers = #tpu.dot_dimension_numbers<[1], [0], [0], [1], [0, 0, 1, 1], [], []>} : vector<256x64xbf16>, vector<64x16xbf16>, vector<256x16xf32> -> vector<256x16xf32>
    %c1_54 = arith.constant 1 : index
    %c0_55 = arith.constant 0 : index
    %c0_56 = arith.constant 0 : index
    %97 = vector.load %arg6[%c1_54, %c0_55, %c0_56] : memref<4x1x16xf32, #tpu.memory_space<vmem>>, vector<1x1x16xf32>
    %98 = vector.shape_cast %97 : vector<1x1x16xf32> to vector<1x16xf32>
    %99 = vector.broadcast %98 : vector<1x16xf32> to vector<256x16xf32>
    %100 = arith.addf %96, %99 : vector<256x16xf32>
    %101 = arith.truncf %100 : vector<256x16xf32> to vector<256x16xbf16>
    %c1_57 = arith.constant 1 : index
    %c0_58 = arith.constant 0 : index
    %c0_59 = arith.constant 0 : index
    %102 = vector.load %arg7[%c1_57, %c0_58, %c0_59] : memref<4x64x16xbf16, #tpu.memory_space<vmem>>, vector<1x64x16xbf16>
    %103 = vector.shape_cast %102 : vector<1x64x16xbf16> to vector<64x16xbf16>
    %cst_60 = arith.constant dense<0.000000e+00> : vector<256x16xf32>
    %104 = tpu.matmul %23, %103, %cst_60 {dimension_numbers = #tpu.dot_dimension_numbers<[1], [0], [0], [1], [0, 0, 1, 1], [], []>} : vector<256x64xbf16>, vector<64x16xbf16>, vector<256x16xf32> -> vector<256x16xf32>
    %c1_61 = arith.constant 1 : index
    %c0_62 = arith.constant 0 : index
    %c0_63 = arith.constant 0 : index
    %105 = vector.load %arg8[%c1_61, %c0_62, %c0_63] : memref<4x1x16xf32, #tpu.memory_space<vmem>>, vector<1x1x16xf32>
    %106 = vector.shape_cast %105 : vector<1x1x16xf32> to vector<1x16xf32>
    %107 = vector.broadcast %106 : vector<1x16xf32> to vector<256x16xf32>
    %108 = arith.addf %104, %107 : vector<256x16xf32>
    %109 = arith.truncf %108 : vector<256x16xf32> to vector<256x16xbf16>
    %cst_64 = arith.constant dense<0.000000e+00> : vector<128x256xf32>
    %110 = tpu.matmul %93, %101, %cst_64 {dimension_numbers = #tpu.dot_dimension_numbers<[1], [1], [0], [0], [0, 0, 1, 0], [], []>} : vector<128x16xbf16>, vector<256x16xbf16>, vector<128x256xf32> -> vector<128x256xf32>
    %cst_65 = arith.constant dense<0xFF800000> : vector<128xf32>
    %111 = vector.multi_reduction <maximumf>, %110, %cst_65 [1] : vector<128x256xf32> to vector<128xf32>
    %112 = vector.shape_cast %111 : vector<128xf32> to vector<128x1xf32>
    %113 = vector.broadcast %112 : vector<128x1xf32> to vector<128x256xf32>
    %114 = arith.subf %110, %113 : vector<128x256xf32>
    %115 = math.exp %114 : vector<128x256xf32>
    %cst_66 = arith.constant dense<0.000000e+00> : vector<128xf32>
    %116 = vector.multi_reduction <add>, %115, %cst_66 [1] : vector<128x256xf32> to vector<128xf32>
    %117 = vector.shape_cast %116 : vector<128xf32> to vector<128x1xf32>
    %118 = arith.truncf %115 : vector<128x256xf32> to vector<128x256xbf16>
    %cst_67 = arith.constant dense<0.000000e+00> : vector<128x16xf32>
    %119 = tpu.matmul %118, %109, %cst_67 {dimension_numbers = #tpu.dot_dimension_numbers<[1], [0], [0], [1], [0, 0, 1, 1], [], []>} : vector<128x256xbf16>, vector<256x16xbf16>, vector<128x16xf32> -> vector<128x16xf32>
    %120 = tpu.reciprocal %117 {approx = true} : vector<128x1xf32> -> vector<128x1xf32>
    %121 = vector.broadcast %120 : vector<128x1xf32> to vector<128x16xf32>
    %122 = arith.mulf %119, %121 : vector<128x16xf32>
    %123 = arith.truncf %122 : vector<128x16xf32> to vector<128x16xbf16>
    %c1_68 = arith.constant 1 : index
    %c0_69 = arith.constant 0 : index
    %c0_70 = arith.constant 0 : index
    %124 = vector.load %arg9[%c1_68, %c0_69, %c0_70] : memref<4x16x64xbf16, #tpu.memory_space<vmem>>, vector<1x16x64xbf16>
    %125 = vector.shape_cast %124 : vector<1x16x64xbf16> to vector<16x64xbf16>
    %cst_71 = arith.constant dense<0.000000e+00> : vector<128x64xf32>
    %126 = tpu.matmul %123, %125, %cst_71 {dimension_numbers = #tpu.dot_dimension_numbers<[1], [0], [0], [1], [0, 0, 1, 1], [], []>} : vector<128x16xbf16>, vector<16x64xbf16>, vector<128x64xf32> -> vector<128x64xf32>
    %127 = arith.addf %85, %126 : vector<128x64xf32>
    %c2 = arith.constant 2 : index
    %c0_72 = arith.constant 0 : index
    %c0_73 = arith.constant 0 : index
    %128 = vector.load %arg3[%c2, %c0_72, %c0_73] : memref<4x64x16xbf16, #tpu.memory_space<vmem>>, vector<1x64x16xbf16>
    %129 = vector.shape_cast %128 : vector<1x64x16xbf16> to vector<64x16xbf16>
    %cst_74 = arith.constant dense<0.000000e+00> : vector<128x16xf32>
    %130 = tpu.matmul %40, %129, %cst_74 {dimension_numbers = #tpu.dot_dimension_numbers<[1], [0], [0], [1], [0, 0, 1, 1], [], []>} : vector<128x64xbf16>, vector<64x16xbf16>, vector<128x16xf32> -> vector<128x16xf32>
    %c2_75 = arith.constant 2 : index
    %c0_76 = arith.constant 0 : index
    %c0_77 = arith.constant 0 : index
    %131 = vector.load %arg4[%c2_75, %c0_76, %c0_77] : memref<4x1x16xf32, #tpu.memory_space<vmem>>, vector<1x1x16xf32>
    %132 = vector.shape_cast %131 : vector<1x1x16xf32> to vector<1x16xf32>
    %133 = vector.broadcast %132 : vector<1x16xf32> to vector<128x16xf32>
    %134 = arith.addf %130, %133 : vector<128x16xf32>
    %135 = arith.truncf %134 : vector<128x16xf32> to vector<128x16xbf16>
    %c2_78 = arith.constant 2 : index
    %c0_79 = arith.constant 0 : index
    %c0_80 = arith.constant 0 : index
    %136 = vector.load %arg5[%c2_78, %c0_79, %c0_80] : memref<4x64x16xbf16, #tpu.memory_space<vmem>>, vector<1x64x16xbf16>
    %137 = vector.shape_cast %136 : vector<1x64x16xbf16> to vector<64x16xbf16>
    %cst_81 = arith.constant dense<0.000000e+00> : vector<256x16xf32>
    %138 = tpu.matmul %23, %137, %cst_81 {dimension_numbers = #tpu.dot_dimension_numbers<[1], [0], [0], [1], [0, 0, 1, 1], [], []>} : vector<256x64xbf16>, vector<64x16xbf16>, vector<256x16xf32> -> vector<256x16xf32>
    %c2_82 = arith.constant 2 : index
    %c0_83 = arith.constant 0 : index
    %c0_84 = arith.constant 0 : index
    %139 = vector.load %arg6[%c2_82, %c0_83, %c0_84] : memref<4x1x16xf32, #tpu.memory_space<vmem>>, vector<1x1x16xf32>
    %140 = vector.shape_cast %139 : vector<1x1x16xf32> to vector<1x16xf32>
    %141 = vector.broadcast %140 : vector<1x16xf32> to vector<256x16xf32>
    %142 = arith.addf %138, %141 : vector<256x16xf32>
    %143 = arith.truncf %142 : vector<256x16xf32> to vector<256x16xbf16>
    %c2_85 = arith.constant 2 : index
    %c0_86 = arith.constant 0 : index
    %c0_87 = arith.constant 0 : index
    %144 = vector.load %arg7[%c2_85, %c0_86, %c0_87] : memref<4x64x16xbf16, #tpu.memory_space<vmem>>, vector<1x64x16xbf16>
    %145 = vector.shape_cast %144 : vector<1x64x16xbf16> to vector<64x16xbf16>
    %cst_88 = arith.constant dense<0.000000e+00> : vector<256x16xf32>
    %146 = tpu.matmul %23, %145, %cst_88 {dimension_numbers = #tpu.dot_dimension_numbers<[1], [0], [0], [1], [0, 0, 1, 1], [], []>} : vector<256x64xbf16>, vector<64x16xbf16>, vector<256x16xf32> -> vector<256x16xf32>
    %c2_89 = arith.constant 2 : index
    %c0_90 = arith.constant 0 : index
    %c0_91 = arith.constant 0 : index
    %147 = vector.load %arg8[%c2_89, %c0_90, %c0_91] : memref<4x1x16xf32, #tpu.memory_space<vmem>>, vector<1x1x16xf32>
    %148 = vector.shape_cast %147 : vector<1x1x16xf32> to vector<1x16xf32>
    %149 = vector.broadcast %148 : vector<1x16xf32> to vector<256x16xf32>
    %150 = arith.addf %146, %149 : vector<256x16xf32>
    %151 = arith.truncf %150 : vector<256x16xf32> to vector<256x16xbf16>
    %cst_92 = arith.constant dense<0.000000e+00> : vector<128x256xf32>
    %152 = tpu.matmul %135, %143, %cst_92 {dimension_numbers = #tpu.dot_dimension_numbers<[1], [1], [0], [0], [0, 0, 1, 0], [], []>} : vector<128x16xbf16>, vector<256x16xbf16>, vector<128x256xf32> -> vector<128x256xf32>
    %cst_93 = arith.constant dense<0xFF800000> : vector<128xf32>
    %153 = vector.multi_reduction <maximumf>, %152, %cst_93 [1] : vector<128x256xf32> to vector<128xf32>
    %154 = vector.shape_cast %153 : vector<128xf32> to vector<128x1xf32>
    %155 = vector.broadcast %154 : vector<128x1xf32> to vector<128x256xf32>
    %156 = arith.subf %152, %155 : vector<128x256xf32>
    %157 = math.exp %156 : vector<128x256xf32>
    %cst_94 = arith.constant dense<0.000000e+00> : vector<128xf32>
    %158 = vector.multi_reduction <add>, %157, %cst_94 [1] : vector<128x256xf32> to vector<128xf32>
    %159 = vector.shape_cast %158 : vector<128xf32> to vector<128x1xf32>
    %160 = arith.truncf %157 : vector<128x256xf32> to vector<128x256xbf16>
    %cst_95 = arith.constant dense<0.000000e+00> : vector<128x16xf32>
    %161 = tpu.matmul %160, %151, %cst_95 {dimension_numbers = #tpu.dot_dimension_numbers<[1], [0], [0], [1], [0, 0, 1, 1], [], []>} : vector<128x256xbf16>, vector<256x16xbf16>, vector<128x16xf32> -> vector<128x16xf32>
    %162 = tpu.reciprocal %159 {approx = true} : vector<128x1xf32> -> vector<128x1xf32>
    %163 = vector.broadcast %162 : vector<128x1xf32> to vector<128x16xf32>
    %164 = arith.mulf %161, %163 : vector<128x16xf32>
    %165 = arith.truncf %164 : vector<128x16xf32> to vector<128x16xbf16>
    %c2_96 = arith.constant 2 : index
    %c0_97 = arith.constant 0 : index
    %c0_98 = arith.constant 0 : index
    %166 = vector.load %arg9[%c2_96, %c0_97, %c0_98] : memref<4x16x64xbf16, #tpu.memory_space<vmem>>, vector<1x16x64xbf16>
    %167 = vector.shape_cast %166 : vector<1x16x64xbf16> to vector<16x64xbf16>
    %cst_99 = arith.constant dense<0.000000e+00> : vector<128x64xf32>
    %168 = tpu.matmul %165, %167, %cst_99 {dimension_numbers = #tpu.dot_dimension_numbers<[1], [0], [0], [1], [0, 0, 1, 1], [], []>} : vector<128x16xbf16>, vector<16x64xbf16>, vector<128x64xf32> -> vector<128x64xf32>
    %169 = arith.addf %127, %168 : vector<128x64xf32>
    %c3 = arith.constant 3 : index
    %c0_100 = arith.constant 0 : index
    %c0_101 = arith.constant 0 : index
    %170 = vector.load %arg3[%c3, %c0_100, %c0_101] : memref<4x64x16xbf16, #tpu.memory_space<vmem>>, vector<1x64x16xbf16>
    %171 = vector.shape_cast %170 : vector<1x64x16xbf16> to vector<64x16xbf16>
    %cst_102 = arith.constant dense<0.000000e+00> : vector<128x16xf32>
    %172 = tpu.matmul %40, %171, %cst_102 {dimension_numbers = #tpu.dot_dimension_numbers<[1], [0], [0], [1], [0, 0, 1, 1], [], []>} : vector<128x64xbf16>, vector<64x16xbf16>, vector<128x16xf32> -> vector<128x16xf32>
    %c3_103 = arith.constant 3 : index
    %c0_104 = arith.constant 0 : index
    %c0_105 = arith.constant 0 : index
    %173 = vector.load %arg4[%c3_103, %c0_104, %c0_105] : memref<4x1x16xf32, #tpu.memory_space<vmem>>, vector<1x1x16xf32>
    %174 = vector.shape_cast %173 : vector<1x1x16xf32> to vector<1x16xf32>
    %175 = vector.broadcast %174 : vector<1x16xf32> to vector<128x16xf32>
    %176 = arith.addf %172, %175 : vector<128x16xf32>
    %177 = arith.truncf %176 : vector<128x16xf32> to vector<128x16xbf16>
    %c3_106 = arith.constant 3 : index
    %c0_107 = arith.constant 0 : index
    %c0_108 = arith.constant 0 : index
    %178 = vector.load %arg5[%c3_106, %c0_107, %c0_108] : memref<4x64x16xbf16, #tpu.memory_space<vmem>>, vector<1x64x16xbf16>
    %179 = vector.shape_cast %178 : vector<1x64x16xbf16> to vector<64x16xbf16>
    %cst_109 = arith.constant dense<0.000000e+00> : vector<256x16xf32>
    %180 = tpu.matmul %23, %179, %cst_109 {dimension_numbers = #tpu.dot_dimension_numbers<[1], [0], [0], [1], [0, 0, 1, 1], [], []>} : vector<256x64xbf16>, vector<64x16xbf16>, vector<256x16xf32> -> vector<256x16xf32>
    %c3_110 = arith.constant 3 : index
    %c0_111 = arith.constant 0 : index
    %c0_112 = arith.constant 0 : index
    %181 = vector.load %arg6[%c3_110, %c0_111, %c0_112] : memref<4x1x16xf32, #tpu.memory_space<vmem>>, vector<1x1x16xf32>
    %182 = vector.shape_cast %181 : vector<1x1x16xf32> to vector<1x16xf32>
    %183 = vector.broadcast %182 : vector<1x16xf32> to vector<256x16xf32>
    %184 = arith.addf %180, %183 : vector<256x16xf32>
    %185 = arith.truncf %184 : vector<256x16xf32> to vector<256x16xbf16>
    %c3_113 = arith.constant 3 : index
    %c0_114 = arith.constant 0 : index
    %c0_115 = arith.constant 0 : index
    %186 = vector.load %arg7[%c3_113, %c0_114, %c0_115] : memref<4x64x16xbf16, #tpu.memory_space<vmem>>, vector<1x64x16xbf16>
    %187 = vector.shape_cast %186 : vector<1x64x16xbf16> to vector<64x16xbf16>
    %cst_116 = arith.constant dense<0.000000e+00> : vector<256x16xf32>
    %188 = tpu.matmul %23, %187, %cst_116 {dimension_numbers = #tpu.dot_dimension_numbers<[1], [0], [0], [1], [0, 0, 1, 1], [], []>} : vector<256x64xbf16>, vector<64x16xbf16>, vector<256x16xf32> -> vector<256x16xf32>
    %c3_117 = arith.constant 3 : index
    %c0_118 = arith.constant 0 : index
    %c0_119 = arith.constant 0 : index
    %189 = vector.load %arg8[%c3_117, %c0_118, %c0_119] : memref<4x1x16xf32, #tpu.memory_space<vmem>>, vector<1x1x16xf32>
    %190 = vector.shape_cast %189 : vector<1x1x16xf32> to vector<1x16xf32>
    %191 = vector.broadcast %190 : vector<1x16xf32> to vector<256x16xf32>
    %192 = arith.addf %188, %191 : vector<256x16xf32>
    %193 = arith.truncf %192 : vector<256x16xf32> to vector<256x16xbf16>
    %cst_120 = arith.constant dense<0.000000e+00> : vector<128x256xf32>
    %194 = tpu.matmul %177, %185, %cst_120 {dimension_numbers = #tpu.dot_dimension_numbers<[1], [1], [0], [0], [0, 0, 1, 0], [], []>} : vector<128x16xbf16>, vector<256x16xbf16>, vector<128x256xf32> -> vector<128x256xf32>
    %cst_121 = arith.constant dense<0xFF800000> : vector<128xf32>
    %195 = vector.multi_reduction <maximumf>, %194, %cst_121 [1] : vector<128x256xf32> to vector<128xf32>
    %196 = vector.shape_cast %195 : vector<128xf32> to vector<128x1xf32>
    %197 = vector.broadcast %196 : vector<128x1xf32> to vector<128x256xf32>
    %198 = arith.subf %194, %197 : vector<128x256xf32>
    %199 = math.exp %198 : vector<128x256xf32>
    %cst_122 = arith.constant dense<0.000000e+00> : vector<128xf32>
    %200 = vector.multi_reduction <add>, %199, %cst_122 [1] : vector<128x256xf32> to vector<128xf32>
    %201 = vector.shape_cast %200 : vector<128xf32> to vector<128x1xf32>
    %202 = arith.truncf %199 : vector<128x256xf32> to vector<128x256xbf16>
    %cst_123 = arith.constant dense<0.000000e+00> : vector<128x16xf32>
    %203 = tpu.matmul %202, %193, %cst_123 {dimension_numbers = #tpu.dot_dimension_numbers<[1], [0], [0], [1], [0, 0, 1, 1], [], []>} : vector<128x256xbf16>, vector<256x16xbf16>, vector<128x16xf32> -> vector<128x16xf32>
    %204 = tpu.reciprocal %201 {approx = true} : vector<128x1xf32> -> vector<128x1xf32>
    %205 = vector.broadcast %204 : vector<128x1xf32> to vector<128x16xf32>
    %206 = arith.mulf %203, %205 : vector<128x16xf32>
    %207 = arith.truncf %206 : vector<128x16xf32> to vector<128x16xbf16>
    %c3_124 = arith.constant 3 : index
    %c0_125 = arith.constant 0 : index
    %c0_126 = arith.constant 0 : index
    %208 = vector.load %arg9[%c3_124, %c0_125, %c0_126] : memref<4x16x64xbf16, #tpu.memory_space<vmem>>, vector<1x16x64xbf16>
    %209 = vector.shape_cast %208 : vector<1x16x64xbf16> to vector<16x64xbf16>
    %cst_127 = arith.constant dense<0.000000e+00> : vector<128x64xf32>
    %210 = tpu.matmul %207, %209, %cst_127 {dimension_numbers = #tpu.dot_dimension_numbers<[1], [0], [0], [1], [0, 0, 1, 1], [], []>} : vector<128x16xbf16>, vector<16x64xbf16>, vector<128x64xf32> -> vector<128x64xf32>
    %211 = arith.addf %169, %210 : vector<128x64xf32>
    %c0_128 = arith.constant 0 : index
    %c0_129 = arith.constant 0 : index
    %c0_130 = arith.constant 0 : index
    %212 = vector.load %arg11[%c0_128, %c0_129, %c0_130] : memref<1x128x64xf32, #tpu.memory_space<vmem>>, vector<1x128x64xf32>
    %213 = vector.shape_cast %212 : vector<1x128x64xf32> to vector<128x64xf32>
    %214 = vector.shape_cast %211 : vector<128x64xf32> to vector<1x128x64xf32>
    tpu.vector_store %arg11[%c0_128, %c0_129, %c0_130], %214 {strides = array<i32>} : memref<1x128x64xf32, #tpu.memory_space<vmem>>, vector<1x128x64xf32>,
    return
  }
  func.func @transform_0(%arg0: i32, %arg1: i32) -> (i32, i32, i32) {
    %c0_i32 = arith.constant 0 : i32
    %c0_i32_0 = arith.constant 0 : i32
    %c0_i32_1 = arith.constant 0 : i32
    return %arg0, %c0_i32, %c0_i32_0 : i32, i32, i32
  }
  func.func @transform_1(%arg0: i32, %arg1: i32) -> (i32, i32, i32) {
    %c0_i32 = arith.constant 0 : i32
    %c0_i32_0 = arith.constant 0 : i32
    %c0_i32_1 = arith.constant 0 : i32
    %c0_i32_2 = arith.constant 0 : i32
    return %c0_i32, %c0_i32_0, %c0_i32_1 : i32, i32, i32
  }
  func.func @transform_2(%arg0: i32, %arg1: i32) -> (i32, i32, i32) {
    %c0_i32 = arith.constant 0 : i32
    %c0_i32_0 = arith.constant 0 : i32
    %c0_i32_1 = arith.constant 0 : i32
    %c0_i32_2 = arith.constant 0 : i32
    return %c0_i32, %c0_i32_0, %c0_i32_1 : i32, i32, i32
  }
  func.func @transform_3(%arg0: i32, %arg1: i32) -> (i32, i32, i32) {
    %c0_i32 = arith.constant 0 : i32
    %c0_i32_0 = arith.constant 0 : i32
    %c0_i32_1 = arith.constant 0 : i32
    %c0_i32_2 = arith.constant 0 : i32
    return %c0_i32, %c0_i32_0, %c0_i32_1 : i32, i32, i32
  }
  func.func @transform_4(%arg0: i32, %arg1: i32) -> (i32, i32, i32) {
    %c0_i32 = arith.constant 0 : i32
    %c0_i32_0 = arith.constant 0 : i32
    %c0_i32_1 = arith.constant 0 : i32
    %c0_i32_2 = arith.constant 0 : i32
    return %c0_i32, %c0_i32_0, %c0_i32_1 : i32, i32, i32
  }
  func.func @transform_5(%arg0: i32, %arg1: i32) -> (i32, i32, i32) {
    %c0_i32 = arith.constant 0 : i32
    %c0_i32_0 = arith.constant 0 : i32
    %c0_i32_1 = arith.constant 0 : i32
    %c0_i32_2 = arith.constant 0 : i32
    return %c0_i32, %c0_i32_0, %c0_i32_1 : i32, i32, i32
  }
  func.func @transform_6(%arg0: i32, %arg1: i32) -> (i32, i32, i32) {
    %c0_i32 = arith.constant 0 : i32
    %c0_i32_0 = arith.constant 0 : i32
    %c0_i32_1 = arith.constant 0 : i32
    %c0_i32_2 = arith.constant 0 : i32
    return %c0_i32, %c0_i32_0, %c0_i32_1 : i32, i32, i32
  }
  func.func @transform_7(%arg0: i32, %arg1: i32) -> (i32, i32, i32) {
    %c0_i32 = arith.constant 0 : i32
    %c0_i32_0 = arith.constant 0 : i32
    %c0_i32_1 = arith.constant 0 : i32
    %c0_i32_2 = arith.constant 0 : i32
    return %c0_i32, %c0_i32_0, %c0_i32_1 : i32, i32, i32
  }
  func.func @transform_8(%arg0: i32, %arg1: i32) -> (i32, i32) {
    %c0_i32 = arith.constant 0 : i32
    %c0_i32_0 = arith.constant 0 : i32
    %c0_i32_1 = arith.constant 0 : i32
    return %c0_i32, %c0_i32_0 : i32, i32
  }
  func.func @transform_9(%arg0: i32, %arg1: i32) -> (i32, i32, i32) {
    %c0_i32 = arith.constant 0 : i32
    %c0_i32_0 = arith.constant 0 : i32
    return %arg0, %arg1, %c0_i32 : i32, i32, i32
  }
}

</mosaic_0001>

<bundles_post_ra>
// kernel: tpu_custom_call.1
= control target key start
LH: loop header
LB: loop body
LE: loop exit
PB: predicated region body
PF: predicated region fallthrough
CT: control target
= control target key end

     0   :  { %s6937_s30 = smov 0   ;;  %s6939_s10 = smov 0   ;;  %s10690_s0 = inlined_call_operand.vmem [shape: f32[2,256,64], index: 0, kind: input, shape index: {}]   ;;  %s10691_s1 = inlined_call_operand.vmem [shape: bf16[4,64,16], index: 1, kind: input, shape index: {}]   ;;  %s10692_s2 = inlined_call_operand.vmem [shape: f32[4,1,16], index: 2, kind: input, shape index: {}]   ;;  %s10693_s3 = inlined_call_operand.vmem [shape: bf16[4,64,16], index: 3, kind: input, shape index: {}]   ;;  %s10694_s4 = inlined_call_operand.vmem [shape: f32[4,1,16], index: 4, kind: input, shape index: {}]   ;;  %s10695_s5 = inlined_call_operand.vmem [shape: bf16[4,64,16], index: 5, kind: input, shape index: {}]   ;;  %s10696_s6 = inlined_call_operand.vmem [shape: f32[4,1,16], index: 6, kind: input, shape index: {}]   ;;  %s10697_s7 = inlined_call_operand.vmem [shape: bf16[4,16,64], index: 7, kind: input, shape index: {}]   ;;  %s10698_s8 = inlined_call_operand.vmem [shape: f32[1,64], index: 8, kind: input, shape index: {}]   ;;  %s10699_s9 = inlined_call_operand.vmem [shape: f32[2,256,64], index: 9, kind: output, shape index: {}]  }
   0x1   :  { %s6941_s11 = smov 0   ;;  %s6943_s12 = smov 0  }
   0x2   :  { %s6945_s13 = smov 0  }
   0x3 LB: > { %s28_s14 = sadd.s32 1, %s6876_s11  ;;  %s31_s15 = sadd.s32 1, %s6880_s12  ;;  %s6884_s13 = sphi %s6945_s13, %s19_s13   ;;  %s6880_s12 = sphi %s6943_s12, %s10909_s12   ;;  %s6876_s11 = sphi %s6941_s11, %s10908_s11   ;;  %s6872_s10 = sphi %s6939_s10, %s10907_s10   ;;  %s6868_s30 = sphi %s6937_s30, %s10906_s30  }
   0x4   : > { %p29_p0 = scmp.ge.s32.totalorder %s28_s14, 2  ;;  %p5667_p1 = scmp.ge.s32.totalorder %s6884_s13, 1 }
   0x5   : > { %p301_p2 = scmp.lt.s32.totalorder %s6884_s13, 5 }
   0x6   : > { %s10911_s14 = smov (%p29_p0, %s28_s14), 0  ;;  %s10913_s15 = smov (!%p29_p0, %s31_s15), %s6880_s12 }
   0x7   : > { %p302_p3 = pnand %p5667_p1, %p301_p2  ;;  %p33_p4 = scmp.ge.s32.totalorder %s10913_s15, 2 }
   0x9   : > { %s10915_s15 = smov (%p33_p4, %s10913_s15), 0  ;;  %305 = sbr.rel (%p302_p3) target bundleno = 4394 (0x112a), region = 56 }
   0xe   : > { %p341_p5 = scmp.lt.s32.totalorder %s6872_s10, 1  ;;  %s5673_s16 = sshll.u32 %s6868_s30, 7  ;;  %vm407_vm0 = vcmask 523264   ;;  %v6886_v14 = vmov 64.0  }
   0xf   : > { %6346 = vrcp.f32 %v6886_v14  ;;  %v6238_v14 = vld [vmem:[%s10695_s5 + $0x10] sm:$0xff]  ;;  %s5670_s25 = sshll.u32 %s6868_s30, 4 }
  0x10   : > { %s10917_s10 = smov (!%p341_p5, %s6872_s10), 1  ;;  %p349_p6 = scmp.lt.s32.totalorder %s5670_s25, 31 }
  0x11   : > { %s6227_s17 = sshll.u32 %s10917_s10, 8  ;;  %s5671_s26 = sshll.u32 %s10917_s10, 5 }
  0x12   : > { %s6976_s20 = scalar_lea.vmem %s10690_s0, %s6227_s17  ;;  %s10919_s25 = smov (!%p349_p6, %s5670_s25), 31 }
  0x13   : > { %v358_v0 = vld [vmem:[%s6976_s20] sm:$0xff]  ;;  %s6980_s21 = scalar_lea.vmem %s6976_s20, %s5673_s16  ;;  %v360_v1 = vld [vmem:[%s6976_s20 + $0x10] sm:$0xff]  ;;  %v359_v6 = vld [vmem:[%s6976_s20 + $0x8] sm:$0xff]  ;;  %s352_s27 = sadd.s32 %s5671_s26, %s10919_s25 }
  0x14   : > { %v408_v2 = vsel %vm407_vm0, %v358_v0, 0.0  ;;  %v405_v3 = vld [vmem:[%s6980_s21 + $0x70] sm:$0xff]  ;;  %v414_v4 = vsel %vm407_vm0, %v360_v1, 0.0  ;;  %v361_v7 = vld [vmem:[%s6976_s20 + $0x18] sm:$0xff]  ;;  %v411_v9 = vsel %vm407_vm0, %v359_v6, 0.0  ;;  %v362_v12 = vld [vmem:[%s6976_s20 + $0x20] sm:$0xff] }
  0x15   : > { %409 = vadd.xlane.f32.xlu1 %v408_v2  ;;  %v1177_v5 = vsel %vm407_vm0, %v405_v3, 0.0  ;;  %415 = vadd.xlane.f32.xlu2 %v414_v4  ;;  %v406_v8 = vld [vmem:[%s6980_s21 + $0x78] sm:$0xff]  ;;  %v417_v10 = vsel %vm407_vm0, %v361_v7, 0.0  ;;  %v420_v13 = vsel %vm407_vm0, %v362_v12, 0.0  ;;  %v6347_v15 = vpop.eup %6346  ;;  %v7010_v35 = vld [vmem:[%s6976_s20 + $0x28] sm:$0xff]  ;;  %v7032_v48 = vld [vmem:[%s6976_s20 + $0x30] sm:$0xff] }
  0x16   : > { %1178 = vadd.xlane.f32.xlu0 %v1177_v5  ;;  %v1180_v11 = vsel %vm407_vm0, %v406_v8, 0.0  ;;  %v505_v16 = vmul.f32 64.0, %v6347_v15  ;;  %vm509_vm1 = vweird.f32 %v6347_v15  ;;  %v423_v41 = vsel %vm407_vm0, %v7010_v35, 0.0  ;;  %v7041_v54 = vld [vmem:[%s6976_s20 + $0x48] sm:$0xff]  ;;  %v7047_v57 = vld [vmem:[%s6976_s20 + $0x38] sm:$0xff]  ;;  %v7057_v62 = vld [vmem:[%s6976_s20 + $0x50] sm:$0xff] }
  0x17   : > { %v426_v50 = vsel %vm407_vm0, %v7032_v48, 0.0  ;;  %v435_v58 = vsel %vm407_vm0, %v7041_v54, 0.0  ;;  %v429_v61 = vsel %vm407_vm0, %v7047_v57, 0.0  ;;  %v7070_v4 = vld [vmem:[%s6976_s20 + $0x58] sm:$0xff]  ;;  %s5672_s28 = sshll.u32 %s352_s27, 3 }
  0x18   : > { %v506_v17 = vsub.f32 1.0, %v505_v16  ;;  %v441_v5 = vsel %vm407_vm0, %v7070_v4, 0.0  ;;  %s10595_s19 = scalar_lea.vmem %s10699_s9, %s5672_s28 }
  0x1a   : > { %v507_v18 = vmul.f32 %v6347_v15, %v506_v17  ;;  %v6235_v17 = vld [vmem:[%s10693_s3 + $0x18] sm:$0xff] }
  0x1c   : > { %v508_v19 = vadd.f32 %v6347_v15, %v507_v18  ;;  %v6237_v18 = vld [vmem:[%s10695_s5 + $0x8] sm:$0xff] }
  0x1d   : > { %412 = vadd.xlane.f32.xlu1 %v411_v9  ;;  %418 = vadd.xlane.f32.xlu2 %v417_v10  ;;  %v6230_v9 = vld [vmem:[%s10691_s1 + $0x10] sm:$0xff]  ;;  %v6229_v10 = vld [vmem:[%s10691_s1 + $0x8] sm:$0xff] }
  0x1e   : > { %1181 = vadd.xlane.f32.xlu0 %v1180_v11  ;;  %v6995_v20 = vsel %vm509_vm1, %v6347_v15, %v508_v19  ;;  %v6239_v11 = vld [vmem:[%s10695_s5 + $0x18] sm:$0xff] }
  0x1f   : > { %1861 = vmatpush.bf16.msra.mxu2 %v6239_v11 }
  0x23   : > { %1862 = vmatpush.bf16.msra.mxu2 %v6238_v14 }
  0x25   : > { %421 = vadd.xlane.f32.xlu2 %v420_v13  ;;  %v6228_v13 = vld [vmem:[%s10691_s1] sm:$0xff] }
  0x27   : > { %1863 = vmatpush.bf16.msra.mxu2 %v6237_v18 }
  0x88   : > { %v410_v21 = vpop.xlane.xlu1 %409  ;;  %v416_v24 = vpop.xlane.xlu2 %415 }
  0x89   : > { %v1179_v22 = vpop.xlane.xlu0 %1178  ;;  %v513_v31 = vmul.f32 %v6995_v20, %v416_v24  ;;  %v511_v32 = vmul.f32 %v6995_v20, %v410_v21  ;;  %v6234_v24 = vld [vmem:[%s10693_s3 + $0x10] sm:$0xff] }
  0x8a   : > { %v1197_v23 = vmul.f32 %v1179_v22, %v6995_v20 }
  0x8b   : > { %v7014_v37 = vsub.f32 %v360_v1, %v513_v31  ;;  %v7018_v40 = vsub.f32 %v358_v0, %v511_v32  ;;  %v7062_v0 = vld [vmem:[%s6976_s20 + $0x40] sm:$0xff]  ;;  %v438_v1 = vsel %vm407_vm0, %v7057_v62, 0.0 }
  0x8c   : > { %v6998_v25 = vsub.f32 %v405_v3, %v1197_v23  ;;  %v432_v3 = vsel %vm407_vm0, %v7062_v0, 0.0 }
  0x8d   : > { %v577_v45 = vmul.f32 %v7014_v37, %v7014_v37  ;;  %v575_v47 = vmul.f32 %v7018_v40, %v7018_v40 }
  0x8e   : > { %v1229_v26 = vmul.f32 %v6998_v25, %v6998_v25 }
  0x8f   : > { %v613_v49 = vsel %vm407_vm0, %v577_v45, 0.0  ;;  %v607_v52 = vsel %vm407_vm0, %v575_v47, 0.0  ;;  %v6232_v47 = vld [vmem:[%s10693_s3] sm:$0xff] }
  0x90   : > { %v413_v27 = vpop.xlane.xlu1 %412  ;;  %v1273_v28 = vsel %vm407_vm0, %v1229_v26, 0.0  ;;  %v419_v39 = vpop.xlane.xlu2 %418  ;;  %v6236_v26 = vld [vmem:[%s10695_s5] sm:$0xff] }
  0x91   : > { %v512_v29 = vmul.f32 %v6995_v20, %v413_v27  ;;  %1274 = vadd.xlane.f32.xlu0 %v1273_v28  ;;  %v1182_v30 = vpop.xlane.xlu0 %1181  ;;  %v514_v46 = vmul.f32 %v6995_v20, %v419_v39  ;;  %1864 = vmatpush.bf16.msra.mxu2 %v6236_v26 }
  0x92   : > { %v1198_v33 = vmul.f32 %v1182_v30, %v6995_v20 }
  0x93   : > { %v7007_v34 = vsub.f32 %v359_v6, %v512_v29  ;;  %v7037_v51 = vsub.f32 %v361_v7, %v514_v46  ;;  %v7075_v6 = vld [vmem:[%s6976_s20 + $0x60] sm:$0xff] }
  0x94   : > { %v7012_v36 = vsub.f32 %v406_v8, %v1198_v33  ;;  %v444_v7 = vsel %vm407_vm0, %v7075_v6, 0.0  ;;  %v6231_v8 = vld [vmem:[%s10691_s1 + $0x18] sm:$0xff] }
  0x95   : > { %v576_v38 = vmul.f32 %v7007_v34, %v7007_v34  ;;  %v578_v55 = vmul.f32 %v7037_v51, %v7037_v51  ;;  %6280 = vmatpush.bf16.msra.mxu1 %v6231_v8  ;;  %1579 = vmatpush.bf16.msra.mxu0 %v6231_v8 }
  0x96   : > { %v1230_v42 = vmul.f32 %v7012_v36, %v7012_v36 }
  0x97   : > { %v610_v43 = vsel %vm407_vm0, %v576_v38, 0.0  ;;  %v616_v59 = vsel %vm407_vm0, %v578_v55, 0.0  ;;  %v6233_v38 = vld [vmem:[%s10693_s3 + $0x8] sm:$0xff] }
  0x98   : > { %611 = vadd.xlane.f32.xlu2 %v610_v43  ;;  %v1276_v44 = vsel %vm407_vm0, %v1230_v42, 0.0  ;;  %v422_v53 = vpop.xlane.xlu2 %421 }
  0x99   : > { %424 = vadd.xlane.f32.xlu0 %v423_v41  ;;  %1277 = vadd.xlane.f32.xlu1 %v1276_v44  ;;  %v515_v56 = vmul.f32 %v6995_v20, %v422_v53 }
  0x9a   : > { %6281 = vmatpush.bf16.msra.mxu1 %v6230_v9  ;;  %1580 = vmatpush.bf16.msra.mxu0 %v6230_v9 }
  0x9b   : > { %v7052_v60 = vsub.f32 %v362_v12, %v515_v56 }
  0x9d   : > { %v579_v63 = vmul.f32 %v7052_v60, %v7052_v60 }
  0x9e   : > { %6282 = vmatpush.bf16.msra.mxu1 %v6229_v10  ;;  %1581 = vmatpush.bf16.msra.mxu0 %v6229_v10 }
  0x9f   : > { %v619_v2 = vsel %vm407_vm0, %v579_v63, 0.0 }
  0xa0   : > { %614 = vadd.xlane.f32.xlu2 %v613_v49 }
  0xa1   : > { %427 = vadd.xlane.f32.xlu0 %v426_v50  ;;  %608 = vadd.xlane.f32.xlu1 %v607_v52 }
  0xa2   : > { %6283 = vmatpush.bf16.msra.mxu1 %v6228_v13  ;;  %1582 = vmatpush.bf16.msra.mxu0 %v6228_v13 }
  0xa6   : > { %1720 = vmatpush.bf16.msrb.mxu1 %v6235_v17 }
  0xa8   : > { %436 = vadd.xlane.f32.xlu2 %v435_v58 }
  0xa9   : > { %617 = vadd.xlane.f32.xlu0 %v616_v59  ;;  %430 = vadd.xlane.f32.xlu1 %v429_v61 }
  0xaa   : > { %1721 = vmatpush.bf16.msrb.mxu1 %v6234_v24 }
  0xae   : > { %1722 = vmatpush.bf16.msrb.mxu1 %v6233_v38 }
  0xb0   : > { %439 = vadd.xlane.f32.xlu2 %v438_v1 }
  0xb1   : > { %620 = vadd.xlane.f32.xlu0 %v619_v2  ;;  %433 = vadd.xlane.f32.xlu1 %v432_v3 }
  0xb2   : > { %1723 = vmatpush.bf16.msrb.mxu1 %v6232_v47 }
  0xb9   : > { %442 = vadd.xlane.f32.xlu0 %v441_v5 }
  0xc1   : > { %445 = vadd.xlane.f32.xlu0 %v444_v7 }
 0x104   : > { %v1275_v12 = vpop.xlane.xlu0 %1274 }
 0x105   : > { %v1293_v15 = vmul.f32 %v1275_v12, %v6995_v20 }
 0x107   : > { %v7098_v16 = vadd.f32 1e-05, %v1293_v15 }
 0x109   : > { %6348 = vrsqrt.f32 %v7098_v16  ;;  %vm1457_vm3 = vweird.f32 %v7098_v16 }
 0x10b   : > { %v612_v19 = vpop.xlane.xlu2 %611 }
 0x10c   : > { %v704_v21 = vmul.f32 %v612_v19, %v6995_v20  ;;  %v425_v22 = vpop.xlane.xlu0 %424  ;;  %v1278_v23 = vpop.xlane.xlu1 %1277 }
 0x10d   : > { %v516_v27 = vmul.f32 %v6995_v20, %v425_v22  ;;  %v1294_v28 = vmul.f32 %v1278_v23, %v6995_v20  ;;  %v7174_v23 = vld [vmem:[%s6976_s20 + $0x68] sm:$0xff] }
 0x10e   : > { %v7116_v29 = vadd.f32 1e-05, %v704_v21 }
 0x10f   : > { %v7118_v30 = vpop.eup %6348  ;;  %v7121_v31 = vsub.f32 %v7010_v35, %v516_v27  ;;  %v1310_v32 = vadd.f32 1e-05, %v1294_v28 }
 0x110   : > { %v1452_v33 = vmul.f32 %v7118_v30, %v7098_v16  ;;  %6350 = vrsqrt.f32 %v7116_v29  ;;  %vm1458_vm2 = vweird.f32 %v7118_v30  ;;  %vm783_vm7 = vweird.f32 %v7116_v29 }
 0x111   : > { %6352 = vrsqrt.f32 %v1310_v32  ;;  %v580_v39 = vmul.f32 %v7121_v31, %v7121_v31  ;;  %vm7167_vm5 = vmor %vm1457_vm3, %vm1458_vm2  ;;  %vm1467_vm6 = vweird.f32 %v1310_v32 }
 0x112   : > { %v1453_v41 = vmul.f32 %v7118_v30, %v1452_v33  ;;  %v447_v33 = vsel %vm407_vm0, %v7174_v23, 0.0 }
 0x113   : > { %v615_v42 = vpop.xlane.xlu2 %614  ;;  %v622_v35 = vsel %vm407_vm0, %v580_v39, 0.0 }
 0x114   : > { %v1454_v43 = vmul.f32 0.5, %v1453_v41  ;;  %v705_v44 = vmul.f32 %v615_v42, %v6995_v20  ;;  %v428_v45 = vpop.xlane.xlu0 %427  ;;  %623 = vadd.xlane.f32.xlu1 %v622_v35  ;;  %v609_v46 = vpop.xlane.xlu1 %608 }
 0x115   : > { %v517_v49 = vmul.f32 %v6995_v20, %v428_v45  ;;  %v703_v50 = vmul.f32 %v609_v46, %v6995_v20 }
 0x116   : > { %v7139_v52 = vpop.eup %6350  ;;  %v7143_v56 = vadd.f32 1e-05, %v705_v44  ;;  %v1455_v61 = vsub.f32 1.5, %v1454_v43 }
 0x117   : > { %v6353_v53 = vpop.eup %6352  ;;  %v778_v55 = vmul.f32 %v7139_v52, %v7116_v29  ;;  %v7146_v58 = vsub.f32 %v7032_v48, %v517_v49  ;;  %v7148_v59 = vadd.f32 1e-05, %v703_v50  ;;  %vm784_vm8 = vweird.f32 %v7139_v52 }
 0x118   : > { %v1462_v63 = vmul.f32 %v6353_v53, %v1310_v32  ;;  %v1456_v48 = vmul.f32 %v7118_v30, %v1455_v61  ;;  %vm1468_vm4 = vweird.f32 %v6353_v53  ;;  %vm7198_vm10 = vmor %vm783_vm7, %vm784_vm8  ;;  %vm793_vm1 = vweird.f32 %v7143_v56 }
 0x119   : > { %v779_v1 = vmul.f32 %v7139_v52, %v778_v55  ;;  %6354 = vrsqrt.f32 %v7148_v59  ;;  %v581_v3 = vmul.f32 %v7146_v58, %v7146_v58  ;;  %vm1469_vm9 = vmor %vm1467_vm6, %vm1468_vm4  ;;  %vm773_vm12 = vweird.f32 %v7148_v59 }
 0x11a   : > { %v1463_v2 = vmul.f32 %v6353_v53, %v1462_v63  ;;  %6356 = vrsqrt.f32 %v7143_v56  ;;  %v1460_v16 = vsel %vm7167_vm5, %v7118_v30, %v1456_v48 }
 0x11b   : > { %v780_v5 = vmul.f32 0.5, %v779_v1  ;;  %v437_v7 = vpop.xlane.xlu2 %436  ;;  %v625_v11 = vsel %vm407_vm0, %v581_v3, 0.0  ;;  %v1485_v39 = vmul.f32 %v1460_v16, %v6998_v25  ;;  %v7223_v1 = vld [vmem:[%s6976_s20 + $0x70] sm:$0xff] }
 0x11c   : > { %v1464_v8 = vmul.f32 0.5, %v1463_v2  ;;  %v520_v9 = vmul.f32 %v6995_v20, %v437_v7  ;;  %v618_v10 = vpop.xlane.xlu0 %617  ;;  %v431_v12 = vpop.xlane.xlu1 %430  ;;  %626 = vadd.xlane.f32.xlu1 %v625_v11  ;;  %v450_v48 = vsel %vm407_vm0, %v7223_v1, 0.0 }
 0x11d   : > { %v706_v13 = vmul.f32 %v618_v10, %v6995_v20  ;;  %v518_v14 = vmul.f32 %v6995_v20, %v431_v12  ;;  %v781_v21 = vsub.f32 1.5, %v780_v5 }
 0x11e   : > { %v1465_v15 = vsub.f32 1.5, %v1464_v8  ;;  %v7163_v17 = vsub.f32 %v7041_v54, %v520_v9 }
 0x11f   : > { %v6355_v18 = vpop.eup %6354  ;;  %v7171_v22 = vadd.f32 1e-05, %v706_v13  ;;  %v7181_v26 = vsub.f32 %v7047_v57, %v518_v14  ;;  %v782_v57 = vmul.f32 %v7139_v52, %v781_v21  ;;  %v7252_v21 = vld [vmem:[%s6976_s20 + $0x78] sm:$0xff] }
 0x120   : > { %v1466_v24 = vmul.f32 %v6353_v53, %v1465_v15  ;;  %v768_v54 = vmul.f32 %v6355_v18, %v7148_v59  ;;  %v7183_v27 = vpop.eup %6356  ;;  %v584_v30 = vmul.f32 %v7163_v17, %v7163_v17  ;;  %vm774_vm11 = vweird.f32 %v6355_v18 }
 0x121   : > { %6358 = vrsqrt.f32 %v7171_v22  ;;  %v582_v29 = vmul.f32 %v7181_v26, %v7181_v26  ;;  %v788_v35 = vmul.f32 %v7183_v27, %v7143_v56  ;;  %v786_v61 = vsel %vm7198_vm10, %v7139_v52, %v782_v57  ;;  %vm775_vm13 = vmor %vm773_vm12, %vm774_vm11 }
 0x122   : > { %v1470_v28 = vsel %vm1469_vm9, %v6353_v53, %v1466_v24  ;;  %v769_v32 = vmul.f32 %v6355_v18, %v768_v54  ;;  %v634_v44 = vsel %vm407_vm0, %v584_v30, 0.0  ;;  %v1088_v8 = vmul.f32 %v786_v61, %v7007_v34  ;;  %v7248_v34 = vld [vmem:[%s6976_s20 + $0x88] sm:$0xff] }
 0x123   : > { %v440_v38 = vpop.xlane.xlu2 %439  ;;  %v1486_v41 = vmul.f32 %v1470_v28, %v7012_v36  ;;  %635 = vadd.xlane.f32.xlu0 %v634_v44  ;;  %v628_v25 = vsel %vm407_vm0, %v582_v29, 0.0  ;;  %v789_v2 = vmul.f32 %v7183_v27, %v788_v35  ;;  %vm803_vm14 = vweird.f32 %v7171_v22 }
 0x124   : > { %v770_v43 = vmul.f32 0.5, %v769_v32  ;;  %v521_v45 = vmul.f32 %v6995_v20, %v440_v38  ;;  %v7206_v46 = vpop.xlane.xlu0 %620  ;;  %v434_v47 = vpop.xlane.xlu1 %433  ;;  %448 = vadd.xlane.f32.xlu1 %v447_v33  ;;  %629 = vadd.xlane.f32.xlu2 %v628_v25  ;;  %vm794_vm2 = vweird.f32 %v7183_v27  ;;  %v459_v24 = vsel %vm407_vm0, %v7248_v34, 0.0  ;;  %v7275_v38 = vld [vmem:[%s6976_s20 + $0x90] sm:$0xff] }
 0x125   : > { %v519_v36 = vmul.f32 %v6995_v20, %v434_v47  ;;  %v7213_v53 = vpack.c.bf16 %v1486_v41, %v1485_v39  ;;  %v790_v11 = vmul.f32 0.5, %v789_v2  ;;  %v453_v28 = vsel %vm407_vm0, %v7252_v21, 0.0  ;;  %vm795_vm4 = vmor %vm793_vm1, %vm794_vm2  ;;  %v7281_v39 = vld [vmem:[%s6976_s20 + $0x80] sm:$0xff] }
 0x126   : > { %v771_v49 = vsub.f32 1.5, %v770_v43  ;;  %v7211_v50 = vsub.f32 %v7057_v62, %v521_v45  ;;  %v707_v25 = vmul.f32 %v7206_v46, %v6995_v20 }
 0x127   : > { %10755 = vst [vmem:[#allocation2_spill] sm:$0xff] %v7213_v53  ;;  %v6359_v55 = vpop.eup %6358  ;;  %v7220_v63 = vsub.f32 %v7062_v0, %v519_v36  ;;  %5697 = vmatmul.msk.bf16.vlgmr.msra.gmra.mxu1 %vm407_vm0, %v7213_v53 }
 0x128   : > { %v772_v3 = vmul.f32 %v6355_v18, %v771_v49  ;;  %v798_v62 = vmul.f32 %v6359_v55, %v7171_v22  ;;  %v585_v5 = vmul.f32 %v7211_v50, %v7211_v50  ;;  %vm804_vm15 = vweird.f32 %v6359_v55 }
 0x129   : > { %v583_v52 = vmul.f32 %v7220_v63, %v7220_v63  ;;  %vm7260_vm3 = vmor %vm803_vm14, %vm804_vm15  ;;  %v739_v36 = vadd.f32 1e-05, %v707_v25 }
 0x12a   : > { %v776_v59 = vsel %vm775_vm13, %v6355_v18, %v772_v3  ;;  %v799_v0 = vmul.f32 %v6359_v55, %v798_v62  ;;  %v637_v7 = vsel %vm407_vm0, %v585_v5, 0.0 }
 0x12b   : > { %v1087_v9 = vmul.f32 %v776_v59, %v7018_v40  ;;  %v631_v10 = vsel %vm407_vm0, %v583_v52, 0.0  ;;  %638 = vadd.xlane.f32.xlu0 %v637_v7  ;;  %v791_v40 = vsub.f32 1.5, %v790_v11  ;;  %6360 = vrsqrt.f32 %v739_v36 }
 0x12c   : > { %v800_v12 = vmul.f32 0.5, %v799_v0  ;;  %v443_v13 = vpop.xlane.xlu0 %442  ;;  %451 = vadd.xlane.f32.xlu1 %v450_v48  ;;  %632 = vadd.xlane.f32.xlu2 %v631_v10  ;;  %vm813_vm5 = vweird.f32 %v739_v36 }
 0x12d   : > { %v7239_v14 = vpack.c.bf16 %v1088_v8, %v1087_v9  ;;  %v522_v15 = vmul.f32 %v6995_v20, %v443_v13  ;;  %v792_v32 = vmul.f32 %v7183_v27, %v791_v40 }
 0x12e   : > { %v801_v18 = vsub.f32 1.5, %v800_v12 }
 0x12f   : > { %10756 = vst [vmem:[#allocation3_spill] sm:$0xff] %v7239_v14  ;;  %v7243_v19 = vsub.f32 %v7070_v4, %v522_v15  ;;  %5746 = vmatmul.msk.bf16.vlgmr.msra.gmra.mxu2 %vm407_vm0, %v7239_v14  ;;  %v796_v29 = vsel %vm795_vm4, %v7183_v27, %v792_v32  ;;  %v456_v27 = vsel %vm407_vm0, %v7281_v39, 0.0 }
 0x130   : > { %v802_v4 = vmul.f32 %v6359_v55, %v801_v18  ;;  %v1089_v35 = vmul.f32 %v796_v29, %v7014_v37  ;;  %v7302_v37 = vld [vmem:[%s6976_s20 + $0xa0] sm:$0xff] }
 0x131   : > { %v586_v16 = vmul.f32 %v7243_v19, %v7243_v19  ;;  %v468_v47 = vsel %vm407_vm0, %v7302_v37, 0.0  ;;  %v6361_v49 = vpop.eup %6360 }
 0x132   : > { %v806_v33 = vsel %vm7260_vm3, %v6359_v55, %v802_v4  ;;  %v808_v55 = vmul.f32 %v6361_v49, %v739_v36  ;;  %vm814_vm6 = vweird.f32 %v6361_v49 }
 0x133   : > { %v640_v22 = vsel %vm407_vm0, %v586_v16, 0.0  ;;  %460 = vadd.xlane.f32.xlu0 %v459_v24  ;;  %v1090_v41 = vmul.f32 %v806_v33, %v7037_v51  ;;  %v7297_v51 = vld [vmem:[%s6976_s20 + $0x98] sm:$0xff]  ;;  %vm7315_vm7 = vmor %vm813_vm5, %vm814_vm6 }
 0x134   : > { %v446_v56 = vpop.xlane.xlu0 %445  ;;  %641 = vadd.xlane.f32.xlu1 %v640_v22  ;;  %454 = vadd.xlane.f32.xlu2 %v453_v28  ;;  %v465_v45 = vsel %vm407_vm0, %v7297_v51, 0.0  ;;  %v809_v3 = vmul.f32 %v6361_v49, %v808_v55 }
 0x135   : > { %v523_v30 = vmul.f32 %v6995_v20, %v446_v56  ;;  %v7292_v44 = vpack.c.bf16 %v1090_v41, %v1089_v35 }
 0x136   : > { %v810_v5 = vmul.f32 0.5, %v809_v3 }
 0x137   : > { %v7272_v57 = vsub.f32 %v7075_v6, %v523_v30  ;;  %5714 = vmatmul.msk.bf16.vlgmr.msrb.gmra.mxu1 %vm407_vm0, %v7239_v14  ;;  %v462_v6 = vsel %vm407_vm0, %v7275_v38, 0.0  ;;  %10759 = vst [vmem:[#allocation4_spill] sm:$0xff] %v7292_v44 }
 0x138   : > { %v811_v7 = vsub.f32 1.5, %v810_v5 }
 0x139   : > { %v587_v42 = vmul.f32 %v7272_v57, %v7272_v57 }
 0x13a   : > { %v812_v9 = vmul.f32 %v6361_v49, %v811_v7 }
 0x13b   : > { %v643_v43 = vsel %vm407_vm0, %v587_v42, 0.0  ;;  %463 = vadd.xlane.f32.xlu0 %v462_v6 }
 0x13c   : > { %644 = vadd.xlane.f32.xlu1 %v643_v43  ;;  %457 = vadd.xlane.f32.xlu2 %v456_v27  ;;  %v816_v4 = vsel %vm7315_vm7, %v6361_v49, %v812_v9 }
 0x13d   : > { %v1091_v41 = vmul.f32 %v816_v4, %v7052_v60 }
 0x13f   : > { %5747 = vmatmul.msk.bf16.gmra.mxu2 %vm407_vm0, %v7292_v44 }
 0x144   : > { %466 = vadd.xlane.f32.xlu1 %v465_v45 }
 0x147   : > { %5715 = vmatmul.msk.bf16.gmra.mxu1 %vm407_vm0, %v7292_v44 }
 0x14c   : > { %469 = vadd.xlane.f32.xlu1 %v468_v47 }
 0x187   : > { %v624_v61 = vpop.xlane.xlu1 %623 }
 0x188   : > { %v708_v2 = vmul.f32 %v624_v61, %v6995_v20 }
 0x18a   : > { %v740_v62 = vadd.f32 1e-05, %v708_v2 }
 0x18c   : > { %6362 = vrsqrt.f32 %v740_v62  ;;  %vm823_vm9 = vweird.f32 %v740_v62 }
 0x18f   : > { %v627_v52 = vpop.xlane.xlu1 %626 }
 0x190   : > { %v709_v59 = vmul.f32 %v627_v52, %v6995_v20 }
 0x192   : > { %v6363_v0 = vpop.eup %6362  ;;  %v7312_v8 = vadd.f32 1e-05, %v709_v59 }
 0x193   : > { %v818_v48 = vmul.f32 %v6363_v0, %v740_v62  ;;  %vm824_vm8 = vweird.f32 %v6363_v0 }
 0x194   : > { %6364 = vrsqrt.f32 %v7312_v8  ;;  %vm825_vm10 = vmor %vm823_vm9, %vm824_vm8  ;;  %vm833_vm12 = vweird.f32 %v7312_v8 }
 0x195   : > { %v819_v46 = vmul.f32 %v6363_v0, %v818_v48 }
 0x196   : > { %v636_v12 = vpop.xlane.xlu0 %635 }
 0x197   : > { %v820_v11 = vmul.f32 0.5, %v819_v46  ;;  %v449_v13 = vpop.xlane.xlu1 %448  ;;  %v712_v18 = vmul.f32 %v636_v12, %v6995_v20  ;;  %v630_v40 = vpop.xlane.xlu2 %629 }
 0x198   : > { %v524_v16 = vmul.f32 %v6995_v20, %v449_v13  ;;  %v710_v24 = vmul.f32 %v630_v40, %v6995_v20 }
 0x199   : > { %v821_v15 = vsub.f32 1.5, %v820_v11  ;;  %v7326_v28 = vadd.f32 1e-05, %v712_v18 }
 0x19a   : > { %v7324_v54 = vpop.eup %6364  ;;  %v7329_v32 = vsub.f32 %v7174_v23, %v524_v16  ;;  %v742_v30 = vadd.f32 1e-05, %v710_v24  ;;  %v7383_v16 = vld [vmem:[%s6976_s20 + $0xa8] sm:$0xff] }
 0x19b   : > { %v822_v22 = vmul.f32 %v6363_v0, %v821_v15  ;;  %v828_v56 = vmul.f32 %v7324_v54, %v7312_v8  ;;  %vm834_vm11 = vweird.f32 %v7324_v54  ;;  %vm863_vm2 = vweird.f32 %v7326_v28 }
 0x19c   : > { %v588_v29 = vmul.f32 %v7329_v32, %v7329_v32  ;;  %6366 = vrsqrt.f32 %v742_v30  ;;  %vm835_vm14 = vmor %vm833_vm12, %vm834_vm11  ;;  %vm843_vm15 = vweird.f32 %v742_v30 }
 0x19d   : > { %v826_v33 = vsel %vm825_vm10, %v6363_v0, %v822_v22  ;;  %v829_v6 = vmul.f32 %v7324_v54, %v828_v56  ;;  %6368 = vrsqrt.f32 %v7326_v28 }
 0x19e   : > { %v1092_v42 = vmul.f32 %v826_v33, %v7121_v31  ;;  %v646_v23 = vsel %vm407_vm0, %v588_v29, 0.0  ;;  %v639_v27 = vpop.xlane.xlu0 %638  ;;  %v471_v33 = vsel %vm407_vm0, %v7383_v16, 0.0 }
 0x19f   : > { %v830_v43 = vmul.f32 0.5, %v829_v6  ;;  %647 = vadd.xlane.f32.xlu2 %v646_v23  ;;  %v452_v45 = vpop.xlane.xlu1 %451  ;;  %v633_v47 = vpop.xlane.xlu2 %632  ;;  %v713_v52 = vmul.f32 %v639_v27, %v6995_v20 }
 0x1a0   : > { %v7340_v35 = vpack.c.bf16 %v1092_v42, %v1091_v41  ;;  %v525_v25 = vmul.f32 %v6995_v20, %v452_v45  ;;  %v711_v60 = vmul.f32 %v633_v47, %v6995_v20 }
 0x1a1   : > { %v831_v49 = vsub.f32 1.5, %v830_v43  ;;  %v7377_v40 = vadd.f32 1e-05, %v713_v52 }
 0x1a2   : > { %10762 = vst [vmem:[#allocation5_spill] sm:$0xff] %v7340_v35  ;;  %5716 = vmatmul.msk.bf16.gmra.mxu1 %vm407_vm0, %v7340_v35  ;;  %5748 = vmatmul.msk.bf16.gmra.mxu2 %vm407_vm0, %v7340_v35  ;;  %v7349_v31 = vsub.f32 %v7223_v1, %v525_v25  ;;  %v6367_v36 = vpop.eup %6366  ;;  %v7351_v55 = vadd.f32 1e-05, %v711_v60 }
 0x1a3   : > { %v7353_v61 = vpop.eup %6368  ;;  %v838_v2 = vmul.f32 %v6367_v36, %v742_v30  ;;  %v832_v5 = vmul.f32 %v7324_v54, %v831_v49  ;;  %vm844_vm13 = vweird.f32 %v6367_v36  ;;  %v7412_v49 = vld [vmem:[%s6976_s20 + $0xb0] sm:$0xff]  ;;  %vm873_vm10 = vweird.f32 %v7377_v40 }
 0x1a4   : > { %6370 = vrsqrt.f32 %v7351_v55  ;;  %v589_v62 = vmul.f32 %v7349_v31, %v7349_v31  ;;  %v858_v1 = vmul.f32 %v7353_v61, %v7326_v28  ;;  %vm845_vm1 = vmor %vm843_vm15, %vm844_vm13  ;;  %vm864_vm3 = vweird.f32 %v7353_v61 }
 0x1a5   : > { %v839_v3 = vmul.f32 %v6367_v36, %v838_v2  ;;  %v836_v4 = vsel %vm835_vm14, %v7324_v54, %v832_v5  ;;  %vm7440_vm5 = vmor %vm863_vm2, %vm864_vm3  ;;  %vm853_vm6 = vweird.f32 %v7351_v55 }
 0x1a6   : > { %v461_v59 = vpop.xlane.xlu0 %460  ;;  %v649_v9 = vsel %vm407_vm0, %v589_v62, 0.0  ;;  %v1093_v54 = vmul.f32 %v836_v4, %v7146_v58 }
 0x1a7   : > { %v642_v0 = vpop.xlane.xlu1 %641  ;;  %v840_v7 = vmul.f32 0.5, %v839_v3  ;;  %v528_v48 = vmul.f32 %v6995_v20, %v461_v59  ;;  %v455_v46 = vpop.xlane.xlu2 %454  ;;  %650 = vadd.xlane.f32.xlu2 %v649_v9 }
 0x1a8   : > { %v714_v10 = vmul.f32 %v642_v0, %v6995_v20  ;;  %v526_v11 = vmul.f32 %v6995_v20, %v455_v46 }
 0x1a9   : > { %v841_v12 = vsub.f32 1.5, %v840_v7  ;;  %v7369_v13 = vsub.f32 %v7248_v34, %v528_v48  ;;  %v859_v34 = vmul.f32 %v7353_v61, %v858_v1  ;;  %v474_v1 = vsel %vm407_vm0, %v7412_v49, 0.0 }
 0x1aa   : > { %v7371_v15 = vadd.f32 1e-05, %v714_v10  ;;  %v7373_v18 = vpop.eup %6370  ;;  %v7380_v8 = vsub.f32 %v7252_v21, %v526_v11 }
 0x1ab   : > { %v842_v24 = vmul.f32 %v6367_v36, %v841_v12  ;;  %v848_v22 = vmul.f32 %v7373_v18, %v7351_v55  ;;  %v592_v21 = vmul.f32 %v7369_v13, %v7369_v13  ;;  %v860_v23 = vmul.f32 0.5, %v859_v34  ;;  %v7454_v34 = vld [vmem:[%s6976_s20 + $0xc8] sm:$0xff] }
 0x1ac   : > { %6372 = vrsqrt.f32 %v7371_v15  ;;  %v590_v42 = vmul.f32 %v7380_v8, %v7380_v8  ;;  %vm854_vm4 = vweird.f32 %v7373_v18  ;;  %vm883_vm8 = vweird.f32 %v7371_v15 }
 0x1ad   : > { %v846_v56 = vsel %vm845_vm1, %v6367_v36, %v842_v24  ;;  %v849_v30 = vmul.f32 %v7373_v18, %v848_v22  ;;  %6374 = vrsqrt.f32 %v7377_v40  ;;  %v658_v27 = vsel %vm407_vm0, %v592_v21, 0.0  ;;  %vm855_vm7 = vmor %vm853_vm6, %vm854_vm4  ;;  %v7461_v22 = vld [vmem:[%s6976_s20 + $0xb8] sm:$0xff] }
 0x1ae   : > { %v1094_v29 = vmul.f32 %v846_v56, %v7181_v26  ;;  %v464_v41 = vpop.xlane.xlu0 %463  ;;  %659 = vadd.xlane.f32.xlu1 %v658_v27  ;;  %v652_v58 = vsel %vm407_vm0, %v590_v42, 0.0  ;;  %v861_v62 = vsub.f32 1.5, %v860_v23  ;;  %v7488_v27 = vld [vmem:[%s6976_s20 + $0xc0] sm:$0xff] }
 0x1af   : > { %v7400_v6 = vpop.xlane.xlu1 %644  ;;  %v850_v43 = vmul.f32 0.5, %v849_v30  ;;  %v529_v45 = vmul.f32 %v6995_v20, %v464_v41  ;;  %v458_v47 = vpop.xlane.xlu2 %457  ;;  %472 = vadd.xlane.f32.xlu2 %v471_v33  ;;  %653 = vadd.xlane.f32.xlu0 %v652_v58 }
 0x1b0   : > { %v7404_v25 = vpack.c.bf16 %v1094_v29, %v1093_v54  ;;  %v527_v26 = vmul.f32 %v6995_v20, %v458_v47  ;;  %v862_v48 = vmul.f32 %v7353_v61, %v861_v62 }
 0x1b1   : > { %v851_v60 = vsub.f32 1.5, %v850_v43  ;;  %v7409_v36 = vsub.f32 %v7275_v38, %v529_v45 }
 0x1b2   : > { %10763 = vst [vmem:[#allocation6_spill] sm:$0xff] %v7404_v25  ;;  %v7414_v2 = vpop.eup %6372  ;;  %v7417_v3 = vsub.f32 %v7281_v39, %v527_v26  ;;  %5717 = vmatmul.msk.bf16.gmra.mxu1 %vm407_vm0, %v7404_v25  ;;  %5749 = vmatmul.msk.bf16.gmra.mxu2 %vm407_vm0, %v7404_v25  ;;  %v866_v24 = vsel %vm7440_vm5, %v7353_v61, %v862_v48  ;;  %v477_v61 = vsel %vm407_vm0, %v7461_v22, 0.0  ;;  %v7817_v25 = vld [vmem:[%s6980_s21 + $0x18] sm:$0xff] }
 0x1b3   : > { %v593_v5 = vmul.f32 %v7409_v36, %v7409_v36  ;;  %v7425_v38 = vpop.eup %6374  ;;  %v852_v52 = vmul.f32 %v7373_v18, %v851_v60  ;;  %v878_v59 = vmul.f32 %v7414_v2, %v7371_v15  ;;  %v1096_v33 = vmul.f32 %v866_v24, %v7163_v17  ;;  %v7483_v17 = vld [vmem:[%s6976_s20 + $0xd0] sm:$0xff]  ;;  %v7503_v60 = vld [vmem:[%s6976_s20 + $0xd8] sm:$0xff] }
 0x1b4   : > { %v591_v39 = vmul.f32 %v7417_v3, %v7417_v3  ;;  %v868_v9 = vmul.f32 %v7425_v38, %v7377_v40  ;;  %vm884_vm9 = vweird.f32 %v7414_v2  ;;  %vm874_vm11 = vweird.f32 %v7425_v38 }
 0x1b5   : > { %v661_v0 = vsel %vm407_vm0, %v593_v5, 0.0  ;;  %v856_v11 = vsel %vm855_vm7, %v7373_v18, %v852_v52  ;;  %v879_v12 = vmul.f32 %v7414_v2, %v878_v59  ;;  %v486_v47 = vsel %vm407_vm0, %v7483_v17, 0.0  ;;  %vm885_vm12 = vmor %vm883_vm8, %vm884_vm9 }
 0x1b6   : > { %v655_v28 = vsel %vm407_vm0, %v591_v39, 0.0  ;;  %662 = vadd.xlane.f32.xlu1 %v661_v0  ;;  %v869_v55 = vmul.f32 %v7425_v38, %v868_v9  ;;  %v1095_v18 = vmul.f32 %v856_v11, %v7220_v63  ;;  %v480_v15 = vsel %vm407_vm0, %v7488_v27, 0.0  ;;  %vm875_vm13 = vmor %vm873_vm10, %vm874_vm11 }
 0x1b7   : > { %v467_v7 = vpop.xlane.xlu1 %466  ;;  %475 = vadd.xlane.f32.xlu2 %v474_v1  ;;  %656 = vadd.xlane.f32.xlu0 %v655_v28  ;;  %v880_v30 = vmul.f32 0.5, %v879_v12  ;;  %v489_v39 = vsel %vm407_vm0, %v7503_v60, 0.0 }
 0x1b8   : > { %v530_v10 = vmul.f32 %v6995_v20, %v467_v7  ;;  %v870_v29 = vmul.f32 0.5, %v869_v55  ;;  %v7473_v42 = vpack.c.bf16 %v1096_v33, %v1095_v18  ;;  %v7527_v18 = vpop.f32.mrf.mxu1 }
 0x1b9   : > { %v881_v63 = vsub.f32 1.5, %v880_v30  ;;  %10768 = vst [vmem:[#allocation9_spill] sm:$0xff] %v7527_v18 }
 0x1ba   : > { %v7451_v4 = vsub.f32 %v7297_v51, %v530_v10  ;;  %v483_v51 = vsel %vm407_vm0, %v7454_v34, 0.0  ;;  %10766 = vst [vmem:[#allocation7_spill] sm:$0xff] %v7473_v42  ;;  %v871_v43 = vsub.f32 1.5, %v870_v29 }
 0x1bb   : > { %v882_v45 = vmul.f32 %v7414_v2, %v881_v63 }
 0x1bc   : > { %v594_v56 = vmul.f32 %v7451_v4, %v7451_v4  ;;  %v872_v26 = vmul.f32 %v7425_v38, %v871_v43 }
 0x1bd   : > { %v886_v40 = vsel %vm885_vm12, %v7414_v2, %v882_v45  ;;  %v7517_v2 = vld [vmem:[%s6976_s20 + $0xe0] sm:$0xff] }
 0x1be   : > { %v664_v21 = vsel %vm407_vm0, %v594_v56, 0.0  ;;  %484 = vadd.xlane.f32.xlu1 %v483_v51  ;;  %v876_v62 = vsel %vm875_vm13, %v7425_v38, %v872_v26  ;;  %v1098_v5 = vmul.f32 %v886_v40, %v7243_v19  ;;  %v492_v38 = vsel %vm407_vm0, %v7517_v2, 0.0 }
 0x1bf   : > { %v470_v54 = vpop.xlane.xlu1 %469  ;;  %665 = vadd.xlane.f32.xlu2 %v664_v21  ;;  %478 = vadd.xlane.f32.xlu0 %v477_v61  ;;  %v1097_v1 = vmul.f32 %v876_v62, %v7211_v50  ;;  %v715_v19 = vmul.f32 %v7400_v6, %v6995_v20 }
 0x1c0   : > { %v531_v41 = vmul.f32 %v6995_v20, %v470_v54 }
 0x1c1   : > { %v7510_v52 = vpack.c.bf16 %v1098_v5, %v1097_v1  ;;  %v747_v59 = vadd.f32 1e-05, %v715_v19  ;;  %v7553_v19 = vpop.f32.mrf.mxu1 }
 0x1c2   : > { %v7476_v23 = vsub.f32 %v7302_v37, %v531_v41  ;;  %5718 = vmatmul.msk.bf16.gmra.mxu1 %vm407_vm0, %v7473_v42  ;;  %5750 = vmatmul.msk.bf16.gmra.mxu2 %vm407_vm0, %v7473_v42 }
 0x1c3   : > { %10767 = vst [vmem:[#allocation8_spill] sm:$0xff] %v7510_v52  ;;  %6376 = vrsqrt.f32 %v747_v59  ;;  %vm893_vm14 = vweird.f32 %v747_v59 }
 0x1c4   : > { %v595_v37 = vmul.f32 %v7476_v23, %v7476_v23 }
 0x1c6   : > { %v667_v58 = vsel %vm407_vm0, %v595_v37, 0.0  ;;  %487 = vadd.xlane.f32.xlu1 %v486_v47 }
 0x1c7   : > { %668 = vadd.xlane.f32.xlu2 %v667_v58  ;;  %481 = vadd.xlane.f32.xlu0 %v480_v15 }
 0x1c9   : > { %v6377_v50 = vpop.eup %6376 }
 0x1ca   : > { %v888_v0 = vmul.f32 %v6377_v50, %v747_v59  ;;  %vm894_vm15 = vweird.f32 %v6377_v50 }
 0x1cb   : > { %vm7530_vm1 = vmor %vm893_vm14, %vm894_vm15 }
 0x1cc   : > { %v889_v46 = vmul.f32 %v6377_v50, %v888_v0 }
 0x1ce   : > { %v890_v9 = vmul.f32 0.5, %v889_v46 }
 0x1cf   : > { %490 = vadd.xlane.f32.xlu2 %v489_v39 }
 0x1d0   : > { %v891_v24 = vsub.f32 1.5, %v890_v9 }
 0x1d2   : > { %5719 = vmatmul.msk.bf16.gmra.mxu1 %vm407_vm0, %v7510_v52  ;;  %5751 = vmatmul.msk.bf16.gmra.mxu2 %vm407_vm0, %v7510_v52  ;;  %v892_v30 = vmul.f32 %v6377_v50, %v891_v24 }
 0x1d4   : > { %v896_v43 = vsel %vm7530_vm1, %v6377_v50, %v892_v30 }
 0x1d5   : > { %v1099_v5 = vmul.f32 %v896_v43, %v7272_v57 }
 0x1d7   : > { %493 = vadd.xlane.f32.xlu2 %v492_v38 }
 0x212   : > { %v648_v28 = vpop.xlane.xlu2 %647 }
 0x213   : > { %v716_v7 = vmul.f32 %v648_v28, %v6995_v20 }
 0x215   : > { %v748_v48 = vadd.f32 1e-05, %v716_v7 }
 0x217   : > { %6378 = vrsqrt.f32 %v748_v48  ;;  %vm903_vm3 = vweird.f32 %v748_v48 }
 0x21a   : > { %v651_v10 = vpop.xlane.xlu2 %650 }
 0x21b   : > { %v717_v12 = vmul.f32 %v651_v10, %v6995_v20 }
 0x21d   : > { %v6379_v11 = vpop.eup %6378  ;;  %v7525_v56 = vadd.f32 1e-05, %v717_v12 }
 0x21e   : > { %v898_v55 = vmul.f32 %v6379_v11, %v748_v48  ;;  %vm904_vm2 = vweird.f32 %v6379_v11 }
 0x21f   : > { %6380 = vrsqrt.f32 %v7525_v56  ;;  %vm905_vm4 = vmor %vm903_vm3, %vm904_vm2  ;;  %vm913_vm6 = vweird.f32 %v7525_v56 }
 0x220   : > { %v899_v6 = vmul.f32 %v6379_v11, %v898_v55 }
 0x221   : > { %v660_v61 = vpop.xlane.xlu1 %659 }
 0x222   : > { %v900_v51 = vmul.f32 0.5, %v899_v6  ;;  %v473_v54 = vpop.xlane.xlu2 %472  ;;  %v720_v29 = vmul.f32 %v660_v61, %v6995_v20  ;;  %v654_v41 = vpop.xlane.xlu0 %653 }
 0x223   : > { %v532_v63 = vmul.f32 %v6995_v20, %v473_v54  ;;  %v718_v45 = vmul.f32 %v654_v41, %v6995_v20 }
 0x224   : > { %v901_v33 = vsub.f32 1.5, %v900_v51  ;;  %v7541_v58 = vadd.f32 1e-05, %v720_v29 }
 0x225   : > { %v7539_v47 = vpop.eup %6380  ;;  %v7544_v15 = vsub.f32 %v7383_v16, %v532_v63  ;;  %v750_v62 = vadd.f32 1e-05, %v718_v45  ;;  %v7583_v63 = vpop.f32.mrf.mxu1 }
 0x226   : > { %v902_v37 = vmul.f32 %v6379_v11, %v901_v33  ;;  %v908_v40 = vmul.f32 %v7539_v47, %v7525_v56  ;;  %vm914_vm5 = vweird.f32 %v7539_v47  ;;  %vm943_vm11 = vweird.f32 %v7541_v58 }
 0x227   : > { %v596_v1 = vmul.f32 %v7544_v15, %v7544_v15  ;;  %6382 = vrsqrt.f32 %v750_v62  ;;  %vm915_vm8 = vmor %vm913_vm6, %vm914_vm5  ;;  %vm923_vm9 = vweird.f32 %v750_v62 }
 0x228   : > { %v906_v26 = vsel %vm905_vm4, %v6379_v11, %v902_v37  ;;  %v909_v38 = vmul.f32 %v7539_v47, %v908_v40  ;;  %6384 = vrsqrt.f32 %v7541_v58 }
 0x229   : > { %v1100_v39 = vmul.f32 %v906_v26, %v7329_v32  ;;  %v670_v16 = vsel %vm407_vm0, %v596_v1, 0.0  ;;  %v663_v0 = vpop.xlane.xlu1 %662 }
 0x22a   : > { %v910_v50 = vmul.f32 0.5, %v909_v38  ;;  %671 = vadd.xlane.f32.xlu0 %v670_v16  ;;  %v476_v57 = vpop.xlane.xlu2 %475  ;;  %v657_v28 = vpop.xlane.xlu0 %656  ;;  %v721_v30 = vmul.f32 %v663_v0, %v6995_v20 }
 0x22b   : > { %v7555_v59 = vpack.c.bf16 %v1100_v39, %v1099_v5  ;;  %v533_v32 = vmul.f32 %v6995_v20, %v476_v57  ;;  %v719_v7 = vmul.f32 %v657_v28, %v6995_v20  ;;  %v7602_v39 = vld [vmem:[%s6976_s20 + $0xe8] sm:$0xff] }
 0x22c   : > { %v911_v9 = vsub.f32 1.5, %v910_v50  ;;  %v7596_v5 = vadd.f32 1e-05, %v721_v30  ;;  %v495_v0 = vsel %vm407_vm0, %v7602_v39, 0.0 }
 0x22d   : > { %10771 = vst [vmem:[#allocation10_spill] sm:$0xff] %v7555_v59  ;;  %5720 = vmatmul.msk.bf16.gmra.mxu1 %vm407_vm0, %v7555_v59  ;;  %5752 = vmatmul.msk.bf16.gmra.mxu2 %vm407_vm0, %v7555_v59  ;;  %v7566_v48 = vsub.f32 %v7412_v49, %v533_v32  ;;  %v6383_v46 = vpop.eup %6382  ;;  %v7568_v10 = vadd.f32 1e-05, %v719_v7 }
 0x22e   : > { %v7570_v11 = vpop.eup %6384  ;;  %v918_v12 = vmul.f32 %v6383_v46, %v750_v62  ;;  %v912_v6 = vmul.f32 %v7539_v47, %v911_v9  ;;  %vm924_vm7 = vweird.f32 %v6383_v46  ;;  %vm953_vm4 = vweird.f32 %v7596_v5 }
 0x22f   : > { %6386 = vrsqrt.f32 %v7568_v10  ;;  %v597_v55 = vmul.f32 %v7566_v48, %v7566_v48  ;;  %v938_v49 = vmul.f32 %v7570_v11, %v7541_v58  ;;  %vm925_vm10 = vmor %vm923_vm9, %vm924_vm7  ;;  %vm944_vm12 = vweird.f32 %v7570_v11 }
 0x230   : > { %v919_v24 = vmul.f32 %v6383_v46, %v918_v12  ;;  %v916_v1 = vsel %vm915_vm8, %v7539_v47, %v912_v6  ;;  %vm7659_vm14 = vmor %vm943_vm11, %vm944_vm12  ;;  %vm933_vm15 = vweird.f32 %v7568_v10 }
 0x231   : > { %v485_v51 = vpop.xlane.xlu1 %484  ;;  %v673_v29 = vsel %vm407_vm0, %v597_v55, 0.0  ;;  %v1101_v47 = vmul.f32 %v916_v1, %v7349_v31 }
 0x232   : > { %v666_v21 = vpop.xlane.xlu2 %665  ;;  %v920_v33 = vmul.f32 0.5, %v919_v24  ;;  %v536_v61 = vmul.f32 %v6995_v20, %v485_v51  ;;  %v479_v54 = vpop.xlane.xlu0 %478  ;;  %674 = vadd.xlane.f32.xlu0 %v673_v29 }
 0x233   : > { %v722_v41 = vmul.f32 %v666_v21, %v6995_v20  ;;  %v534_v43 = vmul.f32 %v6995_v20, %v479_v54  ;;  %v7632_v21 = vpop.f32.mrf.mxu1 }
 0x234   : > { %v921_v37 = vsub.f32 1.5, %v920_v33  ;;  %v7588_v45 = vsub.f32 %v7454_v34, %v536_v61  ;;  %v939_v34 = vmul.f32 %v7570_v11, %v938_v49  ;;  %v7642_v61 = vld [vmem:[%s6976_s20 + $0xf0] sm:$0xff] }
 0x235   : > { %v7590_v26 = vadd.f32 1e-05, %v722_v41  ;;  %v7592_v40 = vpop.eup %6386  ;;  %v7599_v56 = vsub.f32 %v7461_v22, %v534_v43 }
 0x236   : > { %v922_v38 = vmul.f32 %v6383_v46, %v921_v37  ;;  %v928_v16 = vmul.f32 %v7592_v40, %v7568_v10  ;;  %v600_v22 = vmul.f32 %v7588_v45, %v7588_v45  ;;  %vm934_vm13 = vweird.f32 %v7592_v40 }
 0x237   : > { %6388 = vrsqrt.f32 %v7590_v26  ;;  %v598_v32 = vmul.f32 %v7599_v56, %v7599_v56  ;;  %v498_v37 = vsel %vm407_vm0, %v7642_v61, 0.0  ;;  %vm935_vm1 = vmor %vm933_vm15, %vm934_vm13  ;;  %vm963_vm2 = vweird.f32 %v7590_v26 }
 0x238   : > { %v926_v50 = vsel %vm925_vm10, %v6383_v46, %v922_v38  ;;  %v929_v62 = vmul.f32 %v7592_v40, %v928_v16  ;;  %6390 = vrsqrt.f32 %v7596_v5  ;;  %v940_v46 = vmul.f32 0.5, %v939_v34 }
 0x239   : > { %v1102_v57 = vmul.f32 %v926_v50, %v7380_v8  ;;  %v488_v28 = vpop.xlane.xlu1 %487  ;;  %v682_v12 = vsel %vm407_vm0, %v600_v22, 0.0  ;;  %v676_v31 = vsel %vm407_vm0, %v598_v32, 0.0  ;;  %v7675_v32 = vld [vmem:[%s6976_s20 + $0xf8] sm:$0xff] }
 0x23a   : > { %v7619_v7 = vpop.xlane.xlu2 %668  ;;  %v930_v9 = vmul.f32 0.5, %v929_v62  ;;  %v537_v24 = vmul.f32 %v6995_v20, %v488_v28  ;;  %v482_v55 = vpop.xlane.xlu0 %481  ;;  %683 = vadd.xlane.f32.xlu2 %v682_v12  ;;  %496 = vadd.xlane.f32.xlu0 %v495_v0  ;;  %v941_v54 = vsub.f32 1.5, %v940_v46 }
 0x23b   : > { %v7623_v6 = vpack.c.bf16 %v1102_v57, %v1101_v47  ;;  %v535_v8 = vmul.f32 %v6995_v20, %v482_v55  ;;  %677 = vadd.xlane.f32.xlu1 %v676_v31  ;;  %v7679_v46 = vpop.f32.mrf.mxu1 }
 0x23c   : > { %v931_v49 = vsub.f32 1.5, %v930_v9  ;;  %v7628_v30 = vsub.f32 %v7483_v17, %v537_v24  ;;  %v942_v38 = vmul.f32 %v7570_v11, %v941_v54  ;;  %v501_v24 = vsel %vm407_vm0, %v7675_v32, 0.0 }
 0x23d   : > { %10772 = vst [vmem:[#allocation11_spill] sm:$0xff] %v7623_v6  ;;  %v7630_v51 = vpop.eup %6388  ;;  %v7635_v33 = vsub.f32 %v7488_v27, %v535_v8  ;;  %5721 = vmatmul.msk.bf16.gmra.mxu1 %vm407_vm0, %v7623_v6  ;;  %5753 = vmatmul.msk.bf16.gmra.mxu2 %vm407_vm0, %v7623_v6 }
 0x23e   : > { %v6391_v29 = vpop.eup %6390  ;;  %v601_v17 = vmul.f32 %v7628_v30, %v7628_v30  ;;  %v932_v41 = vmul.f32 %v7592_v40, %v931_v49  ;;  %v958_v43 = vmul.f32 %v7630_v51, %v7590_v26  ;;  %v946_v57 = vsel %vm7659_vm14, %v7570_v11, %v942_v38  ;;  %v7718_v38 = vpop.f32.mrf.mxu2 }
 0x23f   : > { %v599_v27 = vmul.f32 %v7635_v33, %v7635_v33  ;;  %v948_v50 = vmul.f32 %v6391_v29, %v7596_v5  ;;  %vm964_vm3 = vweird.f32 %v7630_v51  ;;  %vm954_vm5 = vweird.f32 %v6391_v29 }
 0x240   : > { %v685_v58 = vsel %vm407_vm0, %v601_v17, 0.0  ;;  %v936_v22 = vsel %vm935_vm1, %v7592_v40, %v932_v41  ;;  %v959_v0 = vmul.f32 %v7630_v51, %v958_v43  ;;  %vm965_vm6 = vmor %vm963_vm2, %vm964_vm3 }
 0x241   : > { %v679_v1 = vsel %vm407_vm0, %v599_v27, 0.0  ;;  %v949_v28 = vmul.f32 %v6391_v29, %v948_v50  ;;  %v1103_v40 = vmul.f32 %v936_v22, %v7417_v3  ;;  %vm955_vm7 = vmor %vm953_vm4, %vm954_vm5  ;;  %vm1962_vm5 = vcmask 130048  }
 0x242   : > { %v491_v34 = vpop.xlane.xlu2 %490  ;;  %686 = vadd.xlane.f32.xlu2 %v685_v58  ;;  %499 = vadd.xlane.f32.xlu0 %v498_v37  ;;  %v960_v9 = vmul.f32 0.5, %v959_v0 }
 0x243   : > { %v538_v62 = vmul.f32 %v6995_v20, %v491_v34  ;;  %680 = vadd.xlane.f32.xlu1 %v679_v1  ;;  %v950_v11 = vmul.f32 0.5, %v949_v28  ;;  %v7702_v17 = vpop.f32.mrf.mxu1 }
 0x244   : > { %v961_v49 = vsub.f32 1.5, %v960_v9 }
 0x245   : > { %v7669_v47 = vsub.f32 %v7503_v60, %v538_v62  ;;  %v1104_v60 = vmul.f32 %v946_v57, %v7369_v13  ;;  %v951_v13 = vsub.f32 1.5, %v950_v11  ;;  %v723_v62 = vmul.f32 %v7619_v7, %v6995_v20 }
 0x247   : > { %v602_v10 = vmul.f32 %v7669_v47, %v7669_v47  ;;  %v7687_v8 = vpack.c.bf16 %v1104_v60, %v1103_v40  ;;  %v952_v41 = vmul.f32 %v6391_v29, %v951_v13  ;;  %v755_v57 = vadd.f32 1e-05, %v723_v62 }
 0x249   : > { %v688_v12 = vsel %vm407_vm0, %v602_v10, 0.0  ;;  %10775 = vst [vmem:[#allocation12_spill] sm:$0xff] %v7687_v8  ;;  %v956_v26 = vsel %vm955_vm7, %v6391_v29, %v952_v41  ;;  %v7722_v29 = vpop.f32.mrf.mxu2  ;;  %6392 = vrsqrt.f32 %v755_v57  ;;  %vm973_vm8 = vweird.f32 %v755_v57 }
 0x24a   : > { %v494_v55 = vpop.xlane.xlu2 %493  ;;  %689 = vadd.xlane.f32.xlu0 %v688_v12  ;;  %v1105_v5 = vmul.f32 %v956_v26, %v7409_v36 }
 0x24b   : > { %v539_v31 = vmul.f32 %v6995_v20, %v494_v55  ;;  %502 = vadd.xlane.f32.xlu1 %v501_v24  ;;  %v7707_v58 = vpop.f32.mrf.mxu1 }
 0x24d   : > { %v7690_v54 = vsub.f32 %v7517_v2, %v539_v31  ;;  %5722 = vmatmul.msk.bf16.gmra.mxu1 %vm407_vm0, %v7687_v8  ;;  %5754 = vmatmul.msk.bf16.gmra.mxu2 %vm407_vm0, %v7687_v8  ;;  %v962_v2 = vmul.f32 %v7630_v51, %v961_v49 }
 0x24f   : > { %v603_v3 = vmul.f32 %v7690_v54, %v7690_v54  ;;  %v966_v43 = vsel %vm965_vm6, %v7630_v51, %v962_v2  ;;  %v6393_v40 = vpop.eup %6392 }
 0x250   : > { %v1106_v37 = vmul.f32 %v966_v43, %v7451_v4  ;;  %v968_v9 = vmul.f32 %v6393_v40, %v755_v57  ;;  %vm974_vm9 = vweird.f32 %v6393_v40 }
 0x251   : > { %v691_v27 = vsel %vm407_vm0, %v603_v3, 0.0  ;;  %v7726_v16 = vpop.f32.mrf.mxu2  ;;  %vm7755_vm10 = vmor %vm973_vm8, %vm974_vm9 }
 0x252   : > { %v7710_v1 = vpack.c.bf16 %v1106_v37, %v1105_v5  ;;  %v969_v11 = vmul.f32 %v6393_v40, %v968_v9 }
 0x253   : > { %692 = vadd.xlane.f32.xlu1 %v691_v27  ;;  %v7716_v34 = vpop.f32.mrf.mxu1 }
 0x254   : > { %10776 = vst [vmem:[#allocation13_spill] sm:$0xff] %v7710_v1  ;;  %v970_v31 = vmul.f32 0.5, %v969_v11 }
 0x256   : > { %v971_v27 = vsub.f32 1.5, %v970_v31 }
 0x258   : > { %v972_v5 = vmul.f32 %v6393_v40, %v971_v27 }
 0x259   : > { %v7730_v50 = vpop.f32.mrf.mxu2 }
 0x25b   : > { %v7720_v51 = vpop.f32.mrf.mxu1 }
 0x25d   : > { %5723 = vmatmul.msk.bf16.gmra.mxu1 %vm407_vm0, %v7710_v1  ;;  %5755 = vmatmul.msk.bf16.gmra.mxu2 %vm407_vm0, %v7710_v1 }
 0x261   : > { %v7736_v0 = vpop.f32.mrf.mxu2 }
 0x263   : > { %v7724_v4 = vpop.f32.mrf.mxu1 }
 0x269   : > { %v7740_v10 = vpop.f32.mrf.mxu2 }
 0x26b   : > { %v7728_v36 = vpop.f32.mrf.mxu1 }
 0x271   : > { %v7745_v7 = vpop.f32.mrf.mxu2 }
 0x273   : > { %v7734_v22 = vpop.f32.mrf.mxu1 }
 0x279   : > { %v7752_v37 = vpop.f32.mrf.mxu2 }
 0x27b   : > { %v7738_v28 = vpop.f32.mrf.mxu1 }
 0x283   : > { %v7743_v24 = vpop.f32.mrf.mxu1 }
 0x29d   : > { %v672_v12 = vpop.xlane.xlu0 %671 }
 0x29e   : > { %v724_v60 = vmul.f32 %v672_v12, %v6995_v20 }
 0x2a0   : > { %v756_v55 = vadd.f32 1e-05, %v724_v60 }
 0x2a2   : > { %6394 = vrsqrt.f32 %v756_v55  ;;  %vm983_vm12 = vweird.f32 %v756_v55 }
 0x2a5   : > { %v675_v49 = vpop.xlane.xlu0 %674 }
 0x2a6   : > { %v725_v3 = vmul.f32 %v675_v49, %v6995_v20 }
 0x2a8   : > { %v6395_v13 = vpop.eup %6394  ;;  %v7750_v43 = vadd.f32 1e-05, %v725_v3  ;;  %v976_v3 = vsel %vm7755_vm10, %v6393_v40, %v972_v5 }
 0x2a9   : > { %v978_v41 = vmul.f32 %v6395_v13, %v756_v55  ;;  %vm984_vm11 = vweird.f32 %v6395_v13  ;;  %v1107_v40 = vmul.f32 %v976_v3, %v7476_v23  ;;  %v7793_v3 = vld [vmem:[%s6980_s21] sm:$0xff] }
 0x2aa   : > { %v7748_v2 = vpop.f32.mrf.mxu1  ;;  %6396 = vrsqrt.f32 %v7750_v43  ;;  %vm985_vm13 = vmor %vm983_vm12, %vm984_vm11  ;;  %vm993_vm15 = vweird.f32 %v7750_v43 }
 0x2ab   : > { %v979_v26 = vmul.f32 %v6395_v13, %v978_v41 }
 0x2ad   : > { %v980_v62 = vmul.f32 0.5, %v979_v26  ;;  %v684_v60 = vpop.xlane.xlu2 %683  ;;  %v497_v11 = vpop.xlane.xlu0 %496 }
 0x2ae   : > { %v728_v31 = vmul.f32 %v684_v60, %v6995_v20  ;;  %v540_v57 = vmul.f32 %v6995_v20, %v497_v11  ;;  %v678_v49 = vpop.xlane.xlu1 %677 }
 0x2af   : > { %v981_v12 = vsub.f32 1.5, %v980_v62  ;;  %v726_v27 = vmul.f32 %v678_v49, %v6995_v20 }
 0x2b0   : > { %v7766_v1 = vpop.eup %6396  ;;  %v7769_v62 = vsub.f32 %v7602_v39, %v540_v57  ;;  %v7773_v11 = vadd.f32 1e-05, %v728_v31  ;;  %v7780_v39 = vpop.f32.mrf.mxu2 }
 0x2b1   : > { %v982_v41 = vmul.f32 %v6395_v13, %v981_v12  ;;  %v988_v60 = vmul.f32 %v7766_v1, %v7750_v43  ;;  %v758_v9 = vadd.f32 1e-05, %v726_v27  ;;  %vm994_vm14 = vweird.f32 %v7766_v1  ;;  %v7842_v43 = vld [vmem:[%s6980_s21 + $0x8] sm:$0xff] }
 0x2b2   : > { %v7764_v26 = vpop.f32.mrf.mxu1  ;;  %v604_v5 = vmul.f32 %v7769_v62, %v7769_v62  ;;  %vm7832_vm2 = vmor %vm993_vm15, %vm994_vm14  ;;  %vm1023_vm6 = vweird.f32 %v7773_v11 }
 0x2b3   : > { %v986_v8 = vsel %vm985_vm13, %v6395_v13, %v982_v41  ;;  %v989_v12 = vmul.f32 %v7766_v1, %v988_v60  ;;  %6398 = vrsqrt.f32 %v758_v9  ;;  %vm1003_vm3 = vweird.f32 %v758_v9 }
 0x2b4   : > { %v1108_v55 = vmul.f32 %v986_v8, %v7544_v15  ;;  %v694_v57 = vsel %vm407_vm0, %v604_v5, 0.0  ;;  %6400 = vrsqrt.f32 %v7773_v11 }
 0x2b5   : > { %v990_v31 = vmul.f32 0.5, %v989_v12  ;;  %v500_v49 = vpop.xlane.xlu0 %499  ;;  %695 = vadd.xlane.f32.xlu2 %v694_v57  ;;  %v687_v12 = vpop.xlane.xlu2 %686  ;;  %v1135_v57 = vsel %vm407_vm0, %v7793_v3, 0.0 }
 0x2b6   : > { %v7782_v13 = vpack.c.bf16 %v1108_v55, %v1107_v40  ;;  %v541_v23 = vmul.f32 %v6995_v20, %v500_v49  ;;  %v681_v15 = vpop.xlane.xlu1 %680 }
 0x2b7   : > { %v727_v8 = vmul.f32 %v681_v15, %v6995_v20  ;;  %v991_v60 = vsub.f32 1.5, %v990_v31  ;;  %v729_v31 = vmul.f32 %v687_v12, %v6995_v20 }
 0x2b8   : > { %10779 = vst [vmem:[#allocation14_spill] sm:$0xff] %v7782_v13  ;;  %5724 = vmatmul.msk.bf16.gmra.mxu1 %vm407_vm0, %v7782_v13  ;;  %5756 = vmatmul.msk.bf16.gmra.mxu2 %vm407_vm0, %v7782_v13  ;;  %v7796_v41 = vsub.f32 %v7642_v61, %v541_v23  ;;  %v7810_v13 = vpop.f32.mrf.mxu2 }
 0x2b9   : > { %v6399_v27 = vpop.eup %6398  ;;  %v7798_v40 = vadd.f32 1e-05, %v727_v8  ;;  %v992_v23 = vmul.f32 %v7766_v1, %v991_v60 }
 0x2ba   : > { %v1760_v55 = vpop.f32.mrf.mxu1  ;;  %v998_v5 = vmul.f32 %v6399_v27, %v758_v9  ;;  %v7802_v49 = vpop.eup %6400  ;;  %v605_v61 = vmul.f32 %v7796_v41, %v7796_v41  ;;  %vm1004_vm1 = vweird.f32 %v6399_v27 }
 0x2bb   : > { %6402 = vrsqrt.f32 %v7798_v40  ;;  %v1018_v6 = vmul.f32 %v7802_v49, %v7773_v11  ;;  %vm1005_vm4 = vmor %vm1003_vm3, %vm1004_vm1  ;;  %vm1024_vm7 = vweird.f32 %v7802_v49  ;;  %vm1013_vm10 = vweird.f32 %v7798_v40 }
 0x2bc   : > { %v999_v15 = vmul.f32 %v6399_v27, %v998_v5  ;;  %v697_v52 = vsel %vm407_vm0, %v605_v61, 0.0  ;;  %vm7899_vm9 = vmor %vm1023_vm6, %vm1024_vm7 }
 0x2bd   : > { %v690_v8 = vpop.xlane.xlu0 %689  ;;  %1136 = vadd.xlane.f32.xlu2 %v1135_v57  ;;  %698 = vadd.xlane.f32.xlu0 %v697_v52  ;;  %v1019_v44 = vmul.f32 %v7802_v49, %v1018_v6 }
 0x2be   : > { %v1000_v59 = vmul.f32 0.5, %v999_v15  ;;  %v730_v5 = vmul.f32 %v690_v8, %v6995_v20  ;;  %v503_v42 = vpop.xlane.xlu1 %502  ;;  %v7828_v15 = vld [vmem:[%s10694_s4] ss:$0 sm:$0xff]  ;;  %v1144_v8 = vsel %vm407_vm0, %v7817_v25, 0.0 }
 0x2bf   : > { %v542_v60 = vmul.f32 %v6995_v20, %v503_v42  ;;  %v7836_v42 = vadd.f32 1e-05, %v729_v31  ;;  %v1020_v61 = vmul.f32 0.5, %v1019_v44 }
 0x2c0   : > { %v1001_v12 = vsub.f32 1.5, %v1000_v59  ;;  %v7821_v57 = vadd.f32 1e-05, %v730_v5  ;;  %v996_v5 = vsel %vm7832_vm2, %v7766_v1, %v992_v23  ;;  %v1138_v1 = vsel %vm407_vm0, %v7842_v43, 0.0 }
 0x2c1   : > { %v7823_v35 = vpop.eup %6402  ;;  %v7839_v52 = vsub.f32 %v7675_v32, %v542_v60  ;;  %v1761_v32 = vadd.f32 %v7828_v15, %v1760_v55  ;;  %v1109_v23 = vmul.f32 %v996_v5, %v7566_v48  ;;  %vm1033_vm14 = vweird.f32 %v7836_v42 }
 0x2c2   : > { %v1762_v59 = vpop.f32.mrf.mxu1  ;;  %v1002_v14 = vmul.f32 %v6399_v27, %v1001_v12  ;;  %v1008_v9 = vmul.f32 %v7823_v35, %v7798_v40  ;;  %6404 = vrsqrt.f32 %v7821_v57  ;;  %vm1014_vm8 = vweird.f32 %v7823_v35 }
 0x2c3   : > { %v1763_v31 = vadd.f32 %v7828_v15, %v1762_v59  ;;  %v606_v6 = vmul.f32 %v7839_v52, %v7839_v52  ;;  %6406 = vrsqrt.f32 %v7836_v42  ;;  %vm1015_vm11 = vmor %vm1013_vm10, %vm1014_vm8  ;;  %vm1043_vm12 = vweird.f32 %v7821_v57 }
 0x2c4   : > { %v1006_v60 = vsel %vm1005_vm4, %v6399_v27, %v1002_v14  ;;  %v1009_v18 = vmul.f32 %v7823_v35, %v1008_v9  ;;  %v1758_v9 = vadd.f32 %v7828_v15, %v7764_v26  ;;  %v7884_v26 = vld [vmem:[%s6980_s21 + $0x10] sm:$0xff] }
 0x2c5   : > { %v1110_v12 = vmul.f32 %v1006_v60, %v7599_v56  ;;  %1145 = vadd.xlane.f32.xlu2 %v1144_v8  ;;  %v1812_v55 = vpack.c.bf16 %v1763_v31, %v1761_v32  ;;  %v700_v14 = vsel %vm407_vm0, %v606_v6, 0.0  ;;  %1139 = vadd.xlane.f32.xlu0 %v1138_v1  ;;  %v7870_v56 = vpop.f32.mrf.mxu2  ;;  %v7873_v8 = vld [vmem:[%s6980_s21 + $0x20] sm:$0xff]  ;;  %v1021_v32 = vsub.f32 1.5, %v1020_v61 }
 0x2c6   : > { %v1010_v59 = vmul.f32 0.5, %v1009_v18  ;;  %701 = vadd.xlane.f32.xlu1 %v700_v14  ;;  %v1756_v18 = vadd.f32 %v7828_v15, %v7748_v2  ;;  %v1147_v60 = vsel %vm407_vm0, %v7873_v8, 0.0  ;;  %v1753_v61 = vadd.f32 %v7828_v15, %v7743_v24 }
 0x2c7   : > { %v7865_v27 = vpack.c.bf16 %v1110_v12, %v1109_v23  ;;  %v2009_v48 = vsel %vm1962_vm5, %v1812_v55, 0  ;;  %v1141_v23 = vsel %vm407_vm0, %v7884_v26, 0.0  ;;  %v1022_v12 = vmul.f32 %v7802_v49, %v1021_v32 }
 0x2c8   : > { %v1011_v5 = vsub.f32 1.5, %v1010_v59  ;;  %2035 = vmatpush.bf16.xpose.msra.mxu3 %v2009_v48  ;;  %v7875_v44 = vpop.eup %6404  ;;  %v1811_v1 = vpack.c.bf16 %v1758_v9, %v1756_v18  ;;  %v1751_v48 = vadd.f32 %v7828_v15, %v7738_v28 }
 0x2c9   : > { %10782 = vst [vmem:[#allocation15_spill] sm:$0xff] %v7865_v27  ;;  %5725 = vmatmul.msk.bf16.gmra.mxu1 %vm407_vm0, %v7865_v27  ;;  %5757 = vmatmul.msk.bf16.gmra.mxu2 %vm407_vm0, %v7865_v27  ;;  %v7886_v31 = vpop.eup %6406  ;;  %v1038_v6 = vmul.f32 %v7875_v44, %v7821_v57  ;;  %v1026_v24 = vsel %vm7899_vm9, %v7802_v49, %v1022_v12  ;;  %vm1044_vm13 = vweird.f32 %v7875_v44 }
 0x2ca   : > { %v1012_v2 = vmul.f32 %v7823_v35, %v1011_v5  ;;  %v1028_v55 = vmul.f32 %v7886_v31, %v7836_v42  ;;  %v2006_v59 = vsel %vm1962_vm5, %v1811_v1, 0  ;;  %v7914_v5 = vld [vmem:[%s6980_s21 + $0x28] sm:$0xff]  ;;  %v1112_v28 = vmul.f32 %v1026_v24, %v7588_v45  ;;  %v7938_v45 = vld [vmem:[%s6980_s21 + $0x30] sm:$0xff]  ;;  %vm1045_vm1 = vmor %vm1043_vm12, %vm1044_vm13 }
 0x2cb   : > { %v1039_v9 = vmul.f32 %v7875_v44, %v1038_v6  ;;  %v1150_v1 = vsel %vm407_vm0, %v7914_v5, 0.0  ;;  %v1748_v6 = vadd.f32 %v7828_v15, %v7734_v22  ;;  %vm1034_vm15 = vweird.f32 %v7886_v31 }
 0x2cc   : > { %v1016_v14 = vsel %vm1015_vm11, %v7823_v35, %v1012_v2  ;;  %v1029_v40 = vmul.f32 %v7886_v31, %v1028_v55  ;;  %v1810_v35 = vpack.c.bf16 %v1753_v61, %v1751_v48  ;;  %v1153_v61 = vsel %vm407_vm0, %v7938_v45, 0.0  ;;  %vm1035_vm2 = vmor %vm1033_vm14, %vm1034_vm15 }
 0x2cd   : > { %1148 = vadd.xlane.f32.xlu0 %v1147_v60  ;;  %v7916_v18 = vpop.f32.mrf.mxu2  ;;  %v1111_v32 = vmul.f32 %v1016_v14, %v7635_v33  ;;  %v1040_v60 = vmul.f32 0.5, %v1039_v9  ;;  %v1746_v33 = vadd.f32 %v7828_v15, %v7728_v36  ;;  %v1743_v14 = vadd.f32 %v7828_v15, %v7724_v4 }
 0x2ce   : > { %1142 = vadd.xlane.f32.xlu1 %v1141_v23  ;;  %v1030_v2 = vmul.f32 0.5, %v1029_v40  ;;  %v2003_v49 = vsel %vm1962_vm5, %v1810_v35, 0  ;;  %v1741_v42 = vadd.f32 %v7828_v15, %v7720_v51  ;;  %v1738_v4 = vadd.f32 %v7828_v15, %v7716_v34 }
 0x2cf   : > { %v7928_v23 = vpack.c.bf16 %v1112_v28, %v1111_v32  ;;  %v1041_v12 = vsub.f32 1.5, %v1040_v60  ;;  %v1809_v55 = vpack.c.bf16 %v1748_v6, %v1746_v33 }
 0x2d0   : > { %2036 = vmatpush.bf16.xpose.msra.mxu3 %v2006_v59  ;;  %v1031_v22 = vsub.f32 1.5, %v1030_v2  ;;  %v1808_v40 = vpack.c.bf16 %v1743_v14, %v1741_v42 }
 0x2d1   : > { %10785 = vst [vmem:[#allocation16_spill] sm:$0xff] %v7928_v23  ;;  %v1042_v36 = vmul.f32 %v7875_v44, %v1041_v12  ;;  %v2000_v57 = vsel %vm1962_vm5, %v1809_v55, 0 }
 0x2d2   : > { %v1032_v59 = vmul.f32 %v7886_v31, %v1031_v22 }
 0x2d3   : > { %v1046_v9 = vsel %vm1045_vm1, %v7875_v44, %v1042_v36  ;;  %v1736_v44 = vadd.f32 %v7828_v15, %v7707_v58  ;;  %v1728_v58 = vadd.f32 %v7828_v15, %v7632_v21 }
 0x2d4   : > { %v1036_v48 = vsel %vm1035_vm2, %v7886_v31, %v1032_v59  ;;  %v1114_v24 = vmul.f32 %v1046_v9, %v7669_v47  ;;  %v1731_v31 = vadd.f32 %v7828_v15, %v7679_v46 }
 0x2d5   : > { %v1896_v11 = vpop.f32.mrf.mxu2  ;;  %v1113_v35 = vmul.f32 %v1036_v48, %v7628_v30  ;;  %v1807_v47 = vpack.c.bf16 %v1738_v4, %v1736_v44  ;;  %v1733_v30 = vadd.f32 %v7828_v15, %v7702_v17  ;;  %v1726_v17 = vadd.f32 %v7828_v15, %v7583_v63 }
 0x2d6   : > { %1151 = vadd.xlane.f32.xlu1 %v1150_v1  ;;  %v1997_v1 = vsel %vm1962_vm5, %v1808_v40, 0  ;;  %v693_v40 = vpop.xlane.xlu1 %692 }
 0x2d7   : > { %v7959_v60 = vpack.c.bf16 %v1114_v24, %v1113_v35  ;;  %v1994_v34 = vsel %vm1962_vm5, %v1807_v47, 0  ;;  %v1806_v28 = vpack.c.bf16 %v1733_v30, %v1731_v31  ;;  %v1805_v33 = vpack.c.bf16 %v1728_v58, %v1726_v17 }
 0x2d8   : > { %2037 = vmatpush.bf16.xpose.msra.mxu3 %v2003_v49  ;;  %v6334_v49 = vld [vmem:[%s10696_s6] ss:$0 sm:$0xff] }
 0x2d9   : > { %5726 = vmatmul.msk.bf16.gmra.mxu1 %vm407_vm0, %v7928_v23  ;;  %5758 = vmatmul.msk.bf16.gmra.mxu2 %vm407_vm0, %v7928_v23  ;;  %10786 = vst [vmem:[#allocation17_spill] sm:$0xff] %v7959_v60  ;;  %v1991_v2 = vsel %vm1962_vm5, %v1806_v28, 0  ;;  %v1988_v46 = vsel %vm1962_vm5, %v1805_v33, 0  ;;  %v1897_v21 = vadd.f32 %v6334_v49, %v1896_v11  ;;  %v1892_v14 = vadd.f32 %v6334_v49, %v7870_v56 }
 0x2da   : > { %v1889_v63 = vadd.f32 %v6334_v49, %v7810_v13  ;;  %v1887_v9 = vadd.f32 %v6334_v49, %v7780_v39  ;;  %v1884_v11 = vadd.f32 %v6334_v49, %v7752_v37  ;;  %v1879_v56 = vadd.f32 %v6334_v49, %v7740_v10 }
 0x2db   : > { %v1877_v13 = vadd.f32 %v6334_v49, %v7736_v0  ;;  %v1874_v39 = vadd.f32 %v6334_v49, %v7730_v50  ;;  %v1872_v37 = vadd.f32 %v6334_v49, %v7726_v16  ;;  %v1867_v35 = vadd.f32 %v6334_v49, %v7718_v38 }
 0x2dc   : > { %v7996_v42 = vpack.c.bf16 %v1889_v63, %v1887_v9  ;;  %v8037_v9 = vld [vmem:[%s6980_s21 + $0x38] sm:$0xff] }
 0x2dd   : > { %v1898_v32 = vpop.f32.mrf.mxu2  ;;  %v8006_v24 = vpack.c.bf16 %v1879_v56, %v1877_v13  ;;  %v8012_v10 = vpack.c.bf16 %v1874_v39, %v1872_v37 }
 0x2de   : > { %1154 = vadd.xlane.f32.xlu1 %v1153_v61  ;;  %v1899_v55 = vadd.f32 %v6334_v49, %v1898_v32  ;;  %v1894_v61 = vadd.f32 %v6334_v49, %v7916_v18  ;;  %v1882_v18 = vadd.f32 %v6334_v49, %v7745_v7  ;;  %v1869_v7 = vadd.f32 %v6334_v49, %v7722_v29 }
 0x2df   : > { %v731_v32 = vmul.f32 %v693_v40, %v6995_v20 }
 0x2e0   : > { %2038 = vmatpush.bf16.xpose.msra.mxu3 %v2000_v57  ;;  %v7986_v59 = vpack.c.bf16 %v1899_v55, %v1897_v21  ;;  %v7991_v57 = vpack.c.bf16 %v1894_v61, %v1892_v14  ;;  %v8001_v48 = vpack.c.bf16 %v1884_v11, %v1882_v18  ;;  %v8016_v4 = vpack.c.bf16 %v1869_v7, %v1867_v35 }
 0x2e1   : > { %v763_v0 = vadd.f32 1e-05, %v731_v32  ;;  %v1156_v32 = vsel %vm407_vm0, %v8037_v9, 0.0 }
 0x2e3   : > { %6408 = vrsqrt.f32 %v763_v0  ;;  %vm1053_vm3 = vweird.f32 %v763_v0 }
 0x2e5   : > { %v1901_v51 = vpop.f32.mrf.mxu2 }
 0x2e6   : > { %v1902_v22 = vadd.f32 %v6334_v49, %v1901_v51 }
 0x2e8   : > { %2039 = vmatpush.bf16.xpose.msra.mxu3 %v1997_v1 }
 0x2e9   : > { %5727 = vmatmul.msk.bf16.gmra.mxu1 %vm407_vm0, %v7959_v60  ;;  %5759 = vmatmul.msk.bf16.gmra.mxu2 %vm407_vm0, %v7959_v60  ;;  %v6409_v50 = vpop.eup %6408 }
 0x2ea   : > { %v1048_v16 = vmul.f32 %v6409_v50, %v763_v0  ;;  %vm1054_vm4 = vweird.f32 %v6409_v50 }
 0x2eb   : > { %vm8031_vm6 = vmor %vm1053_vm3, %vm1054_vm4 }
 0x2ec   : > { %v1049_v47 = vmul.f32 %v6409_v50, %v1048_v16 }
 0x2ed   : > { %v1903_v6 = vpop.f32.mrf.mxu2 }
 0x2ee   : > { %v1904_v12 = vadd.f32 %v6334_v49, %v1903_v6  ;;  %v1050_v51 = vmul.f32 0.5, %v1049_v47 }
 0x2f0   : > { %2040 = vmatpush.bf16.xpose.msra.mxu3 %v1994_v34  ;;  %v7982_v36 = vpack.c.bf16 %v1904_v12, %v1902_v22 }
 0x2f8   : > { %2041 = vmatpush.bf16.xpose.msra.mxu3 %v1991_v2  ;;  %v1051_v2 = vsub.f32 1.5, %v1050_v51 }
 0x2fa   : > { %v1052_v22 = vmul.f32 %v6409_v50, %v1051_v2 }
 0x2fc   : > { %v1056_v13 = vsel %vm8031_vm6, %v6409_v50, %v1052_v22 }
 0x2fd   : > { %v1115_v50 = vmul.f32 %v1056_v13, %v7690_v54 }
 0x300   : > { %2042 = vmatpush.bf16.xpose.msra.mxu3 %v1988_v46 }
 0x308   : > { %6284 = vmatpush.bf16.msrb.mxu3 %v7982_v36 }
 0x30c   : > { %6285 = vmatpush.bf16.msrb.mxu3 %v7986_v59 }
 0x310   : > { %6286 = vmatpush.bf16.msrb.mxu3 %v7991_v57 }
 0x314   : > { %6287 = vmatpush.bf16.msrb.mxu3 %v7996_v42 }
 0x318   : > { %6288 = vmatpush.bf16.msrb.mxu3 %v8001_v48 }
 0x31c   : > { %6289 = vmatpush.bf16.msrb.mxu3 %v8006_v24 }
 0x320   : > { %6290 = vmatpush.bf16.msrb.mxu3 %v8012_v10 }
 0x324   : > { %6291 = vmatpush.bf16.msrb.mxu3 %v8016_v4 }
 0x328   : > { %v696_v1 = vpop.xlane.xlu2 %695 }
 0x329   : > { %v732_v44 = vmul.f32 %v696_v1, %v6995_v20 }
 0x32b   : > { %v764_v29 = vadd.f32 1e-05, %v732_v44 }
 0x32d   : > { %6410 = vrsqrt.f32 %v764_v29  ;;  %vm1063_vm8 = vweird.f32 %v764_v29 }
 0x330   : > { %v1137_v30 = vpop.xlane.xlu2 %1136  ;;  %v699_v34 = vpop.xlane.xlu0 %698 }
 0x331   : > { %v1183_v38 = vmul.f32 %v1137_v30, %v6995_v20  ;;  %v733_v28 = vmul.f32 %v699_v34, %v6995_v20 }
 0x333   : > { %v6411_v31 = vpop.eup %6410  ;;  %v8023_v58 = vsub.f32 %v7793_v3, %v1183_v38  ;;  %v8025_v49 = vadd.f32 1e-05, %v733_v28  ;;  %v8067_v38 = vld [vmem:[%s6980_s21 + $0x40] sm:$0xff] }
 0x334   : > { %v1058_v6 = vmul.f32 %v6411_v31, %v764_v29  ;;  %vm1064_vm7 = vweird.f32 %v6411_v31 }
 0x335   : > { %v1215_v17 = vmul.f32 %v8023_v58, %v8023_v58  ;;  %6412 = vrsqrt.f32 %v8025_v49  ;;  %vm1065_vm9 = vmor %vm1063_vm8, %vm1064_vm7  ;;  %vm1073_vm11 = vweird.f32 %v8025_v49 }
 0x336   : > { %v1059_v12 = vmul.f32 %v6411_v31, %v1058_v6  ;;  %v1159_v6 = vsel %vm407_vm0, %v8067_v38, 0.0 }
 0x337   : > { %v1231_v33 = vsel %vm407_vm0, %v1215_v17, 0.0 }
 0x338   : > { %v1060_v55 = vmul.f32 0.5, %v1059_v12  ;;  %1232 = vadd.xlane.f32.xlu2 %v1231_v33  ;;  %v1146_v3 = vpop.xlane.xlu2 %1145  ;;  %v1140_v14 = vpop.xlane.xlu0 %1139 }
 0x339   : > { %v1186_v21 = vmul.f32 %v1146_v3, %v6995_v20  ;;  %v702_v63 = vpop.xlane.xlu1 %701  ;;  %v1184_v11 = vmul.f32 %v1140_v14, %v6995_v20  ;;  %v8092_v14 = vpop.f32.mrf.mxu1 }
 0x33a   : > { %v1061_v61 = vsub.f32 1.5, %v1060_v55  ;;  %v734_v56 = vmul.f32 %v702_v63, %v6995_v20 }
 0x33b   : > { %v8041_v18 = vsub.f32 %v7817_v25, %v1186_v21  ;;  %v8046_v40 = vpop.eup %6412  ;;  %v8049_v37 = vsub.f32 %v7842_v43, %v1184_v11  ;;  %v8096_v11 = vld [vmem:[%s6980_s21 + $0x58] sm:$0xff] }
 0x33c   : > { %v1062_v39 = vmul.f32 %v6411_v31, %v1061_v61  ;;  %v766_v7 = vadd.f32 1e-05, %v734_v56  ;;  %v1068_v0 = vmul.f32 %v8046_v40, %v8025_v49  ;;  %vm1074_vm10 = vweird.f32 %v8046_v40  ;;  %v8099_v56 = vld [vmem:[%s6980_s21 + $0x48] sm:$0xff] }
 0x33d   : > { %v1218_v25 = vmul.f32 %v8041_v18, %v8041_v18  ;;  %v1216_v43 = vmul.f32 %v8049_v37, %v8049_v37  ;;  %vm1075_vm13 = vmor %vm1073_vm11, %vm1074_vm10  ;;  %v1168_v49 = vsel %vm407_vm0, %v8096_v11, 0.0 }
 0x33e   : > { %v1066_v35 = vsel %vm1065_vm9, %v6411_v31, %v1062_v39  ;;  %6414 = vrsqrt.f32 %v766_v7  ;;  %v1069_v1 = vmul.f32 %v8046_v40, %v1068_v0  ;;  %vm1083_vm14 = vweird.f32 %v766_v7 }
 0x33f   : > { %v1116_v16 = vmul.f32 %v1066_v35, %v7769_v62  ;;  %v1240_v44 = vsel %vm407_vm0, %v1218_v25, 0.0  ;;  %v1234_v47 = vsel %vm407_vm0, %v1216_v43, 0.0  ;;  %v1162_v25 = vsel %vm407_vm0, %v8099_v56, 0.0 }
 0x340   : > { %1157 = vadd.xlane.f32.xlu2 %v1156_v32  ;;  %1241 = vadd.xlane.f32.xlu1 %v1240_v44  ;;  %v1070_v51 = vmul.f32 0.5, %v1069_v1  ;;  %v1149_v30 = vpop.xlane.xlu0 %1148  ;;  %v8118_v1 = vld [vmem:[%s6980_s21 + $0x60] sm:$0xff]  ;;  %v8121_v44 = vld [vmem:[%s6980_s21 + $0x50] sm:$0xff] }
 0x341   : > { %v8063_v29 = vpack.c.bf16 %v1116_v16, %v1115_v50  ;;  %1235 = vadd.xlane.f32.xlu0 %v1234_v47  ;;  %v1143_v54 = vpop.xlane.xlu1 %1142  ;;  %v1187_v62 = vmul.f32 %v1149_v30, %v6995_v20 }
 0x342   : > { %v1185_v34 = vmul.f32 %v1143_v54, %v6995_v20  ;;  %v1071_v17 = vsub.f32 1.5, %v1070_v51  ;;  %v1165_v51 = vsel %vm407_vm0, %v8121_v44, 0.0  ;;  %v8140_v54 = vld [vmem:[%s6980_s21 + $0x68] sm:$0xff] }
 0x343   : > { %10789 = vst [vmem:[#allocation18_spill] sm:$0xff] %v8063_v29  ;;  %5728 = vmatmul.msk.bf16.gmra.mxu1 %vm407_vm0, %v8063_v29  ;;  %5760 = vmatmul.msk.bf16.gmra.mxu2 %vm407_vm0, %v8063_v29  ;;  %v8076_v28 = vsub.f32 %v7873_v8, %v1187_v62 }
 0x344   : > { %v6415_v31 = vpop.eup %6414  ;;  %v8079_v2 = vsub.f32 %v7884_v26, %v1185_v34  ;;  %v1072_v3 = vmul.f32 %v8046_v40, %v1071_v17  ;;  %v1174_v34 = vsel %vm407_vm0, %v8140_v54, 0.0 }
 0x345   : > { %v1078_v12 = vmul.f32 %v6415_v31, %v766_v7  ;;  %v1219_v33 = vmul.f32 %v8076_v28, %v8076_v28  ;;  %vm1084_vm12 = vweird.f32 %v6415_v31 }
 0x346   : > { %v1217_v22 = vmul.f32 %v8079_v2, %v8079_v2  ;;  %v1076_v39 = vsel %vm1075_vm13, %v8046_v40, %v1072_v3  ;;  %vm1085_vm15 = vmor %vm1083_vm14, %vm1084_vm12  ;;  %v6242_v3 = vld [vmem:[%s10691_s1 + $0x28] sm:$0xff] }
 0x347   : > { %v1079_v55 = vmul.f32 %v6415_v31, %v1078_v12  ;;  %v1243_v8 = vsel %vm407_vm0, %v1219_v33, 0.0 }
 0x348   : > { %1160 = vadd.xlane.f32.xlu2 %v1159_v6  ;;  %v1237_v26 = vsel %vm407_vm0, %v1217_v22, 0.0  ;;  %1244 = vadd.xlane.f32.xlu1 %v1243_v8 }
 0x349   : > { %v1080_v46 = vmul.f32 0.5, %v1079_v55  ;;  %1238 = vadd.xlane.f32.xlu0 %v1237_v26  ;;  %v1152_v21 = vpop.xlane.xlu1 %1151  ;;  %v6244_v55 = vld [vmem:[%s10691_s1 + $0x38] sm:$0xff]  ;;  %v6243_v26 = vld [vmem:[%s10691_s1 + $0x30] sm:$0xff] }
 0x34a   : > { %v1188_v61 = vmul.f32 %v1152_v21, %v6995_v20  ;;  %2618 = vmatpush.bf16.msrb.mxu2 %v6244_v55 }
 0x34b   : > { %v1081_v63 = vsub.f32 1.5, %v1080_v46 }
 0x34c   : > { %v8102_v13 = vsub.f32 %v7914_v5, %v1188_v61  ;;  %v1117_v5 = vmul.f32 %v1076_v39, %v7796_v41  ;;  %v8130_v41 = vpop.f32.mrf.mxu1  ;;  %v6241_v61 = vld [vmem:[%s10691_s1 + $0x20] sm:$0xff] }
 0x34d   : > { %v1082_v32 = vmul.f32 %v6415_v31, %v1081_v63 }
 0x34e   : > { %v1220_v35 = vmul.f32 %v8102_v13, %v8102_v13  ;;  %2619 = vmatpush.bf16.msrb.mxu2 %v6243_v26 }
 0x34f   : > { %v1086_v0 = vsel %vm1085_vm15, %v6415_v31, %v1082_v32 }
 0x350   : > { %v1118_v50 = vmul.f32 %v1086_v0, %v7839_v52  ;;  %v1246_v40 = vsel %vm407_vm0, %v1220_v35, 0.0  ;;  %1169 = vadd.xlane.f32.xlu1 %v1168_v49  ;;  %v1171_v52 = vsel %vm407_vm0, %v8118_v1, 0.0 }
 0x351   : > { %1163 = vadd.xlane.f32.xlu0 %v1162_v25  ;;  %v1155_v7 = vpop.xlane.xlu1 %1154  ;;  %1247 = vadd.xlane.f32.xlu2 %v1246_v40 }
 0x352   : > { %v8114_v16 = vpack.c.bf16 %v1118_v50, %v1117_v5  ;;  %v1189_v43 = vmul.f32 %v1155_v7, %v6995_v20  ;;  %2620 = vmatpush.bf16.msrb.mxu2 %v6242_v3 }
 0x354   : > { %10790 = vst [vmem:[#allocation19_spill] sm:$0xff] %v8114_v16  ;;  %v8124_v47 = vsub.f32 %v7938_v45, %v1189_v43  ;;  %5729 = vmatmul.msk.bf16.gmra.mxu1 %vm407_vm0, %v8114_v16  ;;  %5761 = vmatmul.msk.bf16.gmra.mxu2 %vm407_vm0, %v8114_v16  ;;  %v8142_v62 = vpop.f32.mrf.mxu1 }
 0x356   : > { %v1221_v30 = vmul.f32 %v8124_v47, %v8124_v47  ;;  %2621 = vmatpush.bf16.msrb.mxu2 %v6241_v61 }
 0x358   : > { %v1249_v45 = vsel %vm407_vm0, %v1221_v30, 0.0  ;;  %1172 = vadd.xlane.f32.xlu1 %v1171_v52 }
 0x359   : > { %1166 = vadd.xlane.f32.xlu0 %v1165_v51  ;;  %1250 = vadd.xlane.f32.xlu2 %v1249_v45 }
 0x35c   : > { %v8146_v31 = vpop.f32.mrf.mxu1 }
 0x361   : > { %1175 = vadd.xlane.f32.xlu2 %v1174_v34 }
 0x364   : > { %v8148_v6 = vpop.f32.mrf.mxu1 }
 0x36c   : > { %v8150_v17 = vpop.f32.mrf.mxu1 }
 0x374   : > { %v8152_v12 = vpop.f32.mrf.mxu1 }
 0x37c   : > { %v8154_v33 = vpop.f32.mrf.mxu1 }
 0x384   : > { %v8156_v22 = vpop.f32.mrf.mxu1 }
 0x38c   : > { %v8161_v8 = vpop.f32.mrf.mxu1 }
 0x394   : > { %v8173_v63 = vpop.f32.mrf.mxu1 }
 0x39c   : > { %v8184_v43 = vpop.f32.mrf.mxu1 }
 0x3ab   : > { %v1233_v46 = vpop.xlane.xlu2 %1232 }
 0x3ac   : > { %v1279_v21 = vmul.f32 %v1233_v46, %v6995_v20 }
 0x3ae   : > { %v1295_v39 = vadd.f32 1e-05, %v1279_v21 }
 0x3b0   : > { %6416 = vrsqrt.f32 %v1295_v39  ;;  %vm1317_vm3 = vweird.f32 %v1295_v39 }
 0x3b3   : > { %v1158_v32 = vpop.xlane.xlu2 %1157  ;;  %v1242_v25 = vpop.xlane.xlu1 %1241 }
 0x3b4   : > { %v1190_v49 = vmul.f32 %v1158_v32, %v6995_v20  ;;  %v1236_v35 = vpop.xlane.xlu0 %1235  ;;  %v1282_v0 = vmul.f32 %v1242_v25, %v6995_v20 }
 0x3b5   : > { %v1280_v50 = vmul.f32 %v1236_v35, %v6995_v20 }
 0x3b6   : > { %v8177_v5 = vpop.eup %6416  ;;  %v8181_v40 = vsub.f32 %v8037_v9, %v1190_v49  ;;  %v8188_v30 = vadd.f32 1e-05, %v1282_v0 }
 0x3b7   : > { %v1312_v7 = vmul.f32 %v8177_v5, %v1295_v39  ;;  %v1296_v52 = vadd.f32 1e-05, %v1280_v50  ;;  %vm1318_vm1 = vweird.f32 %v8177_v5 }
 0x3b8   : > { %v1222_v51 = vmul.f32 %v8181_v40, %v8181_v40  ;;  %vm8228_vm6 = vmor %vm1317_vm3, %vm1318_vm1  ;;  %vm1347_vm8 = vweird.f32 %v8188_v30 }
 0x3b9   : > { %v1313_v45 = vmul.f32 %v8177_v5, %v1312_v7  ;;  %6418 = vrsqrt.f32 %v1296_v52  ;;  %vm1327_vm4 = vweird.f32 %v1296_v52 }
 0x3ba   : > { %v1252_v34 = vsel %vm407_vm0, %v1222_v51, 0.0  ;;  %6420 = vrsqrt.f32 %v8188_v30 }
 0x3bb   : > { %v1161_v55 = vpop.xlane.xlu2 %1160  ;;  %1253 = vadd.xlane.f32.xlu0 %v1252_v34  ;;  %v1245_v3 = vpop.xlane.xlu1 %1244  ;;  %v1314_v46 = vmul.f32 0.5, %v1313_v45 }
 0x3bc   : > { %v1191_v9 = vmul.f32 %v1161_v55, %v6995_v20  ;;  %v1239_v26 = vpop.xlane.xlu0 %1238 }
 0x3bd   : > { %v1281_v21 = vmul.f32 %v1239_v26, %v6995_v20  ;;  %v1315_v0 = vsub.f32 1.5, %v1314_v46 }
 0x3be   : > { %v8196_v61 = vsub.f32 %v8067_v38, %v1191_v9  ;;  %v1283_v38 = vmul.f32 %v1245_v3, %v6995_v20 }
 0x3bf   : > { %v6419_v32 = vpop.eup %6418  ;;  %v8198_v49 = vadd.f32 1e-05, %v1281_v21  ;;  %v1316_v26 = vmul.f32 %v8177_v5, %v1315_v0 }
 0x3c0   : > { %v8200_v25 = vpop.f32.mrf.mxu1  ;;  %v1322_v35 = vmul.f32 %v6419_v32, %v1296_v52  ;;  %v8203_v50 = vpop.eup %6420  ;;  %v1223_v51 = vmul.f32 %v8196_v61, %v8196_v61  ;;  %vm1328_vm2 = vweird.f32 %v6419_v32  ;;  %v8234_v39 = vadd.f32 1e-05, %v1283_v38 }
 0x3c1   : > { %6422 = vrsqrt.f32 %v8198_v49  ;;  %v1342_v46 = vmul.f32 %v8203_v50, %v8188_v30  ;;  %vm1329_vm7 = vmor %vm1327_vm4, %vm1328_vm2  ;;  %vm1348_vm9 = vweird.f32 %v8203_v50  ;;  %vm1337_vm11 = vweird.f32 %v8198_v49 }
 0x3c2   : > { %v1323_v7 = vmul.f32 %v6419_v32, %v1322_v35  ;;  %v1255_v34 = vsel %vm407_vm0, %v1223_v51, 0.0  ;;  %vm8283_vm12 = vmor %vm1347_vm8, %vm1348_vm9  ;;  %vm1357_vm1 = vweird.f32 %v8234_v39 }
 0x3c3   : > { %v1170_v9 = vpop.xlane.xlu1 %1169  ;;  %1256 = vadd.xlane.f32.xlu0 %v1255_v34 }
 0x3c4   : > { %v1324_v45 = vmul.f32 0.5, %v1323_v7  ;;  %v1164_v55 = vpop.xlane.xlu0 %1163  ;;  %v1248_v35 = vpop.xlane.xlu2 %1247  ;;  %v1194_v16 = vmul.f32 %v1170_v9, %v6995_v20 }
 0x3c5   : > { %v1192_v21 = vmul.f32 %v1164_v55, %v6995_v20  ;;  %v1284_v7 = vmul.f32 %v1248_v35, %v6995_v20 }
 0x3c6   : > { %v1325_v29 = vsub.f32 1.5, %v1324_v45  ;;  %v8222_v0 = vsub.f32 %v8096_v11, %v1194_v16  ;;  %v1320_v11 = vsel %vm8228_vm6, %v8177_v5, %v1316_v26 }
 0x3c7   : > { %v8216_v3 = vpop.eup %6422  ;;  %v8219_v51 = vsub.f32 %v8099_v56, %v1192_v21  ;;  %v8236_v52 = vadd.f32 1e-05, %v1284_v7  ;;  %v1343_v56 = vmul.f32 %v8203_v50, %v1342_v46  ;;  %v1471_v46 = vmul.f32 %v1320_v11, %v8023_v58 }
 0x3c8   : > { %v8224_v34 = vpop.f32.mrf.mxu1  ;;  %v1326_v45 = vmul.f32 %v6419_v32, %v1325_v29  ;;  %v1332_v9 = vmul.f32 %v8216_v3, %v8198_v49  ;;  %v1226_v38 = vmul.f32 %v8222_v0, %v8222_v0  ;;  %vm1338_vm10 = vweird.f32 %v8216_v3 }
 0x3c9   : > { %6424 = vrsqrt.f32 %v8236_v52  ;;  %v1224_v29 = vmul.f32 %v8219_v51, %v8219_v51  ;;  %vm1339_vm13 = vmor %vm1337_vm11, %vm1338_vm10  ;;  %vm1367_vm14 = vweird.f32 %v8236_v52 }
 0x3ca   : > { %v1330_v16 = vsel %vm1329_vm7, %v6419_v32, %v1326_v45  ;;  %v1333_v21 = vmul.f32 %v8216_v3, %v1332_v9  ;;  %6426 = vrsqrt.f32 %v8234_v39  ;;  %v1344_v32 = vmul.f32 0.5, %v1343_v56 }
 0x3cb   : > { %v1472_v35 = vmul.f32 %v1330_v16, %v8049_v37  ;;  %v1173_v26 = vpop.xlane.xlu1 %1172  ;;  %v1258_v55 = vsel %vm407_vm0, %v1224_v29, 0.0  ;;  %v1264_v60 = vsel %vm407_vm0, %v1226_v38, 0.0 }
 0x3cc   : > { %v1334_v7 = vmul.f32 0.5, %v1333_v21  ;;  %v1167_v5 = vpop.xlane.xlu0 %1166  ;;  %v8253_v9 = vpop.xlane.xlu2 %1250  ;;  %1259 = vadd.xlane.f32.xlu1 %v1258_v55  ;;  %1265 = vadd.xlane.f32.xlu0 %v1264_v60  ;;  %v1195_v37 = vmul.f32 %v1173_v26, %v6995_v20  ;;  %v1345_v60 = vsub.f32 1.5, %v1344_v32 }
 0x3cd   : > { %v1193_v45 = vmul.f32 %v1167_v5, %v6995_v20  ;;  %v8257_v16 = vpack.c.bf16 %v1472_v35, %v1471_v46 }
 0x3ce   : > { %v1335_v21 = vsub.f32 1.5, %v1334_v7  ;;  %v8265_v11 = vsub.f32 %v8118_v1, %v1195_v37  ;;  %v1346_v7 = vmul.f32 %v8203_v50, %v1345_v60 }
 0x3cf   : > { %v8260_v23 = vsub.f32 %v8121_v44, %v1193_v45  ;;  %v8262_v58 = vpop.eup %6424  ;;  %5690 = vmatmul.msk.bf16.vlgmr.msra.gmra.mxu0 %vm407_vm0, %v8257_v16  ;;  %5815 = vmatmul.msk.bf16.vlgmr.msrb.gmra.mxu2 %vm407_vm0, %v8257_v16 }
 0x3d0   : > { %v6427_v29 = vpop.eup %6426  ;;  %v1336_v44 = vmul.f32 %v8216_v3, %v1335_v21  ;;  %v1362_v1 = vmul.f32 %v8262_v58, %v8236_v52  ;;  %v1227_v35 = vmul.f32 %v8265_v11, %v8265_v11  ;;  %v1350_v21 = vsel %vm8283_vm12, %v8203_v50, %v1346_v7 }
 0x3d1   : > { %v1800_v56 = vpop.f32.mrf.mxu1  ;;  %v1225_v38 = vmul.f32 %v8260_v23, %v8260_v23  ;;  %v1352_v5 = vmul.f32 %v6427_v29, %v8234_v39  ;;  %v1798_v50 = vadd.f32 %v7828_v15, %v8224_v34  ;;  %vm1368_vm15 = vweird.f32 %v8262_v58 }
 0x3d2   : > { %v1267_v32 = vsel %vm407_vm0, %v1227_v35, 0.0  ;;  %v1340_v49 = vsel %vm1339_vm13, %v8216_v3, %v1336_v44  ;;  %v1363_v45 = vmul.f32 %v8262_v58, %v1362_v1  ;;  %v1801_v35 = vadd.f32 %v7828_v15, %v1800_v56  ;;  %vm1369_vm3 = vmor %vm1367_vm14, %vm1368_vm15 }
 0x3d3   : > { %v1261_v26 = vsel %vm407_vm0, %v1225_v38, 0.0  ;;  %v1353_v60 = vmul.f32 %v6427_v29, %v1352_v5  ;;  %v1473_v3 = vmul.f32 %v1340_v49, %v8079_v2  ;;  %v1796_v2 = vadd.f32 %v7828_v15, %v8200_v25 }
 0x3d4   : > { %v1176_v46 = vpop.xlane.xlu2 %1175  ;;  %1262 = vadd.xlane.f32.xlu2 %v1261_v26  ;;  %1268 = vadd.xlane.f32.xlu1 %v1267_v32  ;;  %v1364_v44 = vmul.f32 0.5, %v1363_v45  ;;  %vm1358_vm2 = vweird.f32 %v6427_v29  ;;  %v1793_v25 = vadd.f32 %v7828_v15, %v8184_v43  ;;  %v1791_v52 = vadd.f32 %v7828_v15, %v8173_v63 }
 0x3d5   : > { %v1196_v55 = vmul.f32 %v1176_v46, %v6995_v20  ;;  %v1819_v34 = vpack.c.bf16 %v1798_v50, %v1796_v2  ;;  %vm1359_vm4 = vmor %vm1357_vm1, %vm1358_vm2  ;;  %v1771_v50 = vadd.f32 %v7828_v15, %v8142_v62 }
 0x3d6   : > { %v1365_v30 = vsub.f32 1.5, %v1364_v44  ;;  %v1778_v44 = vadd.f32 %v7828_v15, %v8150_v17  ;;  %v1768_v17 = vadd.f32 %v7828_v15, %v8130_v41  ;;  %v1285_v41 = vmul.f32 %v8253_v9, %v6995_v20 }
 0x3d7   : > { %v8294_v37 = vsub.f32 %v8140_v54, %v1196_v55  ;;  %v1474_v54 = vmul.f32 %v1350_v21, %v8041_v18  ;;  %v1354_v55 = vmul.f32 0.5, %v1353_v60  ;;  %v2030_v45 = vsel %vm1962_vm5, %v1819_v34, 0 }
 0x3d8   : > { %v1366_v5 = vmul.f32 %v8262_v58, %v1365_v30  ;;  %v1301_v62 = vadd.f32 1e-05, %v1285_v41 }
 0x3d9   : > { %v1802_v38 = vpop.f32.mrf.mxu1  ;;  %v1228_v46 = vmul.f32 %v8294_v37, %v8294_v37  ;;  %v8308_v7 = vpack.c.bf16 %v1474_v54, %v1473_v3  ;;  %v1355_v18 = vsub.f32 1.5, %v1354_v55  ;;  %v1776_v54 = vadd.f32 %v7828_v15, %v8148_v6 }
 0x3da   : > { %v1803_v26 = vadd.f32 %v7828_v15, %v1802_v38  ;;  %v1370_v21 = vsel %vm1369_vm3, %v8262_v58, %v1366_v5  ;;  %v1818_v38 = vpack.c.bf16 %v1793_v25, %v1791_v52  ;;  %v1786_v58 = vadd.f32 %v7828_v15, %v8156_v22 }
 0x3db   : > { %v1270_v1 = vsel %vm407_vm0, %v1228_v46, 0.0  ;;  %v1356_v49 = vmul.f32 %v6427_v29, %v1355_v18  ;;  %v1476_v39 = vmul.f32 %v1370_v21, %v8102_v13  ;;  %v8340_v13 = vpop.f32.mrf.mxu2  ;;  %v1773_v55 = vadd.f32 %v7828_v15, %v8146_v31 }
 0x3dc   : > { %v1820_v32 = vpack.c.bf16 %v1803_v26, %v1801_v35  ;;  %1271 = vadd.xlane.f32.xlu2 %v1270_v1  ;;  %v1788_v26 = vadd.f32 %v7828_v15, %v8161_v8  ;;  %v2027_v43 = vsel %vm1962_vm5, %v1818_v38, 0  ;;  %v1783_v8 = vadd.f32 %v7828_v15, %v8154_v33 }
 0x3dd   : > { %v1360_v60 = vsel %vm1359_vm4, %v6427_v29, %v1356_v49  ;;  %v1781_v29 = vadd.f32 %v7828_v15, %v8152_v12  ;;  %v1766_v6 = vadd.f32 %v7828_v15, %v8092_v14  ;;  %6428 = vrsqrt.f32 %v1301_v62 }
 0x3de   : > { %v2033_v56 = vsel %vm1962_vm5, %v1820_v32, 0  ;;  %v1475_v35 = vmul.f32 %v1360_v60, %v8076_v28  ;;  %v1817_v28 = vpack.c.bf16 %v1788_v26, %v1786_v58  ;;  %v1815_v32 = vpack.c.bf16 %v1778_v44, %v1776_v54 }
 0x3df   : > { %2084 = vmatpush.bf16.xpose.msrb.mxu0 %v2033_v56  ;;  %5816 = vmatmul.msk.bf16.gmra.mxu2 %vm407_vm0, %v8308_v7  ;;  %v1816_v3 = vpack.c.bf16 %v1783_v8, %v1781_v29  ;;  %v1814_v56 = vpack.c.bf16 %v1773_v55, %v1771_v50  ;;  %v1813_v18 = vpack.c.bf16 %v1768_v17, %v1766_v6  ;;  %vm1377_vm6 = vweird.f32 %v1301_v62 }
 0x3e0   : > { %5691 = vmatmul.msk.bf16.gmra.mxu0 %vm407_vm0, %v8308_v7  ;;  %v8331_v46 = vpack.c.bf16 %v1476_v39, %v1475_v35  ;;  %v2024_v63 = vsel %vm1962_vm5, %v1817_v28, 0  ;;  %v2018_v12 = vsel %vm1962_vm5, %v1815_v32, 0 }
 0x3e1   : > { %v2021_v1 = vsel %vm1962_vm5, %v1816_v3, 0  ;;  %v2015_v30 = vsel %vm1962_vm5, %v1814_v56, 0  ;;  %v2012_v31 = vsel %vm1962_vm5, %v1813_v18, 0 }
 0x3e3   : > { %v8347_v22 = vpop.f32.mrf.mxu2  ;;  %v6429_v15 = vpop.eup %6428 }
 0x3e4   : > { %vm1378_vm7 = vweird.f32 %v6429_v15 }
 0x3e5   : > { %vm8389_vm8 = vmor %vm1377_vm6, %vm1378_vm7 }
 0x3e7   : > { %2085 = vmatpush.bf16.xpose.msrb.mxu0 %v2030_v45 }
 0x3eb   : > { %v8354_v33 = vpop.f32.mrf.mxu2 }
 0x3ef   : > { %2086 = vmatpush.bf16.xpose.msrb.mxu0 %v2027_v43  ;;  %5817 = vmatmul.msk.bf16.gmra.mxu2 %vm407_vm0, %v8331_v46 }
 0x3f0   : > { %5692 = vmatmul.msk.bf16.gmra.mxu0 %vm407_vm0, %v8331_v46 }
 0x3f3   : > { %v8366_v2 = vpop.f32.mrf.mxu2 }
 0x3f7   : > { %2087 = vmatpush.bf16.xpose.msrb.mxu0 %v2024_v63 }
 0x3fb   : > { %v8369_v34 = vpop.f32.mrf.mxu2 }
 0x3ff   : > { %2088 = vmatpush.bf16.xpose.msrb.mxu0 %v2021_v1 }
 0x403   : > { %v8376_v5 = vpop.f32.mrf.mxu2 }
 0x407   : > { %2089 = vmatpush.bf16.xpose.msrb.mxu0 %v2018_v12 }
 0x40b   : > { %v8380_v14 = vpop.f32.mrf.mxu2 }
 0x40f   : > { %2090 = vmatpush.bf16.xpose.msrb.mxu0 %v2015_v30 }
 0x417   : > { %2091 = vmatpush.bf16.xpose.msrb.mxu0 %v2012_v31 }
 0x41f   : > { %2341 = vmatpush.bf16.msra.mxu0 %v7982_v36 }
 0x423   : > { %2342 = vmatpush.bf16.msra.mxu0 %v7986_v59  ;;  %v1372_v59 = vmul.f32 %v6429_v15, %v1301_v62 }
 0x427   : > { %2343 = vmatpush.bf16.msra.mxu0 %v7991_v57  ;;  %v1373_v57 = vmul.f32 %v6429_v15, %v1372_v59 }
 0x429   : > { %v1374_v25 = vmul.f32 0.5, %v1373_v57 }
 0x42b   : > { %2344 = vmatpush.bf16.msra.mxu0 %v7996_v42  ;;  %v8386_v42 = vpop.f32.mrf.mxu2 }
 0x42e   : > { %v1254_v36 = vpop.xlane.xlu0 %1253 }
 0x42f   : > { %2345 = vmatpush.bf16.msra.mxu0 %v8001_v48  ;;  %v1286_v49 = vmul.f32 %v1254_v36, %v6995_v20 }
 0x431   : > { %v1302_v9 = vadd.f32 1e-05, %v1286_v49 }
 0x433   : > { %2346 = vmatpush.bf16.msra.mxu0 %v8006_v24  ;;  %6430 = vrsqrt.f32 %v1302_v9  ;;  %v1375_v24 = vsub.f32 1.5, %v1374_v25  ;;  %v8393_v26 = vpop.f32.mrf.mxu2  ;;  %vm1387_vm10 = vweird.f32 %v1302_v9 }
 0x436   : > { %v1257_v45 = vpop.xlane.xlu0 %1256 }
 0x437   : > { %2347 = vmatpush.bf16.msra.mxu0 %v8012_v10  ;;  %v1287_v52 = vmul.f32 %v1257_v45, %v6995_v20  ;;  %v1376_v10 = vmul.f32 %v6429_v15, %v1375_v24 }
 0x439   : > { %v6431_v48 = vpop.eup %6430  ;;  %v1303_v39 = vadd.f32 1e-05, %v1287_v52  ;;  %v1380_v8 = vsel %vm8389_vm8, %v6429_v15, %v1376_v10 }
 0x43a   : > { %v1382_v21 = vmul.f32 %v6431_v48, %v1302_v9  ;;  %vm1388_vm9 = vweird.f32 %v6431_v48  ;;  %v1477_v55 = vmul.f32 %v1380_v8, %v8124_v47 }
 0x43b   : > { %2348 = vmatpush.bf16.msra.mxu0 %v8016_v4  ;;  %6432 = vrsqrt.f32 %v1303_v39  ;;  %vm1389_vm11 = vmor %vm1387_vm10, %vm1388_vm9  ;;  %v8411_v18 = vpop.f32.mrf.mxu2  ;;  %vm1397_vm12 = vweird.f32 %v1303_v39 }
 0x43c   : > { %v1383_v60 = vmul.f32 %v6431_v48, %v1382_v21 }
 0x43e   : > { %v1384_v38 = vmul.f32 0.5, %v1383_v60 }
 0x43f   : > { %v1266_v58 = vpop.xlane.xlu0 %1265  ;;  %v1260_v28 = vpop.xlane.xlu1 %1259 }
 0x440   : > { %v1385_v4 = vsub.f32 1.5, %v1384_v38  ;;  %v1290_v63 = vmul.f32 %v1266_v58, %v6995_v20  ;;  %v1288_v29 = vmul.f32 %v1260_v28, %v6995_v20 }
 0x441   : > { %v6433_v3 = vpop.eup %6432 }
 0x442   : > { %v1386_v43 = vmul.f32 %v6431_v48, %v1385_v4  ;;  %v1392_v1 = vmul.f32 %v6433_v3, %v1303_v39  ;;  %v1304_v54 = vadd.f32 1e-05, %v1288_v29  ;;  %v8399_v32 = vadd.f32 1e-05, %v1290_v63  ;;  %v8426_v39 = vld [vmem:[%s10692_s2] ss:$0 sm:$0xff] }
 0x443   : > { %vm1398_vm13 = vweird.f32 %v6433_v3  ;;  %v8428_v38 = vpop.f32.mrf.mxu2 }
 0x444   : > { %v1390_v44 = vsel %vm1389_vm11, %v6431_v48, %v1386_v43  ;;  %v1393_v50 = vmul.f32 %v6433_v3, %v1392_v1  ;;  %6434 = vrsqrt.f32 %v1304_v54  ;;  %vm8430_vm15 = vmor %vm1397_vm12, %vm1398_vm13  ;;  %vm1407_vm1 = vweird.f32 %v1304_v54 }
 0x445   : > { %v1478_v12 = vmul.f32 %v1390_v44, %v8181_v40  ;;  %6436 = vrsqrt.f32 %v8399_v32  ;;  %vm1427_vm3 = vweird.f32 %v8399_v32 }
 0x446   : > { %v1394_v30 = vmul.f32 0.5, %v1393_v50 }
 0x447   : > { %v8403_v56 = vpack.c.bf16 %v1478_v12, %v1477_v55  ;;  %v1263_v17 = vpop.xlane.xlu2 %1262  ;;  %v1269_v31 = vpop.xlane.xlu1 %1268 }
 0x448   : > { %v1289_v6 = vmul.f32 %v1263_v17, %v6995_v20  ;;  %v1395_v62 = vsub.f32 1.5, %v1394_v30  ;;  %v1291_v49 = vmul.f32 %v1269_v31, %v6995_v20 }
 0x449   : > { %5693 = vmatmul.msk.bf16.gmra.mxu0 %vm407_vm0, %v8403_v56  ;;  %5818 = vmatmul.msk.bf16.gmra.mxu2 %vm407_vm0, %v8403_v56 }
 0x44a   : > { %v1305_v47 = vadd.f32 1e-05, %v1289_v6  ;;  %v6435_v40 = vpop.eup %6434  ;;  %v1396_v57 = vmul.f32 %v6433_v3, %v1395_v62  ;;  %v8419_v24 = vadd.f32 1e-05, %v1291_v49 }
 0x44b   : > { %v1402_v15 = vmul.f32 %v6435_v40, %v1304_v54  ;;  %v8413_v36 = vpop.eup %6436  ;;  %vm1408_vm14 = vweird.f32 %v6435_v40 }
 0x44c   : > { %v1584_v41 = vpop.f32.mrf.mxu0  ;;  %6438 = vrsqrt.f32 %v1305_v47  ;;  %v1422_v25 = vmul.f32 %v8413_v36, %v8399_v32  ;;  %v1400_v4 = vsel %vm8430_vm15, %v6433_v3, %v1396_v57  ;;  %vm1409_vm2 = vmor %vm1407_vm1, %vm1408_vm14  ;;  %vm1428_vm4 = vweird.f32 %v8413_v36 }
 0x44d   : > { %v1403_v59 = vmul.f32 %v6435_v40, %v1402_v15  ;;  %v1585_v8 = vadd.f32 %v8426_v39, %v1584_v41  ;;  %v1479_v3 = vmul.f32 %v1400_v4, %v8196_v61  ;;  %v8453_v61 = vpop.f32.mrf.mxu2  ;;  %vm1417_vm6 = vweird.f32 %v1305_v47  ;;  %vm1429_vm8 = vmor %vm1427_vm3, %vm1428_vm4 }
 0x44e   : > { %v1423_v43 = vmul.f32 %v8413_v36, %v1422_v25  ;;  %vm1437_vm12 = vweird.f32 %v8419_v24 }
 0x44f   : > { %v1272_v9 = vpop.xlane.xlu2 %1271  ;;  %v1404_v48 = vmul.f32 0.5, %v1403_v59 }
 0x450   : > { %v1292_v45 = vmul.f32 %v1272_v9, %v6995_v20  ;;  %v1424_v12 = vmul.f32 0.5, %v1423_v43 }
 0x451   : > { %v1405_v52 = vsub.f32 1.5, %v1404_v48 }
 0x452   : > { %v6439_v21 = vpop.eup %6438  ;;  %v8421_v60 = vadd.f32 1e-05, %v1292_v45 }
 0x453   : > { %v1412_v35 = vmul.f32 %v6439_v21, %v1305_v47  ;;  %v1406_v58 = vmul.f32 %v6435_v40, %v1405_v52  ;;  %vm1418_vm7 = vweird.f32 %v6439_v21 }
 0x454   : > { %v1586_v20 = vpop.f32.mrf.mxu0  ;;  %6440 = vrsqrt.f32 %v8421_v60  ;;  %vm1419_vm9 = vmor %vm1417_vm6, %vm1418_vm7  ;;  %vm1447_vm10 = vweird.f32 %v8421_v60 }
 0x455   : > { %v1413_v28 = vmul.f32 %v6439_v21, %v1412_v35  ;;  %v1587_v63 = vadd.f32 %v8426_v39, %v1586_v20  ;;  %v1410_v29 = vsel %vm1409_vm2, %v6435_v40, %v1406_v58  ;;  %6442 = vrsqrt.f32 %v8419_v24  ;;  %v1936_v47 = vpop.f32.mrf.mxu2 }
 0x456   : > { %v1480_v55 = vmul.f32 %v1410_v29, %v8219_v51  ;;  %v1425_v40 = vsub.f32 1.5, %v1424_v12 }
 0x457   : > { %v1414_v44 = vmul.f32 0.5, %v1413_v28  ;;  %v8441_v1 = vpack.c.bf16 %v1587_v63, %v1585_v8 }
 0x458   : > { %v8447_v54 = vpack.c.bf16 %v1480_v55, %v1479_v3  ;;  %v1426_v41 = vmul.f32 %v8413_v36, %v1425_v40 }
 0x459   : > { %5762 = vmatmul.msk.bf16.vlgmr.msra.gmra.mxu3 %vm1962_vm5, %v8441_v1  ;;  %v1415_v50 = vsub.f32 1.5, %v1414_v44 }
 0x45a   : > { %v6441_v17 = vpop.eup %6440  ;;  %5694 = vmatmul.msk.bf16.gmra.mxu0 %vm407_vm0, %v8447_v54  ;;  %5819 = vmatmul.msk.bf16.gmra.mxu2 %vm407_vm0, %v8447_v54  ;;  %v1430_v9 = vsel %vm1429_vm8, %v8413_v36, %v1426_v41 }
 0x45b   : > { %v6443_v6 = vpop.eup %6442  ;;  %v1416_v51 = vmul.f32 %v6439_v21, %v1415_v50  ;;  %v1442_v31 = vmul.f32 %v6441_v17, %v8421_v60  ;;  %v1482_v10 = vmul.f32 %v1430_v9, %v8222_v0  ;;  %vm1448_vm11 = vweird.f32 %v6441_v17  ;;  %v6828_v50 = vld [vmem:[%s10696_s6] ss:$0 sm:$0xff] }
 0x45c   : > { %v1432_v62 = vmul.f32 %v6443_v6, %v8419_v24  ;;  %vm1438_vm13 = vweird.f32 %v6443_v6  ;;  %vm1449_vm14 = vmor %vm1447_vm10, %vm1448_vm11  ;;  %v1934_v40 = vadd.f32 %v6828_v50, %v8453_v61  ;;  %v1929_v41 = vadd.f32 %v6828_v50, %v8411_v18 }
 0x45d   : > { %v1589_v30 = vpop.f32.mrf.mxu0  ;;  %v1420_v15 = vsel %vm1419_vm9, %v6439_v21, %v1416_v51  ;;  %v1443_v59 = vmul.f32 %v6441_v17, %v1442_v31  ;;  %v1938_v0 = vpop.f32.mrf.mxu2  ;;  %vm1439_vm15 = vmor %vm1437_vm12, %vm1438_vm13  ;;  %v1932_v31 = vadd.f32 %v6828_v50, %v8428_v38  ;;  %v1919_v9 = vadd.f32 %v6828_v50, %v8376_v5 }
 0x45e   : > { %v1433_v57 = vmul.f32 %v6443_v6, %v1432_v62  ;;  %v1590_v32 = vadd.f32 %v8426_v39, %v1589_v30  ;;  %v1481_v48 = vmul.f32 %v1420_v15, %v8260_v23  ;;  %v1939_v30 = vadd.f32 %v6828_v50, %v1938_v0 }
 0x45f   : > { %v1444_v45 = vmul.f32 0.5, %v1443_v59  ;;  %v1959_v62 = vpack.c.bf16 %v1934_v40, %v1932_v31  ;;  %v1927_v15 = vadd.f32 %v6828_v50, %v8393_v26  ;;  %v1924_v59 = vadd.f32 %v6828_v50, %v8386_v42 }
 0x460   : > { %v1434_v35 = vmul.f32 0.5, %v1433_v57  ;;  %v8466_v21 = vpack.c.bf16 %v1482_v10, %v1481_v48  ;;  %v1917_v38 = vadd.f32 %v6828_v50, %v8369_v34  ;;  %v1914_v18 = vadd.f32 %v6828_v50, %v8366_v2 }
 0x461   : > { %v1445_v20 = vsub.f32 1.5, %v1444_v45  ;;  %v1912_v26 = vadd.f32 %v6828_v50, %v8354_v33  ;;  %v1909_v42 = vadd.f32 %v6828_v50, %v8347_v22 }
 0x462   : > { %v1435_v4 = vsub.f32 1.5, %v1434_v35  ;;  %v1956_v61 = vpack.c.bf16 %v1919_v9, %v1917_v38 }
 0x463   : > { %v1446_v23 = vmul.f32 %v6441_v17, %v1445_v20 }
 0x464   : > { %v1436_v43 = vmul.f32 %v6443_v6, %v1435_v4 }
 0x465   : > { %v1591_v49 = vpop.f32.mrf.mxu0  ;;  %v1450_v58 = vsel %vm1449_vm14, %v6441_v17, %v1446_v23  ;;  %v1941_v55 = vpop.f32.mrf.mxu2 }
 0x466   : > { %v1592_v25 = vadd.f32 %v8426_v39, %v1591_v49  ;;  %v1440_v8 = vsel %vm1439_vm15, %v6443_v6, %v1436_v43  ;;  %v1484_v44 = vmul.f32 %v1450_v58, %v8294_v37  ;;  %v1942_v17 = vadd.f32 %v6828_v50, %v1941_v55 }
 0x467   : > { %v1483_v60 = vmul.f32 %v1440_v8, %v8265_v11  ;;  %v1937_v6 = vadd.f32 %v6828_v50, %v1936_v47  ;;  %v1922_v49 = vadd.f32 %v6828_v50, %v8380_v14  ;;  %v1907_v14 = vadd.f32 %v6828_v50, %v8340_v13 }
 0x468   : > { %v1625_v52 = vpack.c.bf16 %v1592_v25, %v1590_v32  ;;  %v1955_v32 = vpack.c.bf16 %v1914_v18, %v1912_v26 }
 0x469   : > { %v8479_v24 = vpack.c.bf16 %v1484_v44, %v1483_v60  ;;  %v1960_v51 = vpack.c.bf16 %v1939_v30, %v1937_v6  ;;  %v1957_v57 = vpack.c.bf16 %v1924_v59, %v1922_v49  ;;  %v1954_v25 = vpack.c.bf16 %v1909_v42, %v1907_v14  ;;  %v10799_v60 = vld [vmem:[#allocation9_spill] sm:$0xff] }
 0x46a   : > { %5763 = vmatmul.msk.bf16.gmra.mxu3 %vm1962_vm5, %v1625_v52  ;;  %5695 = vmatmul.msk.bf16.gmra.mxu0 %vm407_vm0, %v8466_v21  ;;  %v1622_v44 = vadd.f32 %v8426_v39, %v7553_v19  ;;  %v1620_v55 = vadd.f32 %v8426_v39, %v10799_v60 }
 0x46b   : > { %5820 = vmatmul.msk.bf16.gmra.mxu2 %vm407_vm0, %v8466_v21 }
 0x46d   : > { %v1594_v36 = vpop.f32.mrf.mxu0  ;;  %v1943_v12 = vpop.f32.mrf.mxu2 }
 0x46e   : > { %v1595_v63 = vadd.f32 %v8426_v39, %v1594_v36  ;;  %v1944_v37 = vadd.f32 %v6828_v50, %v1943_v12  ;;  %v1631_v50 = vpack.c.bf16 %v1622_v44, %v1620_v55 }
 0x470   : > { %v1961_v11 = vpack.c.bf16 %v1944_v37, %v1942_v17 }
 0x475   : > { %v1596_v28 = vpop.f32.mrf.mxu0 }
 0x476   : > { %v1597_v29 = vadd.f32 %v8426_v39, %v1596_v28 }
 0x478   : > { %v1626_v3 = vpack.c.bf16 %v1597_v29, %v1595_v63 }
 0x47a   : > { %5764 = vmatmul.msk.bf16.gmra.mxu3 %vm1962_vm5, %v1626_v3  ;;  %5696 = vmatmul.msk.bf16.gmra.mxu0 %vm407_vm0, %v8479_v24 }
 0x47b   : > { %5821 = vmatmul.msk.bf16.gmra.mxu2 %vm407_vm0, %v8479_v24 }
 0x48a   : > { %5770 = vmatmul.msk.bf16.vlgmr.msrb.gmra.mxu0 %vm1962_vm5, %v8441_v1  ;;  %v1958_v1 = vpack.c.bf16 %v1929_v41, %v1927_v15 }
 0x48b   : > { %5822 = vmatmul.msk.bf16.gmra.mxu2 %vm407_vm0, %v7213_v53  ;;  %2390 = vmatpush.bf16.msrb.mxu0 %v1961_v11 }
 0x48f   : > { %2391 = vmatpush.bf16.msrb.mxu0 %v1960_v51 }
 0x493   : > { %2392 = vmatpush.bf16.msrb.mxu0 %v1959_v62 }
 0x497   : > { %2393 = vmatpush.bf16.msrb.mxu0 %v1958_v1 }
 0x49a   : > { %5771 = vmatmul.msk.bf16.gmra.mxu0 %vm1962_vm5, %v1625_v52 }
 0x49b   : > { %2394 = vmatpush.bf16.msrb.mxu0 %v1957_v57 }
 0x49f   : > { %2395 = vmatpush.bf16.msrb.mxu0 %v1956_v61 }
 0x4a3   : > { %2396 = vmatpush.bf16.msrb.mxu0 %v1955_v32 }
 0x4a7   : > { %2397 = vmatpush.bf16.msrb.mxu0 %v1954_v25 }
 0x4aa   : > { %5772 = vmatmul.msk.bf16.gmra.mxu0 %vm1962_vm5, %v1626_v3 }
 0x4c6   : > { %v1599_v5 = vpop.f32.mrf.mxu0 }
 0x4c7   : > { %v1600_v34 = vadd.f32 %v8426_v39, %v1599_v5 }
 0x4ce   : > { %v1601_v47 = vpop.f32.mrf.mxu0 }
 0x4cf   : > { %v1602_v2 = vadd.f32 %v8426_v39, %v1601_v47 }
 0x4d1   : > { %v1627_v48 = vpack.c.bf16 %v1602_v2, %v1600_v34 }
 0x4d3   : > { %5765 = vmatmul.msk.bf16.gmra.mxu3 %vm1962_vm5, %v1627_v48  ;;  %5773 = vmatmul.msk.bf16.gmra.mxu0 %vm1962_vm5, %v1627_v48 }
 0x4d7   : > { %v1604_v22 = vpop.f32.mrf.mxu0 }
 0x4d8   : > { %v1605_v13 = vadd.f32 %v8426_v39, %v1604_v22 }
 0x4dc   : > { %v8518_v0 = vpop.f32.mrf.mxu3 }
 0x4df   : > { %v1606_v33 = vpop.f32.mrf.mxu0 }
 0x4e0   : > { %v1607_v45 = vadd.f32 %v8426_v39, %v1606_v33 }
 0x4e2   : > { %v1628_v52 = vpack.c.bf16 %v1607_v45, %v1605_v13 }
 0x4e4   : > { %5766 = vmatmul.msk.bf16.gmra.mxu3 %vm1962_vm5, %v1628_v52  ;;  %5774 = vmatmul.msk.bf16.gmra.mxu0 %vm1962_vm5, %v1628_v52  ;;  %v8524_v63 = vpop.f32.mrf.mxu3 }
 0x4e7   : > { %v1609_v10 = vpop.f32.mrf.mxu0 }
 0x4e8   : > { %v1610_v20 = vadd.f32 %v8426_v39, %v1609_v10 }
 0x4ed   : > { %v8534_v12 = vpop.f32.mrf.mxu3 }
 0x4ef   : > { %v1611_v35 = vpop.f32.mrf.mxu0 }
 0x4f0   : > { %v1612_v36 = vadd.f32 %v8426_v39, %v1611_v35 }
 0x4f2   : > { %v1629_v4 = vpack.c.bf16 %v1612_v36, %v1610_v20 }
 0x4f4   : > { %5767 = vmatmul.msk.bf16.gmra.mxu3 %vm1962_vm5, %v1629_v4  ;;  %5775 = vmatmul.msk.bf16.gmra.mxu0 %vm1962_vm5, %v1629_v4 }
 0x4f5   : > { %v8540_v17 = vpop.f32.mrf.mxu3 }
 0x4f7   : > { %v1614_v23 = vpop.f32.mrf.mxu0 }
 0x4f8   : > { %v1615_v58 = vadd.f32 %v8426_v39, %v1614_v23 }
 0x4fd   : > { %v2054_v11 = vpop.f32.mrf.mxu3 }
 0x4ff   : > { %v1616_v43 = vpop.f32.mrf.mxu0 }
 0x500   : > { %v1617_v28 = vadd.f32 %v8426_v39, %v1616_v43 }
 0x502   : > { %v1630_v8 = vpack.c.bf16 %v1617_v28, %v1615_v58 }
 0x504   : > { %5768 = vmatmul.msk.bf16.gmra.mxu3 %vm1962_vm5, %v1630_v8  ;;  %5776 = vmatmul.msk.bf16.gmra.mxu0 %vm1962_vm5, %v1630_v8 }
 0x505   : > { %v2056_v40 = vpop.f32.mrf.mxu3 }
 0x507   : > { %v8526_v29 = vpop.f32.mrf.mxu0 }
 0x508   : > { %v2133_v52 = vmax.f32 %v8518_v0, %v8526_v29 }
 0x50f   : > { %v8530_v3 = vpop.f32.mrf.mxu0 }
 0x510   : > { %v2136_v43 = vmax.f32 %v8524_v63, %v8530_v3 }
 0x514   : > { %5769 = vmatmul.msk.bf16.gmra.mxu3 %vm1962_vm5, %v1631_v50  ;;  %5777 = vmatmul.msk.bf16.gmra.mxu0 %vm1962_vm5, %v1631_v50 }
 0x517   : > { %v8538_v37 = vpop.f32.mrf.mxu0 }
 0x51f   : > { %v8542_v30 = vpop.f32.mrf.mxu0 }
 0x520   : > { %v2142_v8 = vmax.f32 %v8540_v17, %v8542_v30 }
 0x527   : > { %v2103_v19 = vpop.f32.mrf.mxu0 }
 0x528   : > { %v2145_v6 = vmax.f32 %v2054_v11, %v2103_v19 }
 0x52a   : > { %2146 = vmax.xlane.f32.xlu0 %v2145_v6 }
 0x52f   : > { %v2105_v51 = vpop.f32.mrf.mxu0 }
 0x530   : > { %v2148_v39 = vmax.f32 %v2056_v40, %v2105_v51 }
 0x532   : > { %2149 = vmax.xlane.f32.xlu1 %v2148_v39 }
 0x550   : > { %v8544_v31 = vpop.f32.mrf.mxu0 }
 0x556   : > { %v8546_v41 = vpop.f32.mrf.mxu3 }
 0x557   : > { %v2151_v62 = vmax.f32 %v8546_v41, %v8544_v31 }
 0x558   : > { %v8550_v15 = vpop.f32.mrf.mxu0 }
 0x559   : > { %2152 = vmax.xlane.f32.xlu2 %v2151_v62  ;;  %v2139_v62 = vmax.f32 %v8534_v12, %v8538_v37 }
 0x55e   : > { %v8552_v59 = vpop.f32.mrf.mxu3 }
 0x55f   : > { %v2154_v1 = vmax.f32 %v8552_v59, %v8550_v15 }
 0x561   : > { %2155 = vmax.xlane.f32.xlu0 %v2154_v1  ;;  %v8556_v49 = vpop.f32.mrf.mxu0 }
 0x567   : > { %v8558_v9 = vpop.f32.mrf.mxu3 }
 0x568   : > { %v2157_v57 = vmax.f32 %v8558_v9, %v8556_v49 }
 0x569   : > { %v8562_v38 = vpop.f32.mrf.mxu0 }
 0x56a   : > { %2158 = vmax.xlane.f32.xlu1 %v2157_v57 }
 0x56f   : > { %v8564_v18 = vpop.f32.mrf.mxu3 }
 0x570   : > { %v2160_v61 = vmax.f32 %v8564_v18, %v8562_v38 }
 0x571   : > { %v8568_v26 = vpop.f32.mrf.mxu0 }
 0x572   : > { %2161 = vmax.xlane.f32.xlu2 %v2160_v61 }
 0x577   : > { %v8570_v42 = vpop.f32.mrf.mxu3 }
 0x578   : > { %v2163_v32 = vmax.f32 %v8570_v42, %v8568_v26 }
 0x579   : > { %v8574_v14 = vpop.f32.mrf.mxu0 }
 0x57a   : > { %2164 = vmax.xlane.f32.xlu0 %v2163_v32 }
 0x57f   : > { %v8576_v25 = vpop.f32.mrf.mxu3 }
 0x580   : > { %v2166_v5 = vmax.f32 %v8576_v25, %v8574_v14 }
 0x581   : > { %v8580_v47 = vpop.f32.mrf.mxu0 }
 0x582   : > { %2167 = vmax.xlane.f32.xlu1 %v2166_v5 }
 0x587   : > { %v8582_v34 = vpop.f32.mrf.mxu3 }
 0x588   : > { %v2169_v2 = vmax.f32 %v8582_v34, %v8580_v47 }
 0x589   : > { %v8586_v48 = vpop.f32.mrf.mxu0 }
 0x58a   : > { %2170 = vmax.xlane.f32.xlu2 %v2169_v2 }
 0x58f   : > { %v8588_v22 = vpop.f32.mrf.mxu3 }
 0x590   : > { %v2172_v33 = vmax.f32 %v8588_v22, %v8586_v48 }
 0x591   : > { %v8592_v13 = vpop.f32.mrf.mxu0 }
 0x592   : > { %2173 = vmax.xlane.f32.xlu0 %v2172_v33 }
 0x597   : > { %v8594_v45 = vpop.f32.mrf.mxu3 }
 0x598   : > { %v2175_v10 = vmax.f32 %v8594_v45, %v8592_v13 }
 0x599   : > { %v8600_v4 = vpop.f32.mrf.mxu0 }
 0x59a   : > { %2134 = vmax.xlane.f32.xlu0 %v2133_v52  ;;  %2176 = vmax.xlane.f32.xlu1 %v2175_v10 }
 0x59d   : > { %v2147_v35 = vpop.xlane.xlu0 %2146 }
 0x59e   : > { %v2189_v20 = vsub.f32 %v2054_v11, %v2147_v35  ;;  %v2190_v36 = vsub.f32 %v2103_v19, %v2147_v35 }
 0x59f   : > { %v8602_v23 = vpop.f32.mrf.mxu3 }
 0x5a0   : > { %v2229_v58 = vmul.f32 1.442695, %v2189_v20  ;;  %v2231_v28 = vmul.f32 1.442695, %v2190_v36  ;;  %v2178_v44 = vmax.f32 %v8602_v23, %v8600_v4 }
 0x5a2   : > { %6444 = vpow2.f32 %v2229_v58  ;;  %2143 = vmax.xlane.f32.xlu0 %v2142_v8  ;;  %2137 = vmax.xlane.f32.xlu1 %v2136_v43 }
 0x5a3   : > { %6446 = vpow2.f32 %v2231_v28  ;;  %2179 = vmax.xlane.f32.xlu2 %v2178_v44 }
 0x5a5   : > { %v2150_v60 = vpop.xlane.xlu1 %2149 }
 0x5a6   : > { %v2191_v55 = vsub.f32 %v2056_v40, %v2150_v60  ;;  %v2192_v50 = vsub.f32 %v2105_v51, %v2150_v60 }
 0x5a8   : > { %v6445_v11 = vpop.eup %6444  ;;  %v2233_v19 = vmul.f32 1.442695, %v2191_v55  ;;  %v2235_v6 = vmul.f32 1.442695, %v2192_v50 }
 0x5a9   : > { %v8610_v39 = vpop.eup %6446 }
 0x5aa   : > { %6448 = vpow2.f32 %v2233_v19  ;;  %v8615_v1 = vadd.f32 %v8610_v39, %v6445_v11 }
 0x5ab   : > { %6450 = vpow2.f32 %v2235_v6  ;;  %2140 = vmax.xlane.f32.xlu2 %v2139_v62 }
 0x5b0   : > { %v6449_v57 = vpop.eup %6448 }
 0x5b1   : > { %v8617_v61 = vpop.eup %6450  ;;  %v2329_v32 = vpack.c.bf16 %v6449_v57, %v6445_v11 }
 0x5b2   : > { %v8620_v40 = vadd.f32 %v8617_v61, %v6449_v57  ;;  %v2330_v51 = vpack.c.bf16 %v8617_v61, %v8610_v39  ;;  %v10805_v61 = vld [vmem:[#allocation8_spill] sm:$0xff] }
 0x5b3   : > { %2359 = vmatmul.bf16.vlgmr.msrb.gmra.mxu3 %v2329_v32 }
 0x5cc   : > { %v2153_v5 = vpop.xlane.xlu2 %2152 }
 0x5cd   : > { %v2193_v2 = vsub.f32 %v8546_v41, %v2153_v5  ;;  %v2194_v33 = vsub.f32 %v8544_v31, %v2153_v5 }
 0x5cf   : > { %v2237_v52 = vmul.f32 1.442695, %v2193_v2  ;;  %v2239_v10 = vmul.f32 1.442695, %v2194_v33 }
 0x5d1   : > { %6452 = vpow2.f32 %v2237_v52 }
 0x5d2   : > { %6454 = vpow2.f32 %v2239_v10 }
 0x5d4   : > { %v2156_v35 = vpop.xlane.xlu0 %2155 }
 0x5d5   : > { %v2195_v20 = vsub.f32 %v8552_v59, %v2156_v35  ;;  %v2196_v36 = vsub.f32 %v8550_v15, %v2156_v35 }
 0x5d7   : > { %v6453_v43 = vpop.eup %6452  ;;  %v2241_v58 = vmul.f32 1.442695, %v2195_v20  ;;  %v2243_v28 = vmul.f32 1.442695, %v2196_v36 }
 0x5d8   : > { %v8628_v8 = vpop.eup %6454 }
 0x5d9   : > { %6456 = vpow2.f32 %v2241_v58  ;;  %v8631_v44 = vadd.f32 %v8628_v8, %v6453_v43 }
 0x5da   : > { %6458 = vpow2.f32 %v2243_v28 }
 0x5dd   : > { %v2159_v60 = vpop.xlane.xlu1 %2158 }
 0x5de   : > { %v2197_v50 = vsub.f32 %v8558_v9, %v2159_v60  ;;  %v2198_v59 = vsub.f32 %v8556_v49, %v2159_v60  ;;  %v6248_v60 = vld [vmem:[%s10693_s3 + $0x38] sm:$0xff] }
 0x5df   : > { %v6457_v31 = vpop.eup %6456  ;;  %2713 = vmatpush.bf16.msra.mxu3 %v6248_v60 }
 0x5e0   : > { %v8633_v41 = vpop.eup %6458  ;;  %v2331_v55 = vpack.c.bf16 %v6457_v31, %v6453_v43  ;;  %v2245_v19 = vmul.f32 1.442695, %v2197_v50  ;;  %v2247_v6 = vmul.f32 1.442695, %v2198_v59 }
 0x5e1   : > { %v8638_v15 = vadd.f32 %v8633_v41, %v6457_v31  ;;  %v2332_v11 = vpack.c.bf16 %v8633_v41, %v8628_v8  ;;  %v10806_v41 = vld [vmem:[#allocation10_spill] sm:$0xff] }
 0x5e2   : > { %2364 = vmatmul.bf16.gmra.mxu3 %v2331_v55  ;;  %6460 = vpow2.f32 %v2245_v19 }
 0x5e3   : > { %6462 = vpow2.f32 %v2247_v6 }
 0x5e5   : > { %v2162_v62 = vpop.xlane.xlu2 %2161 }
 0x5e6   : > { %v2199_v57 = vsub.f32 %v8564_v18, %v2162_v62  ;;  %v2200_v32 = vsub.f32 %v8562_v38, %v2162_v62 }
 0x5e8   : > { %v6461_v5 = vpop.eup %6460  ;;  %v2249_v9 = vmul.f32 1.442695, %v2199_v57  ;;  %v2251_v2 = vmul.f32 1.442695, %v2200_v32 }
 0x5e9   : > { %v8644_v49 = vpop.eup %6462 }
 0x5ea   : > { %6464 = vpow2.f32 %v2249_v9  ;;  %v8647_v33 = vadd.f32 %v8644_v49, %v6461_v5 }
 0x5eb   : > { %6466 = vpow2.f32 %v2251_v2 }
 0x5ed   : > { %v2165_v52 = vpop.xlane.xlu0 %2164 }
 0x5ee   : > { %v2201_v35 = vsub.f32 %v8570_v42, %v2165_v52  ;;  %v2202_v18 = vsub.f32 %v8568_v26, %v2165_v52 }
 0x5f0   : > { %v6465_v10 = vpop.eup %6464  ;;  %v2253_v58 = vmul.f32 1.442695, %v2201_v35  ;;  %v2255_v28 = vmul.f32 1.442695, %v2202_v18 }
 0x5f1   : > { %v8650_v20 = vpop.eup %6466  ;;  %v2333_v36 = vpack.c.bf16 %v6465_v10, %v6461_v5 }
 0x5f2   : > { %v8654_v38 = vadd.f32 %v8650_v20, %v6465_v10  ;;  %v2334_v43 = vpack.c.bf16 %v8650_v20, %v8644_v49  ;;  %6468 = vpow2.f32 %v2253_v58  ;;  %v6251_v49 = vld [vmem:[%s10695_s5 + $0x30] sm:$0xff]  ;;  %v6240_v20 = vld [vmem:[%s10697_s7] sm:$0xff] }
 0x5f3   : > { %2369 = vmatmul.bf16.gmra.mxu3 %v2333_v36  ;;  %6470 = vpow2.f32 %v2255_v28  ;;  %2518 = vmatpush.bf16.msra.mxu1 %v6240_v20 }
 0x5f5   : > { %v2168_v31 = vpop.xlane.xlu1 %2167 }
 0x5f6   : > { %v2203_v42 = vsub.f32 %v8576_v25, %v2168_v31  ;;  %v2204_v55 = vsub.f32 %v8574_v14, %v2168_v31 }
 0x5f8   : > { %v2257_v26 = vmul.f32 1.442695, %v2203_v42  ;;  %v2259_v50 = vmul.f32 1.442695, %v2204_v55  ;;  %v8663_v19 = vpop.eup %6468 }
 0x5f9   : > { %v8665_v6 = vpop.eup %6470 }
 0x5fa   : > { %6472 = vpow2.f32 %v2257_v26 }
 0x5fb   : > { %6474 = vpow2.f32 %v2259_v50 }
 0x5fd   : > { %v2171_v59 = vpop.xlane.xlu2 %2170 }
 0x5fe   : > { %v2205_v57 = vsub.f32 %v8582_v34, %v2171_v59  ;;  %v2206_v25 = vsub.f32 %v8580_v47, %v2171_v59  ;;  %v6247_v47 = vld [vmem:[%s10693_s3 + $0x30] sm:$0xff] }
 0x5ff   : > { %2714 = vmatpush.bf16.msra.mxu3 %v6247_v47 }
 0x600   : > { %v6473_v62 = vpop.eup %6472  ;;  %v2261_v2 = vmul.f32 1.442695, %v2205_v57  ;;  %v2263_v52 = vmul.f32 1.442695, %v2206_v25 }
 0x601   : > { %v8668_v32 = vpop.eup %6474  ;;  %v2335_v14 = vpack.c.bf16 %v6473_v62, %v8663_v19 }
 0x602   : > { %v8673_v5 = vadd.f32 %v8668_v32, %v6473_v62  ;;  %v2336_v9 = vpack.c.bf16 %v8668_v32, %v8665_v6  ;;  %6476 = vpow2.f32 %v2261_v2  ;;  %v6245_v62 = vld [vmem:[%s10693_s3 + $0x20] sm:$0xff] }
 0x603   : > { %2374 = vmatmul.bf16.gmra.mxu3 %v2335_v14  ;;  %6478 = vpow2.f32 %v2263_v52 }
 0x605   : > { %v2174_v10 = vpop.xlane.xlu0 %2173 }
 0x606   : > { %v2207_v35 = vsub.f32 %v8588_v22, %v2174_v10  ;;  %v2208_v34 = vsub.f32 %v8586_v48, %v2174_v10  ;;  %v6246_v48 = vld [vmem:[%s10693_s3 + $0x28] sm:$0xff] }
 0x607   : > { %2715 = vmatpush.bf16.msra.mxu3 %v6246_v48 }
 0x608   : > { %v2265_v18 = vmul.f32 1.442695, %v2207_v35  ;;  %v2267_v36 = vmul.f32 1.442695, %v2208_v34  ;;  %v8682_v31 = vpop.eup %6476 }
 0x609   : > { %v8689_v42 = vpop.eup %6478 }
 0x60a   : > { %6480 = vpow2.f32 %v2265_v18 }
 0x60b   : > { %6482 = vpow2.f32 %v2267_v36  ;;  %2716 = vmatpush.bf16.msra.mxu3 %v6245_v62 }
 0x60d   : > { %v2135_v58 = vpop.xlane.xlu0 %2134  ;;  %v2177_v28 = vpop.xlane.xlu1 %2176 }
 0x60e   : > { %v2181_v60 = vsub.f32 %v8518_v0, %v2135_v58  ;;  %v2182_v22 = vsub.f32 %v8526_v29, %v2135_v58  ;;  %v2209_v59 = vsub.f32 %v8594_v45, %v2177_v28  ;;  %v2210_v29 = vsub.f32 %v8592_v13, %v2177_v28 }
 0x610   : > { %v8691_v55 = vpop.eup %6480  ;;  %v2213_v26 = vmul.f32 1.442695, %v2181_v60  ;;  %v2215_v50 = vmul.f32 1.442695, %v2182_v22  ;;  %v2269_v14 = vmul.f32 1.442695, %v2209_v59 }
 0x611   : > { %v8697_v0 = vpop.eup %6482  ;;  %v2337_v57 = vpack.c.bf16 %v8691_v55, %v8682_v31  ;;  %v2271_v45 = vmul.f32 1.442695, %v2210_v29 }
 0x612   : > { %6484 = vpow2.f32 %v2213_v26  ;;  %v2338_v25 = vpack.c.bf16 %v8697_v0, %v8689_v42 }
 0x613   : > { %6486 = vpow2.f32 %v2215_v50  ;;  %2379 = vmatmul.bf16.gmra.mxu3 %v2337_v57 }
 0x614   : > { %6488 = vpow2.f32 %v2269_v14 }
 0x615   : > { %v2144_v2 = vpop.xlane.xlu0 %2143  ;;  %v2138_v52 = vpop.xlane.xlu1 %2137  ;;  %6490 = vpow2.f32 %v2271_v45 }
 0x616   : > { %v2187_v10 = vsub.f32 %v8540_v17, %v2144_v2  ;;  %v2188_v35 = vsub.f32 %v8542_v30, %v2144_v2  ;;  %v2183_v13 = vsub.f32 %v8524_v63, %v2138_v52  ;;  %v2184_v34 = vsub.f32 %v8530_v3, %v2138_v52  ;;  %v2180_v47 = vpop.xlane.xlu2 %2179 }
 0x617   : > { %v2211_v18 = vsub.f32 %v8602_v23, %v2180_v47  ;;  %v2212_v36 = vsub.f32 %v8600_v4, %v2180_v47 }
 0x618   : > { %v6485_v58 = vpop.eup %6484  ;;  %v2225_v28 = vmul.f32 1.442695, %v2187_v10  ;;  %v2227_v60 = vmul.f32 1.442695, %v2188_v35  ;;  %v2217_v22 = vmul.f32 1.442695, %v2183_v13 }
 0x619   : > { %v6487_v48 = vpop.eup %6486  ;;  %v2219_v26 = vmul.f32 1.442695, %v2184_v34  ;;  %v2273_v17 = vmul.f32 1.442695, %v2211_v18  ;;  %v2275_v63 = vmul.f32 1.442695, %v2212_v36 }
 0x61a   : > { %6492 = vpow2.f32 %v2225_v28  ;;  %v2277_v30 = vadd.f32 %v6487_v48, %v6485_v58  ;;  %v6489_v3 = vpop.eup %6488  ;;  %v10800_v28 = vld [vmem:[#allocation3_spill] sm:$0xff] }
 0x61b   : > { %6494 = vpow2.f32 %v2227_v60  ;;  %v8710_v4 = vpop.eup %6490  ;;  %v2313_v60 = vadd.f32 %v8689_v42, %v8682_v31 }
 0x61c   : > { %6496 = vpow2.f32 %v2217_v22  ;;  %2278 = vadd.xlane.f32.xlu1 %v2277_v30  ;;  %v2319_v31 = vadd.f32 %v8710_v4, %v6489_v3  ;;  %v10802_v22 = vld [vmem:[#allocation5_spill] sm:$0xff]  ;;  %v10804_v30 = vld [vmem:[#allocation7_spill] sm:$0xff] }
 0x61d   : > { %6498 = vpow2.f32 %v2219_v26 }
 0x61e   : > { %6500 = vpow2.f32 %v2273_v17  ;;  %v2141_v23 = vpop.xlane.xlu2 %2140 }
 0x61f   : > { %6502 = vpow2.f32 %v2275_v63  ;;  %v2185_v50 = vsub.f32 %v8534_v12, %v2141_v23  ;;  %v2186_v59 = vsub.f32 %v8538_v37, %v2141_v23 }
 0x620   : > { %v6493_v62 = vpop.eup %6492 }
 0x621   : > { %v6495_v29 = vpop.eup %6494  ;;  %v2221_v57 = vmul.f32 1.442695, %v2185_v50  ;;  %v2223_v14 = vmul.f32 1.442695, %v2186_v59 }
 0x622   : > { %v6497_v45 = vpop.eup %6496  ;;  %v2286_v2 = vadd.f32 %v6495_v29, %v6493_v62 }
 0x623   : > { %v6499_v52 = vpop.eup %6498  ;;  %v2325_v10 = vpack.c.bf16 %v6497_v45, %v6485_v58  ;;  %6504 = vpow2.f32 %v2221_v57 }
 0x624   : > { %v6501_v35 = vpop.eup %6500  ;;  %6506 = vpow2.f32 %v2223_v14  ;;  %2287 = vadd.xlane.f32.xlu1 %v2286_v2  ;;  %v2280_v13 = vadd.f32 %v6499_v52, %v6497_v45 }
 0x625   : > { %v8714_v34 = vpop.eup %6502  ;;  %2349 = vmatmul.bf16.vlgmr.msra.gmra.mxu0 %v2325_v10  ;;  %v2339_v47 = vpack.c.bf16 %v6501_v35, %v6489_v3  ;;  %v10807_v3 = vld [vmem:[#allocation11_spill] sm:$0xff] }
 0x626   : > { %2281 = vadd.xlane.f32.xlu2 %v2280_v13  ;;  %v2340_v12 = vpack.c.bf16 %v8714_v34, %v8710_v4 }
 0x627   : > { %2384 = vmatmul.bf16.gmra.mxu3 %v2339_v47 }
 0x629   : > { %v6505_v37 = vpop.eup %6504 }
 0x62a   : > { %v6507_v18 = vpop.eup %6506  ;;  %v2327_v58 = vpack.c.bf16 %v6493_v62, %v6505_v37 }
 0x62b   : > { %v2283_v36 = vadd.f32 %v6507_v18, %v6505_v37 }
 0x62c   : > { %2296 = vadd.xlane.f32.xlu1 %v8631_v44  ;;  %v2307_v44 = vadd.f32 %v8665_v6, %v8663_v19 }
 0x62d   : > { %2284 = vadd.xlane.f32.xlu0 %v2283_v36 }
 0x62e   : > { %2290 = vadd.xlane.f32.xlu2 %v8615_v1  ;;  %v2322_v1 = vadd.f32 %v8714_v34, %v6501_v35  ;;  %v10809_v35 = vld [vmem:[#allocation13_spill] sm:$0xff] }
 0x634   : > { %2305 = vadd.xlane.f32.xlu1 %v8654_v38  ;;  %v2326_v38 = vpack.c.bf16 %v6499_v52, %v6487_v48 }
 0x635   : > { %2354 = vmatmul.bf16.gmra.mxu0 %v2327_v58  ;;  %2293 = vadd.xlane.f32.xlu0 %v8620_v40  ;;  %v2316_v40 = vadd.f32 %v8697_v0, %v8691_v55  ;;  %v8811_v0 = vld [vmem:[%s10694_s4 + $0x1] ss:$0 sm:$0xff] }
 0x636   : > { %2299 = vadd.xlane.f32.xlu2 %v8638_v15  ;;  %v10801_v15 = vld [vmem:[#allocation4_spill] sm:$0xff]  ;;  %v8737_v19 = vpop.f32.mrf.mxu3 }
 0x637   : > { %5848 = vmatmul.msk.bf16.vlgmr.msra.gmra.mxu3 %vm407_vm0, %v10800_v28 }
 0x63c   : > { %2314 = vadd.xlane.f32.xlu1 %v2313_v60 }
 0x63d   : > { %2302 = vadd.xlane.f32.xlu0 %v8647_v33  ;;  %v2328_v33 = vpack.c.bf16 %v6495_v29, %v6507_v18  ;;  %v10808_v29 = vld [vmem:[#allocation12_spill] sm:$0xff] }
 0x63e   : > { %2308 = vadd.xlane.f32.xlu2 %v2307_v44  ;;  %v8741_v48 = vpop.f32.mrf.mxu3 }
 0x644   : > { %2323 = vadd.xlane.f32.xlu1 %v2322_v1 }
 0x645   : > { %2398 = vmatmul.bf16.vlgmr.msrb.gmra.mxu0 %v2326_v38  ;;  %2311 = vadd.xlane.f32.xlu0 %v8673_v5  ;;  %v10803_v5 = vld [vmem:[#allocation6_spill] sm:$0xff] }
 0x646   : > { %2317 = vadd.xlane.f32.xlu2 %v2316_v40 }
 0x647   : > { %5849 = vmatmul.msk.bf16.gmra.mxu3 %vm407_vm0, %v10801_v15 }
 0x64d   : > { %2320 = vadd.xlane.f32.xlu0 %v2319_v31 }
 0x655   : > { %2403 = vmatmul.bf16.gmra.mxu0 %v2328_v33 }
 0x657   : > { %5850 = vmatmul.msk.bf16.gmra.mxu3 %vm407_vm0, %v10802_v22 }
 0x665   : > { %v8743_v55 = vpop.f32.mrf.mxu3  ;;  %2408 = vmatmul.bf16.gmra.mxu0 %v2330_v51 }
 0x667   : > { %5851 = vmatmul.msk.bf16.gmra.mxu3 %vm407_vm0, %v10803_v5 }
 0x66d   : > { %v8750_v26 = vpop.f32.mrf.mxu3 }
 0x675   : > { %2413 = vmatmul.bf16.gmra.mxu0 %v2332_v11  ;;  %v6252_v11 = vld [vmem:[%s10695_s5 + $0x38] sm:$0xff] }
 0x676   : > { %v8755_v17 = vpop.f32.mrf.mxu3  ;;  %2856 = vmatpush.bf16.msra.mxu0 %v6252_v11 }
 0x677   : > { %5852 = vmatmul.msk.bf16.gmra.mxu3 %vm407_vm0, %v10804_v30 }
 0x67a   : > { %2857 = vmatpush.bf16.msra.mxu0 %v6251_v49  ;;  %v10810_v49 = vld [vmem:[#allocation14_spill] sm:$0xff] }
 0x67e   : > { %v8759_v63 = vpop.f32.mrf.mxu3 }
 0x685   : > { %2418 = vmatmul.bf16.gmra.mxu0 %v2334_v43  ;;  %v6250_v43 = vld [vmem:[%s10695_s5 + $0x28] sm:$0xff] }
 0x686   : > { %v8764_v39 = vpop.f32.mrf.mxu3  ;;  %2858 = vmatpush.bf16.msra.mxu0 %v6250_v43 }
 0x687   : > { %5853 = vmatmul.msk.bf16.gmra.mxu3 %vm407_vm0, %v10805_v61 }
 0x68e   : > { %v8768_v51 = vpop.f32.mrf.mxu3 }
 0x695   : > { %2423 = vmatmul.bf16.gmra.mxu0 %v2336_v9  ;;  %v6249_v9 = vld [vmem:[%s10695_s5 + $0x20] sm:$0xff] }
 0x696   : > { %v8773_v8 = vpop.f32.mrf.mxu3  ;;  %2859 = vmatpush.bf16.msra.mxu0 %v6249_v9 }
 0x697   : > { %5854 = vmatmul.msk.bf16.gmra.mxu3 %vm407_vm0, %v10806_v41 }
 0x699   : > { %v2282_v2 = vpop.xlane.xlu2 %2281 }
 0x69e   : > { %v8789_v6 = vpop.f32.mrf.mxu3 }
 0x6a0   : > { %v2285_v40 = vpop.xlane.xlu0 %2284 }
 0x6a2   : > { %v2350_v32 = vpop.f32.mrf.mxu0 }
 0x6a5   : > { %2428 = vmatmul.bf16.gmra.mxu0 %v2338_v25  ;;  %v2279_v25 = vpop.xlane.xlu1 %2278 }
 0x6a6   : > { %6508 = vrcp.f32 %v2279_v25 }
 0x6a7   : > { %5855 = vmatmul.msk.bf16.gmra.mxu3 %vm407_vm0, %v10807_v3  ;;  %6510 = vrcp.f32 %v2282_v2  ;;  %v2291_v2 = vpop.xlane.xlu2 %2290 }
 0x6aa   : > { %v8799_v23 = vpop.f32.mrf.mxu3  ;;  %v2352_v50 = vpop.f32.mrf.mxu0 }
 0x6ad   : > { %v2288_v44 = vpop.xlane.xlu1 %2287 }
 0x6ae   : > { %6512 = vrcp.f32 %v2288_v44 }
 0x6af   : > { %6514 = vrcp.f32 %v2285_v40 }
 0x6b0   : > { %6516 = vrcp.f32 %v2291_v2 }
 0x6b2   : > { %v8801_v59 = vpop.f32.mrf.mxu3  ;;  %v2355_v62 = vpop.f32.mrf.mxu0 }
 0x6b5   : > { %2433 = vmatmul.bf16.gmra.mxu0 %v2340_v12  ;;  %v6509_v12 = vpop.eup %6508 }
 0x6b6   : > { %v6511_v18 = vpop.eup %6510 }
 0x6b7   : > { %5856 = vmatmul.msk.bf16.gmra.mxu3 %vm407_vm0, %v10808_v29  ;;  %v6513_v9 = vpop.eup %6512 }
 0x6ba   : > { %v2718_v57 = vpop.f32.mrf.mxu3  ;;  %v2357_v42 = vpop.f32.mrf.mxu0 }
 0x6bb   : > { %v8814_v52 = vadd.f32 %v8811_v0, %v2718_v57  ;;  %v6515_v57 = vpop.eup %6514 }
 0x6c2   : > { %v2720_v14 = vpop.f32.mrf.mxu3  ;;  %v2399_v45 = vpop.f32.mrf.mxu0 }
 0x6c3   : > { %v8817_v4 = vadd.f32 %v8811_v0, %v2720_v14  ;;  %v2400_v13 = vadd.f32 %v2399_v45, %v2350_v32 }
 0x6c5   : > { %5889 = vmatmul.msk.bf16.vlgmr.msra.gmra.mxu0 %vm407_vm0, %v10800_v28  ;;  %v2798_v10 = vpack.c.bf16 %v8817_v4, %v8814_v52  ;;  %v2455_v36 = vmul.f32 %v6509_v12, %v2400_v13 }
 0x6c7   : > { %5857 = vmatmul.msk.bf16.gmra.mxu3 %vm407_vm0, %v10809_v35 }
 0x6ca   : > { %v2723_v34 = vpop.f32.mrf.mxu3  ;;  %v2401_v47 = vpop.f32.mrf.mxu0 }
 0x6cb   : > { %v2402_v37 = vadd.f32 %v2401_v47, %v2352_v50  ;;  %v8827_v31 = vadd.f32 %v8811_v0, %v2723_v34  ;;  %v2294_v47 = vpop.xlane.xlu0 %2293 }
 0x6cc   : > { %6518 = vrcp.f32 %v2294_v47 }
 0x6cd   : > { %v2456_v58 = vmul.f32 %v6511_v18, %v2402_v37 }
 0x6cf   : > { %v2471_v60 = vpack.c.bf16 %v2456_v58, %v2455_v36  ;;  %v6517_v58 = vpop.eup %6516 }
 0x6d1   : > { %5782 = vmatmul.msk.bf16.vlgmr.msra.gmra.mxu1 %vm1962_vm5, %v2471_v60 }
 0x6d2   : > { %v2725_v1 = vpop.f32.mrf.mxu3  ;;  %v2404_v38 = vpop.f32.mrf.mxu0 }
 0x6d3   : > { %v8830_v33 = vadd.f32 %v8811_v0, %v2725_v1  ;;  %v2405_v20 = vadd.f32 %v2404_v38, %v2355_v62  ;;  %v6519_v44 = vpop.eup %6518 }
 0x6d5   : > { %5890 = vmatmul.msk.bf16.gmra.mxu0 %vm407_vm0, %v10801_v15  ;;  %v2799_v11 = vpack.c.bf16 %v8830_v33, %v8827_v31  ;;  %v2457_v25 = vmul.f32 %v6515_v57, %v2405_v20  ;;  %v2297_v20 = vpop.xlane.xlu1 %2296  ;;  %v10811_v57 = vld [vmem:[#allocation16_spill] sm:$0xff]  ;;  %v2982_v31 = vsel %vm1962_vm5, %v2798_v10, 0 }
 0x6d6   : > { %6520 = vrcp.f32 %v2297_v20 }
 0x6d7   : > { %5858 = vmatmul.msk.bf16.gmra.mxu3 %vm407_vm0, %v10810_v49 }
 0x6da   : > { %v2728_v43 = vpop.f32.mrf.mxu3  ;;  %v2406_v32 = vpop.f32.mrf.mxu0 }
 0x6db   : > { %v2407_v50 = vadd.f32 %v2406_v32, %v2357_v42  ;;  %v8840_v12 = vadd.f32 %v8811_v0, %v2728_v43 }
 0x6dc   : > { %v6521_v2 = vpop.eup %6520 }
 0x6dd   : > { %v2458_v14 = vmul.f32 %v6513_v9, %v2407_v50  ;;  %v2300_v9 = vpop.xlane.xlu2 %2299 }
 0x6de   : > { %6522 = vrcp.f32 %v2300_v9 }
 0x6df   : > { %v2472_v45 = vpack.c.bf16 %v2458_v14, %v2457_v25 }
 0x6e1   : > { %5783 = vmatmul.msk.bf16.gmra.mxu1 %vm1962_vm5, %v2472_v45 }
 0x6e2   : > { %v2730_v13 = vpop.f32.mrf.mxu3  ;;  %v2409_v34 = vpop.f32.mrf.mxu0 }
 0x6e3   : > { %v8843_v37 = vadd.f32 %v8811_v0, %v2730_v13  ;;  %v2410_v42 = vadd.f32 %v2409_v34, %v8737_v19 }
 0x6e4   : > { %v6523_v34 = vpop.eup %6522 }
 0x6e5   : > { %5891 = vmatmul.msk.bf16.gmra.mxu0 %vm407_vm0, %v10802_v22  ;;  %v2800_v62 = vpack.c.bf16 %v8843_v37, %v8840_v12  ;;  %v2459_v1 = vmul.f32 %v6517_v58, %v2410_v42 }
 0x6e7   : > { %5859 = vmatmul.msk.bf16.gmra.mxu3 %vm407_vm0, %v7865_v27 }
 0x6ea   : > { %v2733_v18 = vpop.f32.mrf.mxu3  ;;  %v2411_v36 = vpop.f32.mrf.mxu0 }
 0x6eb   : > { %v2412_v60 = vadd.f32 %v2411_v36, %v8741_v48  ;;  %v8855_v50 = vadd.f32 %v8811_v0, %v2733_v18  ;;  %v2306_v36 = vpop.xlane.xlu1 %2305 }
 0x6ec   : > { %6524 = vrcp.f32 %v2306_v36 }
 0x6ed   : > { %v2460_v38 = vmul.f32 %v6519_v44, %v2412_v60  ;;  %v2303_v44 = vpop.xlane.xlu0 %2302 }
 0x6ee   : > { %6526 = vrcp.f32 %v2303_v44 }
 0x6ef   : > { %v2473_v40 = vpack.c.bf16 %v2460_v38, %v2459_v1 }
 0x6f1   : > { %5784 = vmatmul.msk.bf16.gmra.mxu1 %vm1962_vm5, %v2473_v40 }
 0x6f2   : > { %v2735_v43 = vpop.f32.mrf.mxu3  ;;  %v2414_v32 = vpop.f32.mrf.mxu0 }
 0x6f3   : > { %v8858_v19 = vadd.f32 %v8811_v0, %v2735_v43  ;;  %v2415_v25 = vadd.f32 %v2414_v32, %v8743_v55  ;;  %v10812_v55 = vld [vmem:[#allocation17_spill] sm:$0xff]  ;;  %v6525_v40 = vpop.eup %6524 }
 0x6f4   : > { %v6527_v43 = vpop.eup %6526 }
 0x6f5   : > { %5892 = vmatmul.msk.bf16.gmra.mxu0 %vm407_vm0, %v10803_v5  ;;  %v2801_v48 = vpack.c.bf16 %v8858_v19, %v8855_v50  ;;  %v2461_v47 = vmul.f32 %v6521_v2, %v2415_v25  ;;  %v2988_v50 = vsel %vm1962_vm5, %v2800_v62, 0 }
 0x6f7   : > { %5860 = vmatmul.msk.bf16.gmra.mxu3 %vm407_vm0, %v10811_v57 }
 0x6fa   : > { %v8867_v14 = vpop.f32.mrf.mxu3  ;;  %v2416_v45 = vpop.f32.mrf.mxu0 }
 0x6fb   : > { %v2417_v13 = vadd.f32 %v2416_v45, %v8750_v26  ;;  %v2309_v45 = vpop.xlane.xlu2 %2308 }
 0x6fc   : > { %6528 = vrcp.f32 %v2309_v45 }
 0x6fd   : > { %v2462_v42 = vmul.f32 %v6523_v34, %v2417_v13  ;;  %v2312_v34 = vpop.xlane.xlu0 %2311 }
 0x6fe   : > { %6530 = vrcp.f32 %v2312_v34 }
 0x6ff   : > { %v2474_v18 = vpack.c.bf16 %v2462_v42, %v2461_v47 }
 0x701   : > { %5785 = vmatmul.msk.bf16.gmra.mxu1 %vm1962_vm5, %v2474_v18 }
 0x702   : > { %v8871_v58 = vpop.f32.mrf.mxu3  ;;  %v2419_v60 = vpop.f32.mrf.mxu0 }
 0x703   : > { %v2420_v26 = vadd.f32 %v2419_v60, %v8755_v17  ;;  %v10813_v17 = vld [vmem:[#allocation18_spill] sm:$0xff]  ;;  %v6529_v18 = vpop.eup %6528 }
 0x704   : > { %v6531_v60 = vpop.eup %6530 }
 0x705   : > { %5893 = vmatmul.msk.bf16.gmra.mxu0 %vm407_vm0, %v10804_v30  ;;  %v2463_v32 = vmul.f32 %v6527_v43, %v2420_v26 }
 0x707   : > { %5861 = vmatmul.msk.bf16.gmra.mxu3 %vm407_vm0, %v10812_v55 }
 0x70a   : > { %v8878_v1 = vpop.f32.mrf.mxu3  ;;  %v2421_v38 = vpop.f32.mrf.mxu0 }
 0x70b   : > { %v2422_v20 = vadd.f32 %v2421_v38, %v8759_v63 }
 0x70d   : > { %v2464_v9 = vmul.f32 %v6525_v40, %v2422_v20  ;;  %v2315_v40 = vpop.xlane.xlu1 %2314 }
 0x70e   : > { %6532 = vrcp.f32 %v2315_v40 }
 0x70f   : > { %v2475_v25 = vpack.c.bf16 %v2464_v9, %v2463_v32  ;;  %v2318_v32 = vpop.xlane.xlu2 %2317 }
 0x710   : > { %6534 = vrcp.f32 %v2318_v32 }
 0x711   : > { %5786 = vmatmul.msk.bf16.gmra.mxu1 %vm1962_vm5, %v2475_v25 }
 0x712   : > { %v2745_v2 = vpop.f32.mrf.mxu3  ;;  %v2424_v13 = vpop.f32.mrf.mxu0 }
 0x713   : > { %v2425_v63 = vadd.f32 %v2424_v13, %v8764_v39  ;;  %v10814_v39 = vld [vmem:[#allocation19_spill] sm:$0xff] }
 0x714   : > { %v6533_v45 = vpop.eup %6532 }
 0x715   : > { %5894 = vmatmul.msk.bf16.gmra.mxu0 %vm407_vm0, %v10805_v61  ;;  %v2465_v44 = vmul.f32 %v6529_v18, %v2425_v63 }
 0x716   : > { %v6535_v34 = vpop.eup %6534 }
 0x717   : > { %5862 = vmatmul.msk.bf16.gmra.mxu3 %vm407_vm0, %v10813_v17 }
 0x71a   : > { %v2748_v47 = vpop.f32.mrf.mxu3  ;;  %v2426_v42 = vpop.f32.mrf.mxu0 }
 0x71b   : > { %v2427_v36 = vadd.f32 %v2426_v42, %v8768_v51  ;;  %v2749_v32 = vadd.f32 %v8811_v0, %v2748_v47  ;;  %v2744_v47 = vadd.f32 %v8811_v0, %v8878_v1  ;;  %v2623_v1 = vpop.f32.mrf.mxu2 }
 0x71d   : > { %v2466_v26 = vmul.f32 %v6531_v60, %v2427_v36  ;;  %v2324_v36 = vpop.xlane.xlu1 %2323 }
 0x71e   : > { %6536 = vrcp.f32 %v2324_v36  ;;  %v2746_v36 = vadd.f32 %v8811_v0, %v2745_v2  ;;  %v8921_v2 = vld [vmem:[%s10696_s6 + $0x1] ss:$0 sm:$0xff] }
 0x71f   : > { %v2476_v38 = vpack.c.bf16 %v2466_v26, %v2465_v44  ;;  %v2321_v26 = vpop.xlane.xlu0 %2320 }
 0x720   : > { %6538 = vrcp.f32 %v2321_v26  ;;  %v2803_v26 = vpack.c.bf16 %v2746_v36, %v2744_v47 }
 0x721   : > { %5787 = vmatmul.msk.bf16.gmra.mxu1 %vm1962_vm5, %v2476_v38 }
 0x722   : > { %v2750_v20 = vpop.f32.mrf.mxu3  ;;  %v2429_v43 = vpop.f32.mrf.mxu0 }
 0x723   : > { %v2430_v51 = vadd.f32 %v2429_v43, %v8773_v8 }
 0x725   : > { %5895 = vmatmul.msk.bf16.gmra.mxu0 %vm407_vm0, %v10806_v41  ;;  %v2467_v63 = vmul.f32 %v6533_v45, %v2430_v51  ;;  %v6537_v45 = vpop.eup %6536 }
 0x727   : > { %5863 = vmatmul.msk.bf16.gmra.mxu3 %vm407_vm0, %v10814_v39 }
 0x72a   : > { %v2753_v9 = vpop.f32.mrf.mxu3  ;;  %v2431_v25 = vpop.f32.mrf.mxu0 }
 0x72b   : > { %v2432_v13 = vadd.f32 %v2431_v25, %v8789_v6  ;;  %v2754_v38 = vadd.f32 %v8811_v0, %v2753_v9  ;;  %v2751_v6 = vadd.f32 %v8811_v0, %v2750_v20 }
 0x72d   : > { %v2468_v42 = vmul.f32 %v6535_v34, %v2432_v13  ;;  %v2804_v34 = vpack.c.bf16 %v2751_v6, %v2749_v32 }
 0x72f   : > { %v2477_v18 = vpack.c.bf16 %v2468_v42, %v2467_v63  ;;  %v6539_v63 = vpop.eup %6538 }
 0x731   : > { %5788 = vmatmul.msk.bf16.gmra.mxu1 %vm1962_vm5, %v2477_v18 }
 0x732   : > { %v2755_v60 = vpop.f32.mrf.mxu3  ;;  %v2434_v44 = vpop.f32.mrf.mxu0 }
 0x733   : > { %v2756_v40 = vadd.f32 %v8811_v0, %v2755_v60  ;;  %v2435_v51 = vadd.f32 %v2434_v44, %v8799_v23  ;;  %v3000_v60 = vsel %vm1962_vm5, %v2804_v34, 0  ;;  %v2991_v34 = vsel %vm1962_vm5, %v2801_v48, 0 }
 0x735   : > { %v2805_v8 = vpack.c.bf16 %v2756_v40, %v2754_v38  ;;  %5896 = vmatmul.msk.bf16.gmra.mxu0 %vm407_vm0, %v10807_v3  ;;  %v2469_v42 = vmul.f32 %v6539_v63, %v2435_v51  ;;  %v2997_v38 = vsel %vm1962_vm5, %v2803_v26, 0  ;;  %v2739_v40 = vadd.f32 %v8811_v0, %v8867_v14  ;;  %v2625_v14 = vpop.f32.mrf.mxu2  ;;  %v6257_v51 = vld [vmem:[%s10691_s1 + $0x58] sm:$0xff] }
 0x736   : > { %3613 = vmatpush.bf16.msrb.mxu0 %v6257_v51 }
 0x737   : > { %v3003_v43 = vsel %vm1962_vm5, %v2805_v8, 0 }
 0x738   : > { %3029 = vmatpush.bf16.xpose.msrb.mxu1 %v3003_v43 }
 0x73a   : > { %v8904_v25 = vpop.f32.mrf.mxu3  ;;  %v2436_v9 = vpop.f32.mrf.mxu0 }
 0x73b   : > { %v2437_v13 = vadd.f32 %v2436_v9, %v8801_v59  ;;  %v2741_v59 = vadd.f32 %v8811_v0, %v8871_v58 }
 0x73d   : > { %v2470_v18 = vmul.f32 %v6537_v45, %v2437_v13  ;;  %v2802_v32 = vpack.c.bf16 %v2741_v59, %v2739_v40 }
 0x73f   : > { %v2478_v20 = vpack.c.bf16 %v2470_v18, %v2469_v42  ;;  %v2994_v9 = vsel %vm1962_vm5, %v2802_v32, 0 }
 0x740   : > { %3030 = vmatpush.bf16.xpose.msrb.mxu1 %v3000_v60 }
 0x741   : > { %5789 = vmatmul.msk.bf16.gmra.mxu1 %vm1962_vm5, %v2478_v20  ;;  %v2628_v20 = vpop.f32.mrf.mxu2 }
 0x742   : > { %v8912_v23 = vpop.f32.mrf.mxu3  ;;  %v2861_v44 = vpop.f32.mrf.mxu0 }
 0x743   : > { %v8929_v43 = vadd.f32 %v8921_v2, %v2861_v44  ;;  %v2985_v44 = vsel %vm1962_vm5, %v2799_v11, 0 }
 0x745   : > { %5897 = vmatmul.msk.bf16.gmra.mxu0 %vm407_vm0, %v10808_v29 }
 0x748   : > { %3031 = vmatpush.bf16.xpose.msrb.mxu1 %v2997_v38  ;;  %v8980_v38 = vld [vmem:[%s10692_s2 + $0x1] ss:$0 sm:$0xff] }
 0x749   : > { %v2630_v47 = vpop.f32.mrf.mxu2  ;;  %v2626_v33 = vadd.f32 %v8980_v38, %v2625_v14  ;;  %v2624_v32 = vadd.f32 %v8980_v38, %v2623_v1 }
 0x74a   : > { %v8926_v8 = vpop.f32.mrf.mxu3  ;;  %v2863_v6 = vpop.f32.mrf.mxu0 }
 0x74b   : > { %v8932_v58 = vadd.f32 %v8921_v2, %v2863_v6 }
 0x74e   : > { %v9042_v1 = vpop.f32.mrf.mxu1 }
 0x74f   : > { %10815 = vst [vmem:[#allocation9_spill] sm:$0xff] %v9042_v1 }
 0x750   : > { %3032 = vmatpush.bf16.xpose.msrb.mxu1 %v2994_v9  ;;  %v8990_v9 = vpack.c.bf16 %v2626_v33, %v2624_v32 }
 0x751   : > { %v2633_v11 = vpop.f32.mrf.mxu2 }
 0x752   : > { %v8937_v45 = vpop.f32.mrf.mxu3  ;;  %v2866_v13 = vpop.f32.mrf.mxu0 }
 0x753   : > { %v8948_v18 = vadd.f32 %v8921_v2, %v2866_v13 }
 0x755   : > { %5898 = vmatmul.msk.bf16.gmra.mxu0 %vm407_vm0, %v10809_v35 }
 0x758   : > { %3033 = vmatpush.bf16.xpose.msrb.mxu1 %v2991_v34  ;;  %v2631_v34 = vadd.f32 %v8980_v38, %v2630_v47 }
 0x759   : > { %v2635_v10 = vpop.f32.mrf.mxu2 }
 0x75a   : > { %v8945_v63 = vpop.f32.mrf.mxu3  ;;  %v2868_v42 = vpop.f32.mrf.mxu0 }
 0x75b   : > { %v8951_v36 = vadd.f32 %v8921_v2, %v2868_v42 }
 0x760   : > { %3034 = vmatpush.bf16.xpose.msrb.mxu1 %v2988_v50 }
 0x762   : > { %v8959_v19 = vpop.f32.mrf.mxu3  ;;  %v2871_v48 = vpop.f32.mrf.mxu0 }
 0x763   : > { %v8970_v12 = vadd.f32 %v8921_v2, %v2871_v48  ;;  %v2629_v48 = vadd.f32 %v8980_v38, %v2628_v20  ;;  %v2634_v20 = vadd.f32 %v8980_v38, %v2633_v11  ;;  %v6256_v11 = vld [vmem:[%s10691_s1 + $0x50] sm:$0xff] }
 0x764   : > { %3614 = vmatpush.bf16.msrb.mxu0 %v6256_v11 }
 0x765   : > { %5899 = vmatmul.msk.bf16.gmra.mxu0 %vm407_vm0, %v10810_v49 }
 0x768   : > { %3035 = vmatpush.bf16.xpose.msrb.mxu1 %v2985_v44  ;;  %v2638_v44 = vpop.f32.mrf.mxu2 }
 0x769   : > { %v2639_v51 = vadd.f32 %v8980_v38, %v2638_v44 }
 0x76a   : > { %v8967_v26 = vpop.f32.mrf.mxu3  ;;  %v2873_v59 = vpop.f32.mrf.mxu0 }
 0x76b   : > { %v8973_v37 = vadd.f32 %v8921_v2, %v2873_v59  ;;  %v9012_v59 = vpack.c.bf16 %v2631_v34, %v2629_v48 }
 0x770   : > { %3036 = vmatpush.bf16.xpose.msrb.mxu1 %v2982_v31  ;;  %v2640_v47 = vpop.f32.mrf.mxu2 }
 0x772   : > { %v8987_v40 = vpop.f32.mrf.mxu3  ;;  %v2876_v6 = vpop.f32.mrf.mxu0 }
 0x773   : > { %v8999_v13 = vadd.f32 %v8921_v2, %v2876_v6  ;;  %v2636_v6 = vadd.f32 %v8980_v38, %v2635_v10 }
 0x775   : > { %5900 = vmatmul.msk.bf16.gmra.mxu0 %vm407_vm0, %v7865_v27  ;;  %v9026_v34 = vpack.c.bf16 %v2636_v6, %v2634_v20  ;;  %v6255_v6 = vld [vmem:[%s10691_s1 + $0x48] sm:$0xff]  ;;  %v2641_v20 = vadd.f32 %v8980_v38, %v2640_v47  ;;  %v6254_v27 = vld [vmem:[%s10691_s1 + $0x40] sm:$0xff] }
 0x776   : > { %3615 = vmatpush.bf16.msrb.mxu0 %v6255_v6  ;;  %v9054_v6 = vpop.f32.mrf.mxu1 }
 0x777   : > { %5905 = vmatmul.msk.bf16.vlgmr.msrb.gmra.mxu1 %vm1962_vm5, %v8990_v9  ;;  %v9048_v49 = vpack.c.bf16 %v2641_v20, %v2639_v51  ;;  %10816 = vst [vmem:[#allocation3_spill] sm:$0xff] %v9054_v6 }
 0x778   : > { %v2643_v48 = vpop.f32.mrf.mxu2 }
 0x779   : > { %v2644_v3 = vadd.f32 %v8980_v38, %v2643_v48 }
 0x77a   : > { %v8996_v52 = vpop.f32.mrf.mxu3  ;;  %v2878_v4 = vpop.f32.mrf.mxu0  ;;  %3616 = vmatpush.bf16.msrb.mxu0 %v6254_v27 }
 0x77b   : > { %v9002_v14 = vadd.f32 %v8921_v2, %v2878_v4 }
 0x77e   : > { %v9062_v27 = vpop.f32.mrf.mxu1 }
 0x77f   : > { %10817 = vst [vmem:[#allocation4_spill] sm:$0xff] %v9062_v27 }
 0x780   : > { %v2645_v62 = vpop.f32.mrf.mxu2 }
 0x781   : > { %v2646_v44 = vadd.f32 %v8980_v38, %v2645_v62 }
 0x782   : > { %v9007_v42 = vpop.f32.mrf.mxu3  ;;  %v9009_v50 = vpop.f32.mrf.mxu0 }
 0x785   : > { %5901 = vmatmul.msk.bf16.gmra.mxu0 %vm407_vm0, %v10811_v57 }
 0x787   : > { %5906 = vmatmul.msk.bf16.gmra.mxu1 %vm1962_vm5, %v9012_v59 }
 0x788   : > { %v2648_v1 = vpop.f32.mrf.mxu2 }
 0x78a   : > { %v9018_v31 = vpop.f32.mrf.mxu3  ;;  %v9020_v33 = vpop.f32.mrf.mxu0 }
 0x790   : > { %v2650_v6 = vpop.f32.mrf.mxu2 }
 0x792   : > { %v2785_v32 = vpop.f32.mrf.mxu3  ;;  %v9023_v4 = vpop.f32.mrf.mxu0 }
 0x795   : > { %5902 = vmatmul.msk.bf16.gmra.mxu0 %vm407_vm0, %v10812_v55 }
 0x797   : > { %5907 = vmatmul.msk.bf16.gmra.mxu1 %vm1962_vm5, %v9026_v34 }
 0x79a   : > { %v2788_v10 = vpop.f32.mrf.mxu3  ;;  %v2888_v60 = vpop.f32.mrf.mxu0 }
 0x79b   : > { %v2789_v48 = vadd.f32 %v8811_v0, %v2788_v10  ;;  %v2651_v10 = vadd.f32 %v8980_v38, %v2650_v6  ;;  %v2884_v6 = vadd.f32 %v8921_v2, %v9020_v33 }
 0x7a2   : > { %v2790_v55 = vpop.f32.mrf.mxu3  ;;  %v2891_v57 = vpop.f32.mrf.mxu0 }
 0x7a3   : > { %v2791_v61 = vadd.f32 %v8811_v0, %v2790_v55  ;;  %v2786_v55 = vadd.f32 %v8811_v0, %v2785_v32  ;;  %v2892_v27 = vadd.f32 %v8921_v2, %v2891_v57  ;;  %v2887_v57 = vadd.f32 %v8921_v2, %v9023_v4 }
 0x7a4   : > { %v2882_v4 = vadd.f32 %v8921_v2, %v9009_v50 }
 0x7a5   : > { %5903 = vmatmul.msk.bf16.gmra.mxu0 %vm407_vm0, %v10813_v17  ;;  %v9060_v17 = vpack.c.bf16 %v2646_v44, %v2644_v3  ;;  %v2812_v44 = vpack.c.bf16 %v2791_v61, %v2789_v48 }
 0x7a7   : > { %5908 = vmatmul.msk.bf16.gmra.mxu1 %vm1962_vm5, %v9048_v49 }
 0x7aa   : > { %v2793_v47 = vpop.f32.mrf.mxu3  ;;  %v2893_v11 = vpop.f32.mrf.mxu0 }
 0x7ab   : > { %v2794_v20 = vadd.f32 %v8811_v0, %v2793_v47 }
 0x7b2   : > { %v2795_v35 = vpop.f32.mrf.mxu3  ;;  %v2896_v29 = vpop.f32.mrf.mxu0 }
 0x7b3   : > { %v2796_v51 = vadd.f32 %v8811_v0, %v2795_v35  ;;  %v2897_v3 = vadd.f32 %v8921_v2, %v2896_v29  ;;  %v2784_v29 = vadd.f32 %v8811_v0, %v9018_v31 }
 0x7b5   : > { %v2813_v41 = vpack.c.bf16 %v2796_v51, %v2794_v20  ;;  %5904 = vmatmul.msk.bf16.gmra.mxu0 %vm407_vm0, %v10814_v39  ;;  %v2894_v20 = vadd.f32 %v8921_v2, %v2893_v11  ;;  %v9074_v39 = vpop.f32.mrf.mxu1  ;;  %v2889_v11 = vadd.f32 %v8921_v2, %v2888_v60  ;;  %v2811_v32 = vpack.c.bf16 %v2786_v55, %v2784_v29 }
 0x7b6   : > { %10818 = vst [vmem:[#allocation5_spill] sm:$0xff] %v9074_v39  ;;  %v2781_v60 = vadd.f32 %v8811_v0, %v9007_v42 }
 0x7b7   : > { %5909 = vmatmul.msk.bf16.gmra.mxu1 %vm1962_vm5, %v9060_v17  ;;  %v3027_v62 = vsel %vm1962_vm5, %v2813_v41, 0  ;;  %v3024_v41 = vsel %vm1962_vm5, %v2812_v44, 0  ;;  %v2947_v61 = vpack.c.bf16 %v2894_v20, %v2892_v27  ;;  %v2946_v31 = vpack.c.bf16 %v2889_v11, %v2887_v57 }
 0x7b8   : > { %3078 = vmatpush.bf16.xpose.msra.mxu2 %v3027_v62  ;;  %v2653_v62 = vpop.f32.mrf.mxu2  ;;  %v2945_v44 = vpack.c.bf16 %v2884_v6, %v2882_v4 }
 0x7ba   : > { %v2898_v35 = vpop.f32.mrf.mxu0 }
 0x7bb   : > { %v2899_v47 = vadd.f32 %v8921_v2, %v2898_v35  ;;  %v2649_v35 = vadd.f32 %v8980_v38, %v2648_v1  ;;  %v3021_v1 = vsel %vm1962_vm5, %v2811_v32, 0 }
 0x7bd   : > { %v2948_v51 = vpack.c.bf16 %v2899_v47, %v2897_v3  ;;  %v9086_v3 = vpack.c.bf16 %v2651_v10, %v2649_v35  ;;  %v9099_v27 = vpop.f32.mrf.mxu1  ;;  %v2779_v47 = vadd.f32 %v8811_v0, %v8996_v52  ;;  %v10819_v52 = vpack.c.bf16 %v9002_v14, %v8999_v13 }
 0x7be   : > { %v2771_v13 = vadd.f32 %v8811_v0, %v8959_v19  ;;  %v10822_v14 = vpack.c.bf16 %v8951_v36, %v8948_v18 }
 0x7bf   : > { %3335 = vmatpush.bf16.msra.mxu1 %v2948_v51  ;;  %v2810_v55 = vpack.c.bf16 %v2781_v60, %v2779_v47  ;;  %v10823_v60 = vpack.c.bf16 %v8932_v58, %v8929_v43 }
 0x7c0   : > { %3079 = vmatpush.bf16.xpose.msra.mxu2 %v3024_v41  ;;  %v2655_v33 = vpop.f32.mrf.mxu2  ;;  %v2776_v41 = vadd.f32 %v8811_v0, %v8987_v40  ;;  %v10821_v40 = vpack.c.bf16 %v8973_v37, %v8970_v12  ;;  %v2769_v12 = vadd.f32 %v8811_v0, %v8945_v63  ;;  %v2766_v63 = vadd.f32 %v8811_v0, %v8937_v45 }
 0x7c1   : > { %v3018_v10 = vsel %vm1962_vm5, %v2810_v55, 0  ;;  %v2656_v29 = vadd.f32 %v8980_v38, %v2655_v33  ;;  %v2764_v33 = vadd.f32 %v8811_v0, %v8926_v8  ;;  %v2761_v45 = vadd.f32 %v8811_v0, %v8912_v23 }
 0x7c2   : > { %v2901_v48 = vpop.f32.mrf.mxu0  ;;  %v2808_v19 = vpack.c.bf16 %v2771_v13, %v2769_v12  ;;  %v2759_v8 = vadd.f32 %v8811_v0, %v8904_v25 }
 0x7c3   : > { %3336 = vmatpush.bf16.msra.mxu1 %v2947_v61  ;;  %v9104_v42 = vadd.f32 %v8921_v2, %v2901_v48  ;;  %v2774_v61 = vadd.f32 %v8811_v0, %v8967_v26  ;;  %v2654_v48 = vadd.f32 %v8980_v38, %v2653_v62  ;;  %v2807_v58 = vpack.c.bf16 %v2766_v63, %v2764_v33 }
 0x7c4   : > { %v3012_v4 = vsel %vm1962_vm5, %v2808_v19, 0 }
 0x7c5   : > { %5960 = vmatmul.msk.bf16.vlgmr.msrb.gmra.mxu0 %vm407_vm0, %v8257_v16  ;;  %v9121_v35 = vpop.f32.mrf.mxu1  ;;  %v2809_v32 = vpack.c.bf16 %v2776_v41, %v2774_v61  ;;  %v9126_v6 = vpack.c.bf16 %v2656_v29, %v2654_v48  ;;  %v3009_v41 = vsel %vm1962_vm5, %v2807_v58, 0  ;;  %v2806_v29 = vpack.c.bf16 %v2761_v45, %v2759_v8 }
 0x7c6   : > { %10820 = vst [vmem:[#allocation6_spill] sm:$0xff] %v9121_v35 }
 0x7c7   : > { %5910 = vmatmul.msk.bf16.gmra.mxu1 %vm1962_vm5, %v9086_v3  ;;  %v3015_v26 = vsel %vm1962_vm5, %v2809_v32, 0  ;;  %v3006_v23 = vsel %vm1962_vm5, %v2806_v29, 0 }
 0x7c8   : > { %3080 = vmatpush.bf16.xpose.msra.mxu2 %v3021_v1  ;;  %3337 = vmatpush.bf16.msra.mxu1 %v2946_v31  ;;  %v2658_v57 = vpop.f32.mrf.mxu2 }
 0x7c9   : > { %v2659_v43 = vadd.f32 %v8980_v38, %v2658_v57 }
 0x7ca   : > { %v2903_v20 = vpop.f32.mrf.mxu0 }
 0x7cb   : > { %v9107_v51 = vadd.f32 %v8921_v2, %v2903_v20 }
 0x7cc   : > { %3338 = vmatpush.bf16.msra.mxu1 %v2945_v44 }
 0x7cd   : > { %v2949_v50 = vpack.c.bf16 %v9107_v51, %v9104_v42  ;;  %v9149_v1 = vpop.f32.mrf.mxu1 }
 0x7d0   : > { %3081 = vmatpush.bf16.xpose.msra.mxu2 %v3018_v10  ;;  %3339 = vmatpush.bf16.msra.mxu1 %v10819_v52  ;;  %v2660_v36 = vpop.f32.mrf.mxu2 }
 0x7d1   : > { %v2661_v47 = vadd.f32 %v8980_v38, %v2660_v36 }
 0x7d2   : > { %v2906_v11 = vpop.f32.mrf.mxu0 }
 0x7d3   : > { %v9141_v62 = vadd.f32 %v8921_v2, %v2906_v11  ;;  %v9160_v20 = vpack.c.bf16 %v2661_v47, %v2659_v43 }
 0x7d4   : > { %3340 = vmatpush.bf16.msra.mxu1 %v10821_v40 }
 0x7d5   : > { %5961 = vmatmul.msk.bf16.gmra.mxu0 %vm407_vm0, %v8308_v7  ;;  %v9166_v55 = vpop.f32.mrf.mxu1 }
 0x7d6   : > { %10824 = vst [vmem:[#allocation7_spill] sm:$0xff] %v9166_v55 }
 0x7d7   : > { %5911 = vmatmul.msk.bf16.gmra.mxu1 %vm1962_vm5, %v9126_v6 }
 0x7d8   : > { %3082 = vmatpush.bf16.xpose.msra.mxu2 %v3015_v26  ;;  %3341 = vmatpush.bf16.msra.mxu1 %v10822_v14 }
 0x7da   : > { %v2908_v37 = vpop.f32.mrf.mxu0 }
 0x7db   : > { %v9144_v31 = vadd.f32 %v8921_v2, %v2908_v37 }
 0x7dc   : > { %3342 = vmatpush.bf16.msra.mxu1 %v10823_v60 }
 0x7dd   : > { %v2950_v18 = vpack.c.bf16 %v9144_v31, %v9141_v62  ;;  %v9186_v13 = vpop.f32.mrf.mxu1 }
 0x7e0   : > { %3083 = vmatpush.bf16.xpose.msra.mxu2 %v3012_v4 }
 0x7e2   : > { %v2911_v44 = vpop.f32.mrf.mxu0 }
 0x7e3   : > { %v2912_v10 = vadd.f32 %v8921_v2, %v2911_v44 }
 0x7e5   : > { %5962 = vmatmul.msk.bf16.gmra.mxu0 %vm407_vm0, %v8331_v46 }
 0x7e7   : > { %5912 = vmatmul.msk.bf16.gmra.mxu1 %vm1962_vm5, %v9160_v20 }
 0x7e8   : > { %3084 = vmatpush.bf16.xpose.msra.mxu2 %v3009_v41 }
 0x7ea   : > { %v2913_v38 = vpop.f32.mrf.mxu0 }
 0x7eb   : > { %v2914_v52 = vadd.f32 %v8921_v2, %v2913_v38 }
 0x7ed   : > { %v2951_v61 = vpack.c.bf16 %v2914_v52, %v2912_v10 }
 0x7f0   : > { %3085 = vmatpush.bf16.xpose.msra.mxu2 %v3006_v23 }
 0x7f2   : > { %v2916_v11 = vpop.f32.mrf.mxu0 }
 0x7f3   : > { %v2917_v0 = vadd.f32 %v8921_v2, %v2916_v11 }
 0x7f5   : > { %5963 = vmatmul.msk.bf16.gmra.mxu0 %vm407_vm0, %v8403_v56 }
 0x7f7   : > { %5913 = vmatmul.msk.bf16.vlgmr.msra.gmra.mxu2 %vm1962_vm5, %v8990_v9  ;;  %v9192_v9 = vpop.f32.mrf.mxu1 }
 0x7f8   : > { %10825 = vst [vmem:[#allocation20_spill] sm:$0xff] %v9192_v9 }
 0x7fa   : > { %v2918_v48 = vpop.f32.mrf.mxu0 }
 0x7fb   : > { %v2919_v25 = vadd.f32 %v8921_v2, %v2918_v48 }
 0x7fd   : > { %v2952_v32 = vpack.c.bf16 %v2919_v25, %v2917_v0 }
 0x7ff   : > { %v9194_v12 = vpop.f32.mrf.mxu1 }
 0x802   : > { %v2921_v57 = vpop.f32.mrf.mxu0 }
 0x803   : > { %v2922_v8 = vadd.f32 %v8921_v2, %v2921_v57 }
 0x805   : > { %5964 = vmatmul.msk.bf16.gmra.mxu0 %vm407_vm0, %v8447_v54 }
 0x807   : > { %5914 = vmatmul.msk.bf16.gmra.mxu2 %vm1962_vm5, %v9012_v59  ;;  %v9200_v19 = vpop.f32.mrf.mxu1 }
 0x808   : > { %10826 = vst [vmem:[#allocation21_spill] sm:$0xff] %v9200_v19 }
 0x80a   : > { %v2923_v40 = vpop.f32.mrf.mxu0 }
 0x812   : > { %v2926_v26 = vpop.f32.mrf.mxu0 }
 0x813   : > { %v2927_v45 = vadd.f32 %v8921_v2, %v2926_v26 }
 0x815   : > { %5965 = vmatmul.msk.bf16.gmra.mxu0 %vm407_vm0, %v8466_v21 }
 0x817   : > { %5915 = vmatmul.msk.bf16.gmra.mxu2 %vm1962_vm5, %v9026_v34  ;;  %v9204_v34 = vpop.f32.mrf.mxu1 }
 0x81a   : > { %v2928_v14 = vpop.f32.mrf.mxu0 }
 0x81b   : > { %v2929_v58 = vadd.f32 %v8921_v2, %v2928_v14 }
 0x81d   : > { %v2954_v41 = vpack.c.bf16 %v2929_v58, %v2927_v45 }
 0x81f   : > { %v9212_v44 = vpop.f32.mrf.mxu1 }
 0x820   : > { %10827 = vst [vmem:[#allocation22_spill] sm:$0xff] %v9212_v44 }
 0x822   : > { %v2931_v37 = vpop.f32.mrf.mxu0 }
 0x823   : > { %v2932_v33 = vadd.f32 %v8921_v2, %v2931_v37 }
 0x825   : > { %5966 = vmatmul.msk.bf16.gmra.mxu0 %vm407_vm0, %v8479_v24 }
 0x827   : > { %5916 = vmatmul.msk.bf16.gmra.mxu2 %vm1962_vm5, %v9048_v49  ;;  %v9220_v38 = vpop.f32.mrf.mxu1 }
 0x82a   : > { %v2933_v59 = vpop.f32.mrf.mxu0 }
 0x82b   : > { %v2934_v47 = vadd.f32 %v8921_v2, %v2933_v59 }
 0x82d   : > { %v2955_v43 = vpack.c.bf16 %v2934_v47, %v2932_v33 }
 0x82f   : > { %v9222_v52 = vpop.f32.mrf.mxu1 }
 0x830   : > { %10828 = vst [vmem:[#allocation23_spill] sm:$0xff] %v9222_v52 }
 0x832   : > { %v2936_v60 = vpop.f32.mrf.mxu0 }
 0x833   : > { %v2937_v63 = vadd.f32 %v8921_v2, %v2936_v60 }
 0x835   : > { %5967 = vmatmul.msk.bf16.gmra.mxu0 %vm407_vm0, %v7213_v53 }
 0x837   : > { %5917 = vmatmul.msk.bf16.gmra.mxu2 %vm1962_vm5, %v9060_v17  ;;  %v2924_v17 = vadd.f32 %v8921_v2, %v2923_v40  ;;  %v9229_v29 = vpop.f32.mrf.mxu1 }
 0x839   : > { %v2953_v10 = vpack.c.bf16 %v2924_v17, %v2922_v8 }
 0x83a   : > { %v2938_v36 = vpop.f32.mrf.mxu0 }
 0x83b   : > { %v2939_v4 = vadd.f32 %v8921_v2, %v2938_v36 }
 0x83d   : > { %v2956_v49 = vpack.c.bf16 %v2939_v4, %v2937_v63 }
 0x83f   : > { %3384 = vmatpush.bf16.msrb.mxu2 %v2956_v49  ;;  %v9234_v2 = vpop.f32.mrf.mxu1 }
 0x843   : > { %3385 = vmatpush.bf16.msrb.mxu2 %v2955_v43 }
 0x847   : > { %5918 = vmatmul.msk.bf16.gmra.mxu2 %vm1962_vm5, %v9086_v3  ;;  %v9238_v3 = vpop.f32.mrf.mxu1 }
 0x848   : > { %3386 = vmatpush.bf16.msrb.mxu2 %v2954_v41 }
 0x84c   : > { %3387 = vmatpush.bf16.msrb.mxu2 %v2953_v10 }
 0x850   : > { %3388 = vmatpush.bf16.msrb.mxu2 %v2952_v32 }
 0x854   : > { %3389 = vmatpush.bf16.msrb.mxu2 %v2951_v61  ;;  %v9240_v61 = vpop.f32.mrf.mxu1 }
 0x857   : > { %5919 = vmatmul.msk.bf16.gmra.mxu2 %vm1962_vm5, %v9126_v6 }
 0x858   : > { %3390 = vmatpush.bf16.msrb.mxu2 %v2950_v18 }
 0x85c   : > { %3391 = vmatpush.bf16.msrb.mxu2 %v2949_v50  ;;  %v9247_v42 = vpop.f32.mrf.mxu1 }
 0x864   : > { %v9253_v18 = vpop.f32.mrf.mxu1 }
 0x867   : > { %5920 = vmatmul.msk.bf16.gmra.mxu2 %vm1962_vm5, %v9160_v20 }
 0x86c   : > { %v9259_v48 = vpop.f32.mrf.mxu1 }
 0x874   : > { %v9265_v32 = vpop.f32.mrf.mxu1 }
 0x87a   : > { %v3087_v6 = vpop.f32.mrf.mxu2 }
 0x87b   : > { %v3127_v23 = vmax.f32 %v9229_v29, %v3087_v6 }
 0x87c   : > { %v9275_v37 = vpop.f32.mrf.mxu1 }
 0x87d   : > { %3128 = vmax.xlane.f32.xlu2 %v3127_v23 }
 0x882   : > { %v9243_v62 = vpop.f32.mrf.mxu2 }
 0x883   : > { %v3130_v31 = vmax.f32 %v9234_v2, %v9243_v62 }
 0x884   : > { %v9281_v36 = vpop.f32.mrf.mxu1 }
 0x885   : > { %3131 = vmax.xlane.f32.xlu0 %v3130_v31 }
 0x88a   : > { %v9249_v51 = vpop.f32.mrf.mxu2 }
 0x88b   : > { %v3133_v50 = vmax.f32 %v9238_v3, %v9249_v51 }
 0x88c   : > { %v9287_v47 = vpop.f32.mrf.mxu1 }
 0x88d   : > { %3134 = vmax.xlane.f32.xlu1 %v3133_v50 }
 0x892   : > { %v9255_v20 = vpop.f32.mrf.mxu2 }
 0x893   : > { %v3136_v11 = vmax.f32 %v9240_v61, %v9255_v20 }
 0x894   : > { %v9293_v43 = vpop.f32.mrf.mxu1 }
 0x895   : > { %3137 = vmax.xlane.f32.xlu2 %v3136_v11 }
 0x89a   : > { %v9261_v0 = vpop.f32.mrf.mxu2 }
 0x89b   : > { %v3139_v25 = vmax.f32 %v9247_v42, %v9261_v0 }
 0x89c   : > { %v9303_v8 = vpop.f32.mrf.mxu1 }
 0x89d   : > { %3140 = vmax.xlane.f32.xlu0 %v3139_v25 }
 0x8a2   : > { %v9267_v57 = vpop.f32.mrf.mxu2 }
 0x8a3   : > { %v3142_v40 = vmax.f32 %v9253_v18, %v9267_v57 }
 0x8a4   : > { %v9309_v31 = vpop.f32.mrf.mxu1 }
 0x8a5   : > { %3143 = vmax.xlane.f32.xlu1 %v3142_v40 }
 0x8aa   : > { %v9271_v26 = vpop.f32.mrf.mxu2 }
 0x8ab   : > { %v3145_v14 = vmax.f32 %v9259_v48, %v9271_v26 }
 0x8ac   : > { %v9315_v25 = vpop.f32.mrf.mxu1 }
 0x8ad   : > { %3146 = vmax.xlane.f32.xlu2 %v3145_v14 }
 0x8b2   : > { %v9277_v59 = vpop.f32.mrf.mxu2 }
 0x8b3   : > { %v3148_v60 = vmax.f32 %v9265_v32, %v9277_v59 }
 0x8b5   : > { %3149 = vmax.xlane.f32.xlu0 %v3148_v60 }
 0x8ba   : > { %v9283_v63 = vpop.f32.mrf.mxu2 }
 0x8bb   : > { %v3151_v4 = vmax.f32 %v9275_v37, %v9283_v63 }
 0x8bd   : > { %3152 = vmax.xlane.f32.xlu1 %v3151_v4 }
 0x8c2   : > { %v9289_v49 = vpop.f32.mrf.mxu2 }
 0x8c3   : > { %v3154_v33 = vmax.f32 %v9281_v36, %v9289_v49 }
 0x8c5   : > { %3155 = vmax.xlane.f32.xlu2 %v3154_v33 }
 0x8ca   : > { %v9295_v58 = vpop.f32.mrf.mxu2 }
 0x8cb   : > { %v3157_v45 = vmax.f32 %v9287_v47, %v9295_v58 }
 0x8cd   : > { %3158 = vmax.xlane.f32.xlu0 %v3157_v45  ;;  %v9322_v45 = vpop.f32.mrf.mxu1 }
 0x8d2   : > { %v9299_v17 = vpop.f32.mrf.mxu2 }
 0x8d3   : > { %v3160_v41 = vmax.f32 %v9293_v43, %v9299_v17 }
 0x8d5   : > { %3161 = vmax.xlane.f32.xlu1 %v3160_v41 }
 0x8da   : > { %v9305_v10 = vpop.f32.mrf.mxu2 }
 0x8db   : > { %v3163_v23 = vmax.f32 %v9303_v8, %v9305_v10 }
 0x8dd   : > { %3164 = vmax.xlane.f32.xlu2 %v3163_v23 }
 0x8e2   : > { %v9311_v50 = vpop.f32.mrf.mxu2 }
 0x8e3   : > { %v3166_v11 = vmax.f32 %v9309_v31, %v9311_v50 }
 0x8e5   : > { %3167 = vmax.xlane.f32.xlu0 %v3166_v11 }
 0x8ea   : > { %v9317_v40 = vpop.f32.mrf.mxu2 }
 0x8eb   : > { %v3169_v14 = vmax.f32 %v9315_v25, %v9317_v40 }
 0x8ed   : > { %3170 = vmax.xlane.f32.xlu1 %v3169_v14 }
 0x8f0   : > { %v3129_v60 = vpop.xlane.xlu2 %3128 }
 0x8f1   : > { %v3175_v4 = vsub.f32 %v9229_v29, %v3129_v60  ;;  %v3176_v33 = vsub.f32 %v3087_v6, %v3129_v60 }
 0x8f2   : > { %v9324_v41 = vpop.f32.mrf.mxu2 }
 0x8f3   : > { %v3207_v23 = vmul.f32 1.442695, %v3175_v4  ;;  %v3209_v52 = vmul.f32 1.442695, %v3176_v33  ;;  %v3172_v11 = vmax.f32 %v9322_v45, %v9324_v41 }
 0x8f5   : > { %6540 = vpow2.f32 %v3207_v23  ;;  %3173 = vmax.xlane.f32.xlu2 %v3172_v11 }
 0x8f6   : > { %6542 = vpow2.f32 %v3209_v52 }
 0x8f8   : > { %v3132_v44 = vpop.xlane.xlu0 %3131 }
 0x8f9   : > { %v3177_v19 = vsub.f32 %v9234_v2, %v3132_v44  ;;  %v3178_v14 = vsub.f32 %v9243_v62, %v3132_v44 }
 0x8fb   : > { %v6541_v9 = vpop.eup %6540  ;;  %v3211_v29 = vmul.f32 1.442695, %v3177_v19  ;;  %v3213_v6 = vmul.f32 1.442695, %v3178_v14 }
 0x8fc   : > { %v6543_v60 = vpop.eup %6542 }
 0x8fd   : > { %6544 = vpow2.f32 %v3211_v29  ;;  %v3271_v55 = vadd.f32 %v6543_v60, %v6541_v9 }
 0x8fe   : > { %6546 = vpow2.f32 %v3213_v6 }
 0x8ff   : > { %3272 = vadd.xlane.f32.xlu0 %v3271_v55 }
 0x900   : > { %v3135_v4 = vpop.xlane.xlu1 %3134 }
 0x901   : > { %v3179_v33 = vsub.f32 %v9238_v3, %v3135_v4  ;;  %v3180_v23 = vsub.f32 %v9249_v51, %v3135_v4 }
 0x903   : > { %v6545_v11 = vpop.eup %6544  ;;  %v3215_v52 = vmul.f32 1.442695, %v3179_v33  ;;  %v3217_v35 = vmul.f32 1.442695, %v3180_v23 }
 0x904   : > { %v6547_v39 = vpop.eup %6546  ;;  %v3319_v2 = vpack.c.bf16 %v6545_v11, %v6541_v9 }
 0x905   : > { %v3320_v53 = vpack.c.bf16 %v6547_v39, %v6543_v60  ;;  %6548 = vpow2.f32 %v3215_v52  ;;  %v3274_v44 = vadd.f32 %v6547_v39, %v6545_v11 }
 0x906   : > { %6550 = vpow2.f32 %v3217_v35  ;;  %3343 = vmatmul.bf16.vlgmr.msra.gmra.mxu1 %v3319_v2 }
 0x907   : > { %3392 = vmatmul.bf16.vlgmr.msrb.gmra.mxu2 %v3320_v53  ;;  %3275 = vadd.xlane.f32.xlu1 %v3274_v44 }
 0x908   : > { %v3138_v19 = vpop.xlane.xlu2 %3137 }
 0x909   : > { %v3181_v55 = vsub.f32 %v9240_v61, %v3138_v19  ;;  %v3182_v62 = vsub.f32 %v9255_v20, %v3138_v19 }
 0x90b   : > { %v6549_v3 = vpop.eup %6548  ;;  %v3219_v14 = vmul.f32 1.442695, %v3181_v55  ;;  %v3221_v51 = vmul.f32 1.442695, %v3182_v62 }
 0x90c   : > { %v6551_v29 = vpop.eup %6550 }
 0x90d   : > { %6552 = vpow2.f32 %v3219_v14  ;;  %v3277_v6 = vadd.f32 %v6551_v29, %v6549_v3 }
 0x90e   : > { %6554 = vpow2.f32 %v3221_v51 }
 0x90f   : > { %3278 = vadd.xlane.f32.xlu2 %v3277_v6 }
 0x910   : > { %v3141_v9 = vpop.xlane.xlu0 %3140 }
 0x911   : > { %v3183_v39 = vsub.f32 %v9247_v42, %v3141_v9  ;;  %v3184_v35 = vsub.f32 %v9261_v0, %v3141_v9 }
 0x913   : > { %v6553_v53 = vpop.eup %6552  ;;  %v3223_v60 = vmul.f32 1.442695, %v3183_v39  ;;  %v3225_v4 = vmul.f32 1.442695, %v3184_v35  ;;  %v6261_v35 = vld [vmem:[%s10693_s3 + $0x58] sm:$0xff] }
 0x914   : > { %v6555_v33 = vpop.eup %6554  ;;  %v3321_v61 = vpack.c.bf16 %v6553_v53, %v6549_v3  ;;  %3708 = vmatpush.bf16.msrb.mxu1 %v6261_v35 }
 0x915   : > { %6556 = vpow2.f32 %v3223_v60  ;;  %v3322_v20 = vpack.c.bf16 %v6555_v33, %v6551_v29  ;;  %v3280_v23 = vadd.f32 %v6555_v33, %v6553_v53 }
 0x916   : > { %6558 = vpow2.f32 %v3225_v4  ;;  %3348 = vmatmul.bf16.gmra.mxu1 %v3321_v61 }
 0x917   : > { %3397 = vmatmul.bf16.gmra.mxu2 %v3322_v20  ;;  %3281 = vadd.xlane.f32.xlu0 %v3280_v23 }
 0x918   : > { %v3144_v11 = vpop.xlane.xlu1 %3143 }
 0x919   : > { %v3185_v52 = vsub.f32 %v9253_v18, %v3144_v11  ;;  %v3186_v2 = vsub.f32 %v9267_v57, %v3144_v11 }
 0x91b   : > { %v6557_v42 = vpop.eup %6556  ;;  %v3227_v44 = vmul.f32 1.442695, %v3185_v52  ;;  %v3229_v0 = vmul.f32 1.442695, %v3186_v2 }
 0x91c   : > { %v6559_v19 = vpop.eup %6558 }
 0x91d   : > { %6560 = vpow2.f32 %v3227_v44  ;;  %v3283_v55 = vadd.f32 %v6559_v19, %v6557_v42 }
 0x91e   : > { %6562 = vpow2.f32 %v3229_v0 }
 0x91f   : > { %3284 = vadd.xlane.f32.xlu1 %v3283_v55 }
 0x920   : > { %v3147_v62 = vpop.xlane.xlu2 %3146 }
 0x921   : > { %v3187_v3 = vsub.f32 %v9259_v48, %v3147_v62  ;;  %v3188_v14 = vsub.f32 %v9271_v26, %v3147_v62 }
 0x923   : > { %v6561_v51 = vpop.eup %6560  ;;  %v3231_v29 = vmul.f32 1.442695, %v3187_v3  ;;  %v3233_v6 = vmul.f32 1.442695, %v3188_v14 }
 0x924   : > { %v6563_v9 = vpop.eup %6562  ;;  %v3323_v18 = vpack.c.bf16 %v6561_v51, %v6557_v42 }
 0x925   : > { %6564 = vpow2.f32 %v3231_v29  ;;  %v3324_v57 = vpack.c.bf16 %v6563_v9, %v6559_v19  ;;  %v3286_v39 = vadd.f32 %v6563_v9, %v6561_v51 }
 0x926   : > { %6566 = vpow2.f32 %v3233_v6  ;;  %3353 = vmatmul.bf16.gmra.mxu1 %v3323_v18 }
 0x927   : > { %3402 = vmatmul.bf16.gmra.mxu2 %v3324_v57  ;;  %3287 = vadd.xlane.f32.xlu2 %v3286_v39 }
 0x928   : > { %v3150_v53 = vpop.xlane.xlu0 %3149 }
 0x929   : > { %v3189_v48 = vsub.f32 %v9265_v32, %v3150_v53  ;;  %v3190_v26 = vsub.f32 %v9277_v59, %v3150_v53 }
 0x92b   : > { %v6565_v60 = vpop.eup %6564  ;;  %v3235_v4 = vmul.f32 1.442695, %v3189_v48  ;;  %v3237_v33 = vmul.f32 1.442695, %v3190_v26  ;;  %v6260_v26 = vld [vmem:[%s10693_s3 + $0x50] sm:$0xff] }
 0x92c   : > { %v6567_v61 = vpop.eup %6566  ;;  %3709 = vmatpush.bf16.msrb.mxu1 %v6260_v26 }
 0x92d   : > { %6568 = vpow2.f32 %v3235_v4  ;;  %v3289_v20 = vadd.f32 %v6567_v61, %v6565_v60 }
 0x92e   : > { %6570 = vpow2.f32 %v3237_v33 }
 0x92f   : > { %3290 = vadd.xlane.f32.xlu0 %v3289_v20 }
 0x930   : > { %v3153_v23 = vpop.xlane.xlu1 %3152 }
 0x931   : > { %v3191_v11 = vsub.f32 %v9275_v37, %v3153_v23  ;;  %v3192_v52 = vsub.f32 %v9283_v63, %v3153_v23 }
 0x933   : > { %v6569_v2 = vpop.eup %6568  ;;  %v3239_v42 = vmul.f32 1.442695, %v3191_v11  ;;  %v3241_v44 = vmul.f32 1.442695, %v3192_v52 }
 0x934   : > { %v6571_v32 = vpop.eup %6570  ;;  %v3325_v0 = vpack.c.bf16 %v6569_v2, %v6565_v60 }
 0x935   : > { %6572 = vpow2.f32 %v3239_v42  ;;  %v3326_v59 = vpack.c.bf16 %v6571_v32, %v6567_v61  ;;  %v3292_v19 = vadd.f32 %v6571_v32, %v6569_v2 }
 0x936   : > { %6574 = vpow2.f32 %v3241_v44  ;;  %3358 = vmatmul.bf16.gmra.mxu1 %v3325_v0 }
 0x937   : > { %3407 = vmatmul.bf16.gmra.mxu2 %v3326_v59  ;;  %3293 = vadd.xlane.f32.xlu1 %v3292_v19  ;;  %v6265_v19 = vld [vmem:[%s10695_s5 + $0x58] sm:$0xff] }
 0x938   : > { %v3156_v55 = vpop.xlane.xlu2 %3155  ;;  %3851 = vmatpush.bf16.msra.mxu2 %v6265_v19 }
 0x939   : > { %v3193_v62 = vsub.f32 %v9281_v36, %v3156_v55  ;;  %v3194_v3 = vsub.f32 %v9289_v49, %v3156_v55 }
 0x93b   : > { %v6573_v37 = vpop.eup %6572  ;;  %v3243_v14 = vmul.f32 1.442695, %v3193_v62  ;;  %v3245_v63 = vmul.f32 1.442695, %v3194_v3  ;;  %v6264_v62 = vld [vmem:[%s10695_s5 + $0x50] sm:$0xff] }
 0x93c   : > { %v6575_v51 = vpop.eup %6574  ;;  %3852 = vmatpush.bf16.msra.mxu2 %v6264_v62 }
 0x93d   : > { %6576 = vpow2.f32 %v3243_v14  ;;  %v3295_v29 = vadd.f32 %v6575_v51, %v6573_v37 }
 0x93e   : > { %6578 = vpow2.f32 %v3245_v63  ;;  %v6259_v63 = vld [vmem:[%s10693_s3 + $0x48] sm:$0xff] }
 0x93f   : > { %3296 = vadd.xlane.f32.xlu2 %v3295_v29  ;;  %v6263_v29 = vld [vmem:[%s10695_s5 + $0x48] sm:$0xff]  ;;  %3710 = vmatpush.bf16.msrb.mxu1 %v6259_v63 }
 0x940   : > { %v3159_v6 = vpop.xlane.xlu0 %3158  ;;  %3853 = vmatpush.bf16.msra.mxu2 %v6263_v29 }
 0x941   : > { %v3195_v9 = vsub.f32 %v9287_v47, %v3159_v6  ;;  %v3196_v18 = vsub.f32 %v9295_v58, %v3159_v6 }
 0x943   : > { %v6577_v57 = vpop.eup %6576  ;;  %v3247_v39 = vmul.f32 1.442695, %v3195_v9  ;;  %v3249_v35 = vmul.f32 1.442695, %v3196_v18  ;;  %v6258_v18 = vld [vmem:[%s10693_s3 + $0x40] sm:$0xff] }
 0x944   : > { %v6579_v53 = vpop.eup %6578  ;;  %v3327_v36 = vpack.c.bf16 %v6577_v57, %v6573_v37  ;;  %3711 = vmatpush.bf16.msrb.mxu1 %v6258_v18 }
 0x945   : > { %6580 = vpow2.f32 %v3247_v39  ;;  %v3328_v49 = vpack.c.bf16 %v6579_v53, %v6575_v51  ;;  %v3298_v48 = vadd.f32 %v6579_v53, %v6577_v57  ;;  %v6262_v57 = vld [vmem:[%s10695_s5 + $0x40] sm:$0xff] }
 0x946   : > { %6582 = vpow2.f32 %v3249_v35  ;;  %3363 = vmatmul.bf16.gmra.mxu1 %v3327_v36  ;;  %3854 = vmatpush.bf16.msra.mxu2 %v6262_v57 }
 0x947   : > { %3412 = vmatmul.bf16.gmra.mxu2 %v3328_v49  ;;  %3299 = vadd.xlane.f32.xlu0 %v3298_v48 }
 0x948   : > { %v3162_v60 = vpop.xlane.xlu1 %3161 }
 0x949   : > { %v3197_v47 = vsub.f32 %v9293_v43, %v3162_v60  ;;  %v3198_v58 = vsub.f32 %v9299_v17, %v3162_v60 }
 0x94b   : > { %v6581_v4 = vpop.eup %6580  ;;  %v3251_v33 = vmul.f32 1.442695, %v3197_v47  ;;  %v3253_v61 = vmul.f32 1.442695, %v3198_v58 }
 0x94c   : > { %v6583_v20 = vpop.eup %6582 }
 0x94d   : > { %6584 = vpow2.f32 %v3251_v33  ;;  %v3301_v23 = vadd.f32 %v6583_v20, %v6581_v4 }
 0x94e   : > { %6586 = vpow2.f32 %v3253_v61 }
 0x94f   : > { %3302 = vadd.xlane.f32.xlu1 %v3301_v23 }
 0x950   : > { %v3165_v11 = vpop.xlane.xlu2 %3164 }
 0x951   : > { %v3199_v52 = vsub.f32 %v9303_v8, %v3165_v11  ;;  %v3200_v2 = vsub.f32 %v9305_v10, %v3165_v11 }
 0x953   : > { %v6585_v42 = vpop.eup %6584  ;;  %v3255_v44 = vmul.f32 1.442695, %v3199_v52  ;;  %v3257_v32 = vmul.f32 1.442695, %v3200_v2  ;;  %v6253_v52 = vld [vmem:[%s10697_s7 + $0x8] sm:$0xff] }
 0x954   : > { %v6587_v43 = vpop.eup %6586  ;;  %v3329_v0 = vpack.c.bf16 %v6585_v42, %v6581_v4  ;;  %3513 = vmatpush.bf16.msrb.mxu3 %v6253_v52 }
 0x955   : > { %6588 = vpow2.f32 %v3255_v44  ;;  %v3330_v17 = vpack.c.bf16 %v6587_v43, %v6583_v20  ;;  %v3304_v59 = vadd.f32 %v6587_v43, %v6585_v42 }
 0x956   : > { %6590 = vpow2.f32 %v3257_v32  ;;  %3368 = vmatmul.bf16.gmra.mxu1 %v3329_v0 }
 0x957   : > { %3417 = vmatmul.bf16.gmra.mxu2 %v3330_v17  ;;  %3305 = vadd.xlane.f32.xlu2 %v3304_v59 }
 0x958   : > { %v3168_v55 = vpop.xlane.xlu0 %3167 }
 0x959   : > { %v3201_v8 = vsub.f32 %v9309_v31, %v3168_v55  ;;  %v3202_v10 = vsub.f32 %v9311_v50, %v3168_v55 }
 0x95b   : > { %v6589_v3 = vpop.eup %6588  ;;  %v3259_v37 = vmul.f32 1.442695, %v3201_v8  ;;  %v3261_v14 = vmul.f32 1.442695, %v3202_v10 }
 0x95c   : > { %v6591_v51 = vpop.eup %6590 }
 0x95d   : > { %6592 = vpow2.f32 %v3259_v37  ;;  %v3307_v31 = vadd.f32 %v6591_v51, %v6589_v3 }
 0x95e   : > { %6594 = vpow2.f32 %v3261_v14 }
 0x95f   : > { %3308 = vadd.xlane.f32.xlu0 %v3307_v31 }
 0x960   : > { %v3171_v50 = vpop.xlane.xlu1 %3170 }
 0x961   : > { %v3203_v6 = vsub.f32 %v9315_v25, %v3171_v50  ;;  %v3204_v9 = vsub.f32 %v9317_v40, %v3171_v50 }
 0x963   : > { %v6593_v39 = vpop.eup %6592  ;;  %v3263_v35 = vmul.f32 1.442695, %v3203_v6  ;;  %v3265_v53 = vmul.f32 1.442695, %v3204_v9 }
 0x964   : > { %v6595_v36 = vpop.eup %6594  ;;  %v3331_v49 = vpack.c.bf16 %v6593_v39, %v6589_v3 }
 0x965   : > { %6596 = vpow2.f32 %v3263_v35  ;;  %v3332_v48 = vpack.c.bf16 %v6595_v36, %v6591_v51  ;;  %v3310_v25 = vadd.f32 %v6595_v36, %v6593_v39 }
 0x966   : > { %6598 = vpow2.f32 %v3265_v53  ;;  %3373 = vmatmul.bf16.gmra.mxu1 %v3331_v49 }
 0x967   : > { %3422 = vmatmul.bf16.gmra.mxu2 %v3332_v48  ;;  %3311 = vadd.xlane.f32.xlu1 %v3310_v25 }
 0x968   : > { %v3174_v40 = vpop.xlane.xlu2 %3173 }
 0x969   : > { %v3205_v26 = vsub.f32 %v9322_v45, %v3174_v40  ;;  %v3206_v60 = vsub.f32 %v9324_v41, %v3174_v40 }
 0x96b   : > { %v6597_v47 = vpop.eup %6596  ;;  %v3267_v58 = vmul.f32 1.442695, %v3205_v26  ;;  %v3269_v4 = vmul.f32 1.442695, %v3206_v60 }
 0x96c   : > { %v6599_v33 = vpop.eup %6598 }
 0x96d   : > { %6600 = vpow2.f32 %v3267_v58  ;;  %v3313_v61 = vadd.f32 %v6599_v33, %v6597_v47 }
 0x96e   : > { %6602 = vpow2.f32 %v3269_v4 }
 0x96f   : > { %3314 = vadd.xlane.f32.xlu2 %v3313_v61 }
 0x972   : > { %v3273_v41 = vpop.xlane.xlu0 %3272 }
 0x973   : > { %v6601_v20 = vpop.eup %6600  ;;  %6604 = vrcp.f32 %v3273_v41 }
 0x974   : > { %v6603_v23 = vpop.eup %6602  ;;  %v3333_v11 = vpack.c.bf16 %v6601_v20, %v6597_v47 }
 0x975   : > { %v3334_v2 = vpack.c.bf16 %v6603_v23, %v6599_v33  ;;  %v3316_v42 = vadd.f32 %v6603_v23, %v6601_v20 }
 0x976   : > { %3378 = vmatmul.bf16.gmra.mxu1 %v3333_v11 }
 0x977   : > { %3427 = vmatmul.bf16.gmra.mxu2 %v3334_v2  ;;  %3317 = vadd.xlane.f32.xlu0 %v3316_v42 }
 0x979   : > { %v6605_v59 = vpop.eup %6604 }
 0x97a   : > { %v3276_v32 = vpop.xlane.xlu1 %3275 }
 0x97b   : > { %6606 = vrcp.f32 %v3276_v32 }
 0x981   : > { %v6607_v8 = vpop.eup %6606 }
 0x982   : > { %v3279_v37 = vpop.xlane.xlu2 %3278 }
 0x983   : > { %v3344_v45 = vpop.f32.mrf.mxu1  ;;  %6608 = vrcp.f32 %v3279_v37 }
 0x986   : > { %5993 = vmatmul.msk.bf16.vlgmr.msrb.gmra.mxu1 %vm407_vm0, %v10800_v28 }
 0x987   : > { %6034 = vmatmul.msk.bf16.vlgmr.msra.gmra.mxu2 %vm407_vm0, %v10800_v28 }
 0x989   : > { %v6609_v50 = vpop.eup %6608 }
 0x98a   : > { %v3393_v44 = vpop.f32.mrf.mxu2  ;;  %v3282_v63 = vpop.xlane.xlu0 %3281 }
 0x98b   : > { %v3346_v43 = vpop.f32.mrf.mxu1  ;;  %v3394_v0 = vadd.f32 %v3393_v44, %v3344_v45  ;;  %6610 = vrcp.f32 %v3282_v63 }
 0x98d   : > { %v3449_v10 = vmul.f32 %v6605_v59, %v3394_v0 }
 0x991   : > { %v6611_v18 = vpop.eup %6610 }
 0x992   : > { %v3395_v17 = vpop.f32.mrf.mxu2  ;;  %v3285_v53 = vpop.xlane.xlu1 %3284 }
 0x993   : > { %v3396_v19 = vadd.f32 %v3395_v17, %v3346_v43  ;;  %v3349_v55 = vpop.f32.mrf.mxu1  ;;  %6612 = vrcp.f32 %v3285_v53 }
 0x995   : > { %v3450_v62 = vmul.f32 %v6607_v8, %v3396_v19 }
 0x996   : > { %5994 = vmatmul.msk.bf16.gmra.mxu1 %vm407_vm0, %v10801_v15 }
 0x997   : > { %v3465_v3 = vpack.c.bf16 %v3450_v62, %v3449_v10  ;;  %6035 = vmatmul.msk.bf16.gmra.mxu2 %vm407_vm0, %v10801_v15 }
 0x999   : > { %5927 = vmatmul.msk.bf16.vlgmr.msrb.gmra.mxu3 %vm1962_vm5, %v3465_v3  ;;  %v6613_v26 = vpop.eup %6612 }
 0x99a   : > { %v3398_v14 = vpop.f32.mrf.mxu2  ;;  %v3288_v49 = vpop.xlane.xlu2 %3287 }
 0x99b   : > { %v3351_v51 = vpop.f32.mrf.mxu1  ;;  %v3399_v29 = vadd.f32 %v3398_v14, %v3349_v55  ;;  %6614 = vrcp.f32 %v3288_v49 }
 0x99d   : > { %v3451_v57 = vmul.f32 %v6609_v50, %v3399_v29 }
 0x9a1   : > { %v6615_v58 = vpop.eup %6614 }
 0x9a2   : > { %v3400_v31 = vpop.f32.mrf.mxu2  ;;  %v3291_v20 = vpop.xlane.xlu0 %3290 }
 0x9a3   : > { %v3401_v6 = vadd.f32 %v3400_v31, %v3351_v51  ;;  %v3354_v9 = vpop.f32.mrf.mxu1  ;;  %6616 = vrcp.f32 %v3291_v20  ;;  %v10829_v31 = vld [vmem:[#allocation8_spill] sm:$0xff] }
 0x9a5   : > { %v3452_v39 = vmul.f32 %v6611_v18, %v3401_v6 }
 0x9a6   : > { %5995 = vmatmul.msk.bf16.gmra.mxu1 %vm407_vm0, %v10802_v22 }
 0x9a7   : > { %v3466_v35 = vpack.c.bf16 %v3452_v39, %v3451_v57  ;;  %6036 = vmatmul.msk.bf16.gmra.mxu2 %vm407_vm0, %v10802_v22 }
 0x9a9   : > { %5928 = vmatmul.msk.bf16.gmra.mxu3 %vm1962_vm5, %v3466_v35  ;;  %v6617_v45 = vpop.eup %6616 }
 0x9aa   : > { %v3403_v36 = vpop.f32.mrf.mxu2  ;;  %v3294_v11 = vpop.xlane.xlu1 %3293 }
 0x9ab   : > { %v3356_v48 = vpop.f32.mrf.mxu1  ;;  %v3404_v25 = vadd.f32 %v3403_v36, %v3354_v9  ;;  %6618 = vrcp.f32 %v3294_v11 }
 0x9ad   : > { %v3453_v4 = vmul.f32 %v6613_v26, %v3404_v25  ;;  %v10830_v26 = vld [vmem:[#allocation10_spill] sm:$0xff] }
 0x9b1   : > { %v6619_v32 = vpop.eup %6618 }
 0x9b2   : > { %v3405_v40 = vpop.f32.mrf.mxu2  ;;  %v3297_v59 = vpop.xlane.xlu2 %3296 }
 0x9b3   : > { %v3406_v60 = vadd.f32 %v3405_v40, %v3356_v48  ;;  %v3359_v47 = vpop.f32.mrf.mxu1  ;;  %6620 = vrcp.f32 %v3297_v59 }
 0x9b5   : > { %v3454_v33 = vmul.f32 %v6615_v58, %v3406_v60 }
 0x9b6   : > { %5996 = vmatmul.msk.bf16.gmra.mxu1 %vm407_vm0, %v10803_v5 }
 0x9b7   : > { %v3467_v61 = vpack.c.bf16 %v3454_v33, %v3453_v4  ;;  %6037 = vmatmul.msk.bf16.gmra.mxu2 %vm407_vm0, %v10803_v5 }
 0x9b9   : > { %5929 = vmatmul.msk.bf16.gmra.mxu3 %vm1962_vm5, %v3467_v61  ;;  %v6621_v3 = vpop.eup %6620 }
 0x9ba   : > { %v3408_v23 = vpop.f32.mrf.mxu2  ;;  %v3300_v55 = vpop.xlane.xlu0 %3299 }
 0x9bb   : > { %v3361_v52 = vpop.f32.mrf.mxu1  ;;  %v3409_v2 = vadd.f32 %v3408_v23, %v3359_v47  ;;  %6622 = vrcp.f32 %v3300_v55 }
 0x9bd   : > { %v3455_v43 = vmul.f32 %v6617_v45, %v3409_v2 }
 0x9c1   : > { %v6623_v63 = vpop.eup %6622 }
 0x9c2   : > { %v3410_v42 = vpop.f32.mrf.mxu2  ;;  %v3303_v6 = vpop.xlane.xlu1 %3302 }
 0x9c3   : > { %v3411_v41 = vadd.f32 %v3410_v42, %v3361_v52  ;;  %v3364_v44 = vpop.f32.mrf.mxu1  ;;  %6624 = vrcp.f32 %v3303_v6 }
 0x9c5   : > { %v3456_v0 = vmul.f32 %v6619_v32, %v3411_v41  ;;  %v10831_v41 = vld [vmem:[#allocation11_spill] sm:$0xff] }
 0x9c6   : > { %5997 = vmatmul.msk.bf16.gmra.mxu1 %vm407_vm0, %v10804_v30 }
 0x9c7   : > { %v3468_v17 = vpack.c.bf16 %v3456_v0, %v3455_v43  ;;  %6038 = vmatmul.msk.bf16.gmra.mxu2 %vm407_vm0, %v10804_v30 }
 0x9c9   : > { %5930 = vmatmul.msk.bf16.gmra.mxu3 %vm1962_vm5, %v3468_v17  ;;  %v6625_v53 = vpop.eup %6624 }
 0x9ca   : > { %v3413_v19 = vpop.f32.mrf.mxu2  ;;  %v3306_v18 = vpop.xlane.xlu2 %3305 }
 0x9cb   : > { %v3366_v8 = vpop.f32.mrf.mxu1  ;;  %v3414_v10 = vadd.f32 %v3413_v19, %v3364_v44  ;;  %6626 = vrcp.f32 %v3306_v18 }
 0x9cd   : > { %v3457_v51 = vmul.f32 %v6621_v3, %v3414_v10 }
 0x9d1   : > { %v6627_v48 = vpop.eup %6626 }
 0x9d2   : > { %v3415_v62 = vpop.f32.mrf.mxu2  ;;  %v3309_v47 = vpop.xlane.xlu0 %3308 }
 0x9d3   : > { %v3416_v37 = vadd.f32 %v3415_v62, %v3366_v8  ;;  %v3369_v14 = vpop.f32.mrf.mxu1  ;;  %6628 = vrcp.f32 %v3309_v47 }
 0x9d5   : > { %v3458_v29 = vmul.f32 %v6623_v63, %v3416_v37 }
 0x9d6   : > { %5998 = vmatmul.msk.bf16.gmra.mxu1 %vm407_vm0, %v10829_v31 }
 0x9d7   : > { %v3469_v50 = vpack.c.bf16 %v3458_v29, %v3457_v51  ;;  %6039 = vmatmul.msk.bf16.gmra.mxu2 %vm407_vm0, %v10829_v31  ;;  %v9431_v51 = vld [vmem:[%s10694_s4 + $0x2] ss:$0 sm:$0xff] }
 0x9d9   : > { %5931 = vmatmul.msk.bf16.gmra.mxu3 %vm1962_vm5, %v3469_v50  ;;  %v6629_v23 = vpop.eup %6628 }
 0x9da   : > { %v3418_v9 = vpop.f32.mrf.mxu2  ;;  %v3312_v4 = vpop.xlane.xlu1 %3311 }
 0x9db   : > { %v3371_v57 = vpop.f32.mrf.mxu1  ;;  %v3419_v39 = vadd.f32 %v3418_v9, %v3369_v14  ;;  %6630 = vrcp.f32 %v3312_v4  ;;  %v10832_v14 = vld [vmem:[#allocation12_spill] sm:$0xff] }
 0x9dd   : > { %v3459_v25 = vmul.f32 %v6625_v53, %v3419_v39 }
 0x9e1   : > { %v6631_v2 = vpop.eup %6630 }
 0x9e2   : > { %v3420_v35 = vpop.f32.mrf.mxu2  ;;  %v3315_v32 = vpop.xlane.xlu2 %3314 }
 0x9e3   : > { %v3421_v36 = vadd.f32 %v3420_v35, %v3371_v57  ;;  %v3374_v49 = vpop.f32.mrf.mxu1  ;;  %6632 = vrcp.f32 %v3315_v32  ;;  %v9445_v57 = vld [vmem:[%s10696_s6 + $0x2] ss:$0 sm:$0xff]  ;;  %v9450_v35 = vld [vmem:[%s10698_s8] ss:$0 sm:$0xff] }
 0x9e5   : > { %v3460_v40 = vmul.f32 %v6627_v48, %v3421_v36 }
 0x9e6   : > { %5999 = vmatmul.msk.bf16.gmra.mxu1 %vm407_vm0, %v10830_v26 }
 0x9e7   : > { %v3470_v60 = vpack.c.bf16 %v3460_v40, %v3459_v25  ;;  %6040 = vmatmul.msk.bf16.gmra.mxu2 %vm407_vm0, %v10830_v26  ;;  %v10833_v25 = vld [vmem:[#allocation13_spill] sm:$0xff]  ;;  %v6829_v40 = vld [vmem:[%s6980_s21] sm:$0xff] }
 0x9e9   : > { %5932 = vmatmul.msk.bf16.gmra.mxu3 %vm1962_vm5, %v3470_v60  ;;  %v6633_v55 = vpop.eup %6632  ;;  %v1499_v60 = vadd.f32 %v6829_v40, %v9450_v35 }
 0x9ea   : > { %v3423_v58 = vpop.f32.mrf.mxu2  ;;  %v3318_v0 = vpop.xlane.xlu0 %3317 }
 0x9eb   : > { %v3376_v33 = vpop.f32.mrf.mxu1  ;;  %v3424_v61 = vadd.f32 %v3423_v58, %v3374_v49  ;;  %6634 = vrcp.f32 %v3318_v0  ;;  %v10834_v58 = vld [vmem:[#allocation9_spill] sm:$0xff]  ;;  %v10837_v0 = vld [vmem:[#allocation14_spill] sm:$0xff] }
 0x9ec   : > { %v2560_v4 = vadd.f32 %v10834_v58, %v1499_v60  ;;  %v10841_v58 = vld [vmem:[#allocation15_spill] sm:$0xff] }
 0x9ed   : > { %v3461_v42 = vmul.f32 %v6629_v23, %v3424_v61 }
 0x9f1   : > { %v6635_v62 = vpop.eup %6634 }
 0x9f2   : > { %v3425_v20 = vpop.f32.mrf.mxu2 }
 0x9f3   : > { %v3426_v11 = vadd.f32 %v3425_v20, %v3376_v33  ;;  %v3379_v52 = vpop.f32.mrf.mxu1 }
 0x9f5   : > { %v3462_v45 = vmul.f32 %v6631_v2, %v3426_v11 }
 0x9f6   : > { %6000 = vmatmul.msk.bf16.gmra.mxu1 %vm407_vm0, %v10831_v41 }
 0x9f7   : > { %v3471_v44 = vpack.c.bf16 %v3462_v45, %v3461_v42  ;;  %6041 = vmatmul.msk.bf16.gmra.mxu2 %vm407_vm0, %v10831_v41 }
 0x9f9   : > { %5933 = vmatmul.msk.bf16.gmra.mxu3 %vm1962_vm5, %v3471_v44 }
 0x9fa   : > { %v3428_v43 = vpop.f32.mrf.mxu2 }
 0x9fb   : > { %v3381_v17 = vpop.f32.mrf.mxu1  ;;  %v3429_v59 = vadd.f32 %v3428_v43, %v3379_v52  ;;  %v10847_v52 = vld [vmem:[#allocation17_spill] sm:$0xff] }
 0x9fd   : > { %v3463_v3 = vmul.f32 %v6633_v55, %v3429_v59  ;;  %v10838_v55 = vld [vmem:[#allocation4_spill] sm:$0xff] }
 0xa02   : > { %v3430_v19 = vpop.f32.mrf.mxu2 }
 0xa03   : > { %v3431_v8 = vadd.f32 %v3430_v19, %v3381_v17  ;;  %v3713_v10 = vpop.f32.mrf.mxu1  ;;  %v6830_v17 = vld [vmem:[%s6980_s21 + $0x10] sm:$0xff] }
 0xa04   : > { %v9435_v6 = vadd.f32 %v9431_v51, %v3713_v10  ;;  %v1501_v59 = vadd.f32 %v6830_v17, %v9450_v35 }
 0xa05   : > { %v3464_v37 = vmul.f32 %v6635_v62, %v3431_v8 }
 0xa06   : > { %6001 = vmatmul.msk.bf16.gmra.mxu1 %vm407_vm0, %v10832_v14  ;;  %v2562_v8 = vadd.f32 %v10838_v55, %v1501_v59 }
 0xa07   : > { %v3472_v63 = vpack.c.bf16 %v3464_v37, %v3463_v3  ;;  %6042 = vmatmul.msk.bf16.gmra.mxu2 %vm407_vm0, %v10832_v14 }
 0xa09   : > { %5934 = vmatmul.msk.bf16.gmra.mxu3 %vm1962_vm5, %v3472_v63 }
 0xa0a   : > { %v3856_v29 = vpop.f32.mrf.mxu2 }
 0xa0b   : > { %v3715_v50 = vpop.f32.mrf.mxu1  ;;  %v9453_v53 = vadd.f32 %v9445_v57, %v3856_v29  ;;  %v6833_v29 = vld [vmem:[%s6980_s21 + $0x40] sm:$0xff] }
 0xa0c   : > { %v9438_v9 = vadd.f32 %v9431_v51, %v3715_v50 }
 0xa12   : > { %v3858_v39 = vpop.f32.mrf.mxu2 }
 0xa13   : > { %v9456_v36 = vadd.f32 %v9445_v57, %v3858_v39  ;;  %v3718_v49 = vpop.f32.mrf.mxu1 }
 0xa14   : > { %v9468_v61 = vadd.f32 %v9431_v51, %v3718_v49 }
 0xa16   : > { %6002 = vmatmul.msk.bf16.gmra.mxu1 %vm407_vm0, %v10833_v25 }
 0xa17   : > { %6043 = vmatmul.msk.bf16.gmra.mxu2 %vm407_vm0, %v10833_v25 }
 0xa1a   : > { %v3861_v47 = vpop.f32.mrf.mxu2 }
 0xa1b   : > { %v3720_v33 = vpop.f32.mrf.mxu1  ;;  %v9478_v42 = vadd.f32 %v9445_v57, %v3861_v47 }
 0xa1c   : > { %v3515_v20 = vpop.f32.mrf.mxu3  ;;  %v9471_v23 = vadd.f32 %v9431_v51, %v3720_v33 }
 0xa1d   : > { %v9473_v11 = vadd.f32 %v3515_v20, %v2560_v4  ;;  %v6831_v4 = vld [vmem:[%s6980_s21 + $0x20] sm:$0xff] }
 0xa1e   : > { %v1503_v33 = vadd.f32 %v6831_v4, %v9450_v35 }
 0xa1f   : > { %10835 = vst [vmem:[#allocation8_spill] sm:$0xff] %v9473_v11 }
 0xa22   : > { %v3863_v2 = vpop.f32.mrf.mxu2 }
 0xa23   : > { %v9481_v45 = vadd.f32 %v9445_v57, %v3863_v2  ;;  %v3723_v44 = vpop.f32.mrf.mxu1  ;;  %v2564_v2 = vadd.f32 %v9099_v27, %v1503_v33  ;;  %v10844_v33 = vld [vmem:[#allocation16_spill] sm:$0xff] }
 0xa24   : > { %v9483_v32 = vpop.f32.mrf.mxu3  ;;  %v9495_v62 = vadd.f32 %v9431_v51, %v3723_v44 }
 0xa25   : > { %10836 = vst [vmem:[#allocation10_spill] sm:$0xff] %v9483_v32 }
 0xa26   : > { %6003 = vmatmul.msk.bf16.gmra.mxu1 %vm407_vm0, %v10837_v0 }
 0xa27   : > { %6044 = vmatmul.msk.bf16.gmra.mxu2 %vm407_vm0, %v10837_v0 }
 0xa2a   : > { %v3866_v19 = vpop.f32.mrf.mxu2 }
 0xa2b   : > { %v3725_v10 = vpop.f32.mrf.mxu1  ;;  %v9505_v39 = vadd.f32 %v9445_v57, %v3866_v19 }
 0xa2c   : > { %v3520_v3 = vpop.f32.mrf.mxu3  ;;  %v9498_v37 = vadd.f32 %v9431_v51, %v3725_v10 }
 0xa2d   : > { %v9500_v63 = vadd.f32 %v3520_v3, %v2562_v8 }
 0xa2f   : > { %10839 = vst [vmem:[#allocation11_spill] sm:$0xff] %v9500_v63 }
 0xa32   : > { %v3868_v50 = vpop.f32.mrf.mxu2 }
 0xa33   : > { %v9508_v49 = vadd.f32 %v9445_v57, %v3868_v50  ;;  %v3728_v40 = vpop.f32.mrf.mxu1 }
 0xa34   : > { %v9510_v60 = vpop.f32.mrf.mxu3  ;;  %v9522_v17 = vadd.f32 %v9431_v51, %v3728_v40 }
 0xa35   : > { %10840 = vst [vmem:[#allocation9_spill] sm:$0xff] %v9510_v60  ;;  %v6267_v60 = vld [vmem:[%s10691_s1 + $0x60] sm:$0xff] }
 0xa36   : > { %6004 = vmatmul.msk.bf16.gmra.mxu1 %vm407_vm0, %v10841_v58 }
 0xa37   : > { %6045 = vmatmul.msk.bf16.gmra.mxu2 %vm407_vm0, %v10841_v58  ;;  %v10853_v58 = vld [vmem:[#allocation19_spill] sm:$0xff] }
 0xa3a   : > { %v3871_v20 = vpop.f32.mrf.mxu2 }
 0xa3b   : > { %v3730_v44 = vpop.f32.mrf.mxu1  ;;  %v9532_v3 = vadd.f32 %v9445_v57, %v3871_v20 }
 0xa3c   : > { %v3525_v59 = vpop.f32.mrf.mxu3  ;;  %v9525_v19 = vadd.f32 %v9431_v51, %v3730_v44 }
 0xa3d   : > { %v9527_v55 = vadd.f32 %v3525_v59, %v2564_v2  ;;  %v6832_v2 = vld [vmem:[%s6980_s21 + $0x30] sm:$0xff] }
 0xa3e   : > { %v1505_v44 = vadd.f32 %v6832_v2, %v9450_v35  ;;  %v6270_v2 = vld [vmem:[%s10691_s1 + $0x78] sm:$0xff] }
 0xa3f   : > { %10842 = vst [vmem:[#allocation4_spill] sm:$0xff] %v9527_v55  ;;  %4608 = vmatpush.bf16.msrb.mxu2 %v6270_v2 }
 0xa40   : > { %v2566_v59 = vadd.f32 %v9149_v1, %v1505_v44  ;;  %v1507_v1 = vadd.f32 %v6833_v29, %v9450_v35  ;;  %v6269_v44 = vld [vmem:[%s10691_s1 + $0x70] sm:$0xff]  ;;  %v6268_v29 = vld [vmem:[%s10691_s1 + $0x68] sm:$0xff] }
 0xa42   : > { %v3873_v10 = vpop.f32.mrf.mxu2 }
 0xa43   : > { %v9535_v50 = vadd.f32 %v9445_v57, %v3873_v10  ;;  %v9537_v27 = vpop.f32.mrf.mxu1  ;;  %4609 = vmatpush.bf16.msrb.mxu2 %v6269_v44 }
 0xa44   : > { %v9539_v40 = vpop.f32.mrf.mxu3 }
 0xa45   : > { %10843 = vst [vmem:[#allocation24_spill] sm:$0xff] %v9539_v40 }
 0xa46   : > { %6005 = vmatmul.msk.bf16.gmra.mxu1 %vm407_vm0, %v10844_v33 }
 0xa47   : > { %6046 = vmatmul.msk.bf16.gmra.mxu2 %vm407_vm0, %v10844_v33 }
 0xa48   : > { %4610 = vmatpush.bf16.msrb.mxu2 %v6268_v29 }
 0xa4a   : > { %v9549_v20 = vpop.f32.mrf.mxu2 }
 0xa4b   : > { %v9552_v10 = vpop.f32.mrf.mxu1 }
 0xa4c   : > { %v3530_v48 = vpop.f32.mrf.mxu3  ;;  %4611 = vmatpush.bf16.msrb.mxu2 %v6267_v60 }
 0xa4d   : > { %v9554_v43 = vadd.f32 %v3530_v48, %v2566_v59  ;;  %v2568_v59 = vadd.f32 %v9186_v13, %v1507_v1  ;;  %v10850_v13 = vld [vmem:[#allocation18_spill] sm:$0xff] }
 0xa4f   : > { %10845 = vst [vmem:[#allocation25_spill] sm:$0xff] %v9554_v43 }
 0xa52   : > { %v9556_v47 = vpop.f32.mrf.mxu2 }
 0xa53   : > { %v3738_v4 = vpop.f32.mrf.mxu1 }
 0xa54   : > { %v9558_v18 = vpop.f32.mrf.mxu3 }
 0xa55   : > { %10846 = vst [vmem:[#allocation26_spill] sm:$0xff] %v9558_v18 }
 0xa56   : > { %6006 = vmatmul.msk.bf16.gmra.mxu1 %vm407_vm0, %v10847_v52 }
 0xa57   : > { %6047 = vmatmul.msk.bf16.gmra.mxu2 %vm407_vm0, %v10847_v52 }
 0xa5a   : > { %v9569_v48 = vpop.f32.mrf.mxu2 }
 0xa5b   : > { %v3740_v8 = vpop.f32.mrf.mxu1 }
 0xa5c   : > { %v3535_v18 = vpop.f32.mrf.mxu3 }
 0xa5d   : > { %v9575_v40 = vadd.f32 %v3535_v18, %v2568_v59  ;;  %v6834_v18 = vld [vmem:[%s6980_s21 + $0x50] sm:$0xff] }
 0xa5e   : > { %v1509_v1 = vadd.f32 %v6834_v18, %v9450_v35  ;;  %v6835_v18 = vld [vmem:[%s6980_s21 + $0x60] sm:$0xff] }
 0xa5f   : > { %10848 = vst [vmem:[#allocation27_spill] sm:$0xff] %v9575_v40  ;;  %v1511_v55 = vadd.f32 %v6835_v18, %v9450_v35 }
 0xa60   : > { %v2570_v59 = vadd.f32 %v9194_v12, %v1509_v1 }
 0xa61   : > { %v2572_v12 = vadd.f32 %v9204_v34, %v1511_v55 }
 0xa62   : > { %v9580_v2 = vpop.f32.mrf.mxu2 }
 0xa63   : > { %v3743_v32 = vpop.f32.mrf.mxu1 }
 0xa64   : > { %v9585_v52 = vpop.f32.mrf.mxu3 }
 0xa65   : > { %10849 = vst [vmem:[#allocation28_spill] sm:$0xff] %v9585_v52 }
 0xa66   : > { %6007 = vmatmul.msk.bf16.gmra.mxu1 %vm407_vm0, %v10850_v13 }
 0xa67   : > { %6048 = vmatmul.msk.bf16.gmra.mxu2 %vm407_vm0, %v10850_v13 }
 0xa6a   : > { %v9593_v44 = vpop.f32.mrf.mxu2 }
 0xa6b   : > { %v3745_v29 = vpop.f32.mrf.mxu1 }
 0xa6c   : > { %v3540_v40 = vpop.f32.mrf.mxu3  ;;  %v3746_v63 = vadd.f32 %v9431_v51, %v3745_v29 }
 0xa6d   : > { %v9596_v33 = vadd.f32 %v3540_v40, %v2570_v59 }
 0xa6f   : > { %10851 = vst [vmem:[#allocation29_spill] sm:$0xff] %v9596_v33 }
 0xa72   : > { %v9598_v43 = vpop.f32.mrf.mxu2 }
 0xa73   : > { %v3748_v60 = vpop.f32.mrf.mxu1 }
 0xa74   : > { %v9600_v52 = vpop.f32.mrf.mxu3  ;;  %v3749_v1 = vadd.f32 %v9431_v51, %v3748_v60  ;;  %v6836_v60 = vld [vmem:[%s6980_s21 + $0x70] sm:$0xff] }
 0xa75   : > { %10852 = vst [vmem:[#allocation30_spill] sm:$0xff] %v9600_v52  ;;  %v1513_v14 = vadd.f32 %v6836_v60, %v9450_v35  ;;  %v3618_v35 = vpop.f32.mrf.mxu0 }
 0xa76   : > { %6008 = vmatmul.msk.bf16.gmra.mxu1 %vm407_vm0, %v10853_v58 }
 0xa77   : > { %6049 = vmatmul.msk.bf16.gmra.mxu2 %vm407_vm0, %v10853_v58  ;;  %v3744_v58 = vadd.f32 %v9431_v51, %v3743_v32 }
 0xa79   : > { %v3799_v55 = vpack.c.bf16 %v3746_v63, %v3744_v58 }
 0xa7a   : > { %v9608_v13 = vpop.f32.mrf.mxu2 }
 0xa7b   : > { %v3750_v40 = vpop.f32.mrf.mxu1  ;;  %v3995_v29 = vsel %vm1962_vm5, %v3799_v55, 0 }
 0xa7c   : > { %v3545_v59 = vpop.f32.mrf.mxu3  ;;  %v3751_v52 = vadd.f32 %v9431_v51, %v3750_v40 }
 0xa7d   : > { %v9613_v33 = vadd.f32 %v3545_v59, %v2572_v12  ;;  %v2574_v12 = vadd.f32 %v9220_v38, %v1513_v14  ;;  %v3734_v59 = vadd.f32 %v9431_v51, %v9537_v27  ;;  %v3620_v27 = vpop.f32.mrf.mxu0 }
 0xa7e   : > { %v3800_v0 = vpack.c.bf16 %v3751_v52, %v3749_v1  ;;  %v3741_v52 = vadd.f32 %v9431_v51, %v3740_v8 }
 0xa80   : > { %v3998_v18 = vsel %vm1962_vm5, %v3800_v0, 0  ;;  %v3739_v0 = vadd.f32 %v9431_v51, %v3738_v4 }
 0xa81   : > { %4024 = vmatpush.bf16.xpose.msra.mxu3 %v3998_v18 }
 0xa82   : > { %v3893_v25 = vpop.f32.mrf.mxu2  ;;  %v3798_v63 = vpack.c.bf16 %v3741_v52, %v3739_v0  ;;  %v10854_v0 = vpack.c.bf16 %v9525_v19, %v9522_v17  ;;  %v10855_v17 = vpack.c.bf16 %v9498_v37, %v9495_v62 }
 0xa83   : > { %v9618_v11 = vpop.f32.mrf.mxu1  ;;  %v3894_v37 = vadd.f32 %v9445_v57, %v3893_v25  ;;  %v10857_v25 = vpack.c.bf16 %v9438_v9, %v9435_v6  ;;  %v3882_v6 = vadd.f32 %v9445_v57, %v9569_v48  ;;  %v3879_v9 = vadd.f32 %v9445_v57, %v9556_v47 }
 0xa84   : > { %v9620_v34 = vpop.f32.mrf.mxu3  ;;  %v3992_v8 = vsel %vm1962_vm5, %v3798_v63, 0  ;;  %v3983_v19 = vsel %vm1962_vm5, %v10855_v17, 0 }
 0xa87   : > { %6105 = vmatmul.msk.bf16.vlgmr.msrb.gmra.mxu2 %vm407_vm0, %v8257_v16  ;;  %v3736_v16 = vadd.f32 %v9431_v51, %v9552_v10 }
 0xa89   : > { %4025 = vmatpush.bf16.xpose.msra.mxu3 %v3995_v29  ;;  %v3797_v55 = vpack.c.bf16 %v3736_v16, %v3734_v59  ;;  %v3623_v16 = vpop.f32.mrf.mxu0 }
 0xa8a   : > { %v3896_v32 = vpop.f32.mrf.mxu2 }
 0xa8b   : > { %v9630_v40 = vpop.f32.mrf.mxu1  ;;  %v9640_v18 = vadd.f32 %v9445_v57, %v3896_v32  ;;  %v3989_v10 = vsel %vm1962_vm5, %v3797_v55, 0  ;;  %v3986_v32 = vsel %vm1962_vm5, %v10854_v0, 0 }
 0xa8c   : > { %v3550_v1 = vpop.f32.mrf.mxu3 }
 0xa8d   : > { %v9632_v58 = vadd.f32 %v3550_v1, %v2574_v12 }
 0xa91   : > { %4026 = vmatpush.bf16.xpose.msra.mxu3 %v3992_v8  ;;  %v3625_v55 = vpop.f32.mrf.mxu0 }
 0xa92   : > { %v3898_v4 = vpop.f32.mrf.mxu2 }
 0xa93   : > { %v9643_v38 = vadd.f32 %v9445_v57, %v3898_v4  ;;  %v9645_v14 = vpop.f32.mrf.mxu1 }
 0xa97   : > { %6106 = vmatmul.msk.bf16.gmra.mxu2 %vm407_vm0, %v8308_v7 }
 0xa99   : > { %4027 = vmatpush.bf16.xpose.msra.mxu3 %v3989_v10  ;;  %v10856_v10 = vpack.c.bf16 %v9471_v23, %v9468_v61  ;;  %v3892_v61 = vadd.f32 %v9445_v57, %v9608_v13  ;;  %v9698_v23 = vld [vmem:[%s10692_s2 + $0x2] ss:$0 sm:$0xff]  ;;  %v3628_v17 = vpop.f32.mrf.mxu0 }
 0xa9a   : > { %v3901_v52 = vpop.f32.mrf.mxu2  ;;  %v3621_v13 = vadd.f32 %v9698_v23, %v3620_v27  ;;  %v3619_v60 = vadd.f32 %v9698_v23, %v3618_v35  ;;  %v3877_v35 = vadd.f32 %v9445_v57, %v9549_v20  ;;  %v3626_v20 = vadd.f32 %v9698_v23, %v3625_v55 }
 0xa9b   : > { %v9652_v29 = vpop.f32.mrf.mxu1  ;;  %v9659_v1 = vadd.f32 %v9445_v57, %v3901_v52  ;;  %v3980_v52 = vsel %vm1962_vm5, %v10856_v10, 0  ;;  %v3977_v10 = vsel %vm1962_vm5, %v10857_v25, 0  ;;  %v10858_v25 = vpack.c.bf16 %v9535_v50, %v9532_v3 }
 0xa9c   : > { %v10861_v50 = vpack.c.bf16 %v9456_v36, %v9453_v53 }
 0xaa1   : > { %4028 = vmatpush.bf16.xpose.msra.mxu3 %v3986_v32  ;;  %v3630_v27 = vpop.f32.mrf.mxu0 }
 0xaa2   : > { %v3903_v12 = vpop.f32.mrf.mxu2 }
 0xaa3   : > { %v9662_v63 = vadd.f32 %v9445_v57, %v3903_v12  ;;  %v9664_v7 = vpop.f32.mrf.mxu1 }
 0xaa5   : > { %v3945_v8 = vpack.c.bf16 %v9662_v63, %v9659_v1 }
 0xaa7   : > { %6107 = vmatmul.msk.bf16.gmra.mxu2 %vm407_vm0, %v8331_v46 }
 0xaa9   : > { %4029 = vmatpush.bf16.xpose.msra.mxu3 %v3983_v19  ;;  %v3889_v19 = vadd.f32 %v9445_v57, %v9598_v43  ;;  %v3884_v43 = vadd.f32 %v9445_v57, %v9580_v2 }
 0xaaa   : > { %v3906_v59 = vpop.f32.mrf.mxu2 }
 0xaab   : > { %v9674_v4 = vpop.f32.mrf.mxu1  ;;  %v9681_v32 = vadd.f32 %v9445_v57, %v3906_v59  ;;  %v3943_v59 = vpack.c.bf16 %v3894_v37, %v3892_v61  ;;  %v9714_v61 = vpack.c.bf16 %v3621_v13, %v3619_v60  ;;  %v3624_v13 = vadd.f32 %v9698_v23, %v3623_v16 }
 0xaac   : > { %v3631_v16 = vadd.f32 %v9698_v23, %v3630_v27 }
 0xab1   : > { %4030 = vmatpush.bf16.xpose.msra.mxu3 %v3980_v52 }
 0xab2   : > { %v3908_v0 = vpop.f32.mrf.mxu2 }
 0xab3   : > { %v9684_v46 = vadd.f32 %v9445_v57, %v3908_v0  ;;  %v9686_v62 = vpop.f32.mrf.mxu1 }
 0xab5   : > { %v3946_v12 = vpack.c.bf16 %v9684_v46, %v9681_v32  ;;  %v9864_v32 = vpop.f32.mrf.mxu3 }
 0xab7   : > { %6108 = vmatmul.msk.bf16.gmra.mxu2 %vm407_vm0, %v8403_v56  ;;  %v3887_v56 = vadd.f32 %v9445_v57, %v9593_v44  ;;  %v3941_v44 = vpack.c.bf16 %v3884_v43, %v3882_v6  ;;  %v10859_v43 = vpack.c.bf16 %v9508_v49, %v9505_v39  ;;  %v3629_v49 = vadd.f32 %v9698_v23, %v3628_v17 }
 0xab9   : > { %4031 = vmatpush.bf16.xpose.msra.mxu3 %v3977_v10  ;;  %v3942_v37 = vpack.c.bf16 %v3889_v19, %v3887_v56  ;;  %v3940_v19 = vpack.c.bf16 %v3879_v9, %v3877_v35  ;;  %v3633_v56 = vpop.f32.mrf.mxu0 }
 0xaba   : > { %v3911_v52 = vpop.f32.mrf.mxu2  ;;  %v3634_v9 = vadd.f32 %v9698_v23, %v3633_v56 }
 0xabb   : > { %v9709_v0 = vpop.f32.mrf.mxu1  ;;  %v9725_v2 = vadd.f32 %v9445_v57, %v3911_v52  ;;  %v9741_v52 = vpack.c.bf16 %v3626_v20, %v3624_v13 }
 0xac0   : > { %6050 = vmatmul.msk.bf16.vlgmr.msra.gmra.mxu3 %vm1962_vm5, %v9714_v61 }
 0xac1   : > { %4330 = vmatpush.bf16.msrb.mxu3 %v3943_v59  ;;  %v3635_v3 = vpop.f32.mrf.mxu0 }
 0xac2   : > { %v3913_v59 = vpop.f32.mrf.mxu2  ;;  %v3636_v53 = vadd.f32 %v9698_v23, %v3635_v3 }
 0xac3   : > { %v9728_v60 = vadd.f32 %v9445_v57, %v3913_v59  ;;  %v9730_v48 = vpop.f32.mrf.mxu1  ;;  %v10862_v59 = vld [vmem:[#allocation2_spill] sm:$0xff] }
 0xac4   : > { %10864 = vst [vmem:[#allocation2_spill] sm:$0xff] %v9864_v32 }
 0xac5   : > { %4331 = vmatpush.bf16.msrb.mxu3 %v3942_v37  ;;  %v3947_v47 = vpack.c.bf16 %v9728_v60, %v9725_v2  ;;  %v9758_v37 = vpack.c.bf16 %v3631_v16, %v3629_v49 }
 0xac7   : > { %6109 = vmatmul.msk.bf16.gmra.mxu2 %vm407_vm0, %v8447_v54  ;;  %v10860_v54 = vpack.c.bf16 %v9481_v45, %v9478_v42 }
 0xac9   : > { %4332 = vmatpush.bf16.msrb.mxu3 %v3941_v44  ;;  %v3638_v6 = vpop.f32.mrf.mxu0  ;;  %v9768_v44 = vpack.c.bf16 %v3636_v53, %v3634_v9 }
 0xaca   : > { %v9765_v45 = vpop.f32.mrf.mxu2  ;;  %v3639_v20 = vadd.f32 %v9698_v23, %v3638_v6 }
 0xacb   : > { %v3775_v10 = vpop.f32.mrf.mxu1 }
 0xacd   : > { %4333 = vmatpush.bf16.msrb.mxu3 %v3940_v19 }
 0xad0   : > { %6051 = vmatmul.msk.bf16.gmra.mxu3 %vm1962_vm5, %v9741_v52 }
 0xad1   : > { %4334 = vmatpush.bf16.msrb.mxu3 %v10858_v25  ;;  %v3640_v36 = vpop.f32.mrf.mxu0 }
 0xad2   : > { %v9772_v35 = vpop.f32.mrf.mxu2 }
 0xad3   : > { %v3778_v55 = vpop.f32.mrf.mxu1 }
 0xad5   : > { %4335 = vmatpush.bf16.msrb.mxu3 %v10859_v43 }
 0xad7   : > { %6110 = vmatmul.msk.bf16.gmra.mxu2 %vm407_vm0, %v8466_v21 }
 0xad9   : > { %4336 = vmatpush.bf16.msrb.mxu3 %v10860_v54  ;;  %v3643_v27 = vpop.f32.mrf.mxu0 }
 0xada   : > { %v9782_v3 = vpop.f32.mrf.mxu2 }
 0xadb   : > { %v3780_v39 = vpop.f32.mrf.mxu1 }
 0xadc   : > { %v3781_v53 = vadd.f32 %v9431_v51, %v3780_v39 }
 0xadd   : > { %4337 = vmatpush.bf16.msrb.mxu3 %v10861_v50 }
 0xae0   : > { %6052 = vmatmul.msk.bf16.gmra.mxu3 %vm1962_vm5, %v9758_v37 }
 0xae1   : > { %v3645_v54 = vpop.f32.mrf.mxu0 }
 0xae3   : > { %v3783_v42 = vpop.f32.mrf.mxu1 }
 0xae4   : > { %v3784_v49 = vadd.f32 %v9431_v51, %v3783_v42  ;;  %v3774_v42 = vadd.f32 %v9431_v51, %v9730_v48 }
 0xae7   : > { %6111 = vmatmul.msk.bf16.gmra.mxu2 %vm407_vm0, %v8479_v24  ;;  %v3641_v24 = vadd.f32 %v9698_v23, %v3640_v36 }
 0xae9   : > { %v9780_v56 = vpack.c.bf16 %v3641_v24, %v3639_v20  ;;  %v3648_v9 = vpop.f32.mrf.mxu0  ;;  %v3644_v24 = vadd.f32 %v9698_v23, %v3643_v27 }
 0xaeb   : > { %v3785_v21 = vpop.f32.mrf.mxu1 }
 0xaec   : > { %v3786_v50 = vadd.f32 %v9431_v51, %v3785_v21  ;;  %v3779_v21 = vadd.f32 %v9431_v51, %v3778_v55  ;;  %v3771_v55 = vadd.f32 %v9431_v51, %v9709_v0 }
 0xaee   : > { %v3807_v6 = vpack.c.bf16 %v3786_v50, %v3784_v49  ;;  %v3769_v50 = vadd.f32 %v9431_v51, %v9686_v62 }
 0xaf0   : > { %6053 = vmatmul.msk.bf16.gmra.mxu3 %vm1962_vm5, %v9768_v44  ;;  %v4019_v36 = vsel %vm1962_vm5, %v3807_v6, 0  ;;  %v3804_v49 = vpack.c.bf16 %v3771_v55, %v3769_v50  ;;  %v3754_v55 = vadd.f32 %v9431_v51, %v9618_v11  ;;  %v3919_v11 = vadd.f32 %v9445_v57, %v9772_v35 }
 0xaf2   : > { %v4010_v0 = vsel %vm1962_vm5, %v3804_v49, 0 }
 0xaf3   : > { %v3788_v17 = vpop.f32.mrf.mxu1 }
 0xaf4   : > { %v3789_v25 = vadd.f32 %v9431_v51, %v3788_v17  ;;  %v3923_v17 = vpop.f32.mrf.mxu2 }
 0xaf5   : > { %v3924_v49 = vadd.f32 %v9445_v57, %v3923_v17 }
 0xaf7   : > { %6112 = vmatmul.msk.bf16.gmra.mxu2 %vm407_vm0, %v10862_v59  ;;  %v3646_v59 = vadd.f32 %v9698_v23, %v3645_v54 }
 0xaf9   : > { %v9794_v20 = vpack.c.bf16 %v3646_v59, %v3644_v24  ;;  %v3764_v59 = vadd.f32 %v9431_v51, %v9664_v7  ;;  %v3756_v7 = vadd.f32 %v9431_v51, %v9630_v40 }
 0xafb   : > { %v3790_v19 = vpop.f32.mrf.mxu1 }
 0xafc   : > { %v3791_v13 = vadd.f32 %v9431_v51, %v3790_v19  ;;  %v3806_v19 = vpack.c.bf16 %v3781_v53, %v3779_v21 }
 0xafe   : > { %v3808_v43 = vpack.c.bf16 %v3791_v13, %v3789_v25  ;;  %v3776_v25 = vadd.f32 %v9431_v51, %v3775_v10  ;;  %v4016_v39 = vsel %vm1962_vm5, %v3806_v19, 0  ;;  %v3650_v13 = vpop.f32.mrf.mxu0 }
 0xaff   : > { %v3651_v10 = vadd.f32 %v9698_v23, %v3650_v13 }
 0xb00   : > { %6054 = vmatmul.msk.bf16.gmra.mxu3 %vm1962_vm5, %v9780_v56  ;;  %v4022_v16 = vsel %vm1962_vm5, %v3808_v43, 0  ;;  %v3926_v43 = vpop.f32.mrf.mxu2  ;;  %v3805_v54 = vpack.c.bf16 %v3776_v25, %v3774_v42 }
 0xb01   : > { %4073 = vmatpush.bf16.xpose.msra.mxu0 %v4022_v16  ;;  %v3649_v16 = vadd.f32 %v9698_v23, %v3648_v9  ;;  %v3761_v9 = vadd.f32 %v9431_v51, %v9652_v29  ;;  %v3927_v40 = vadd.f32 %v9445_v57, %v3926_v43 }
 0xb02   : > { %v4013_v27 = vsel %vm1962_vm5, %v3805_v54, 0 }
 0xb03   : > { %v3664_v48 = vpack.c.bf16 %v3651_v10, %v3649_v16  ;;  %v3801_v10 = vpack.c.bf16 %v3756_v7, %v3754_v55 }
 0xb05   : > { %v4001_v16 = vsel %vm1962_vm5, %v3801_v10, 0 }
 0xb06   : > { %v3653_v6 = vpop.f32.mrf.mxu0 }
 0xb08   : > { %v3928_v53 = vpop.f32.mrf.mxu2 }
 0xb09   : > { %4074 = vmatpush.bf16.xpose.msra.mxu0 %v4019_v36  ;;  %v3766_v36 = vadd.f32 %v9431_v51, %v9674_v4  ;;  %v3759_v4 = vadd.f32 %v9431_v51, %v9645_v14  ;;  %v3922_v51 = vadd.f32 %v9445_v57, %v9782_v3 }
 0xb0b   : > { %v3803_v21 = vpack.c.bf16 %v3766_v36, %v3764_v59  ;;  %v3802_v42 = vpack.c.bf16 %v3761_v9, %v3759_v4  ;;  %v3949_v36 = vpack.c.bf16 %v3924_v49, %v3922_v51 }
 0xb0d   : > { %v4007_v19 = vsel %vm1962_vm5, %v3803_v21, 0  ;;  %v4004_v54 = vsel %vm1962_vm5, %v3802_v42, 0 }
 0xb0e   : > { %v3655_v24 = vpop.f32.mrf.mxu0 }
 0xb0f   : > { %v3656_v25 = vadd.f32 %v9698_v23, %v3655_v24 }
 0xb10   : > { %6055 = vmatmul.msk.bf16.gmra.mxu3 %vm1962_vm5, %v9794_v20  ;;  %v3931_v62 = vpop.f32.mrf.mxu2 }
 0xb11   : > { %4075 = vmatpush.bf16.xpose.msra.mxu0 %v4016_v39  ;;  %v3654_v39 = vadd.f32 %v9698_v23, %v3653_v6  ;;  %v3932_v14 = vadd.f32 %v9445_v57, %v3931_v62  ;;  %v3929_v23 = vadd.f32 %v9445_v57, %v3928_v53  ;;  %v3917_v53 = vadd.f32 %v9445_v57, %v9765_v45 }
 0xb13   : > { %v3665_v13 = vpack.c.bf16 %v3656_v25, %v3654_v39  ;;  %v3950_v6 = vpack.c.bf16 %v3929_v23, %v3927_v40  ;;  %v3948_v43 = vpack.c.bf16 %v3919_v11, %v3917_v53 }
 0xb18   : > { %v3933_v29 = vpop.f32.mrf.mxu2 }
 0xb19   : > { %4076 = vmatpush.bf16.xpose.msra.mxu0 %v4013_v27  ;;  %v3934_v27 = vadd.f32 %v9445_v57, %v3933_v29  ;;  %v10863_v57 = vpack.c.bf16 %v9643_v38, %v9640_v18 }
 0xb1b   : > { %v3951_v50 = vpack.c.bf16 %v3934_v27, %v3932_v14 }
 0xb20   : > { %6056 = vmatmul.msk.bf16.gmra.mxu3 %vm1962_vm5, %v3664_v48 }
 0xb21   : > { %4077 = vmatpush.bf16.xpose.msra.mxu0 %v4010_v0 }
 0xb29   : > { %4078 = vmatpush.bf16.xpose.msra.mxu0 %v4007_v19 }
 0xb30   : > { %6057 = vmatmul.msk.bf16.gmra.mxu3 %vm1962_vm5, %v3665_v13 }
 0xb31   : > { %4079 = vmatpush.bf16.xpose.msra.mxu0 %v4004_v54 }
 0xb39   : > { %4080 = vmatpush.bf16.xpose.msra.mxu0 %v4001_v16 }
 0xb40   : > { %6058 = vmatmul.msk.bf16.vlgmr.msra.gmra.mxu0 %vm1962_vm5, %v9714_v61 }
 0xb41   : > { %4379 = vmatpush.bf16.msrb.mxu0 %v3951_v50 }
 0xb43   : > { %v9866_v1 = vpop.f32.mrf.mxu3 }
 0xb45   : > { %4380 = vmatpush.bf16.msrb.mxu0 %v3950_v6 }
 0xb49   : > { %4381 = vmatpush.bf16.msrb.mxu0 %v3949_v36 }
 0xb4b   : > { %v9869_v18 = vpop.f32.mrf.mxu3 }
 0xb4d   : > { %4382 = vmatpush.bf16.msrb.mxu0 %v3948_v43 }
 0xb50   : > { %6059 = vmatmul.msk.bf16.gmra.mxu0 %vm1962_vm5, %v9741_v52 }
 0xb51   : > { %4383 = vmatpush.bf16.msrb.mxu0 %v3947_v47 }
 0xb53   : > { %v9872_v38 = vpop.f32.mrf.mxu3 }
 0xb55   : > { %4384 = vmatpush.bf16.msrb.mxu0 %v3946_v12 }
 0xb59   : > { %4385 = vmatpush.bf16.msrb.mxu0 %v3945_v8 }
 0xb5b   : > { %v9874_v63 = vpop.f32.mrf.mxu3 }
 0xb5d   : > { %4386 = vmatpush.bf16.msrb.mxu0 %v10863_v57 }
 0xb60   : > { %6060 = vmatmul.msk.bf16.gmra.mxu0 %vm1962_vm5, %v9758_v37 }
 0xb63   : > { %v9881_v2 = vpop.f32.mrf.mxu3 }
 0xb6b   : > { %v9887_v52 = vpop.f32.mrf.mxu3 }
 0xb70   : > { %6061 = vmatmul.msk.bf16.gmra.mxu0 %vm1962_vm5, %v9768_v44 }
 0xb73   : > { %v9893_v44 = vpop.f32.mrf.mxu3 }
 0xb7b   : > { %v9899_v3 = vpop.f32.mrf.mxu3 }
 0xb80   : > { %6062 = vmatmul.msk.bf16.gmra.mxu0 %vm1962_vm5, %v9780_v56 }
 0xb83   : > { %v9909_v59 = vpop.f32.mrf.mxu3 }
 0xb8b   : > { %v9915_v62 = vpop.f32.mrf.mxu3 }
 0xb90   : > { %6063 = vmatmul.msk.bf16.gmra.mxu0 %vm1962_vm5, %v9794_v20 }
 0xb93   : > { %v9921_v25 = vpop.f32.mrf.mxu3 }
 0xb9b   : > { %v9927_v42 = vpop.f32.mrf.mxu3 }
 0xba0   : > { %6064 = vmatmul.msk.bf16.gmra.mxu0 %vm1962_vm5, %v3664_v48 }
 0xba3   : > { %v9937_v55 = vpop.f32.mrf.mxu3 }
 0xbab   : > { %v9943_v14 = vpop.f32.mrf.mxu3 }
 0xbb0   : > { %6065 = vmatmul.msk.bf16.gmra.mxu0 %vm1962_vm5, %v3665_v13 }
 0xbb3   : > { %v9949_v16 = vpop.f32.mrf.mxu3 }
 0xbbb   : > { %v9956_v36 = vpop.f32.mrf.mxu3 }
 0xbbd   : > { %v4082_v8 = vpop.f32.mrf.mxu0 }
 0xbbe   : > { %v4122_v46 = vmax.f32 %v9866_v1, %v4082_v8 }
 0xbc0   : > { %4123 = vmax.xlane.f32.xlu1 %v4122_v46 }
 0xbc5   : > { %v9877_v12 = vpop.f32.mrf.mxu0 }
 0xbc6   : > { %v4125_v61 = vmax.f32 %v9869_v18, %v9877_v12 }
 0xbc8   : > { %4126 = vmax.xlane.f32.xlu2 %v4125_v61 }
 0xbcd   : > { %v9883_v60 = vpop.f32.mrf.mxu0 }
 0xbce   : > { %v4128_v47 = vmax.f32 %v9872_v38, %v9883_v60 }
 0xbd0   : > { %4129 = vmax.xlane.f32.xlu0 %v4128_v47 }
 0xbd5   : > { %v9889_v37 = vpop.f32.mrf.mxu0 }
 0xbd6   : > { %v4131_v45 = vmax.f32 %v9874_v63, %v9889_v37 }
 0xbd8   : > { %4132 = vmax.xlane.f32.xlu1 %v4131_v45 }
 0xbdd   : > { %v9895_v35 = vpop.f32.mrf.mxu0 }
 0xbde   : > { %v4134_v56 = vmax.f32 %v9881_v2, %v9895_v35 }
 0xbe0   : > { %4135 = vmax.xlane.f32.xlu2 %v4134_v56 }
 0xbe5   : > { %v9901_v17 = vpop.f32.mrf.mxu0 }
 0xbe6   : > { %v4137_v20 = vmax.f32 %v9887_v52, %v9901_v17 }
 0xbe8   : > { %4138 = vmax.xlane.f32.xlu0 %v4137_v20 }
 0xbed   : > { %v9905_v48 = vpop.f32.mrf.mxu0 }
 0xbee   : > { %v4140_v0 = vmax.f32 %v9893_v44, %v9905_v48 }
 0xbf0   : > { %4141 = vmax.xlane.f32.xlu1 %v4140_v0 }
 0xbf5   : > { %v9911_v21 = vpop.f32.mrf.mxu0 }
 0xbf6   : > { %v4143_v24 = vmax.f32 %v9899_v3, %v9911_v21 }
 0xbf8   : > { %4144 = vmax.xlane.f32.xlu2 %v4143_v24 }
 0xbfd   : > { %v9917_v9 = vpop.f32.mrf.mxu0 }
 0xbfe   : > { %v4146_v19 = vmax.f32 %v9909_v59, %v9917_v9 }
 0xc00   : > { %4147 = vmax.xlane.f32.xlu0 %v4146_v19 }
 0xc05   : > { %v9923_v4 = vpop.f32.mrf.mxu0 }
 0xc06   : > { %v4149_v39 = vmax.f32 %v9915_v62, %v9923_v4 }
 0xc08   : > { %4150 = vmax.xlane.f32.xlu1 %v4149_v39 }
 0xc0d   : > { %v9929_v13 = vpop.f32.mrf.mxu0 }
 0xc0e   : > { %v4152_v7 = vmax.f32 %v9921_v25, %v9929_v13 }
 0xc10   : > { %4153 = vmax.xlane.f32.xlu2 %v4152_v7 }
 0xc15   : > { %v9933_v54 = vpop.f32.mrf.mxu0 }
 0xc16   : > { %v4155_v29 = vmax.f32 %v9927_v42, %v9933_v54 }
 0xc18   : > { %4156 = vmax.xlane.f32.xlu0 %v4155_v29 }
 0xc1d   : > { %v9939_v27 = vpop.f32.mrf.mxu0 }
 0xc1e   : > { %v4158_v10 = vmax.f32 %v9937_v55, %v9939_v27 }
 0xc20   : > { %4159 = vmax.xlane.f32.xlu1 %v4158_v10 }
 0xc25   : > { %v9945_v23 = vpop.f32.mrf.mxu0 }
 0xc26   : > { %v4161_v50 = vmax.f32 %v9943_v14, %v9945_v23 }
 0xc28   : > { %4162 = vmax.xlane.f32.xlu2 %v4161_v50 }
 0xc2d   : > { %v9951_v40 = vpop.f32.mrf.mxu0 }
 0xc2e   : > { %v4164_v49 = vmax.f32 %v9949_v16, %v9951_v40 }
 0xc30   : > { %4165 = vmax.xlane.f32.xlu0 %v4164_v49 }
 0xc33   : > { %v4124_v6 = vpop.xlane.xlu1 %4123 }
 0xc34   : > { %v4170_v51 = vsub.f32 %v9866_v1, %v4124_v6  ;;  %v4171_v11 = vsub.f32 %v4082_v8, %v4124_v6 }
 0xc35   : > { %v9958_v53 = vpop.f32.mrf.mxu0 }
 0xc36   : > { %v4202_v43 = vmul.f32 1.442695, %v4170_v51  ;;  %v4204_v57 = vmul.f32 1.442695, %v4171_v11  ;;  %v4167_v46 = vmax.f32 %v9956_v36, %v9958_v53 }
 0xc38   : > { %6636 = vpow2.f32 %v4202_v43  ;;  %4168 = vmax.xlane.f32.xlu1 %v4167_v46 }
 0xc39   : > { %6638 = vpow2.f32 %v4204_v57 }
 0xc3b   : > { %v4127_v61 = vpop.xlane.xlu2 %4126 }
 0xc3c   : > { %v4172_v47 = vsub.f32 %v9869_v18, %v4127_v61  ;;  %v4173_v45 = vsub.f32 %v9877_v12, %v4127_v61 }
 0xc3e   : > { %v6637_v56 = vpop.eup %6636  ;;  %v4206_v1 = vmul.f32 1.442695, %v4172_v47  ;;  %v4208_v8 = vmul.f32 1.442695, %v4173_v45 }
 0xc3f   : > { %v6639_v20 = vpop.eup %6638 }
 0xc40   : > { %6640 = vpow2.f32 %v4206_v1  ;;  %v4266_v0 = vadd.f32 %v6639_v20, %v6637_v56 }
 0xc41   : > { %6642 = vpow2.f32 %v4208_v8 }
 0xc42   : > { %4267 = vadd.xlane.f32.xlu2 %v4266_v0 }
 0xc43   : > { %v4130_v24 = vpop.xlane.xlu0 %4129 }
 0xc44   : > { %v4174_v19 = vsub.f32 %v9872_v38, %v4130_v24  ;;  %v4175_v39 = vsub.f32 %v9883_v60, %v4130_v24 }
 0xc46   : > { %v6641_v7 = vpop.eup %6640  ;;  %v4210_v29 = vmul.f32 1.442695, %v4174_v19  ;;  %v4212_v10 = vmul.f32 1.442695, %v4175_v39 }
 0xc47   : > { %v6643_v50 = vpop.eup %6642  ;;  %v4314_v18 = vpack.c.bf16 %v6641_v7, %v6637_v56 }
 0xc48   : > { %v4315_v49 = vpack.c.bf16 %v6643_v50, %v6639_v20  ;;  %6644 = vpow2.f32 %v4210_v29  ;;  %v4269_v12 = vadd.f32 %v6643_v50, %v6641_v7 }
 0xc49   : > { %6646 = vpow2.f32 %v4212_v10  ;;  %4338 = vmatmul.bf16.vlgmr.msrb.gmra.mxu3 %v4314_v18 }
 0xc4a   : > { %4387 = vmatmul.bf16.vlgmr.msrb.gmra.mxu0 %v4315_v49  ;;  %4270 = vadd.xlane.f32.xlu0 %v4269_v12 }
 0xc4b   : > { %v4133_v6 = vpop.xlane.xlu1 %4132 }
 0xc4c   : > { %v4176_v51 = vsub.f32 %v9874_v63, %v4133_v6  ;;  %v4177_v11 = vsub.f32 %v9889_v37, %v4133_v6 }
 0xc4e   : > { %v6645_v38 = vpop.eup %6644  ;;  %v4214_v43 = vmul.f32 1.442695, %v4176_v51  ;;  %v4216_v60 = vmul.f32 1.442695, %v4177_v11 }
 0xc4f   : > { %v6647_v57 = vpop.eup %6646 }
 0xc50   : > { %6648 = vpow2.f32 %v4214_v43  ;;  %v4272_v46 = vadd.f32 %v6647_v57, %v6645_v38  ;;  %v6274_v43 = vld [vmem:[%s10693_s3 + $0x78] sm:$0xff] }
 0xc51   : > { %6650 = vpow2.f32 %v4216_v60  ;;  %4703 = vmatpush.bf16.msra.mxu3 %v6274_v43 }
 0xc52   : > { %4273 = vadd.xlane.f32.xlu1 %v4272_v46 }
 0xc53   : > { %v4136_v61 = vpop.xlane.xlu2 %4135 }
 0xc54   : > { %v4178_v47 = vsub.f32 %v9881_v2, %v4136_v61  ;;  %v4179_v45 = vsub.f32 %v9895_v35, %v4136_v61 }
 0xc56   : > { %v6649_v56 = vpop.eup %6648  ;;  %v4218_v1 = vmul.f32 1.442695, %v4178_v47  ;;  %v4220_v8 = vmul.f32 1.442695, %v4179_v45 }
 0xc57   : > { %v6651_v20 = vpop.eup %6650  ;;  %v4316_v63 = vpack.c.bf16 %v6649_v56, %v6645_v38 }
 0xc58   : > { %6652 = vpow2.f32 %v4218_v1  ;;  %v4317_v37 = vpack.c.bf16 %v6651_v20, %v6647_v57  ;;  %v4275_v0 = vadd.f32 %v6651_v20, %v6649_v56 }
 0xc59   : > { %6654 = vpow2.f32 %v4220_v8  ;;  %4343 = vmatmul.bf16.gmra.mxu3 %v4316_v63 }
 0xc5a   : > { %4392 = vmatmul.bf16.gmra.mxu0 %v4317_v37  ;;  %4276 = vadd.xlane.f32.xlu2 %v4275_v0 }
 0xc5b   : > { %v4139_v24 = vpop.xlane.xlu0 %4138 }
 0xc5c   : > { %v4180_v19 = vsub.f32 %v9887_v52, %v4139_v24  ;;  %v4181_v39 = vsub.f32 %v9901_v17, %v4139_v24 }
 0xc5e   : > { %v6653_v2 = vpop.eup %6652  ;;  %v4222_v7 = vmul.f32 1.442695, %v4180_v19  ;;  %v4224_v35 = vmul.f32 1.442695, %v4181_v39 }
 0xc5f   : > { %v6655_v29 = vpop.eup %6654 }
 0xc60   : > { %6656 = vpow2.f32 %v4222_v7  ;;  %v4278_v10 = vadd.f32 %v6655_v29, %v6653_v2 }
 0xc61   : > { %6658 = vpow2.f32 %v4224_v35 }
 0xc62   : > { %4279 = vadd.xlane.f32.xlu0 %v4278_v10 }
 0xc63   : > { %v4142_v50 = vpop.xlane.xlu1 %4141 }
 0xc64   : > { %v4182_v18 = vsub.f32 %v9893_v44, %v4142_v50  ;;  %v4183_v49 = vsub.f32 %v9905_v48, %v4142_v50 }
 0xc66   : > { %v6657_v12 = vpop.eup %6656  ;;  %v4226_v6 = vmul.f32 1.442695, %v4182_v18  ;;  %v4228_v51 = vmul.f32 1.442695, %v4183_v49 }
 0xc67   : > { %v6659_v11 = vpop.eup %6658  ;;  %v4318_v52 = vpack.c.bf16 %v6657_v12, %v6653_v2 }
 0xc68   : > { %6660 = vpow2.f32 %v4226_v6  ;;  %v4319_v17 = vpack.c.bf16 %v6659_v11, %v6655_v29  ;;  %v4281_v38 = vadd.f32 %v6659_v11, %v6657_v12 }
 0xc69   : > { %6662 = vpow2.f32 %v4228_v51  ;;  %4348 = vmatmul.bf16.gmra.mxu3 %v4318_v52  ;;  %v6273_v52 = vld [vmem:[%s10693_s3 + $0x70] sm:$0xff] }
 0xc6a   : > { %4397 = vmatmul.bf16.gmra.mxu0 %v4319_v17  ;;  %4282 = vadd.xlane.f32.xlu1 %v4281_v38 }
 0xc6b   : > { %v4145_v60 = vpop.xlane.xlu2 %4144  ;;  %4704 = vmatpush.bf16.msra.mxu3 %v6273_v52 }
 0xc6c   : > { %v4184_v44 = vsub.f32 %v9899_v3, %v4145_v60  ;;  %v4185_v48 = vsub.f32 %v9911_v21, %v4145_v60 }
 0xc6e   : > { %v6661_v57 = vpop.eup %6660  ;;  %v4230_v46 = vmul.f32 1.442695, %v4184_v44  ;;  %v4232_v61 = vmul.f32 1.442695, %v4185_v48 }
 0xc6f   : > { %v6663_v47 = vpop.eup %6662 }
 0xc70   : > { %6664 = vpow2.f32 %v4230_v46  ;;  %v4284_v45 = vadd.f32 %v6663_v47, %v6661_v57 }
 0xc71   : > { %6666 = vpow2.f32 %v4232_v61 }
 0xc72   : > { %4285 = vadd.xlane.f32.xlu2 %v4284_v45 }
 0xc73   : > { %v4148_v56 = vpop.xlane.xlu0 %4147 }
 0xc74   : > { %v4186_v1 = vsub.f32 %v9909_v59, %v4148_v56  ;;  %v4187_v8 = vsub.f32 %v9917_v9, %v4148_v56 }
 0xc76   : > { %v6665_v20 = vpop.eup %6664  ;;  %v4234_v63 = vmul.f32 1.442695, %v4186_v1  ;;  %v4236_v37 = vmul.f32 1.442695, %v4187_v8 }
 0xc77   : > { %v6667_v3 = vpop.eup %6666  ;;  %v4320_v0 = vpack.c.bf16 %v6665_v20, %v6661_v57 }
 0xc78   : > { %6668 = vpow2.f32 %v4234_v63  ;;  %v4321_v21 = vpack.c.bf16 %v6667_v3, %v6663_v47  ;;  %v4287_v24 = vadd.f32 %v6667_v3, %v6665_v20  ;;  %v6278_v20 = vld [vmem:[%s10695_s5 + $0x78] sm:$0xff] }
 0xc79   : > { %6670 = vpow2.f32 %v4236_v37  ;;  %4353 = vmatmul.bf16.gmra.mxu3 %v4320_v0  ;;  %4846 = vmatpush.bf16.msra.mxu0 %v6278_v20  ;;  %v6277_v37 = vld [vmem:[%s10695_s5 + $0x70] sm:$0xff] }
 0xc7a   : > { %4402 = vmatmul.bf16.gmra.mxu0 %v4321_v21  ;;  %4288 = vadd.xlane.f32.xlu0 %v4287_v24  ;;  %v6272_v24 = vld [vmem:[%s10693_s3 + $0x68] sm:$0xff] }
 0xc7b   : > { %v4151_v19 = vpop.xlane.xlu1 %4150  ;;  %4705 = vmatpush.bf16.msra.mxu3 %v6272_v24 }
 0xc7c   : > { %v4188_v39 = vsub.f32 %v9915_v62, %v4151_v19  ;;  %v4189_v2 = vsub.f32 %v9923_v4, %v4151_v19 }
 0xc7d   : > { %4847 = vmatpush.bf16.msra.mxu0 %v6277_v37 }
 0xc7e   : > { %v6669_v59 = vpop.eup %6668  ;;  %v4238_v7 = vmul.f32 1.442695, %v4188_v39  ;;  %v4240_v9 = vmul.f32 1.442695, %v4189_v2  ;;  %v6276_v39 = vld [vmem:[%s10695_s5 + $0x68] sm:$0xff] }
 0xc7f   : > { %v6671_v35 = vpop.eup %6670 }
 0xc80   : > { %6672 = vpow2.f32 %v4238_v7  ;;  %v4290_v29 = vadd.f32 %v6671_v35, %v6669_v59  ;;  %v6271_v7 = vld [vmem:[%s10693_s3 + $0x60] sm:$0xff] }
 0xc81   : > { %6674 = vpow2.f32 %v4240_v9  ;;  %4848 = vmatpush.bf16.msra.mxu0 %v6276_v39  ;;  %v6275_v9 = vld [vmem:[%s10695_s5 + $0x60] sm:$0xff]  ;;  %4706 = vmatpush.bf16.msra.mxu3 %v6271_v7 }
 0xc82   : > { %4291 = vadd.xlane.f32.xlu1 %v4290_v29 }
 0xc83   : > { %v4154_v10 = vpop.xlane.xlu2 %4153 }
 0xc84   : > { %v4190_v50 = vsub.f32 %v9921_v25, %v4154_v10  ;;  %v4191_v18 = vsub.f32 %v9929_v13, %v4154_v10 }
 0xc85   : > { %4849 = vmatpush.bf16.msra.mxu0 %v6275_v9 }
 0xc86   : > { %v6673_v49 = vpop.eup %6672  ;;  %v4242_v12 = vmul.f32 1.442695, %v4190_v50  ;;  %v4244_v6 = vmul.f32 1.442695, %v4191_v18 }
 0xc87   : > { %v6675_v51 = vpop.eup %6674  ;;  %v4322_v62 = vpack.c.bf16 %v6673_v49, %v6669_v59 }
 0xc88   : > { %6676 = vpow2.f32 %v4242_v12  ;;  %v4323_v4 = vpack.c.bf16 %v6675_v51, %v6671_v35  ;;  %v4293_v11 = vadd.f32 %v6675_v51, %v6673_v49 }
 0xc89   : > { %6678 = vpow2.f32 %v4244_v6  ;;  %4358 = vmatmul.bf16.gmra.mxu3 %v4322_v62 }
 0xc8a   : > { %4407 = vmatmul.bf16.gmra.mxu0 %v4323_v4  ;;  %4294 = vadd.xlane.f32.xlu2 %v4293_v11 }
 0xc8b   : > { %v4157_v17 = vpop.xlane.xlu0 %4156 }
 0xc8c   : > { %v4192_v25 = vsub.f32 %v9927_v42, %v4157_v17  ;;  %v4193_v13 = vsub.f32 %v9933_v54, %v4157_v17 }
 0xc8e   : > { %v6677_v38 = vpop.eup %6676  ;;  %v4246_v43 = vmul.f32 1.442695, %v4192_v25  ;;  %v4248_v60 = vmul.f32 1.442695, %v4193_v13 }
 0xc8f   : > { %v6679_v44 = vpop.eup %6678 }
 0xc90   : > { %6680 = vpow2.f32 %v4246_v43  ;;  %v4296_v48 = vadd.f32 %v6679_v44, %v6677_v38 }
 0xc91   : > { %6682 = vpow2.f32 %v4248_v60 }
 0xc92   : > { %4297 = vadd.xlane.f32.xlu0 %v4296_v48 }
 0xc93   : > { %v4160_v57 = vpop.xlane.xlu1 %4159 }
 0xc94   : > { %v4194_v46 = vsub.f32 %v9937_v55, %v4160_v57  ;;  %v4195_v61 = vsub.f32 %v9939_v27, %v4160_v57 }
 0xc96   : > { %v6681_v47 = vpop.eup %6680  ;;  %v4250_v45 = vmul.f32 1.442695, %v4194_v46  ;;  %v4252_v56 = vmul.f32 1.442695, %v4195_v61 }
 0xc97   : > { %v6683_v42 = vpop.eup %6682  ;;  %v4324_v1 = vpack.c.bf16 %v6681_v47, %v6677_v38  ;;  %v6266_v38 = vld [vmem:[%s10697_s7 + $0x10] sm:$0xff] }
 0xc98   : > { %6684 = vpow2.f32 %v4250_v45  ;;  %v4325_v54 = vpack.c.bf16 %v6683_v42, %v6679_v44  ;;  %v4299_v8 = vadd.f32 %v6683_v42, %v6681_v47  ;;  %4508 = vmatpush.bf16.msra.mxu1 %v6266_v38 }
 0xc99   : > { %6686 = vpow2.f32 %v4252_v56  ;;  %4363 = vmatmul.bf16.gmra.mxu3 %v4324_v1 }
 0xc9a   : > { %4412 = vmatmul.bf16.gmra.mxu0 %v4325_v54  ;;  %4300 = vadd.xlane.f32.xlu1 %v4299_v8 }
 0xc9b   : > { %v4163_v63 = vpop.xlane.xlu2 %4162 }
 0xc9c   : > { %v4196_v55 = vsub.f32 %v9943_v14, %v4163_v63  ;;  %v4197_v27 = vsub.f32 %v9945_v23, %v4163_v63 }
 0xc9e   : > { %v6685_v3 = vpop.eup %6684  ;;  %v4254_v0 = vmul.f32 1.442695, %v4196_v55  ;;  %v4256_v21 = vmul.f32 1.442695, %v4197_v27 }
 0xc9f   : > { %v6687_v19 = vpop.eup %6686 }
 0xca0   : > { %6688 = vpow2.f32 %v4254_v0  ;;  %v4302_v14 = vadd.f32 %v6687_v19, %v6685_v3 }
 0xca1   : > { %6690 = vpow2.f32 %v4256_v21 }
 0xca2   : > { %4303 = vadd.xlane.f32.xlu2 %v4302_v14 }
 0xca3   : > { %v4166_v23 = vpop.xlane.xlu0 %4165 }
 0xca4   : > { %v4198_v2 = vsub.f32 %v9949_v16, %v4166_v23  ;;  %v4199_v59 = vsub.f32 %v9951_v40, %v4166_v23 }
 0xca6   : > { %v6689_v35 = vpop.eup %6688  ;;  %v4258_v29 = vmul.f32 1.442695, %v4198_v2  ;;  %v4260_v10 = vmul.f32 1.442695, %v4199_v59 }
 0xca7   : > { %v6691_v50 = vpop.eup %6690  ;;  %v4326_v18 = vpack.c.bf16 %v6689_v35, %v6685_v3 }
 0xca8   : > { %6692 = vpow2.f32 %v4258_v29  ;;  %v4327_v49 = vpack.c.bf16 %v6691_v50, %v6687_v19  ;;  %v4305_v16 = vadd.f32 %v6691_v50, %v6689_v35 }
 0xca9   : > { %6694 = vpow2.f32 %v4260_v10  ;;  %4368 = vmatmul.bf16.gmra.mxu3 %v4326_v18 }
 0xcaa   : > { %4417 = vmatmul.bf16.gmra.mxu0 %v4327_v49  ;;  %4306 = vadd.xlane.f32.xlu0 %v4305_v16 }
 0xcab   : > { %v4169_v40 = vpop.xlane.xlu1 %4168 }
 0xcac   : > { %v4200_v12 = vsub.f32 %v9956_v36, %v4169_v40  ;;  %v4201_v6 = vsub.f32 %v9958_v53, %v4169_v40 }
 0xcae   : > { %v6693_v51 = vpop.eup %6692  ;;  %v4262_v62 = vmul.f32 1.442695, %v4200_v12  ;;  %v4264_v4 = vmul.f32 1.442695, %v4201_v6 }
 0xcaf   : > { %v6695_v11 = vpop.eup %6694 }
 0xcb0   : > { %6696 = vpow2.f32 %v4262_v62  ;;  %v4308_v52 = vadd.f32 %v6695_v11, %v6693_v51 }
 0xcb1   : > { %6698 = vpow2.f32 %v4264_v4 }
 0xcb2   : > { %4309 = vadd.xlane.f32.xlu1 %v4308_v52 }
 0xcb5   : > { %v4268_v53 = vpop.xlane.xlu2 %4267 }
 0xcb6   : > { %v6697_v17 = vpop.eup %6696  ;;  %6700 = vrcp.f32 %v4268_v53 }
 0xcb7   : > { %v6699_v25 = vpop.eup %6698  ;;  %v4328_v13 = vpack.c.bf16 %v6697_v17, %v6693_v51 }
 0xcb8   : > { %v4329_v43 = vpack.c.bf16 %v6699_v25, %v6695_v11  ;;  %v4311_v60 = vadd.f32 %v6699_v25, %v6697_v17 }
 0xcb9   : > { %4373 = vmatmul.bf16.gmra.mxu3 %v4328_v13 }
 0xcba   : > { %4422 = vmatmul.bf16.gmra.mxu0 %v4329_v43  ;;  %4312 = vadd.xlane.f32.xlu2 %v4311_v60 }
 0xcbc   : > { %v6701_v47 = vpop.eup %6700 }
 0xcbd   : > { %v4271_v48 = vpop.xlane.xlu0 %4270 }
 0xcbe   : > { %6702 = vrcp.f32 %v4271_v48 }
 0xcc4   : > { %v6703_v56 = vpop.eup %6702 }
 0xcc7   : > { %v4388_v36 = vpop.f32.mrf.mxu0 }
 0xcc9   : > { %6138 = vmatmul.msk.bf16.vlgmr.msra.gmra.mxu3 %vm407_vm0, %v10800_v28 }
 0xcca   : > { %6179 = vmatmul.msk.bf16.vlgmr.msra.gmra.mxu0 %vm407_vm0, %v10800_v28  ;;  %v4274_v28 = vpop.xlane.xlu1 %4273 }
 0xccb   : > { %6704 = vrcp.f32 %v4274_v28 }
 0xccc   : > { %v4339_v44 = vpop.f32.mrf.mxu3 }
 0xccd   : > { %v4389_v46 = vadd.f32 %v4388_v36, %v4339_v44  ;;  %v4277_v63 = vpop.xlane.xlu2 %4276 }
 0xcce   : > { %6706 = vrcp.f32 %v4277_v63 }
 0xccf   : > { %v4390_v57 = vpop.f32.mrf.mxu0  ;;  %v4444_v42 = vmul.f32 %v6701_v47, %v4389_v46 }
 0xcd1   : > { %v6705_v3 = vpop.eup %6704 }
 0xcd4   : > { %v4341_v61 = vpop.f32.mrf.mxu3  ;;  %v6707_v21 = vpop.eup %6706 }
 0xcd5   : > { %v4391_v45 = vadd.f32 %v4390_v57, %v4341_v61 }
 0xcd7   : > { %v4445_v1 = vmul.f32 %v6703_v56, %v4391_v45  ;;  %v4393_v54 = vpop.f32.mrf.mxu0 }
 0xcd9   : > { %v4460_v8 = vpack.c.bf16 %v4445_v1, %v4444_v42  ;;  %6139 = vmatmul.msk.bf16.gmra.mxu3 %vm407_vm0, %v10801_v15 }
 0xcda   : > { %6180 = vmatmul.msk.bf16.gmra.mxu0 %vm407_vm0, %v10801_v15  ;;  %v4280_v15 = vpop.xlane.xlu0 %4279 }
 0xcdb   : > { %6072 = vmatmul.msk.bf16.vlgmr.msra.gmra.mxu1 %vm1962_vm5, %v4460_v8  ;;  %6708 = vrcp.f32 %v4280_v15 }
 0xcdc   : > { %v4344_v20 = vpop.f32.mrf.mxu3 }
 0xcdd   : > { %v4394_v27 = vadd.f32 %v4393_v54, %v4344_v20  ;;  %v4283_v2 = vpop.xlane.xlu1 %4282 }
 0xcde   : > { %6710 = vrcp.f32 %v4283_v2 }
 0xcdf   : > { %v4395_v55 = vpop.f32.mrf.mxu0  ;;  %v4446_v24 = vmul.f32 %v6705_v3, %v4394_v27 }
 0xce1   : > { %v6709_v35 = vpop.eup %6708 }
 0xce4   : > { %v4346_v37 = vpop.f32.mrf.mxu3  ;;  %v6711_v10 = vpop.eup %6710 }
 0xce5   : > { %v4396_v0 = vadd.f32 %v4395_v55, %v4346_v37 }
 0xce7   : > { %v4447_v19 = vmul.f32 %v6707_v21, %v4396_v0  ;;  %v4398_v39 = vpop.f32.mrf.mxu0 }
 0xce9   : > { %v4461_v14 = vpack.c.bf16 %v4447_v19, %v4446_v24  ;;  %6140 = vmatmul.msk.bf16.gmra.mxu3 %vm407_vm0, %v10802_v22 }
 0xcea   : > { %6181 = vmatmul.msk.bf16.gmra.mxu0 %vm407_vm0, %v10802_v22  ;;  %v4286_v22 = vpop.xlane.xlu2 %4285 }
 0xceb   : > { %6073 = vmatmul.msk.bf16.gmra.mxu1 %vm1962_vm5, %v4461_v14  ;;  %6712 = vrcp.f32 %v4286_v22 }
 0xcec   : > { %v4349_v23 = vpop.f32.mrf.mxu3 }
 0xced   : > { %v4399_v7 = vadd.f32 %v4398_v39, %v4349_v23  ;;  %v4289_v12 = vpop.xlane.xlu0 %4288 }
 0xcee   : > { %6714 = vrcp.f32 %v4289_v12 }
 0xcef   : > { %v4400_v59 = vpop.f32.mrf.mxu0  ;;  %v4448_v50 = vmul.f32 %v6709_v35, %v4399_v7 }
 0xcf1   : > { %v6713_v4 = vpop.eup %6712 }
 0xcf4   : > { %v4351_v9 = vpop.f32.mrf.mxu3  ;;  %v6715_v52 = vpop.eup %6714 }
 0xcf5   : > { %v4401_v29 = vadd.f32 %v4400_v59, %v4351_v9 }
 0xcf7   : > { %v4449_v18 = vmul.f32 %v6711_v10, %v4401_v29  ;;  %v4403_v49 = vpop.f32.mrf.mxu0 }
 0xcf9   : > { %v4462_v16 = vpack.c.bf16 %v4449_v18, %v4448_v50  ;;  %6141 = vmatmul.msk.bf16.gmra.mxu3 %vm407_vm0, %v10803_v5 }
 0xcfa   : > { %6182 = vmatmul.msk.bf16.gmra.mxu0 %vm407_vm0, %v10803_v5  ;;  %v4292_v5 = vpop.xlane.xlu1 %4291 }
 0xcfb   : > { %6074 = vmatmul.msk.bf16.gmra.mxu1 %vm1962_vm5, %v4462_v16  ;;  %6716 = vrcp.f32 %v4292_v5 }
 0xcfc   : > { %v4354_v40 = vpop.f32.mrf.mxu3 }
 0xcfd   : > { %v4404_v51 = vadd.f32 %v4403_v49, %v4354_v40  ;;  %v4295_v60 = vpop.xlane.xlu2 %4294 }
 0xcfe   : > { %6718 = vrcp.f32 %v4295_v60 }
 0xcff   : > { %v4405_v6 = vpop.f32.mrf.mxu0  ;;  %v4450_v17 = vmul.f32 %v6713_v4, %v4404_v51  ;;  %v10865_v4 = vld [vmem:[#allocation12_spill] sm:$0xff] }
 0xd01   : > { %v6717_v48 = vpop.eup %6716 }
 0xd04   : > { %v4356_v62 = vpop.f32.mrf.mxu3  ;;  %v6719_v46 = vpop.eup %6718 }
 0xd05   : > { %v4406_v11 = vadd.f32 %v4405_v6, %v4356_v62 }
 0xd07   : > { %v4451_v25 = vmul.f32 %v6715_v52, %v4406_v11  ;;  %v4408_v13 = vpop.f32.mrf.mxu0 }
 0xd09   : > { %v4463_v38 = vpack.c.bf16 %v4451_v25, %v4450_v17  ;;  %6142 = vmatmul.msk.bf16.gmra.mxu3 %vm407_vm0, %v10804_v30 }
 0xd0a   : > { %6183 = vmatmul.msk.bf16.gmra.mxu0 %vm407_vm0, %v10804_v30  ;;  %v4298_v30 = vpop.xlane.xlu0 %4297 }
 0xd0b   : > { %6075 = vmatmul.msk.bf16.gmra.mxu1 %vm1962_vm5, %v4463_v38  ;;  %6720 = vrcp.f32 %v4298_v30 }
 0xd0c   : > { %v4359_v43 = vpop.f32.mrf.mxu3 }
 0xd0d   : > { %v4409_v53 = vadd.f32 %v4408_v13, %v4359_v43  ;;  %v4301_v1 = vpop.xlane.xlu1 %4300  ;;  %v10077_v13 = vld [vmem:[%s10694_s4 + $0x3] ss:$0 sm:$0xff] }
 0xd0e   : > { %6722 = vrcp.f32 %v4301_v1 }
 0xd0f   : > { %v4410_v36 = vpop.f32.mrf.mxu0  ;;  %v4452_v61 = vmul.f32 %v6717_v48, %v4409_v53  ;;  %v10866_v48 = vld [vmem:[#allocation8_spill] sm:$0xff] }
 0xd11   : > { %v6721_v20 = vpop.eup %6720 }
 0xd14   : > { %v4361_v44 = vpop.f32.mrf.mxu3  ;;  %v6723_v55 = vpop.eup %6722 }
 0xd15   : > { %v4411_v57 = vadd.f32 %v4410_v36, %v4361_v44 }
 0xd17   : > { %v4453_v47 = vmul.f32 %v6719_v46, %v4411_v57  ;;  %v4413_v45 = vpop.f32.mrf.mxu0  ;;  %v10867_v46 = vld [vmem:[#allocation13_spill] sm:$0xff] }
 0xd19   : > { %v4464_v56 = vpack.c.bf16 %v4453_v47, %v4452_v61  ;;  %6143 = vmatmul.msk.bf16.gmra.mxu3 %vm407_vm0, %v10829_v31 }
 0xd1a   : > { %6184 = vmatmul.msk.bf16.gmra.mxu0 %vm407_vm0, %v10829_v31  ;;  %v4304_v31 = vpop.xlane.xlu2 %4303 }
 0xd1b   : > { %6076 = vmatmul.msk.bf16.gmra.mxu1 %vm1962_vm5, %v4464_v56  ;;  %6724 = vrcp.f32 %v4304_v31 }
 0xd1c   : > { %v4364_v42 = vpop.f32.mrf.mxu3 }
 0xd1d   : > { %v4414_v8 = vadd.f32 %v4413_v45, %v4364_v42  ;;  %v4307_v24 = vpop.xlane.xlu0 %4306 }
 0xd1e   : > { %6726 = vrcp.f32 %v4307_v24 }
 0xd1f   : > { %v4415_v54 = vpop.f32.mrf.mxu0  ;;  %v4454_v27 = vmul.f32 %v6721_v20, %v4414_v8 }
 0xd21   : > { %v6725_v15 = vpop.eup %6724 }
 0xd24   : > { %v4366_v28 = vpop.f32.mrf.mxu3  ;;  %v6727_v2 = vpop.eup %6726 }
 0xd25   : > { %v4416_v63 = vadd.f32 %v4415_v54, %v4366_v28 }
 0xd27   : > { %v4455_v37 = vmul.f32 %v6723_v55, %v4416_v63  ;;  %v4418_v3 = vpop.f32.mrf.mxu0  ;;  %v10868_v55 = vld [vmem:[#allocation11_spill] sm:$0xff] }
 0xd29   : > { %v4465_v0 = vpack.c.bf16 %v4455_v37, %v4454_v27  ;;  %6144 = vmatmul.msk.bf16.gmra.mxu3 %vm407_vm0, %v10830_v26  ;;  %v10869_v37 = vld [vmem:[#allocation14_spill] sm:$0xff] }
 0xd2a   : > { %6185 = vmatmul.msk.bf16.gmra.mxu0 %vm407_vm0, %v10830_v26  ;;  %v4310_v26 = vpop.xlane.xlu1 %4309 }
 0xd2b   : > { %6077 = vmatmul.msk.bf16.gmra.mxu1 %vm1962_vm5, %v4465_v0  ;;  %6728 = vrcp.f32 %v4310_v26 }
 0xd2c   : > { %v4369_v21 = vpop.f32.mrf.mxu3 }
 0xd2d   : > { %v4419_v39 = vadd.f32 %v4418_v3, %v4369_v21  ;;  %v4313_v10 = vpop.xlane.xlu2 %4312 }
 0xd2e   : > { %6730 = vrcp.f32 %v4313_v10 }
 0xd2f   : > { %v4420_v19 = vpop.f32.mrf.mxu0  ;;  %v4456_v59 = vmul.f32 %v6725_v15, %v4419_v39 }
 0xd31   : > { %v6729_v16 = vpop.eup %6728 }
 0xd34   : > { %v4371_v14 = vpop.f32.mrf.mxu3  ;;  %v6731_v40 = vpop.eup %6730 }
 0xd35   : > { %v4421_v23 = vadd.f32 %v4420_v19, %v4371_v14 }
 0xd37   : > { %v4457_v7 = vmul.f32 %v6727_v2, %v4421_v23  ;;  %v4423_v9 = vpop.f32.mrf.mxu0 }
 0xd39   : > { %v4466_v35 = vpack.c.bf16 %v4457_v7, %v4456_v59  ;;  %6145 = vmatmul.msk.bf16.gmra.mxu3 %vm407_vm0, %v10831_v41  ;;  %v10870_v7 = vld [vmem:[#allocation4_spill] sm:$0xff] }
 0xd3a   : > { %6186 = vmatmul.msk.bf16.gmra.mxu0 %vm407_vm0, %v10831_v41  ;;  %v10066_v41 = vld [vmem:[%s10696_s6 + $0x3] ss:$0 sm:$0xff] }
 0xd3b   : > { %6078 = vmatmul.msk.bf16.gmra.mxu1 %vm1962_vm5, %v4466_v35  ;;  %v10871_v35 = vld [vmem:[#allocation15_spill] sm:$0xff] }
 0xd3c   : > { %v4374_v29 = vpop.f32.mrf.mxu3 }
 0xd3d   : > { %v4424_v18 = vadd.f32 %v4423_v9, %v4374_v29 }
 0xd3f   : > { %v4425_v50 = vpop.f32.mrf.mxu0  ;;  %v4458_v12 = vmul.f32 %v6729_v16, %v4424_v18 }
 0xd44   : > { %v4376_v49 = vpop.f32.mrf.mxu3 }
 0xd45   : > { %v4426_v22 = vadd.f32 %v4425_v50, %v4376_v49 }
 0xd47   : > { %v4459_v6 = vmul.f32 %v6731_v40, %v4426_v22  ;;  %v4851_v51 = vpop.f32.mrf.mxu0 }
 0xd48   : > { %v10069_v17 = vadd.f32 %v10066_v41, %v4851_v51 }
 0xd49   : > { %v4467_v62 = vpack.c.bf16 %v4459_v6, %v4458_v12  ;;  %6146 = vmatmul.msk.bf16.gmra.mxu3 %vm407_vm0, %v10865_v4 }
 0xd4a   : > { %6187 = vmatmul.msk.bf16.gmra.mxu0 %vm407_vm0, %v10865_v4 }
 0xd4b   : > { %6079 = vmatmul.msk.bf16.gmra.mxu1 %vm1962_vm5, %v4467_v62  ;;  %v10872_v62 = vld [vmem:[#allocation25_spill] sm:$0xff] }
 0xd4c   : > { %v4708_v11 = vpop.f32.mrf.mxu3 }
 0xd4d   : > { %v10082_v43 = vadd.f32 %v10077_v13, %v4708_v11  ;;  %v10873_v11 = vld [vmem:[#allocation16_spill] sm:$0xff] }
 0xd4f   : > { %v4853_v52 = vpop.f32.mrf.mxu0 }
 0xd50   : > { %v10072_v25 = vadd.f32 %v10066_v41, %v4853_v52 }
 0xd54   : > { %v4710_v5 = vpop.f32.mrf.mxu3 }
 0xd55   : > { %v10085_v60 = vadd.f32 %v10077_v13, %v4710_v5 }
 0xd57   : > { %v4856_v36 = vpop.f32.mrf.mxu0 }
 0xd58   : > { %v4510_v44 = vpop.f32.mrf.mxu1  ;;  %v10097_v45 = vadd.f32 %v10066_v41, %v4856_v36 }
 0xd59   : > { %v10090_v57 = vadd.f32 %v4510_v44, %v10866_v48  ;;  %6147 = vmatmul.msk.bf16.gmra.mxu3 %vm407_vm0, %v10867_v46 }
 0xd5a   : > { %6188 = vmatmul.msk.bf16.gmra.mxu0 %vm407_vm0, %v10867_v46 }
 0xd5c   : > { %v4713_v61 = vpop.f32.mrf.mxu3 }
 0xd5d   : > { %v10107_v54 = vadd.f32 %v10077_v13, %v4713_v61  ;;  %v10874_v61 = vld [vmem:[#allocation27_spill] sm:$0xff] }
 0xd5f   : > { %v4858_v47 = vpop.f32.mrf.mxu0 }
 0xd60   : > { %v10100_v56 = vadd.f32 %v10066_v41, %v4858_v47  ;;  %v10102_v30 = vpop.f32.mrf.mxu1 }
 0xd64   : > { %v4715_v1 = vpop.f32.mrf.mxu3 }
 0xd65   : > { %v10110_v8 = vadd.f32 %v10077_v13, %v4715_v1  ;;  %v10875_v1 = vld [vmem:[#allocation17_spill] sm:$0xff] }
 0xd67   : > { %v4861_v28 = vpop.f32.mrf.mxu0 }
 0xd68   : > { %v4515_v63 = vpop.f32.mrf.mxu1  ;;  %v10122_v31 = vadd.f32 %v10066_v41, %v4861_v28 }
 0xd69   : > { %v10115_v27 = vadd.f32 %v4515_v63, %v10868_v55  ;;  %6148 = vmatmul.msk.bf16.gmra.mxu3 %vm407_vm0, %v10869_v37 }
 0xd6a   : > { %6189 = vmatmul.msk.bf16.gmra.mxu0 %vm407_vm0, %v10869_v37 }
 0xd6c   : > { %v4718_v3 = vpop.f32.mrf.mxu3 }
 0xd6d   : > { %v10132_v14 = vadd.f32 %v10077_v13, %v4718_v3 }
 0xd6f   : > { %v4863_v0 = vpop.f32.mrf.mxu0 }
 0xd70   : > { %v10125_v21 = vadd.f32 %v10066_v41, %v4863_v0  ;;  %v10127_v24 = vpop.f32.mrf.mxu1 }
 0xd74   : > { %v4720_v39 = vpop.f32.mrf.mxu3 }
 0xd75   : > { %v10135_v15 = vadd.f32 %v10077_v13, %v4720_v39  ;;  %v10876_v39 = vld [vmem:[#allocation29_spill] sm:$0xff] }
 0xd77   : > { %v4866_v23 = vpop.f32.mrf.mxu0 }
 0xd78   : > { %v4520_v59 = vpop.f32.mrf.mxu1  ;;  %v10147_v10 = vadd.f32 %v10066_v41, %v4866_v23 }
 0xd79   : > { %v10140_v9 = vadd.f32 %v4520_v59, %v10870_v7  ;;  %6149 = vmatmul.msk.bf16.gmra.mxu3 %vm407_vm0, %v10871_v35  ;;  %v10877_v59 = vld [vmem:[#allocation18_spill] sm:$0xff] }
 0xd7a   : > { %6190 = vmatmul.msk.bf16.gmra.mxu0 %vm407_vm0, %v10871_v35 }
 0xd7c   : > { %v4723_v26 = vpop.f32.mrf.mxu3 }
 0xd7d   : > { %v10157_v22 = vadd.f32 %v10077_v13, %v4723_v26 }
 0xd7f   : > { %v4868_v29 = vpop.f32.mrf.mxu0 }
 0xd80   : > { %v10150_v50 = vadd.f32 %v10066_v41, %v4868_v29  ;;  %v10152_v18 = vpop.f32.mrf.mxu1 }
 0xd84   : > { %v4725_v16 = vpop.f32.mrf.mxu3 }
 0xd85   : > { %v10160_v40 = vadd.f32 %v10077_v13, %v4725_v16 }
 0xd87   : > { %v10162_v12 = vpop.f32.mrf.mxu0  ;;  %v4791_v6 = vpack.c.bf16 %v10160_v40, %v10157_v22 }
 0xd88   : > { %v4525_v51 = vpop.f32.mrf.mxu1 }
 0xd89   : > { %v10167_v4 = vadd.f32 %v4525_v51, %v10872_v62  ;;  %6150 = vmatmul.msk.bf16.gmra.mxu3 %vm407_vm0, %v10873_v11 }
 0xd8a   : > { %6191 = vmatmul.msk.bf16.gmra.mxu0 %vm407_vm0, %v10873_v11  ;;  %v10878_v11 = vld [vmem:[#allocation19_spill] sm:$0xff] }
 0xd8c   : > { %v4728_v52 = vpop.f32.mrf.mxu3 }
 0xd8f   : > { %v10173_v5 = vpop.f32.mrf.mxu0 }
 0xd90   : > { %v10175_v36 = vpop.f32.mrf.mxu1 }
 0xd94   : > { %v4730_v44 = vpop.f32.mrf.mxu3 }
 0xd97   : > { %v10177_v48 = vpop.f32.mrf.mxu0 }
 0xd98   : > { %v4530_v46 = vpop.f32.mrf.mxu1 }
 0xd99   : > { %v10180_v47 = vadd.f32 %v4530_v46, %v10874_v61  ;;  %6151 = vmatmul.msk.bf16.gmra.mxu3 %vm407_vm0, %v10875_v1 }
 0xd9a   : > { %6192 = vmatmul.msk.bf16.gmra.mxu0 %vm407_vm0, %v10875_v1 }
 0xd9c   : > { %v4733_v28 = vpop.f32.mrf.mxu3 }
 0xd9f   : > { %v10186_v63 = vpop.f32.mrf.mxu0 }
 0xda0   : > { %v10188_v55 = vpop.f32.mrf.mxu1 }
 0xda4   : > { %v4735_v37 = vpop.f32.mrf.mxu3 }
 0xda7   : > { %v10190_v3 = vpop.f32.mrf.mxu0 }
 0xda8   : > { %v4535_v0 = vpop.f32.mrf.mxu1  ;;  %v4882_v32 = vadd.f32 %v10066_v41, %v10190_v3 }
 0xda9   : > { %v10193_v23 = vadd.f32 %v4535_v0, %v10876_v39  ;;  %6152 = vmatmul.msk.bf16.gmra.mxu3 %vm407_vm0, %v10877_v59 }
 0xdaa   : > { %6193 = vmatmul.msk.bf16.gmra.mxu0 %vm407_vm0, %v10877_v59 }
 0xdac   : > { %v4738_v7 = vpop.f32.mrf.mxu3 }
 0xdaf   : > { %v10199_v35 = vpop.f32.mrf.mxu0 }
 0xdb0   : > { %v10201_v26 = vpop.f32.mrf.mxu1 }
 0xdb4   : > { %v4740_v29 = vpop.f32.mrf.mxu3 }
 0xdb7   : > { %v10203_v16 = vpop.f32.mrf.mxu0 }
 0xdb8   : > { %v4540_v51 = vpop.f32.mrf.mxu1 }
 0xdb9   : > { %v10206_v62 = vadd.f32 %v4540_v51, %v9613_v33  ;;  %6153 = vmatmul.msk.bf16.gmra.mxu3 %vm407_vm0, %v10878_v11  ;;  %v4741_v33 = vadd.f32 %v10077_v13, %v4740_v29  ;;  %v4736_v29 = vadd.f32 %v10077_v13, %v4735_v37  ;;  %v4729_v37 = vadd.f32 %v10077_v13, %v4728_v52 }
 0xdba   : > { %6194 = vmatmul.msk.bf16.gmra.mxu0 %vm407_vm0, %v10878_v11  ;;  %v4739_v11 = vadd.f32 %v10077_v13, %v4738_v7 }
 0xdbc   : > { %v4743_v46 = vpop.f32.mrf.mxu3  ;;  %v4794_v20 = vpack.c.bf16 %v4741_v33, %v4739_v11 }
 0xdbd   : > { %v4744_v39 = vadd.f32 %v10077_v13, %v4743_v46 }
 0xdbf   : > { %v4888_v61 = vpop.f32.mrf.mxu0 }
 0xdc0   : > { %v10212_v1 = vpop.f32.mrf.mxu1 }
 0xdc4   : > { %v4745_v0 = vpop.f32.mrf.mxu3 }
 0xdc5   : > { %v4746_v59 = vadd.f32 %v10077_v13, %v4745_v0 }
 0xdc7   : > { %v4795_v38 = vpack.c.bf16 %v4746_v59, %v4744_v39  ;;  %v4891_v42 = vpop.f32.mrf.mxu0  ;;  %v4613_v59 = vpop.f32.mrf.mxu2 }
 0xdc8   : > { %v4545_v19 = vpop.f32.mrf.mxu1  ;;  %v10225_v46 = vadd.f32 %v10066_v41, %v4891_v42  ;;  %v4731_v42 = vadd.f32 %v10077_v13, %v4730_v44 }
 0xdc9   : > { %v10218_v51 = vadd.f32 %v4545_v19, %v9632_v58  ;;  %v4993_v49 = vsel %vm1962_vm5, %v4795_v38, 0  ;;  %v4990_v58 = vsel %vm1962_vm5, %v4794_v20, 0  ;;  %v4734_v19 = vadd.f32 %v10077_v13, %v4733_v28 }
 0xdca   : > { %5019 = vmatpush.bf16.xpose.msrb.mxu1 %v4993_v49  ;;  %v4792_v20 = vpack.c.bf16 %v4731_v42, %v4729_v37  ;;  %v4981_v42 = vsel %vm1962_vm5, %v4791_v6, 0 }
 0xdcb   : > { %10879 = vst [vmem:[#allocation12_spill] sm:$0xff] %v10218_v51  ;;  %v4793_v7 = vpack.c.bf16 %v4736_v29, %v4734_v19 }
 0xdcc   : > { %v10222_v53 = vpop.f32.mrf.mxu3  ;;  %v4984_v29 = vsel %vm1962_vm5, %v4792_v20, 0 }
 0xdcf   : > { %v4893_v2 = vpop.f32.mrf.mxu0  ;;  %v4615_v19 = vpop.f32.mrf.mxu2 }
 0xdd0   : > { %v10228_v0 = vadd.f32 %v10066_v41, %v4893_v2  ;;  %v4987_v2 = vsel %vm1962_vm5, %v4793_v7, 0 }
 0xdd2   : > { %5020 = vmatpush.bf16.xpose.msrb.mxu1 %v4990_v58 }
 0xdd4   : > { %v10235_v49 = vpop.f32.mrf.mxu3 }
 0xdd7   : > { %v4896_v39 = vpop.f32.mrf.mxu0 }
 0xdd8   : > { %v10243_v58 = vadd.f32 %v10066_v41, %v4896_v39 }
 0xdda   : > { %5021 = vmatpush.bf16.xpose.msrb.mxu1 %v4987_v2  ;;  %v4618_v2 = vpop.f32.mrf.mxu2 }
 0xddc   : > { %v10240_v33 = vpop.f32.mrf.mxu3 }
 0xddf   : > { %v4898_v11 = vpop.f32.mrf.mxu0 }
 0xde0   : > { %v10246_v28 = vadd.f32 %v10066_v41, %v4898_v11 }
 0xde2   : > { %5022 = vmatpush.bf16.xpose.msrb.mxu1 %v4984_v29  ;;  %v10880_v29 = vpack.c.bf16 %v10135_v15, %v10132_v14  ;;  %v4620_v6 = vpop.f32.mrf.mxu2  ;;  %v4889_v14 = vadd.f32 %v10066_v41, %v4888_v61  ;;  %v4887_v15 = vadd.f32 %v10066_v41, %v10203_v16  ;;  %v10882_v16 = vpack.c.bf16 %v10085_v60, %v10082_v43 }
 0xde4   : > { %v10251_v7 = vpop.f32.mrf.mxu3  ;;  %v4978_v38 = vsel %vm1962_vm5, %v10880_v29, 0  ;;  %v4938_v61 = vpack.c.bf16 %v4889_v14, %v4887_v15  ;;  %v4879_v14 = vadd.f32 %v10066_v41, %v10186_v63  ;;  %v4877_v15 = vadd.f32 %v10066_v41, %v10177_v48 }
 0xde5   : > { %v10883_v48 = vpack.c.bf16 %v10150_v50, %v10147_v10  ;;  %v10885_v10 = vpack.c.bf16 %v10100_v56, %v10097_v45 }
 0xde7   : > { %v4901_v52 = vpop.f32.mrf.mxu0 }
 0xde8   : > { %v10260_v20 = vadd.f32 %v10066_v41, %v4901_v52  ;;  %v10881_v52 = vpack.c.bf16 %v10110_v8, %v10107_v54  ;;  %v10291_v54 = vld [vmem:[%s10692_s2 + $0x3] ss:$0 sm:$0xff] }
 0xdea   : > { %5023 = vmatpush.bf16.xpose.msrb.mxu1 %v4981_v42  ;;  %v4975_v44 = vsel %vm1962_vm5, %v10881_v52, 0  ;;  %v4623_v8 = vpop.f32.mrf.mxu2  ;;  %v4972_v52 = vsel %vm1962_vm5, %v10882_v16, 0  ;;  %v4936_v16 = vpack.c.bf16 %v4879_v14, %v4877_v15 }
 0xdec   : > { %v10257_v39 = vpop.f32.mrf.mxu3 }
 0xdef   : > { %v4903_v37 = vpop.f32.mrf.mxu0 }
 0xdf0   : > { %v10263_v11 = vadd.f32 %v10066_v41, %v4903_v37 }
 0xdf2   : > { %5024 = vmatpush.bf16.xpose.msrb.mxu1 %v4978_v38  ;;  %v4625_v3 = vpop.f32.mrf.mxu2 }
 0xdf3   : > { %v4626_v15 = vadd.f32 %v10291_v54, %v4625_v3 }
 0xdf4   : > { %v10271_v40 = vpop.f32.mrf.mxu3 }
 0xdf7   : > { %v4906_v42 = vpop.f32.mrf.mxu0 }
 0xdf8   : > { %v10283_v38 = vadd.f32 %v10066_v41, %v4906_v42 }
 0xdfa   : > { %5025 = vmatpush.bf16.xpose.msrb.mxu1 %v4975_v44  ;;  %v4884_v44 = vadd.f32 %v10066_v41, %v10199_v35  ;;  %v4614_v35 = vadd.f32 %v10291_v54, %v4613_v59  ;;  %v4872_v59 = vadd.f32 %v10066_v41, %v10162_v12 }
 0xdfc   : > { %v10277_v37 = vpop.f32.mrf.mxu3  ;;  %v4937_v43 = vpack.c.bf16 %v4884_v44, %v4882_v32  ;;  %v4621_v44 = vadd.f32 %v10291_v54, %v4620_v6  ;;  %v10886_v6 = vpack.c.bf16 %v10072_v25, %v10069_v17 }
 0xdff   : > { %v4908_v29 = vpop.f32.mrf.mxu0 }
 0xe00   : > { %v10286_v22 = vadd.f32 %v10066_v41, %v4908_v29  ;;  %v4616_v29 = vadd.f32 %v10291_v54, %v4615_v19  ;;  %v4874_v19 = vadd.f32 %v10066_v41, %v10173_v5  ;;  %v4619_v5 = vadd.f32 %v10291_v54, %v4618_v2 }
 0xe02   : > { %v4942_v42 = vpack.c.bf16 %v10286_v22, %v10283_v38  ;;  %5026 = vmatpush.bf16.xpose.msrb.mxu1 %v4972_v52  ;;  %v10309_v60 = vpack.c.bf16 %v4616_v29, %v4614_v35  ;;  %v4935_v32 = vpack.c.bf16 %v4874_v19, %v4872_v59  ;;  %v4628_v52 = vpop.f32.mrf.mxu2  ;;  %v10326_v14 = vpack.c.bf16 %v4621_v44, %v4619_v5 }
 0xe03   : > { %v4629_v17 = vadd.f32 %v10291_v54, %v4628_v52 }
 0xe04   : > { %v10304_v51 = vpop.f32.mrf.mxu3 }
 0xe09   : > { %6195 = vmatmul.msk.bf16.vlgmr.msrb.gmra.mxu1 %vm1962_vm5, %v10309_v60 }
 0xe0a   : > { %5325 = vmatpush.bf16.msra.mxu1 %v4938_v61  ;;  %v4630_v2 = vpop.f32.mrf.mxu2 }
 0xe0b   : > { %v4631_v45 = vadd.f32 %v10291_v54, %v4630_v2 }
 0xe0c   : > { %v4768_v63 = vpop.f32.mrf.mxu3 }
 0xe0d   : > { %v4769_v29 = vadd.f32 %v10077_v13, %v4768_v63  ;;  %v10346_v63 = vpop.f32.mrf.mxu0  ;;  %v10349_v25 = vpack.c.bf16 %v4631_v45, %v4629_v17 }
 0xe0e   : > { %5326 = vmatpush.bf16.msra.mxu1 %v4937_v43  ;;  %v10884_v43 = vpack.c.bf16 %v10125_v21, %v10122_v31 }
 0xe12   : > { %5327 = vmatpush.bf16.msra.mxu1 %v4936_v16  ;;  %v4624_v16 = vadd.f32 %v10291_v54, %v4623_v8  ;;  %v4633_v21 = vpop.f32.mrf.mxu2 }
 0xe13   : > { %v4634_v5 = vadd.f32 %v10291_v54, %v4633_v21 }
 0xe14   : > { %v4770_v61 = vpop.f32.mrf.mxu3  ;;  %v10341_v31 = vpack.c.bf16 %v4626_v15, %v4624_v16 }
 0xe15   : > { %v4771_v35 = vadd.f32 %v10077_v13, %v4770_v61  ;;  %v10353_v44 = vpop.f32.mrf.mxu0 }
 0xe16   : > { %5328 = vmatpush.bf16.msra.mxu1 %v4935_v32 }
 0xe17   : > { %v4800_v12 = vpack.c.bf16 %v4771_v35, %v4769_v29 }
 0xe19   : > { %6196 = vmatmul.msk.bf16.gmra.mxu1 %vm1962_vm5, %v10326_v14 }
 0xe1a   : > { %5329 = vmatpush.bf16.msra.mxu1 %v10883_v48  ;;  %v4635_v56 = vpop.f32.mrf.mxu2 }
 0xe1b   : > { %v4636_v48 = vadd.f32 %v10291_v54, %v4635_v56 }
 0xe1c   : > { %v4773_v50 = vpop.f32.mrf.mxu3 }
 0xe1d   : > { %v10361_v2 = vpop.f32.mrf.mxu0 }
 0xe1e   : > { %5330 = vmatpush.bf16.msra.mxu1 %v10884_v43  ;;  %v10359_v43 = vpack.c.bf16 %v4636_v48, %v4634_v5 }
 0xe22   : > { %5331 = vmatpush.bf16.msra.mxu1 %v10885_v10  ;;  %v4638_v3 = vpop.f32.mrf.mxu2 }
 0xe24   : > { %v4775_v19 = vpop.f32.mrf.mxu3 }
 0xe25   : > { %v4776_v45 = vadd.f32 %v10077_v13, %v4775_v19 }
 0xe26   : > { %5332 = vmatpush.bf16.msra.mxu1 %v10886_v6 }
 0xe29   : > { %6197 = vmatmul.msk.bf16.gmra.mxu1 %vm1962_vm5, %v10341_v31 }
 0xe2a   : > { %v4640_v10 = vpop.f32.mrf.mxu2 }
 0xe2b   : > { %v4641_v48 = vadd.f32 %v10291_v54, %v4640_v10  ;;  %v5008_v10 = vsel %vm1962_vm5, %v4800_v12, 0  ;;  %v4759_v12 = vadd.f32 %v10077_v13, %v10257_v39  ;;  %v4751_v39 = vadd.f32 %v10077_v13, %v10235_v49 }
 0xe2c   : > { %v4778_v59 = vpop.f32.mrf.mxu3 }
 0xe2d   : > { %v4779_v16 = vadd.f32 %v10077_v13, %v4778_v59 }
 0xe32   : > { %v4643_v17 = vpop.f32.mrf.mxu2 }
 0xe34   : > { %v4780_v32 = vpop.f32.mrf.mxu3 }
 0xe35   : > { %v4781_v6 = vadd.f32 %v10077_v13, %v4780_v32  ;;  %v4774_v32 = vadd.f32 %v10077_v13, %v4773_v50 }
 0xe37   : > { %v4802_v21 = vpack.c.bf16 %v4781_v6, %v4779_v16  ;;  %v4801_v5 = vpack.c.bf16 %v4776_v45, %v4774_v32  ;;  %v4644_v6 = vadd.f32 %v10291_v54, %v4643_v17  ;;  %v4756_v17 = vadd.f32 %v10077_v13, %v10251_v7 }
 0xe39   : > { %6198 = vmatmul.msk.bf16.gmra.mxu1 %vm1962_vm5, %v10349_v25  ;;  %v5014_v56 = vsel %vm1962_vm5, %v4802_v21, 0  ;;  %v5011_v59 = vsel %vm1962_vm5, %v4801_v5, 0 }
 0xe3a   : > { %v4645_v19 = vpop.f32.mrf.mxu2 }
 0xe3b   : > { %v4646_v50 = vadd.f32 %v10291_v54, %v4645_v19 }
 0xe3c   : > { %v4783_v8 = vpop.f32.mrf.mxu3 }
 0xe3d   : > { %v4784_v29 = vadd.f32 %v10077_v13, %v4783_v8  ;;  %v4918_v8 = vpop.f32.mrf.mxu0  ;;  %v4659_v45 = vpack.c.bf16 %v4646_v50, %v4644_v6  ;;  %v4749_v50 = vadd.f32 %v10077_v13, %v10222_v53  ;;  %v4914_v53 = vadd.f32 %v10066_v41, %v10353_v44 }
 0xe3f   : > { %v4796_v6 = vpack.c.bf16 %v4751_v39, %v4749_v50 }
 0xe42   : > { %v4648_v16 = vpop.f32.mrf.mxu2 }
 0xe44   : > { %v4785_v61 = vpop.f32.mrf.mxu3 }
 0xe45   : > { %v4786_v35 = vadd.f32 %v10077_v13, %v4785_v61  ;;  %v4639_v61 = vadd.f32 %v10291_v54, %v4638_v3  ;;  %v4764_v3 = vadd.f32 %v10077_v13, %v10277_v37 }
 0xe47   : > { %v4803_v52 = vpack.c.bf16 %v4786_v35, %v4784_v29  ;;  %v10373_v29 = vpack.c.bf16 %v4641_v48, %v4639_v61  ;;  %v4921_v35 = vpop.f32.mrf.mxu0 }
 0xe48   : > { %v4922_v49 = vadd.f32 %v10066_v41, %v4921_v35 }
 0xe49   : > { %6199 = vmatmul.msk.bf16.gmra.mxu1 %vm1962_vm5, %v10359_v43  ;;  %v5017_v15 = vsel %vm1962_vm5, %v4803_v52, 0  ;;  %v4766_v52 = vadd.f32 %v10077_v13, %v10304_v51 }
 0xe4a   : > { %5068 = vmatpush.bf16.xpose.msra.mxu2 %v5017_v15  ;;  %v4650_v32 = vpop.f32.mrf.mxu2 }
 0xe4b   : > { %v4799_v15 = vpack.c.bf16 %v4766_v52, %v4764_v3  ;;  %v4651_v5 = vadd.f32 %v10291_v54, %v4650_v32 }
 0xe4d   : > { %v5005_v51 = vsel %vm1962_vm5, %v4799_v15, 0 }
 0xe4f   : > { %v4923_v21 = vpop.f32.mrf.mxu0 }
 0xe52   : > { %5069 = vmatpush.bf16.xpose.msra.mxu2 %v5014_v56  ;;  %v4761_v56 = vadd.f32 %v10077_v13, %v10271_v40  ;;  %v4754_v40 = vadd.f32 %v10077_v13, %v10240_v33  ;;  %v4917_v13 = vadd.f32 %v10066_v41, %v10361_v2  ;;  %v10887_v2 = vpack.c.bf16 %v10263_v11, %v10260_v20  ;;  %v10440_v20 = vpop.f32.mrf.mxu1 }
 0xe54   : > { %v4798_v48 = vpack.c.bf16 %v4761_v56, %v4759_v12  ;;  %v4797_v19 = vpack.c.bf16 %v4756_v17, %v4754_v40  ;;  %v4919_v56 = vadd.f32 %v10066_v41, %v4918_v8 }
 0xe56   : > { %v5002_v61 = vsel %vm1962_vm5, %v4798_v48, 0  ;;  %v4944_v12 = vpack.c.bf16 %v4919_v56, %v4917_v13 }
 0xe57   : > { %v4926_v37 = vpop.f32.mrf.mxu0 }
 0xe58   : > { %v4927_v33 = vadd.f32 %v10066_v41, %v4926_v37 }
 0xe59   : > { %6200 = vmatmul.msk.bf16.gmra.mxu1 %vm1962_vm5, %v10373_v29 }
 0xe5a   : > { %5070 = vmatpush.bf16.xpose.msra.mxu2 %v5011_v59  ;;  %v4649_v59 = vadd.f32 %v10291_v54, %v4648_v16  ;;  %v4924_v54 = vadd.f32 %v10066_v41, %v4923_v21  ;;  %v4996_v16 = vsel %vm1962_vm5, %v4796_v6, 0  ;;  %v4912_v21 = vadd.f32 %v10066_v41, %v10346_v63 }
 0xe5c   : > { %v4660_v52 = vpack.c.bf16 %v4651_v5, %v4649_v59  ;;  %v4943_v35 = vpack.c.bf16 %v4914_v53, %v4912_v21 }
 0xe5f   : > { %v4928_v7 = vpop.f32.mrf.mxu0 }
 0xe60   : > { %v4929_v3 = vadd.f32 %v10066_v41, %v4928_v7  ;;  %v10889_v41 = vpack.c.bf16 %v10228_v0, %v10225_v46 }
 0xe62   : > { %5071 = vmatpush.bf16.xpose.msra.mxu2 %v5008_v10  ;;  %v4999_v10 = vsel %vm1962_vm5, %v4797_v19, 0  ;;  %v4946_v15 = vpack.c.bf16 %v4929_v3, %v4927_v33  ;;  %v6279_v19 = vld [vmem:[%s10697_s7 + $0x18] sm:$0xff] }
 0xe63   : > { %5503 = vmatpush.bf16.msrb.mxu3 %v6279_v19 }
 0xe69   : > { %6201 = vmatmul.msk.bf16.gmra.mxu1 %vm1962_vm5, %v4659_v45 }
 0xe6a   : > { %5072 = vmatpush.bf16.xpose.msra.mxu2 %v5005_v51  ;;  %v4945_v51 = vpack.c.bf16 %v4924_v54, %v4922_v49 }
 0xe72   : > { %5073 = vmatpush.bf16.xpose.msra.mxu2 %v5002_v61 }
 0xe79   : > { %6202 = vmatmul.msk.bf16.gmra.mxu1 %vm1962_vm5, %v4660_v52 }
 0xe7a   : > { %5074 = vmatpush.bf16.xpose.msra.mxu2 %v4999_v10 }
 0xe82   : > { %5075 = vmatpush.bf16.xpose.msra.mxu2 %v4996_v16 }
 0xe89   : > { %6203 = vmatmul.msk.bf16.vlgmr.msra.gmra.mxu2 %vm1962_vm5, %v10309_v60  ;;  %v10888_v60 = vpack.c.bf16 %v10246_v28, %v10243_v58  ;;  %v10443_v58 = vpop.f32.mrf.mxu1 }
 0xe8a   : > { %5374 = vmatpush.bf16.msrb.mxu2 %v4946_v15 }
 0xe8e   : > { %5375 = vmatpush.bf16.msrb.mxu2 %v4945_v51 }
 0xe91   : > { %v10445_v46 = vpop.f32.mrf.mxu1 }
 0xe92   : > { %5376 = vmatpush.bf16.msrb.mxu2 %v4944_v12 }
 0xe96   : > { %5377 = vmatpush.bf16.msrb.mxu2 %v4943_v35 }
 0xe99   : > { %6204 = vmatmul.msk.bf16.gmra.mxu2 %vm1962_vm5, %v10326_v14  ;;  %v10448_v0 = vpop.f32.mrf.mxu1 }
 0xe9a   : > { %5378 = vmatpush.bf16.msrb.mxu2 %v4942_v42 }
 0xe9e   : > { %5379 = vmatpush.bf16.msrb.mxu2 %v10887_v2 }
 0xea1   : > { %v10450_v28 = vpop.f32.mrf.mxu1 }
 0xea2   : > { %5380 = vmatpush.bf16.msrb.mxu2 %v10888_v60 }
 0xea6   : > { %5381 = vmatpush.bf16.msrb.mxu2 %v10889_v41 }
 0xea9   : > { %6205 = vmatmul.msk.bf16.gmra.mxu2 %vm1962_vm5, %v10341_v31  ;;  %v10460_v14 = vpop.f32.mrf.mxu1 }
 0xeb9   : > { %6206 = vmatmul.msk.bf16.gmra.mxu2 %vm1962_vm5, %v10349_v25  ;;  %v10466_v25 = vpop.f32.mrf.mxu1 }
 0xec1   : > { %v10472_v8 = vpop.f32.mrf.mxu1 }
 0xec9   : > { %6207 = vmatmul.msk.bf16.gmra.mxu2 %vm1962_vm5, %v10359_v43  ;;  %v10478_v48 = vpop.f32.mrf.mxu1 }
 0xed1   : > { %v10488_v5 = vpop.f32.mrf.mxu1 }
 0xed9   : > { %6208 = vmatmul.msk.bf16.gmra.mxu2 %vm1962_vm5, %v10373_v29 }
 0xee9   : > { %6209 = vmatmul.msk.bf16.gmra.mxu2 %vm1962_vm5, %v4659_v45 }
 0xef9   : > { %6210 = vmatmul.msk.bf16.gmra.mxu2 %vm1962_vm5, %v4660_v52  ;;  %v10497_v52 = vpop.f32.mrf.mxu1 }
 0xf01   : > { %v10503_v7 = vpop.f32.mrf.mxu1 }
 0xf09   : > { %v10509_v6 = vpop.f32.mrf.mxu1 }
 0xf0c   : > { %v10452_v11 = vpop.f32.mrf.mxu2 }
 0xf0d   : > { %v5117_v22 = vmax.f32 %v10443_v58, %v10452_v11 }
 0xf0f   : > { %5118 = vmax.xlane.f32.xlu0 %v5117_v22 }
 0xf11   : > { %v10519_v49 = vpop.f32.mrf.mxu1 }
 0xf14   : > { %v10456_v38 = vpop.f32.mrf.mxu2 }
 0xf15   : > { %v5120_v42 = vmax.f32 %v10445_v46, %v10456_v38 }
 0xf17   : > { %5121 = vmax.xlane.f32.xlu1 %v5120_v42 }
 0xf19   : > { %v10525_v13 = vpop.f32.mrf.mxu1 }
 0xf1c   : > { %v10462_v31 = vpop.f32.mrf.mxu2 }
 0xf1d   : > { %v5123_v63 = vmax.f32 %v10448_v0, %v10462_v31 }
 0xf1f   : > { %5124 = vmax.xlane.f32.xlu2 %v5123_v63 }
 0xf21   : > { %v10531_v21 = vpop.f32.mrf.mxu1 }
 0xf24   : > { %v10468_v44 = vpop.f32.mrf.mxu2 }
 0xf25   : > { %v5126_v43 = vmax.f32 %v10450_v28, %v10468_v44 }
 0xf27   : > { %5127 = vmax.xlane.f32.xlu0 %v5126_v43 }
 0xf29   : > { %v10539_v42 = vpop.f32.mrf.mxu1 }
 0xf2c   : > { %v10474_v29 = vpop.f32.mrf.mxu2 }
 0xf2d   : > { %v5129_v45 = vmax.f32 %v10460_v14, %v10474_v29 }
 0xf2f   : > { %5130 = vmax.xlane.f32.xlu1 %v5129_v45 }
 0xf34   : > { %v10480_v32 = vpop.f32.mrf.mxu2 }
 0xf35   : > { %v5132_v37 = vmax.f32 %v10466_v25, %v10480_v32 }
 0xf37   : > { %5133 = vmax.xlane.f32.xlu2 %v5132_v37 }
 0xf3c   : > { %v10484_v17 = vpop.f32.mrf.mxu2 }
 0xf3d   : > { %v5135_v61 = vmax.f32 %v10472_v8, %v10484_v17 }
 0xf3f   : > { %5136 = vmax.xlane.f32.xlu0 %v5135_v61 }
 0xf44   : > { %v10490_v40 = vpop.f32.mrf.mxu2 }
 0xf45   : > { %v5138_v59 = vmax.f32 %v10478_v48, %v10490_v40 }
 0xf47   : > { %5139 = vmax.xlane.f32.xlu1 %v5138_v59 }
 0xf4c   : > { %v10499_v39 = vpop.f32.mrf.mxu2 }
 0xf4d   : > { %v5141_v10 = vmax.f32 %v10488_v5, %v10499_v39 }
 0xf4f   : > { %5142 = vmax.xlane.f32.xlu2 %v5141_v10 }
 0xf54   : > { %v10505_v50 = vpop.f32.mrf.mxu2 }
 0xf55   : > { %v5144_v3 = vmax.f32 %v10497_v52, %v10505_v50 }
 0xf57   : > { %5145 = vmax.xlane.f32.xlu0 %v5144_v3 }
 0xf5c   : > { %v10511_v33 = vpop.f32.mrf.mxu2 }
 0xf5d   : > { %v5147_v54 = vmax.f32 %v10503_v7, %v10511_v33 }
 0xf5f   : > { %5148 = vmax.xlane.f32.xlu1 %v5147_v54 }
 0xf64   : > { %v10515_v15 = vpop.f32.mrf.mxu2 }
 0xf65   : > { %v5150_v16 = vmax.f32 %v10509_v6, %v10515_v15 }
 0xf67   : > { %5151 = vmax.xlane.f32.xlu2 %v5150_v16 }
 0xf6c   : > { %v10521_v56 = vpop.f32.mrf.mxu2 }
 0xf6d   : > { %v5153_v51 = vmax.f32 %v10519_v49, %v10521_v56 }
 0xf6f   : > { %5154 = vmax.xlane.f32.xlu0 %v5153_v51 }
 0xf74   : > { %v10527_v53 = vpop.f32.mrf.mxu2 }
 0xf75   : > { %v5156_v12 = vmax.f32 %v10525_v13, %v10527_v53 }
 0xf77   : > { %5157 = vmax.xlane.f32.xlu1 %v5156_v12 }
 0xf7c   : > { %v10533_v35 = vpop.f32.mrf.mxu2 }
 0xf7d   : > { %v5159_v2 = vmax.f32 %v10531_v21, %v10533_v35 }
 0xf7f   : > { %5160 = vmax.xlane.f32.xlu2 %v5159_v2 }
 0xf82   : > { %v5119_v60 = vpop.xlane.xlu0 %5118 }
 0xf83   : > { %v5165_v41 = vsub.f32 %v10443_v58, %v5119_v60  ;;  %v5166_v22 = vsub.f32 %v10452_v11, %v5119_v60 }
 0xf84   : > { %v10541_v63 = vpop.f32.mrf.mxu2 }
 0xf85   : > { %v5197_v43 = vmul.f32 1.442695, %v5165_v41  ;;  %v5199_v45 = vmul.f32 1.442695, %v5166_v22  ;;  %v5162_v37 = vmax.f32 %v10539_v42, %v10541_v63 }
 0xf87   : > { %6732 = vpow2.f32 %v5197_v43  ;;  %5163 = vmax.xlane.f32.xlu0 %v5162_v37 }
 0xf88   : > { %6734 = vpow2.f32 %v5199_v45 }
 0xf8a   : > { %v5122_v61 = vpop.xlane.xlu1 %5121 }
 0xf8b   : > { %v5167_v59 = vsub.f32 %v10445_v46, %v5122_v61  ;;  %v5168_v19 = vsub.f32 %v10456_v38, %v5122_v61 }
 0xf8d   : > { %v6733_v58 = vpop.eup %6732  ;;  %v5201_v10 = vmul.f32 1.442695, %v5167_v59  ;;  %v5203_v11 = vmul.f32 1.442695, %v5168_v19 }
 0xf8e   : > { %v6735_v3 = vpop.eup %6734 }
 0xf8f   : > { %6736 = vpow2.f32 %v5201_v10  ;;  %v5261_v54 = vadd.f32 %v6735_v3, %v6733_v58 }
 0xf90   : > { %6738 = vpow2.f32 %v5203_v11 }
 0xf91   : > { %5262 = vadd.xlane.f32.xlu1 %v5261_v54 }
 0xf92   : > { %v5125_v16 = vpop.xlane.xlu2 %5124 }
 0xf93   : > { %v5169_v51 = vsub.f32 %v10448_v0, %v5125_v16  ;;  %v5170_v12 = vsub.f32 %v10462_v31, %v5125_v16 }
 0xf95   : > { %v6737_v2 = vpop.eup %6736  ;;  %v5205_v60 = vmul.f32 1.442695, %v5169_v51  ;;  %v5207_v41 = vmul.f32 1.442695, %v5170_v12 }
 0xf96   : > { %v6739_v22 = vpop.eup %6738  ;;  %v5309_v46 = vpack.c.bf16 %v6737_v2, %v6733_v58 }
 0xf97   : > { %v5310_v43 = vpack.c.bf16 %v6739_v22, %v6735_v3  ;;  %6740 = vpow2.f32 %v5205_v60  ;;  %v5264_v38 = vadd.f32 %v6739_v22, %v6737_v2 }
 0xf98   : > { %6742 = vpow2.f32 %v5207_v41  ;;  %5333 = vmatmul.bf16.vlgmr.msra.gmra.mxu1 %v5309_v46 }
 0xf99   : > { %5382 = vmatmul.bf16.vlgmr.msrb.gmra.mxu2 %v5310_v43  ;;  %5265 = vadd.xlane.f32.xlu2 %v5264_v38 }
 0xf9a   : > { %v5128_v45 = vpop.xlane.xlu0 %5127 }
 0xf9b   : > { %v5171_v37 = vsub.f32 %v10450_v28, %v5128_v45  ;;  %v5172_v61 = vsub.f32 %v10468_v44, %v5128_v45 }
 0xf9d   : > { %v6741_v0 = vpop.eup %6740  ;;  %v5209_v59 = vmul.f32 1.442695, %v5171_v37  ;;  %v5211_v31 = vmul.f32 1.442695, %v5172_v61 }
 0xf9e   : > { %v6743_v19 = vpop.eup %6742 }
 0xf9f   : > { %6744 = vpow2.f32 %v5209_v59  ;;  %v5267_v10 = vadd.f32 %v6743_v19, %v6741_v0 }
 0xfa0   : > { %6746 = vpow2.f32 %v5211_v31 }
 0xfa1   : > { %5268 = vadd.xlane.f32.xlu0 %v5267_v10 }
 0xfa2   : > { %v5131_v58 = vpop.xlane.xlu1 %5130 }
 0xfa3   : > { %v5173_v11 = vsub.f32 %v10460_v14, %v5131_v58  ;;  %v5174_v3 = vsub.f32 %v10474_v29, %v5131_v58 }
 0xfa5   : > { %v6745_v54 = vpop.eup %6744  ;;  %v5213_v16 = vmul.f32 1.442695, %v5173_v11  ;;  %v5215_v51 = vmul.f32 1.442695, %v5174_v3 }
 0xfa6   : > { %v6747_v12 = vpop.eup %6746  ;;  %v5311_v28 = vpack.c.bf16 %v6745_v54, %v6741_v0 }
 0xfa7   : > { %6748 = vpow2.f32 %v5213_v16  ;;  %v5312_v44 = vpack.c.bf16 %v6747_v12, %v6743_v19  ;;  %v5270_v2 = vadd.f32 %v6747_v12, %v6745_v54 }
 0xfa8   : > { %6750 = vpow2.f32 %v5215_v51  ;;  %5338 = vmatmul.bf16.gmra.mxu1 %v5311_v28 }
 0xfa9   : > { %5387 = vmatmul.bf16.gmra.mxu2 %v5312_v44  ;;  %5271 = vadd.xlane.f32.xlu1 %v5270_v2 }
 0xfaa   : > { %v5134_v60 = vpop.xlane.xlu2 %5133 }
 0xfab   : > { %v5175_v41 = vsub.f32 %v10466_v25, %v5134_v60  ;;  %v5176_v22 = vsub.f32 %v10480_v32, %v5134_v60 }
 0xfad   : > { %v6749_v14 = vpop.eup %6748  ;;  %v5217_v46 = vmul.f32 1.442695, %v5175_v41  ;;  %v5219_v29 = vmul.f32 1.442695, %v5176_v22 }
 0xfae   : > { %v6751_v43 = vpop.eup %6750 }
 0xfaf   : > { %6752 = vpow2.f32 %v5217_v46  ;;  %v5273_v38 = vadd.f32 %v6751_v43, %v6749_v14 }
 0xfb0   : > { %6754 = vpow2.f32 %v5219_v29 }
 0xfb1   : > { %5274 = vadd.xlane.f32.xlu2 %v5273_v38 }
 0xfb2   : > { %v5137_v45 = vpop.xlane.xlu0 %5136 }
 0xfb3   : > { %v5177_v37 = vsub.f32 %v10472_v8, %v5137_v45  ;;  %v5178_v61 = vsub.f32 %v10484_v17, %v5137_v45 }
 0xfb5   : > { %v6753_v0 = vpop.eup %6752  ;;  %v5221_v59 = vmul.f32 1.442695, %v5177_v37  ;;  %v5223_v31 = vmul.f32 1.442695, %v5178_v61 }
 0xfb6   : > { %v6755_v19 = vpop.eup %6754  ;;  %v5313_v25 = vpack.c.bf16 %v6753_v0, %v6749_v14 }
 0xfb7   : > { %6756 = vpow2.f32 %v5221_v59  ;;  %v5314_v32 = vpack.c.bf16 %v6755_v19, %v6751_v43  ;;  %v5276_v10 = vadd.f32 %v6755_v19, %v6753_v0 }
 0xfb8   : > { %6758 = vpow2.f32 %v5223_v31  ;;  %5343 = vmatmul.bf16.gmra.mxu1 %v5313_v25 }
 0xfb9   : > { %5392 = vmatmul.bf16.gmra.mxu2 %v5314_v32  ;;  %5277 = vadd.xlane.f32.xlu0 %v5276_v10 }
 0xfba   : > { %v5140_v58 = vpop.xlane.xlu1 %5139 }
 0xfbb   : > { %v5179_v11 = vsub.f32 %v10478_v48, %v5140_v58  ;;  %v5180_v3 = vsub.f32 %v10490_v40, %v5140_v58 }
 0xfbd   : > { %v6757_v8 = vpop.eup %6756  ;;  %v5225_v54 = vmul.f32 1.442695, %v5179_v11  ;;  %v5227_v17 = vmul.f32 1.442695, %v5180_v3 }
 0xfbe   : > { %v6759_v16 = vpop.eup %6758 }
 0xfbf   : > { %6760 = vpow2.f32 %v5225_v54  ;;  %v5279_v51 = vadd.f32 %v6759_v16, %v6757_v8 }
 0xfc0   : > { %6762 = vpow2.f32 %v5227_v17 }
 0xfc1   : > { %5280 = vadd.xlane.f32.xlu1 %v5279_v51 }
 0xfc2   : > { %v5143_v12 = vpop.xlane.xlu2 %5142 }
 0xfc3   : > { %v5181_v28 = vsub.f32 %v10488_v5, %v5143_v12  ;;  %v5182_v44 = vsub.f32 %v10499_v39, %v5143_v12 }
 0xfc5   : > { %v6761_v2 = vpop.eup %6760  ;;  %v5229_v60 = vmul.f32 1.442695, %v5181_v28  ;;  %v5231_v41 = vmul.f32 1.442695, %v5182_v44 }
 0xfc6   : > { %v6763_v22 = vpop.eup %6762  ;;  %v5315_v48 = vpack.c.bf16 %v6761_v2, %v6757_v8 }
 0xfc7   : > { %6764 = vpow2.f32 %v5229_v60  ;;  %v5316_v40 = vpack.c.bf16 %v6763_v22, %v6759_v16  ;;  %v5282_v14 = vadd.f32 %v6763_v22, %v6761_v2 }
 0xfc8   : > { %6766 = vpow2.f32 %v5231_v41  ;;  %5348 = vmatmul.bf16.gmra.mxu1 %v5315_v48 }
 0xfc9   : > { %5397 = vmatmul.bf16.gmra.mxu2 %v5316_v40  ;;  %5283 = vadd.xlane.f32.xlu2 %v5282_v14 }
 0xfca   : > { %v5146_v46 = vpop.xlane.xlu0 %5145 }
 0xfcb   : > { %v5183_v29 = vsub.f32 %v10497_v52, %v5146_v46  ;;  %v5184_v43 = vsub.f32 %v10505_v50, %v5146_v46 }
 0xfcd   : > { %v6765_v5 = vpop.eup %6764  ;;  %v5233_v38 = vmul.f32 1.442695, %v5183_v29  ;;  %v5235_v39 = vmul.f32 1.442695, %v5184_v43 }
 0xfce   : > { %v6767_v45 = vpop.eup %6766 }
 0xfcf   : > { %6768 = vpow2.f32 %v5233_v38  ;;  %v5285_v37 = vadd.f32 %v6767_v45, %v6765_v5 }
 0xfd0   : > { %6770 = vpow2.f32 %v5235_v39 }
 0xfd1   : > { %5286 = vadd.xlane.f32.xlu0 %v5285_v37 }
 0xfd2   : > { %v5149_v61 = vpop.xlane.xlu1 %5148 }
 0xfd3   : > { %v5185_v0 = vsub.f32 %v10503_v7, %v5149_v61  ;;  %v5186_v59 = vsub.f32 %v10511_v33, %v5149_v61 }
 0xfd5   : > { %v6769_v31 = vpop.eup %6768  ;;  %v5237_v19 = vmul.f32 1.442695, %v5185_v0  ;;  %v5239_v25 = vmul.f32 1.442695, %v5186_v59 }
 0xfd6   : > { %v6771_v32 = vpop.eup %6770  ;;  %v5317_v52 = vpack.c.bf16 %v6769_v31, %v6765_v5 }
 0xfd7   : > { %6772 = vpow2.f32 %v5237_v19  ;;  %v5318_v50 = vpack.c.bf16 %v6771_v32, %v6767_v45  ;;  %v5288_v10 = vadd.f32 %v6771_v32, %v6769_v31 }
 0xfd8   : > { %6774 = vpow2.f32 %v5239_v25  ;;  %5353 = vmatmul.bf16.gmra.mxu1 %v5317_v52 }
 0xfd9   : > { %5402 = vmatmul.bf16.gmra.mxu2 %v5318_v50  ;;  %5289 = vadd.xlane.f32.xlu1 %v5288_v10 }
 0xfda   : > { %v5152_v58 = vpop.xlane.xlu2 %5151 }
 0xfdb   : > { %v5187_v11 = vsub.f32 %v10509_v6, %v5152_v58  ;;  %v5188_v3 = vsub.f32 %v10515_v15, %v5152_v58 }
 0xfdd   : > { %v6773_v7 = vpop.eup %6772  ;;  %v5241_v8 = vmul.f32 1.442695, %v5187_v11  ;;  %v5243_v33 = vmul.f32 1.442695, %v5188_v3 }
 0xfde   : > { %v6775_v54 = vpop.eup %6774 }
 0xfdf   : > { %6776 = vpow2.f32 %v5241_v8  ;;  %v5291_v17 = vadd.f32 %v6775_v54, %v6773_v7 }
 0xfe0   : > { %6778 = vpow2.f32 %v5243_v33 }
 0xfe1   : > { %5292 = vadd.xlane.f32.xlu2 %v5291_v17 }
 0xfe2   : > { %v5155_v16 = vpop.xlane.xlu0 %5154 }
 0xfe3   : > { %v5189_v51 = vsub.f32 %v10519_v49, %v5155_v16  ;;  %v5190_v12 = vsub.f32 %v10521_v56, %v5155_v16 }
 0xfe5   : > { %v6777_v28 = vpop.eup %6776  ;;  %v5245_v44 = vmul.f32 1.442695, %v5189_v51  ;;  %v5247_v2 = vmul.f32 1.442695, %v5190_v12 }
 0xfe6   : > { %v6779_v60 = vpop.eup %6778  ;;  %v5319_v6 = vpack.c.bf16 %v6777_v28, %v6773_v7 }
 0xfe7   : > { %6780 = vpow2.f32 %v5245_v44  ;;  %v5320_v15 = vpack.c.bf16 %v6779_v60, %v6775_v54  ;;  %v5294_v41 = vadd.f32 %v6779_v60, %v6777_v28 }
 0xfe8   : > { %6782 = vpow2.f32 %v5247_v2  ;;  %5358 = vmatmul.bf16.gmra.mxu1 %v5319_v6 }
 0xfe9   : > { %5407 = vmatmul.bf16.gmra.mxu2 %v5320_v15  ;;  %5295 = vadd.xlane.f32.xlu0 %v5294_v41 }
 0xfea   : > { %v5158_v22 = vpop.xlane.xlu1 %5157 }
 0xfeb   : > { %v5191_v48 = vsub.f32 %v10525_v13, %v5158_v22  ;;  %v5192_v40 = vsub.f32 %v10527_v53, %v5158_v22 }
 0xfed   : > { %v6781_v49 = vpop.eup %6780  ;;  %v5249_v14 = vmul.f32 1.442695, %v5191_v48  ;;  %v5251_v56 = vmul.f32 1.442695, %v5192_v40 }
 0xfee   : > { %v6783_v46 = vpop.eup %6782 }
 0xfef   : > { %6784 = vpow2.f32 %v5249_v14  ;;  %v5297_v29 = vadd.f32 %v6783_v46, %v6781_v49 }
 0xff0   : > { %6786 = vpow2.f32 %v5251_v56 }
 0xff1   : > { %5298 = vadd.xlane.f32.xlu1 %v5297_v29 }
 0xff2   : > { %v5161_v43 = vpop.xlane.xlu2 %5160 }
 0xff3   : > { %v5193_v5 = vsub.f32 %v10531_v21, %v5161_v43  ;;  %v5194_v38 = vsub.f32 %v10533_v35, %v5161_v43 }
 0xff5   : > { %v6785_v39 = vpop.eup %6784  ;;  %v5253_v45 = vmul.f32 1.442695, %v5193_v5  ;;  %v5255_v37 = vmul.f32 1.442695, %v5194_v38 }
 0xff6   : > { %v6787_v61 = vpop.eup %6786  ;;  %v5321_v13 = vpack.c.bf16 %v6785_v39, %v6781_v49 }
 0xff7   : > { %6788 = vpow2.f32 %v5253_v45  ;;  %v5322_v53 = vpack.c.bf16 %v6787_v61, %v6783_v46  ;;  %v5300_v0 = vadd.f32 %v6787_v61, %v6785_v39 }
 0xff8   : > { %6790 = vpow2.f32 %v5255_v37  ;;  %5363 = vmatmul.bf16.gmra.mxu1 %v5321_v13 }
 0xff9   : > { %5412 = vmatmul.bf16.gmra.mxu2 %v5322_v53  ;;  %5301 = vadd.xlane.f32.xlu2 %v5300_v0 }
 0xffa   : > { %v5164_v59 = vpop.xlane.xlu0 %5163 }
 0xffb   : > { %v5195_v31 = vsub.f32 %v10539_v42, %v5164_v59  ;;  %v5196_v19 = vsub.f32 %v10541_v63, %v5164_v59 }
 0xffd   : > { %v6789_v21 = vpop.eup %6788  ;;  %v5257_v25 = vmul.f32 1.442695, %v5195_v31  ;;  %v5259_v35 = vmul.f32 1.442695, %v5196_v19 }
 0xffe   : > { %v6791_v32 = vpop.eup %6790 }
 0xfff   : > { %6792 = vpow2.f32 %v5257_v25  ;;  %v5303_v52 = vadd.f32 %v6791_v32, %v6789_v21 }
0x1000   : > { %6794 = vpow2.f32 %v5259_v35 }
0x1001   : > { %5304 = vadd.xlane.f32.xlu0 %v5303_v52 }
0x1004   : > { %v5263_v42 = vpop.xlane.xlu1 %5262 }
0x1005   : > { %v6793_v50 = vpop.eup %6792  ;;  %6796 = vrcp.f32 %v5263_v42 }
0x1006   : > { %v6795_v10 = vpop.eup %6794  ;;  %v5323_v58 = vpack.c.bf16 %v6793_v50, %v6789_v21 }
0x1007   : > { %v5324_v11 = vpack.c.bf16 %v6795_v10, %v6791_v32  ;;  %v5306_v3 = vadd.f32 %v6795_v10, %v6793_v50 }
0x1008   : > { %5368 = vmatmul.bf16.gmra.mxu1 %v5323_v58 }
0x1009   : > { %5417 = vmatmul.bf16.gmra.mxu2 %v5324_v11  ;;  %5307 = vadd.xlane.f32.xlu1 %v5306_v3 }
0x100b   : > { %v6797_v16 = vpop.eup %6796 }
0x100c   : > { %v5266_v63 = vpop.xlane.xlu2 %5265 }
0x100d   : > { %6798 = vrcp.f32 %v5266_v63 }
0x1013   : > { %v6799_v28 = vpop.eup %6798 }
0x1014   : > { %v5269_v6 = vpop.xlane.xlu0 %5268 }
0x1015   : > { %v5334_v7 = vpop.f32.mrf.mxu1  ;;  %6800 = vrcp.f32 %v5269_v6 }
0x101b   : > { %v6801_v49 = vpop.eup %6800 }
0x101c   : > { %v5383_v8 = vpop.f32.mrf.mxu2  ;;  %v5272_v41 = vpop.xlane.xlu1 %5271 }
0x101d   : > { %v5336_v33 = vpop.f32.mrf.mxu1  ;;  %v5384_v54 = vadd.f32 %v5383_v8, %v5334_v7  ;;  %6802 = vrcp.f32 %v5272_v41 }
0x101f   : > { %v5439_v44 = vmul.f32 %v6797_v16, %v5384_v54 }
0x1023   : > { %v6803_v46 = vpop.eup %6802 }
0x1024   : > { %v5385_v17 = vpop.f32.mrf.mxu2  ;;  %v5275_v38 = vpop.xlane.xlu2 %5274 }
0x1025   : > { %v5386_v51 = vadd.f32 %v5385_v17, %v5336_v33  ;;  %v5339_v12 = vpop.f32.mrf.mxu1  ;;  %6804 = vrcp.f32 %v5275_v38 }
0x1027   : > { %v5440_v2 = vmul.f32 %v6799_v28, %v5386_v51 }
0x1029   : > { %v5455_v60 = vpack.c.bf16 %v5440_v2, %v5439_v44 }
0x102b   : > { %6217 = vmatmul.msk.bf16.vlgmr.msrb.gmra.mxu3 %vm1962_vm5, %v5455_v60  ;;  %v6805_v53 = vpop.eup %6804 }
0x102c   : > { %v5388_v15 = vpop.f32.mrf.mxu2  ;;  %v5278_v45 = vpop.xlane.xlu0 %5277 }
0x102d   : > { %v5341_v22 = vpop.f32.mrf.mxu1  ;;  %v5389_v48 = vadd.f32 %v5388_v15, %v5339_v12  ;;  %6806 = vrcp.f32 %v5278_v45 }
0x102f   : > { %v5441_v29 = vmul.f32 %v6801_v49, %v5389_v48 }
0x1033   : > { %v6807_v31 = vpop.eup %6806 }
0x1034   : > { %v5390_v40 = vpop.f32.mrf.mxu2  ;;  %v5281_v35 = vpop.xlane.xlu1 %5280 }
0x1035   : > { %v5391_v14 = vadd.f32 %v5390_v40, %v5341_v22  ;;  %v5344_v56 = vpop.f32.mrf.mxu1  ;;  %6808 = vrcp.f32 %v5281_v35 }
0x1037   : > { %v5442_v43 = vmul.f32 %v6803_v46, %v5391_v14 }
0x1039   : > { %v5456_v5 = vpack.c.bf16 %v5442_v43, %v5441_v29 }
0x103b   : > { %6218 = vmatmul.msk.bf16.gmra.mxu3 %vm1962_vm5, %v5456_v5  ;;  %v6809_v11 = vpop.eup %6808 }
0x103c   : > { %v5393_v39 = vpop.f32.mrf.mxu2  ;;  %v5284_v52 = vpop.xlane.xlu2 %5283 }
0x103d   : > { %v5346_v37 = vpop.f32.mrf.mxu1  ;;  %v5394_v61 = vadd.f32 %v5393_v39, %v5344_v56  ;;  %6810 = vrcp.f32 %v5284_v52 }
0x103f   : > { %v5443_v19 = vmul.f32 %v6805_v53, %v5394_v61 }
0x1043   : > { %v6811_v42 = vpop.eup %6810 }
0x1044   : > { %v5395_v13 = vpop.f32.mrf.mxu2  ;;  %v5287_v54 = vpop.xlane.xlu0 %5286 }
0x1045   : > { %v5396_v0 = vadd.f32 %v5395_v13, %v5346_v37  ;;  %v5349_v59 = vpop.f32.mrf.mxu1  ;;  %6812 = vrcp.f32 %v5287_v54 }
0x1047   : > { %v5444_v21 = vmul.f32 %v6807_v31, %v5396_v0 }
0x1049   : > { %v5457_v25 = vpack.c.bf16 %v5444_v21, %v5443_v19 }
0x104b   : > { %6219 = vmatmul.msk.bf16.gmra.mxu3 %vm1962_vm5, %v5457_v25  ;;  %v6813_v44 = vpop.eup %6812 }
0x104c   : > { %v5398_v32 = vpop.f32.mrf.mxu2  ;;  %v5290_v16 = vpop.xlane.xlu1 %5289 }
0x104d   : > { %v5351_v50 = vpop.f32.mrf.mxu1  ;;  %v5399_v10 = vadd.f32 %v5398_v32, %v5349_v59  ;;  %6814 = vrcp.f32 %v5290_v16 }
0x104f   : > { %v5445_v8 = vmul.f32 %v6809_v11, %v5399_v10 }
0x1053   : > { %v6815_v6 = vpop.eup %6814 }
0x1054   : > { %v5400_v58 = vpop.f32.mrf.mxu2  ;;  %v5293_v48 = vpop.xlane.xlu2 %5292 }
0x1055   : > { %v5401_v3 = vadd.f32 %v5400_v58, %v5351_v50  ;;  %v5354_v7 = vpop.f32.mrf.mxu1  ;;  %6816 = vrcp.f32 %v5293_v48 }
0x1057   : > { %v5446_v63 = vmul.f32 %v6811_v42, %v5401_v3 }
0x1059   : > { %v5458_v33 = vpack.c.bf16 %v5446_v63, %v5445_v8 }
0x105b   : > { %6220 = vmatmul.msk.bf16.gmra.mxu3 %vm1962_vm5, %v5458_v33  ;;  %v6817_v29 = vpop.eup %6816 }
0x105c   : > { %v5403_v17 = vpop.f32.mrf.mxu2  ;;  %v5296_v49 = vpop.xlane.xlu0 %5295 }
0x105d   : > { %v5356_v51 = vpop.f32.mrf.mxu1  ;;  %v5404_v12 = vadd.f32 %v5403_v17, %v5354_v7  ;;  %6818 = vrcp.f32 %v5296_v49  ;;  %v6839_v49 = vld [vmem:[%s6980_s21 + $0x18] sm:$0xff] }
0x105f   : > { %v5447_v15 = vmul.f32 %v6813_v44, %v5404_v12  ;;  %v10589_v12 = vld [vmem:[%s10698_s8] ss:$0 sm:$0xff] }
0x1063   : > { %v6819_v5 = vpop.eup %6818 }
0x1064   : > { %v5405_v28 = vpop.f32.mrf.mxu2  ;;  %v5299_v61 = vpop.xlane.xlu1 %5298 }
0x1065   : > { %v5406_v2 = vadd.f32 %v5405_v28, %v5356_v51  ;;  %v5359_v60 = vpop.f32.mrf.mxu1  ;;  %6820 = vrcp.f32 %v5299_v61  ;;  %v6837_v51 = vld [vmem:[%s6980_s21 + $0x8] sm:$0xff] }
0x1066   : > { %v1500_v28 = vadd.f32 %v10589_v12, %v6837_v51  ;;  %v6843_v51 = vld [vmem:[%s6980_s21 + $0x58] sm:$0xff] }
0x1067   : > { %v5448_v41 = vmul.f32 %v6815_v6, %v5406_v2 }
0x1069   : > { %v5459_v22 = vpack.c.bf16 %v5448_v41, %v5447_v15  ;;  %v10891_v15 = vld [vmem:[#allocation10_spill] sm:$0xff] }
0x106b   : > { %6221 = vmatmul.msk.bf16.gmra.mxu3 %vm1962_vm5, %v5459_v22  ;;  %v6821_v19 = vpop.eup %6820 }
0x106c   : > { %v5408_v40 = vpop.f32.mrf.mxu2  ;;  %v5302_v53 = vpop.xlane.xlu2 %5301 }
0x106d   : > { %v5361_v14 = vpop.f32.mrf.mxu1  ;;  %v5409_v56 = vadd.f32 %v5408_v40, %v5359_v60  ;;  %6822 = vrcp.f32 %v5302_v53  ;;  %v10890_v60 = vld [vmem:[#allocation3_spill] sm:$0xff] }
0x106e   : > { %v2561_v6 = vadd.f32 %v10890_v60, %v1500_v28  ;;  %v1510_v28 = vadd.f32 %v6843_v51, %v10589_v12 }
0x106f   : > { %v5449_v39 = vmul.f32 %v6817_v29, %v5409_v56 }
0x1070   : > { %v3556_v41 = vadd.f32 %v10891_v15, %v2561_v6  ;;  %v10901_v6 = vld [vmem:[#allocation30_spill] sm:$0xff] }
0x1072   : > { %v4551_v22 = vadd.f32 %v10102_v30, %v3556_v41 }
0x1073   : > { %v6823_v25 = vpop.eup %6822 }
0x1074   : > { %v5410_v46 = vpop.f32.mrf.mxu2  ;;  %v5305_v10 = vpop.xlane.xlu0 %5304 }
0x1075   : > { %v5411_v43 = vadd.f32 %v5410_v46, %v5361_v14  ;;  %v5364_v38 = vpop.f32.mrf.mxu1  ;;  %6824 = vrcp.f32 %v5305_v10  ;;  %v1502_v14 = vadd.f32 %v6839_v49, %v10589_v12  ;;  %v10892_v46 = vld [vmem:[#allocation5_spill] sm:$0xff] }
0x1077   : > { %v5450_v45 = vmul.f32 %v6819_v5, %v5411_v43  ;;  %v2563_v29 = vadd.f32 %v10892_v46, %v1502_v14  ;;  %v10893_v43 = vld [vmem:[#allocation9_spill] sm:$0xff]  ;;  %v10902_v14 = vld [vmem:[#allocation22_spill] sm:$0xff] }
0x1079   : > { %v5460_v37 = vpack.c.bf16 %v5450_v45, %v5449_v39  ;;  %v3558_v5 = vadd.f32 %v10893_v43, %v2563_v29  ;;  %v6840_v45 = vld [vmem:[%s6980_s21 + $0x28] sm:$0xff]  ;;  %v6845_v43 = vld [vmem:[%s6980_s21 + $0x78] sm:$0xff] }
0x107b   : > { %6222 = vmatmul.msk.bf16.gmra.mxu3 %vm1962_vm5, %v5460_v37  ;;  %v6825_v8 = vpop.eup %6824  ;;  %v4553_v30 = vadd.f32 %v10127_v24, %v3558_v5  ;;  %v1504_v37 = vadd.f32 %v6840_v45, %v10589_v12  ;;  %v1514_v5 = vadd.f32 %v6845_v43, %v10589_v12 }
0x107c   : > { %v5413_v13 = vpop.f32.mrf.mxu2  ;;  %v5308_v11 = vpop.xlane.xlu1 %5307 }
0x107d   : > { %v5366_v0 = vpop.f32.mrf.mxu1  ;;  %v5414_v59 = vadd.f32 %v5413_v13, %v5364_v38  ;;  %6826 = vrcp.f32 %v5308_v11  ;;  %v10894_v13 = vld [vmem:[#allocation6_spill] sm:$0xff] }
0x107e   : > { %v2565_v53 = vadd.f32 %v10894_v13, %v1504_v37  ;;  %v10905_v37 = vld [vmem:[#allocation2_spill] sm:$0xff] }
0x107f   : > { %v5451_v35 = vmul.f32 %v6821_v19, %v5414_v59 }
0x1083   : > { %v6827_v33 = vpop.eup %6826 }
0x1084   : > { %v5415_v31 = vpop.f32.mrf.mxu2 }
0x1085   : > { %v5416_v21 = vadd.f32 %v5415_v31, %v5366_v0  ;;  %v5369_v50 = vpop.f32.mrf.mxu1  ;;  %v10895_v0 = vld [vmem:[#allocation24_spill] sm:$0xff] }
0x1086   : > { %v3560_v59 = vadd.f32 %v10895_v0, %v2565_v53 }
0x1087   : > { %v5452_v32 = vmul.f32 %v6823_v25, %v5416_v21  ;;  %v6841_v21 = vld [vmem:[%s6980_s21 + $0x38] sm:$0xff] }
0x1088   : > { %v4555_v24 = vadd.f32 %v10152_v18, %v3560_v59  ;;  %v1506_v25 = vadd.f32 %v6841_v21, %v10589_v12 }
0x1089   : > { %v5461_v52 = vpack.c.bf16 %v5452_v32, %v5451_v35  ;;  %v10896_v32 = vld [vmem:[#allocation7_spill] sm:$0xff] }
0x108b   : > { %6223 = vmatmul.msk.bf16.gmra.mxu3 %vm1962_vm5, %v5461_v52  ;;  %v2567_v52 = vadd.f32 %v10896_v32, %v1506_v25 }
0x108c   : > { %v5418_v58 = vpop.f32.mrf.mxu2 }
0x108d   : > { %v5419_v3 = vadd.f32 %v5418_v58, %v5369_v50  ;;  %v5371_v7 = vpop.f32.mrf.mxu1  ;;  %v10897_v50 = vld [vmem:[#allocation26_spill] sm:$0xff] }
0x108e   : > { %v3562_v10 = vadd.f32 %v10897_v50, %v2567_v52 }
0x108f   : > { %v5453_v54 = vmul.f32 %v6825_v8, %v5419_v3  ;;  %v6842_v3 = vld [vmem:[%s6980_s21 + $0x48] sm:$0xff]  ;;  %v10898_v8 = vld [vmem:[#allocation20_spill] sm:$0xff] }
0x1090   : > { %v4557_v18 = vadd.f32 %v10175_v36, %v3562_v10 }
0x1094   : > { %v5420_v42 = vpop.f32.mrf.mxu2 }
0x1095   : > { %v5421_v63 = vadd.f32 %v5420_v42, %v5371_v7  ;;  %v1508_v7 = vadd.f32 %v6842_v3, %v10589_v12 }
0x1097   : > { %v5454_v17 = vmul.f32 %v6827_v33, %v5421_v63  ;;  %v2569_v63 = vadd.f32 %v10898_v8, %v1508_v7  ;;  %v10899_v33 = vld [vmem:[#allocation28_spill] sm:$0xff] }
0x1099   : > { %v5462_v16 = vpack.c.bf16 %v5454_v17, %v5453_v54  ;;  %v3564_v54 = vadd.f32 %v10899_v33, %v2569_v63 }
0x109b   : > { %6224 = vmatmul.msk.bf16.gmra.mxu3 %vm1962_vm5, %v5462_v16  ;;  %v4559_v36 = vadd.f32 %v10188_v55, %v3564_v54 }
0x10ae   : > { %v5505_v44 = vpop.f32.mrf.mxu3 }
0x10af   : > { %v5545_v2 = vadd.f32 %v5505_v44, %v10090_v57 }
0x10b1   : > { %5561 = vst.msk [vmem:[%s10595_s19] sm:$0xff] %vm407_vm0, %v5545_v2  ;;  %v10900_v2 = vld [vmem:[#allocation21_spill] sm:$0xff] }
0x10b2   : > { %v2571_v60 = vadd.f32 %v10900_v2, %v1510_v28 }
0x10b4   : > { %v3566_v15 = vadd.f32 %v10901_v6, %v2571_v60 }
0x10b6   : > { %v5507_v48 = vpop.f32.mrf.mxu3  ;;  %v4561_v55 = vadd.f32 %v10201_v26, %v3566_v15 }
0x10b7   : > { %v5546_v40 = vadd.f32 %v5507_v48, %v4551_v22  ;;  %v6844_v48 = vld [vmem:[%s6980_s21 + $0x68] sm:$0xff] }
0x10b9   : > { %5562 = vst.msk [vmem:[%s10595_s19 + $0x8] sm:$0xff] %vm407_vm0, %v5546_v40  ;;  %v1512_v40 = vadd.f32 %v6844_v48, %v10589_v12 }
0x10be   : > { %v5510_v56 = vpop.f32.mrf.mxu3 }
0x10bf   : > { %v5547_v57 = vadd.f32 %v5510_v56, %v10115_v27  ;;  %v2573_v56 = vadd.f32 %v10902_v14, %v1512_v40 }
0x10c1   : > { %5563 = vst.msk [vmem:[%s10595_s19 + $0x10] sm:$0xff] %vm407_vm0, %v5547_v57  ;;  %v3568_v57 = vadd.f32 %v9620_v34, %v2573_v56 }
0x10c3   : > { %v4563_v26 = vadd.f32 %v10212_v1, %v3568_v57 }
0x10c6   : > { %v5512_v38 = vpop.f32.mrf.mxu3 }
0x10c7   : > { %v5548_v39 = vadd.f32 %v5512_v38, %v4553_v30  ;;  %v10903_v38 = vld [vmem:[#allocation12_spill] sm:$0xff] }
0x10c9   : > { %5564 = vst.msk [vmem:[%s10595_s19 + $0x18] sm:$0xff] %vm407_vm0, %v5548_v39 }
0x10ce   : > { %v5515_v61 = vpop.f32.mrf.mxu3 }
0x10cf   : > { %v5549_v27 = vadd.f32 %v5515_v61, %v10140_v9 }
0x10d1   : > { %5565 = vst.msk [vmem:[%s10595_s19 + $0x20] sm:$0xff] %vm407_vm0, %v5549_v27 }
0x10d6   : > { %v5517_v31 = vpop.f32.mrf.mxu3 }
0x10d7   : > { %v5550_v19 = vadd.f32 %v5517_v31, %v4555_v24 }
0x10d9   : > { %5566 = vst.msk [vmem:[%s10595_s19 + $0x28] sm:$0xff] %vm407_vm0, %v5550_v19 }
0x10de   : > { %v5520_v35 = vpop.f32.mrf.mxu3 }
0x10df   : > { %v5551_v9 = vadd.f32 %v5520_v35, %v10167_v4 }
0x10e1   : > { %5567 = vst.msk [vmem:[%s10595_s19 + $0x30] sm:$0xff] %vm407_vm0, %v5551_v9 }
0x10e6   : > { %v5522_v58 = vpop.f32.mrf.mxu3 }
0x10e7   : > { %v5552_v11 = vadd.f32 %v5522_v58, %v4557_v18 }
0x10e9   : > { %5568 = vst.msk [vmem:[%s10595_s19 + $0x38] sm:$0xff] %vm407_vm0, %v5552_v11 }
0x10ee   : > { %v5525_v42 = vpop.f32.mrf.mxu3 }
0x10ef   : > { %v5553_v4 = vadd.f32 %v5525_v42, %v10180_v47 }
0x10f1   : > { %5569 = vst.msk [vmem:[%s10595_s19 + $0x40] sm:$0xff] %vm407_vm0, %v5553_v4 }
0x10f6   : > { %v5527_v17 = vpop.f32.mrf.mxu3 }
0x10f7   : > { %v5554_v16 = vadd.f32 %v5527_v17, %v4559_v36 }
0x10f9   : > { %5570 = vst.msk [vmem:[%s10595_s19 + $0x48] sm:$0xff] %vm407_vm0, %v5554_v16 }
0x10fe   : > { %v5530_v44 = vpop.f32.mrf.mxu3 }
0x10ff   : > { %v5555_v47 = vadd.f32 %v5530_v44, %v10193_v23 }
0x1101   : > { %5571 = vst.msk [vmem:[%s10595_s19 + $0x50] sm:$0xff] %vm407_vm0, %v5555_v47 }
0x1106   : > { %v5532_v41 = vpop.f32.mrf.mxu3 }
0x1107   : > { %v5556_v22 = vadd.f32 %v5532_v41, %v4561_v55 }
0x1109   : > { %5572 = vst.msk [vmem:[%s10595_s19 + $0x58] sm:$0xff] %vm407_vm0, %v5556_v22 }
0x110e   : > { %v5535_v49 = vpop.f32.mrf.mxu3 }
0x110f   : > { %v5557_v23 = vadd.f32 %v5535_v49, %v10206_v62  ;;  %v10904_v62 = vld [vmem:[#allocation23_spill] sm:$0xff] }
0x1110   : > { %v2575_v45 = vadd.f32 %v10904_v62, %v1514_v5 }
0x1111   : > { %5573 = vst.msk [vmem:[%s10595_s19 + $0x60] sm:$0xff] %vm407_vm0, %v5557_v23 }
0x1112   : > { %v3570_v61 = vadd.f32 %v10905_v37, %v2575_v45 }
0x1114   : > { %v4565_v34 = vadd.f32 %v10440_v20, %v3570_v61 }
0x1116   : > { %v5537_v46 = vpop.f32.mrf.mxu3 }
0x1117   : > { %v5558_v29 = vadd.f32 %v5537_v46, %v4563_v26 }
0x1119   : > { %5574 = vst.msk [vmem:[%s10595_s19 + $0x68] sm:$0xff] %vm407_vm0, %v5558_v29 }
0x111e   : > { %v5540_v30 = vpop.f32.mrf.mxu3 }
0x111f   : > { %v5559_v39 = vadd.f32 %v5540_v30, %v10903_v38 }
0x1121   : > { %5575 = vst.msk [vmem:[%s10595_s19 + $0x70] sm:$0xff] %vm407_vm0, %v5559_v39 }
0x1126   : > { %v5542_v27 = vpop.f32.mrf.mxu3 }
0x1127   : > { %v5560_v1 = vadd.f32 %v5542_v27, %v4565_v34 }
0x1129   : > { %5576 = vst.msk [vmem:[%s10595_s19 + $0x78] sm:$0xff] %vm407_vm0, %v5560_v1 }
0x112a PF: > { %s19_s13 = sadd.s32 1, %s6884_s13   ;;  %s10906_s30 = smov %s6876_s11 }
0x112b   : > { %p16_p7 = scmp.ge.s32.totalorder %s19_s13, 6   ;;  %s10907_s10 = smov %s6880_s12 }
0x112c   : > { %s10908_s11 = smov %s10911_s14  ;;  %s10909_s12 = smov %s10915_s15 }
0x112d   :  { %18 = sbr.rel (!%p16_p7) target bundleno = 3 (0x3), region = 108 }

</bundles_post_ra>
